<compile_context>
chip_gen: v7x
topology: tpu7x:2x2x1
jax: 0.10.0
libtpu: 0.0.40
codegen_flags: <defaults>
</compile_context>

<pallas_src>
import functools

import jax
import jax.numpy as jnp
from jax.experimental import pallas as pl
from jax.experimental.pallas import tpu as pltpu

NEG = -1e30  # finite "-inf": safe under (* 0.0) (no NaN) and exp() underflow.


# ----------------------------- encoder kernel -----------------------------

def encoder_kernel(x_ref, mask_ref,
                   wqkv_ref, bqkv_ref, wo_ref, bo_ref,
                   g1_ref, be1_ref, w1_ref, b1_ref, w2_ref, b2_ref, g2_ref, be2_ref,
                   out_ref, *, S, H):
    """Single-head transformer encoder layer, one batch-tile per grid step."""
    xb = x_ref[...]                                           # [bt, S, H] f32
    bt = xb.shape[0]
    x = xb.reshape(bt * S, H)

    def dense(a_f32, w_ref, b_ref):
        # bf16 weights + bf16 MXU operands, f32 accumulation.
        return jnp.dot(a_f32.astype(jnp.bfloat16), w_ref[...],
                       preferred_element_type=jnp.float32) + b_ref[...]

    qkv = dense(x, wqkv_ref, bqkv_ref)                        # [bt*S, 3H] (fused QKV)
    q = qkv[:, 0 * H:1 * H].reshape(bt, S, H).astype(jnp.bfloat16)
    k = qkv[:, 1 * H:2 * H].reshape(bt, S, H).astype(jnp.bfloat16)
    v = qkv[:, 2 * H:3 * H].reshape(bt, S, H).astype(jnp.bfloat16)

    scale = 1.0 / (float(H) ** 0.5)
    scores = jnp.einsum('bqd,bkd->bqk', q, k,
                        preferred_element_type=jnp.float32) * scale      # [bt,S,S] f32
    scores = scores + (1.0 - mask_ref[...]) * (-1e9)          # [bt,1,S] additive pad mask
    m = jnp.max(scores, axis=-1, keepdims=True)
    p = jnp.exp(scores - m)
    p = p * pl.reciprocal(jnp.sum(p, axis=-1, keepdims=True), approx=True)  # EUP divide
    ctx = jnp.einsum('bqk,bkd->bqd', p.astype(jnp.bfloat16), v,
                     preferred_element_type=jnp.float32)
    attn = dense(ctx.reshape(bt * S, H), wo_ref, bo_ref)

    def layernorm(a, g_ref, b_ref):
        mu = jnp.mean(a, axis=-1, keepdims=True)
        var = jnp.mean((a - mu) ** 2, axis=-1, keepdims=True)
        return (a - mu) * jax.lax.rsqrt(var + 1e-12) * g_ref[...] + b_ref[...]

    h = layernorm(x + attn, g1_ref, be1_ref)
    ff = jax.nn.gelu(dense(h, w1_ref, b1_ref), approximate=True)
    ff = dense(ff, w2_ref, b2_ref)
    o = layernorm(h + ff, g2_ref, be2_ref)
    out_ref[...] = o.reshape(bt, S, H).astype(out_ref.dtype)  # bf16 writeback


def run_encoder(x3, mask3, p, B, S, H, bt=1):
    """x3: [B,S,H] f32, mask3: [B,1,S] f32.  Returns o1: [B,S,H] bf16."""
    assert B % bt == 0
    # TODO(synk): at realistic batch sizes pick bt so bt*S ~ 256 MXU rows
    # (v7x: keep the tile budget within 64 MiB VMEM; v6e/v5e can go larger).
    weights = (p['w_qkv'], p['b_qkv'], p['wo'], p['bo'],
               p['ln1_g'], p['ln1_b'], p['w_ff1'], p['b_ff1'],
               p['w_ff2'], p['b_ff2'], p['ln2_g'], p['ln2_b'])
    in_specs = [pl.BlockSpec((bt, S, H), lambda i: (i, 0, 0)),
                pl.BlockSpec((bt, 1, S), lambda i: (i, 0, 0))]
    # Weights: constant block index -> DMA'd once, resident in VMEM across steps.
    in_specs += [pl.BlockSpec(w.shape, lambda i: (0, 0)) for w in weights]
    return pl.pallas_call(
        functools.partial(encoder_kernel, S=S, H=H),
        grid=(B // bt,),
        out_shape=jax.ShapeDtypeStruct((B, S, H), jnp.bfloat16),
        in_specs=in_specs,
        out_specs=pl.BlockSpec((bt, S, H), lambda i: (i, 0, 0)),
        compiler_params=pltpu.CompilerParams(
            dimension_semantics=("parallel",),           # 2nd TensorCore on v7x
            vmem_limit_bytes=48 * 1024 * 1024),          # fits v7x 64 MiB physical VMEM
    )(x3, mask3, *weights)


# ----------------------------- fused heads + CRF kernel -----------------------------

def heads_crf_kernel(o_ref, mask_ref, ttag_ref, tpos_ref, wh_ref, bh_ref,
                     ts_ref, tt_ref, te_ref, ps_ref, pt_ref, pe_ref,
                     pred_ref, loss_tag_ref, loss_pos_ref,
                     *, B, S, T, P, TP):
    """Fused: out_tag/out_pos Linear heads (one lane-dense [H,128] matmul) +
    CRF loss (torchcrf, reduction='mean') + Viterbi decode, with the tag and pos
    CRFs STACKED into one [2B, S, TP] computation."""
    GB = 2 * B
    H = o_ref.shape[-1]

    o = o_ref[...].reshape(B * S, H)                          # bf16
    logits = jnp.dot(o, wh_ref[...],
                     preferred_element_type=jnp.float32) + bh_ref[...]   # [B*S, 128]
    logits = logits.reshape(B, S, -1)

    # Stack the two CRFs along the batch axis: rows [0:B) = tag, [B:2B) = pos.
    emis = jnp.concatenate([logits[:, :, 0:TP], logits[:, :, TP:2 * TP]], axis=0)  # [GB,S,TP]
    tags = jnp.concatenate([ttag_ref[...], tpos_ref[...]], axis=0)                 # [GB,S]
    maskf = mask_ref[...]                                                           # [B,S]
    mask_gb = jnp.concatenate([maskf, maskf], axis=0)                               # [GB,S]

    lab_iota = jax.lax.broadcasted_iota(jnp.int32, (GB, S, TP), 2)
    row_iota = jax.lax.broadcasted_iota(jnp.int32, (GB, S, TP), 0)
    n_valid = jnp.where(row_iota < B, T, P)
    emis = jnp.where(lab_iota < n_valid, emis, NEG)            # neutralize padded labels
    # NOTE: no pre-CRF log_softmax — the per-timestep constant shift cancels exactly
    # between the CRF numerator and the log-partition, so the loss is unchanged;
    # decode uses raw logits as in the reference.

    start_gb = jnp.concatenate([jnp.broadcast_to(ts_ref[...], (B, TP)),
                                jnp.broadcast_to(ps_ref[...], (B, TP))], axis=0)    # [GB,TP]
    end_gb = jnp.concatenate([jnp.broadcast_to(te_ref[...], (B, TP)),
                              jnp.broadcast_to(pe_ref[...], (B, TP))], axis=0)      # [GB,TP]
    # trans_gb[gb, c, p] = transitions[p, c] (transposed, zero-padded to TP).
    trans_gb = jnp.concatenate([jnp.broadcast_to(tt_ref[...][None], (B, TP, TP)),
                                jnp.broadcast_to(pt_ref[...][None], (B, TP, TP))], axis=0)

    seq_end = jnp.maximum(jnp.sum(mask_gb, axis=1) - 1.0, 0.0).astype(jnp.int32)[:, None]  # [GB,1]
    time_iota = jax.lax.broadcasted_iota(jnp.int32, (GB, S), 1)
    iota_t = jax.lax.broadcasted_iota(jnp.int32, (GB, TP), 1)
    iota3 = jax.lax.broadcasted_iota(jnp.int32, (GB, TP, TP), 2)

    # ---- numerator: fully vectorized (no per-step loop) ----
    oh = (lab_iota == tags[:, :, None]).astype(jnp.float32)                         # [GB,S,TP]
    e_gold = jnp.sum(emis * oh, axis=-1)                                            # [GB,S]
    num_emis = jnp.sum(e_gold * mask_gb, axis=-1, keepdims=True)                    # [GB,1]
    start_gold = jnp.sum(start_gb * oh[:, 0, :], axis=-1, keepdims=True)
    # transition[prev=tags[s-1], cur=tags[s]] for s>=1
    inner = jnp.sum(oh[:, :-1, None, :] * trans_gb[:, None, :, :], axis=-1)         # [GB,S-1,TP(cur)]
    t_gold = jnp.sum(inner * oh[:, 1:, :], axis=-1)                                 # [GB,S-1]
    num_trans = jnp.sum(t_gold * mask_gb[:, 1:], axis=-1, keepdims=True)
    te_sel = (time_iota == seq_end).astype(jnp.float32)                             # [GB,S]
    oh_last = jnp.sum(te_sel[:, :, None] * oh, axis=1)                              # [GB,TP]
    end_gold = jnp.sum(end_gb * oh_last, axis=-1, keepdims=True)
    num = start_gold + num_emis + num_trans + end_gold                              # [GB,1]

    # ---- denominator: log-partition (forward algorithm), both CRFs at once ----
    # TODO(synk): for realistic S (128+) convert the unrolled forward/Viterbi/backtrack
    # loops to lax.fori_loop with the Viterbi history in a VMEM scratch [S,GB,TP].
    score = start_gb + emis[:, 0, :]                                                # [GB,TP]
    for i in range(1, S):
        A = score[:, None, :] + trans_gb                                            # [GB,cur,prev]
        mmax = jnp.max(A, axis=-1)
        lse = mmax + jnp.log(jnp.sum(jnp.exp(A - mmax[:, :, None]), axis=-1))
        nxt = emis[:, i, :] + lse
        score = jnp.where(mask_gb[:, i][:, None] > 0.0, nxt, score)
    score = score + end_gb
    smax = jnp.max(score, axis=-1, keepdims=True)
    denom = smax + jnp.log(jnp.sum(jnp.exp(score - smax), axis=-1, keepdims=True))  # [GB,1]

    nd = num - denom                                                                # [GB,1]
    grp = jax.lax.broadcasted_iota(jnp.int32, (GB, 1), 0)
    loss_tag_ref[0, 0] = -jnp.sum(jnp.where(grp < B, nd, 0.0)) / float(B)  # reduction='mean'
    loss_pos_ref[0, 0] = -jnp.sum(jnp.where(grp >= B, nd, 0.0)) / float(B)

    # ---- Viterbi decode (raw logits), both CRFs at once ----
    vscore = start_gb + emis[:, 0, :]
    history = []
    for i in range(1, S):
        A = vscore[:, None, :] + trans_gb                                           # [GB,cur,prev]
        best = jnp.max(A, axis=-1)
        # first-occurrence argmax over prev (kept explicit for robust Mosaic lowering)
        idx = jnp.min(jnp.where(A >= best[:, :, None], iota3, TP), axis=-1)
        history.append(idx)
        nxt = best + emis[:, i, :]
        vscore = jnp.where(mask_gb[:, i][:, None] > 0.0, nxt, vscore)
    vscore = vscore + end_gb
    vmax = jnp.max(vscore, axis=-1, keepdims=True)
    best_last = jnp.min(jnp.where(vscore >= vmax, iota_t, TP), axis=-1, keepdims=True)  # [GB,1]

    out = jnp.where(time_iota == seq_end, best_last, jnp.zeros((GB, S), jnp.int32))
    cur = best_last
    for t in range(S - 1, 0, -1):                      # backtrack (unrolled, S is tiny/static)
        hist_t = history[t - 1]                                                     # [GB,TP]
        ohc = (iota_t == cur).astype(jnp.int32)
        prev = jnp.sum(hist_t * ohc, axis=-1, keepdims=True)                        # [GB,1]
        valid = t <= seq_end                                                        # [GB,1]
        cur = jnp.where(valid, prev, cur)
        out = jnp.where((time_iota == (t - 1)) & valid, cur, out)
    pred_ref[...] = out


def run_heads_crf(o1, maskf, target_tag, target_pos, p, B, S, T, P, TP):
    args = (o1, maskf, target_tag, target_pos, p['w_heads'], p['b_heads'],
            p['crf_tag_start'], p['crf_tag_trans_t'], p['crf_tag_end'],
            p['crf_pos_start'], p['crf_pos_trans_t'], p['crf_pos_end'])
    vmem = pl.BlockSpec(memory_space=pltpu.MemorySpace.VMEM)
    smem = pl.BlockSpec(memory_space=pltpu.MemorySpace.SMEM)
    return pl.pallas_call(
        functools.partial(heads_crf_kernel, B=B, S=S, T=T, P=P, TP=TP),
        out_shape=(jax.ShapeDtypeStruct((2 * B, S), jnp.int32),   # packed [tag; pos] decode
                   jax.ShapeDtypeStruct((1, 1), jnp.float32),     # loss_tag (SMEM)
                   jax.ShapeDtypeStruct((1, 1), jnp.float32)),    # loss_pos (SMEM)
        in_specs=[vmem] * len(args),
        out_specs=(vmem, smem, smem),
    )(*args)


# ----------------------------- model forward (glue) -----------------------------

def entity_model_forward(params, ids, mask, token_type_ids, target_pos, target_tag,
                         *, num_tag, num_pos, tp=16):
    B, S = ids.shape
    H = params['wo'].shape[0]

    # "phobert": embedding gathers (glue) + Pallas encoder layer (hot path).
    emb = (params['word_emb'][ids]
           + params['pos_emb'][None, :S, :]
           + params['type_emb'][token_type_ids])
    x3 = emb.astype(jnp.float32)                              # [B,S,H]
    maskf = mask.astype(jnp.float32)                          # [B,S]
    o1 = run_encoder(x3, maskf[:, None, :], params, B, S, H)  # [B,S,H] bf16 sequence output

    # bert_drop_1 / bert_drop_2 = nn.Dropout(0.3): identity at inference time.

    pred, loss_tag, loss_pos = run_heads_crf(
        o1, maskf, target_tag.astype(jnp.int32), target_pos.astype(jnp.int32),
        params, B, S, num_tag, num_pos, tp)
    return pred[:B], pred[B:], loss_tag[0, 0], loss_pos[0, 0]


# ----------------------------- deterministic parameter init -----------------------------

def init_params(key, *, vocab=64, H=768, max_seq=8, num_tag=9, num_pos=7,
                d_ff=1536, tp=16, head_w=128):
    keys = jax.random.split(key, 16)
    n = lambda k, shape: 0.02 * jax.random.normal(k, shape, jnp.float32)
    u = lambda k, shape: jax.random.uniform(k, shape, jnp.float32, -0.1, 0.1)
    zeros = lambda shape: jnp.zeros(shape, jnp.float32)
    ones = lambda shape: jnp.ones(shape, jnp.float32)

    wq, wk, wv = n(keys[3], (H, H)), n(keys[4], (H, H)), n(keys[5], (H, H))

    # fused, lane-dense dual head: tag logits in cols [0:num_tag), pos in [tp:tp+num_pos)
    w_tag, w_pos = n(keys[9], (H, num_tag)), n(keys[10], (H, num_pos))
    w_heads = jnp.zeros((H, head_w), jnp.float32)
    w_heads = w_heads.at[:, 0:num_tag].set(w_tag)
    w_heads = w_heads.at[:, tp:tp + num_pos].set(w_pos)
    b_heads = jnp.zeros((1, head_w), jnp.float32)             # both head biases zero-init

    def pad2(a, rows, cols):
        out = jnp.zeros((rows, cols), jnp.float32)
        return out.at[:a.shape[0], :a.shape[1]].set(a)

    tag_trans = u(keys[13], (num_tag, num_tag))
    pos_trans = u(jax.random.fold_in(key, 99), (num_pos, num_pos))

    # TODO(synk): on v5e/v6e (DMA-bound small-batch regime) int8 weight quantization
    # would halve weight traffic again; not applied (v7x MXU has no integer path).
    return {
        'word_emb': n(keys[0], (vocab, H)),
        'pos_emb': n(keys[1], (max_seq, H)),
        'type_emb': n(keys[2], (2, H)),
        # encoder matmul weights in bf16 (halve HBM traffic); biases / LN params in f32
        'w_qkv': jnp.concatenate([wq, wk, wv], axis=1).astype(jnp.bfloat16),
        'b_qkv': zeros((1, 3 * H)),
        'wo': n(keys[6], (H, H)).astype(jnp.bfloat16), 'bo': zeros((1, H)),
        'ln1_g': ones((1, H)), 'ln1_b': zeros((1, H)),
        'w_ff1': n(keys[7], (H, d_ff)).astype(jnp.bfloat16), 'b_ff1': zeros((1, d_ff)),
        'w_ff2': n(keys[8], (d_ff, H)).astype(jnp.bfloat16), 'b_ff2': zeros((1, H)),
        'ln2_g': ones((1, H)), 'ln2_b': zeros((1, H)),
        'w_heads': w_heads.astype(jnp.bfloat16), 'b_heads': b_heads,
        # CRF params (torchcrf init: uniform(-0.1, 0.1)); transitions stored transposed,
        # zero-padded to tp labels (pad labels neutralized in-kernel with -inf emissions).
        'crf_tag_start': pad2(u(keys[11], (1, num_tag)), 1, tp),
        'crf_tag_end': pad2(u(keys[12], (1, num_tag)), 1, tp),
        'crf_tag_trans_t': pad2(tag_trans.T, tp, tp),
        'crf_pos_start': pad2(u(keys[14], (1, num_pos)), 1, tp),
        'crf_pos_end': pad2(u(keys[15], (1, num_pos)), 1, tp),
        'crf_pos_trans_t': pad2(pos_trans.T, tp, tp),
    }


if __name__ == "__main__":
    B, S, H, V = 2, 8, 768, 64
    NUM_TAG, NUM_POS, TP = 9, 7, 16

    key = jax.random.PRNGKey(0)
    kp, k1, k2, k3 = jax.random.split(key, 4)
    params = init_params(kp, vocab=V, H=H, max_seq=S, num_tag=NUM_TAG, num_pos=NUM_POS, tp=TP)

    ids = jax.random.randint(k1, (B, S), 0, V, dtype=jnp.int32)
    lengths = jnp.array([S, 5], dtype=jnp.int32)
    mask = (jnp.arange(S)[None, :] < lengths[:, None]).astype(jnp.int32)     # [B,S], mask[:,0]=1
    token_type_ids = jnp.zeros((B, S), jnp.int32)
    target_tag = jax.random.randint(k2, (B, S), 0, NUM_TAG, dtype=jnp.int32)
    target_pos = jax.random.randint(k3, (B, S), 0, NUM_POS, dtype=jnp.int32)

    out = entity_model_forward(params, ids, mask, token_type_ids, target_pos, target_tag,
                               num_tag=NUM_TAG, num_pos=NUM_POS, tp=TP)
    jax.block_until_ready(out)
    print("KERNEL_OK")
</pallas_src>

<mosaic_0001>
module attributes {stable_mosaic.version = 11 : i64} {
  func.func @encoder_kernel(%arg0: i32, %arg1: memref<1x8x768xf32, #tpu.memory_space<vmem>>, %arg2: memref<1x1x8xf32, #tpu.memory_space<vmem>>, %arg3: memref<768x2304xbf16, #tpu.memory_space<vmem>>, %arg4: memref<1x2304xf32, #tpu.memory_space<vmem>>, %arg5: memref<768x768xbf16, #tpu.memory_space<vmem>>, %arg6: memref<1x768xf32, #tpu.memory_space<vmem>>, %arg7: memref<1x768xf32, #tpu.memory_space<vmem>>, %arg8: memref<1x768xf32, #tpu.memory_space<vmem>>, %arg9: memref<768x1536xbf16, #tpu.memory_space<vmem>>, %arg10: memref<1x1536xf32, #tpu.memory_space<vmem>>, %arg11: memref<1536x768xbf16, #tpu.memory_space<vmem>>, %arg12: memref<1x768xf32, #tpu.memory_space<vmem>>, %arg13: memref<1x768xf32, #tpu.memory_space<vmem>>, %arg14: memref<1x768xf32, #tpu.memory_space<vmem>>, %arg15: memref<1x8x768xbf16, #tpu.memory_space<vmem>>) attributes {dimension_semantics = [#tpu.dimension_semantics<parallel>], iteration_bounds = array<i64: 2>, scalar_prefetch = 0 : i64, scratch_operands = 0 : i64, tpu.core_type = #tpu.core_type<tc>, window_params = [{transform_indices = @transform_0, window_bounds = array<i64: 1, 8, 768>}, {transform_indices = @transform_1, window_bounds = array<i64: 1, 1, 8>}, {pipeline_mode = #tpu.pipeline_mode<synchronous>, transform_indices = @transform_2, window_bounds = array<i64: 768, 2304>}, {pipeline_mode = #tpu.pipeline_mode<synchronous>, transform_indices = @transform_3, window_bounds = array<i64: 1, 2304>}, {pipeline_mode = #tpu.pipeline_mode<synchronous>, transform_indices = @transform_4, window_bounds = array<i64: 768, 768>}, {pipeline_mode = #tpu.pipeline_mode<synchronous>, transform_indices = @transform_5, window_bounds = array<i64: 1, 768>}, {pipeline_mode = #tpu.pipeline_mode<synchronous>, transform_indices = @transform_6, window_bounds = array<i64: 1, 768>}, {pipeline_mode = #tpu.pipeline_mode<synchronous>, transform_indices = @transform_7, window_bounds = array<i64: 1, 768>}, {pipeline_mode = #tpu.pipeline_mode<synchronous>, transform_indices = @transform_8, window_bounds = array<i64: 768, 1536>}, {pipeline_mode = #tpu.pipeline_mode<synchronous>, transform_indices = @transform_9, window_bounds = array<i64: 1, 1536>}, {pipeline_mode = #tpu.pipeline_mode<synchronous>, transform_indices = @transform_10, window_bounds = array<i64: 1536, 768>}, {pipeline_mode = #tpu.pipeline_mode<synchronous>, transform_indices = @transform_11, window_bounds = array<i64: 1, 768>}, {pipeline_mode = #tpu.pipeline_mode<synchronous>, transform_indices = @transform_12, window_bounds = array<i64: 1, 768>}, {pipeline_mode = #tpu.pipeline_mode<synchronous>, transform_indices = @transform_13, window_bounds = array<i64: 1, 768>}, {transform_indices = @transform_14, window_bounds = array<i64: 1, 8, 768>}]} {
    %c0 = arith.constant 0 : index
    %c0_0 = arith.constant 0 : index
    %c0_1 = arith.constant 0 : index
    %0 = vector.load %arg1[%c0, %c0_0, %c0_1] : memref<1x8x768xf32, #tpu.memory_space<vmem>>, vector<1x8x768xf32>
    %1 = vector.shape_cast %0 : vector<1x8x768xf32> to vector<8x768xf32>
    %2 = arith.truncf %1 : vector<8x768xf32> to vector<8x768xbf16>
    %c0_2 = arith.constant 0 : index
    %c0_3 = arith.constant 0 : index
    %3 = vector.load %arg3[%c0_2, %c0_3] : memref<768x2304xbf16, #tpu.memory_space<vmem>>, vector<768x2304xbf16>
    %cst = arith.constant dense<0.000000e+00> : vector<8x2304xf32>
    %4 = tpu.matmul %2, %3, %cst {dimension_numbers = #tpu.dot_dimension_numbers<[1], [0], [0], [1], [0, 0, 1, 1], [], []>} : vector<8x768xbf16>, vector<768x2304xbf16>, vector<8x2304xf32> -> vector<8x2304xf32>
    %c0_4 = arith.constant 0 : index
    %c0_5 = arith.constant 0 : index
    %5 = vector.load %arg4[%c0_4, %c0_5] : memref<1x2304xf32, #tpu.memory_space<vmem>>, vector<1x2304xf32>
    %6 = vector.broadcast %5 : vector<1x2304xf32> to vector<8x2304xf32>
    %7 = arith.addf %4, %6 : vector<8x2304xf32>
    %8 = vector.extract_strided_slice %7 {offsets = [0, 0], sizes = [8, 768], strides = [1, 1]} : vector<8x2304xf32> to vector<8x768xf32>
    %9 = vector.shape_cast %8 : vector<8x768xf32> to vector<1x8x768xf32>
    %10 = arith.truncf %9 : vector<1x8x768xf32> to vector<1x8x768xbf16>
    %11 = vector.extract_strided_slice %7 {offsets = [0, 768], sizes = [8, 768], strides = [1, 1]} : vector<8x2304xf32> to vector<8x768xf32>
    %12 = vector.shape_cast %11 : vector<8x768xf32> to vector<1x8x768xf32>
    %13 = arith.truncf %12 : vector<1x8x768xf32> to vector<1x8x768xbf16>
    %14 = vector.extract_strided_slice %7 {offsets = [0, 1536], sizes = [8, 768], strides = [1, 1]} : vector<8x2304xf32> to vector<8x768xf32>
    %15 = vector.shape_cast %14 : vector<8x768xf32> to vector<1x8x768xf32>
    %16 = arith.truncf %15 : vector<1x8x768xf32> to vector<1x8x768xbf16>
    "tpu.trace_start"() <{level = 10 : i32, message = "bqd,bkd->bqk"}> : () -> ()
    %cst_6 = arith.constant dense<0.000000e+00> : vector<1x8x8xf32>
    %17 = tpu.matmul %10, %13, %cst_6 {dimension_numbers = #tpu.dot_dimension_numbers<[2], [2], [1], [1], [0, 0, 0, 1, 1, 1], [0], [0]>} : vector<1x8x768xbf16>, vector<1x8x768xbf16>, vector<1x8x8xf32> -> vector<1x8x8xf32>
    "tpu.trace_stop"() : () -> ()
    %cst_7 = arith.constant 0.0360843912 : f32
    %18 = vector.broadcast %cst_7 : f32 to vector<1x8x8xf32>
    %19 = arith.mulf %17, %18 : vector<1x8x8xf32>
    %c0_8 = arith.constant 0 : index
    %c0_9 = arith.constant 0 : index
    %c0_10 = arith.constant 0 : index
    %20 = vector.load %arg2[%c0_8, %c0_9, %c0_10] : memref<1x1x8xf32, #tpu.memory_space<vmem>>, vector<1x1x8xf32>
    %cst_11 = arith.constant 1.000000e+00 : f32
    %21 = vector.broadcast %cst_11 : f32 to vector<1x1x8xf32>
    %22 = arith.subf %21, %20 : vector<1x1x8xf32>
    %cst_12 = arith.constant -1.000000e+09 : f32
    %23 = vector.broadcast %cst_12 : f32 to vector<1x1x8xf32>
    %24 = arith.mulf %22, %23 : vector<1x1x8xf32>
    %25 = vector.broadcast %24 : vector<1x1x8xf32> to vector<1x8x8xf32>
    %26 = arith.addf %19, %25 : vector<1x8x8xf32>
    %cst_13 = arith.constant dense<0xFF800000> : vector<1x8xf32>
    %27 = vector.multi_reduction <maximumf>, %26, %cst_13 [2] : vector<1x8x8xf32> to vector<1x8xf32>
    %28 = vector.shape_cast %27 : vector<1x8xf32> to vector<1x8x1xf32>
    %29 = vector.broadcast %28 : vector<1x8x1xf32> to vector<1x8x8xf32>
    %30 = arith.subf %26, %29 : vector<1x8x8xf32>
    %31 = math.exp %30 : vector<1x8x8xf32>
    %cst_14 = arith.constant dense<0.000000e+00> : vector<1x8xf32>
    %32 = vector.multi_reduction <add>, %31, %cst_14 [2] : vector<1x8x8xf32> to vector<1x8xf32>
    %33 = vector.shape_cast %32 : vector<1x8xf32> to vector<1x8x1xf32>
    %34 = tpu.reciprocal %33 {approx = true} : vector<1x8x1xf32> -> vector<1x8x1xf32>
    %35 = vector.broadcast %34 : vector<1x8x1xf32> to vector<1x8x8xf32>
    %36 = arith.mulf %31, %35 : vector<1x8x8xf32>
    %37 = arith.truncf %36 : vector<1x8x8xf32> to vector<1x8x8xbf16>
    "tpu.trace_start"() <{level = 10 : i32, message = "bqk,bkd->bqd"}> : () -> ()
    %cst_15 = arith.constant dense<0.000000e+00> : vector<1x8x768xf32>
    %38 = tpu.matmul %37, %16, %cst_15 {dimension_numbers = #tpu.dot_dimension_numbers<[2], [1], [1], [2], [0, 0, 0, 1, 1, 2], [0], [0]>} : vector<1x8x8xbf16>, vector<1x8x768xbf16>, vector<1x8x768xf32> -> vector<1x8x768xf32>
    "tpu.trace_stop"() : () -> ()
    %39 = vector.shape_cast %38 : vector<1x8x768xf32> to vector<8x768xf32>
    %40 = arith.truncf %39 : vector<8x768xf32> to vector<8x768xbf16>
    %c0_16 = arith.constant 0 : index
    %c0_17 = arith.constant 0 : index
    %41 = vector.load %arg5[%c0_16, %c0_17] : memref<768x768xbf16, #tpu.memory_space<vmem>>, vector<768x768xbf16>
    %cst_18 = arith.constant dense<0.000000e+00> : vector<8x768xf32>
    %42 = tpu.matmul %40, %41, %cst_18 {dimension_numbers = #tpu.dot_dimension_numbers<[1], [0], [0], [1], [0, 0, 1, 1], [], []>} : vector<8x768xbf16>, vector<768x768xbf16>, vector<8x768xf32> -> vector<8x768xf32>
    %c0_19 = arith.constant 0 : index
    %c0_20 = arith.constant 0 : index
    %43 = vector.load %arg6[%c0_19, %c0_20] : memref<1x768xf32, #tpu.memory_space<vmem>>, vector<1x768xf32>
    %44 = vector.broadcast %43 : vector<1x768xf32> to vector<8x768xf32>
    %45 = arith.addf %42, %44 : vector<8x768xf32>
    %46 = arith.addf %1, %45 : vector<8x768xf32>
    %cst_21 = arith.constant dense<0.000000e+00> : vector<8xf32>
    %47 = vector.multi_reduction <add>, %46, %cst_21 [1] : vector<8x768xf32> to vector<8xf32>
    %48 = vector.shape_cast %47 : vector<8xf32> to vector<8x1xf32>
    %cst_22 = arith.constant 7.680000e+02 : f32
    %49 = vector.broadcast %cst_22 : f32 to vector<8x1xf32>
    %50 = arith.divf %48, %49 : vector<8x1xf32>
    %51 = vector.broadcast %50 : vector<8x1xf32> to vector<8x768xf32>
    %52 = arith.subf %46, %51 : vector<8x768xf32>
    %53 = arith.mulf %52, %52 : vector<8x768xf32>
    %cst_23 = arith.constant dense<0.000000e+00> : vector<8xf32>
    %54 = vector.multi_reduction <add>, %53, %cst_23 [1] : vector<8x768xf32> to vector<8xf32>
    %55 = vector.shape_cast %54 : vector<8xf32> to vector<8x1xf32>
    %cst_24 = arith.constant 7.680000e+02 : f32
    %56 = vector.broadcast %cst_24 : f32 to vector<8x1xf32>
    %57 = arith.divf %55, %56 : vector<8x1xf32>
    %58 = vector.broadcast %50 : vector<8x1xf32> to vector<8x768xf32>
    %59 = arith.subf %46, %58 : vector<8x768xf32>
    %cst_25 = arith.constant 9.99999996E-13 : f32
    %60 = vector.broadcast %cst_25 : f32 to vector<8x1xf32>
    %61 = arith.addf %57, %60 : vector<8x1xf32>
    %62 = math.rsqrt %61 : vector<8x1xf32>
    %63 = vector.broadcast %62 : vector<8x1xf32> to vector<8x768xf32>
    %64 = arith.mulf %59, %63 : vector<8x768xf32>
    %c0_26 = arith.constant 0 : index
    %c0_27 = arith.constant 0 : index
    %65 = vector.load %arg7[%c0_26, %c0_27] : memref<1x768xf32, #tpu.memory_space<vmem>>, vector<1x768xf32>
    %66 = vector.broadcast %65 : vector<1x768xf32> to vector<8x768xf32>
    %67 = arith.mulf %64, %66 : vector<8x768xf32>
    %c0_28 = arith.constant 0 : index
    %c0_29 = arith.constant 0 : index
    %68 = vector.load %arg8[%c0_28, %c0_29] : memref<1x768xf32, #tpu.memory_space<vmem>>, vector<1x768xf32>
    %69 = vector.broadcast %68 : vector<1x768xf32> to vector<8x768xf32>
    %70 = arith.addf %67, %69 : vector<8x768xf32>
    %71 = arith.truncf %70 : vector<8x768xf32> to vector<8x768xbf16>
    %c0_30 = arith.constant 0 : index
    %c0_31 = arith.constant 0 : index
    %72 = vector.load %arg9[%c0_30, %c0_31] : memref<768x1536xbf16, #tpu.memory_space<vmem>>, vector<768x1536xbf16>
    %cst_32 = arith.constant dense<0.000000e+00> : vector<8x1536xf32>
    %73 = tpu.matmul %71, %72, %cst_32 {dimension_numbers = #tpu.dot_dimension_numbers<[1], [0], [0], [1], [0, 0, 1, 1], [], []>} : vector<8x768xbf16>, vector<768x1536xbf16>, vector<8x1536xf32> -> vector<8x1536xf32>
    %c0_33 = arith.constant 0 : index
    %c0_34 = arith.constant 0 : index
    %74 = vector.load %arg10[%c0_33, %c0_34] : memref<1x1536xf32, #tpu.memory_space<vmem>>, vector<1x1536xf32>
    %75 = vector.broadcast %74 : vector<1x1536xf32> to vector<8x1536xf32>
    %76 = arith.addf %73, %75 : vector<8x1536xf32>
    %77 = arith.mulf %76, %76 : vector<8x1536xf32>
    %78 = arith.mulf %76, %77 : vector<8x1536xf32>
    %cst_35 = arith.constant 4.471500e-02 : f32
    %79 = vector.broadcast %cst_35 : f32 to vector<8x1536xf32>
    %80 = arith.mulf %79, %78 : vector<8x1536xf32>
    %81 = arith.addf %76, %80 : vector<8x1536xf32>
    %cst_36 = arith.constant 0.797884583 : f32
    %82 = vector.broadcast %cst_36 : f32 to vector<8x1536xf32>
    %83 = arith.mulf %82, %81 : vector<8x1536xf32>
    %84 = math.tanh %83 : vector<8x1536xf32>
    %cst_37 = arith.constant 1.000000e+00 : f32
    %85 = vector.broadcast %cst_37 : f32 to vector<8x1536xf32>
    %86 = arith.addf %85, %84 : vector<8x1536xf32>
    %cst_38 = arith.constant 5.000000e-01 : f32
    %87 = vector.broadcast %cst_38 : f32 to vector<8x1536xf32>
    %88 = arith.mulf %87, %86 : vector<8x1536xf32>
    %89 = arith.mulf %76, %88 : vector<8x1536xf32>
    %90 = arith.truncf %89 : vector<8x1536xf32> to vector<8x1536xbf16>
    %c0_39 = arith.constant 0 : index
    %c0_40 = arith.constant 0 : index
    %91 = vector.load %arg11[%c0_39, %c0_40] : memref<1536x768xbf16, #tpu.memory_space<vmem>>, vector<1536x768xbf16>
    %cst_41 = arith.constant dense<0.000000e+00> : vector<8x768xf32>
    %92 = tpu.matmul %90, %91, %cst_41 {dimension_numbers = #tpu.dot_dimension_numbers<[1], [0], [0], [1], [0, 0, 1, 1], [], []>} : vector<8x1536xbf16>, vector<1536x768xbf16>, vector<8x768xf32> -> vector<8x768xf32>
    %c0_42 = arith.constant 0 : index
    %c0_43 = arith.constant 0 : index
    %93 = vector.load %arg12[%c0_42, %c0_43] : memref<1x768xf32, #tpu.memory_space<vmem>>, vector<1x768xf32>
    %94 = vector.broadcast %93 : vector<1x768xf32> to vector<8x768xf32>
    %95 = arith.addf %92, %94 : vector<8x768xf32>
    %96 = arith.addf %70, %95 : vector<8x768xf32>
    %cst_44 = arith.constant dense<0.000000e+00> : vector<8xf32>
    %97 = vector.multi_reduction <add>, %96, %cst_44 [1] : vector<8x768xf32> to vector<8xf32>
    %98 = vector.shape_cast %97 : vector<8xf32> to vector<8x1xf32>
    %cst_45 = arith.constant 7.680000e+02 : f32
    %99 = vector.broadcast %cst_45 : f32 to vector<8x1xf32>
    %100 = arith.divf %98, %99 : vector<8x1xf32>
    %101 = vector.broadcast %100 : vector<8x1xf32> to vector<8x768xf32>
    %102 = arith.subf %96, %101 : vector<8x768xf32>
    %103 = arith.mulf %102, %102 : vector<8x768xf32>
    %cst_46 = arith.constant dense<0.000000e+00> : vector<8xf32>
    %104 = vector.multi_reduction <add>, %103, %cst_46 [1] : vector<8x768xf32> to vector<8xf32>
    %105 = vector.shape_cast %104 : vector<8xf32> to vector<8x1xf32>
    %cst_47 = arith.constant 7.680000e+02 : f32
    %106 = vector.broadcast %cst_47 : f32 to vector<8x1xf32>
    %107 = arith.divf %105, %106 : vector<8x1xf32>
    %108 = vector.broadcast %100 : vector<8x1xf32> to vector<8x768xf32>
    %109 = arith.subf %96, %108 : vector<8x768xf32>
    %cst_48 = arith.constant 9.99999996E-13 : f32
    %110 = vector.broadcast %cst_48 : f32 to vector<8x1xf32>
    %111 = arith.addf %107, %110 : vector<8x1xf32>
    %112 = math.rsqrt %111 : vector<8x1xf32>
    %113 = vector.broadcast %112 : vector<8x1xf32> to vector<8x768xf32>
    %114 = arith.mulf %109, %113 : vector<8x768xf32>
    %c0_49 = arith.constant 0 : index
    %c0_50 = arith.constant 0 : index
    %115 = vector.load %arg13[%c0_49, %c0_50] : memref<1x768xf32, #tpu.memory_space<vmem>>, vector<1x768xf32>
    %116 = vector.broadcast %115 : vector<1x768xf32> to vector<8x768xf32>
    %117 = arith.mulf %114, %116 : vector<8x768xf32>
    %c0_51 = arith.constant 0 : index
    %c0_52 = arith.constant 0 : index
    %118 = vector.load %arg14[%c0_51, %c0_52] : memref<1x768xf32, #tpu.memory_space<vmem>>, vector<1x768xf32>
    %119 = vector.broadcast %118 : vector<1x768xf32> to vector<8x768xf32>
    %120 = arith.addf %117, %119 : vector<8x768xf32>
    %121 = vector.shape_cast %120 : vector<8x768xf32> to vector<1x8x768xf32>
    %122 = arith.truncf %121 : vector<1x8x768xf32> to vector<1x8x768xbf16>
    %c0_53 = arith.constant 0 : index
    %c0_54 = arith.constant 0 : index
    %c0_55 = arith.constant 0 : index
    %123 = vector.load %arg15[%c0_53, %c0_54, %c0_55] : memref<1x8x768xbf16, #tpu.memory_space<vmem>>, vector<1x8x768xbf16>
    tpu.vector_store %arg15[%c0_53, %c0_54, %c0_55], %122 {strides = array<i32>} : memref<1x8x768xbf16, #tpu.memory_space<vmem>>, vector<1x8x768xbf16>,
    return
  }
  func.func @transform_0(%arg0: i32) -> (i32, i32, i32) {
    %c0_i32 = arith.constant 0 : i32
    %c0_i32_0 = arith.constant 0 : i32
    %c0_i32_1 = arith.constant 0 : i32
    return %arg0, %c0_i32, %c0_i32_0 : i32, i32, i32
  }
  func.func @transform_1(%arg0: i32) -> (i32, i32, i32) {
    %c0_i32 = arith.constant 0 : i32
    %c0_i32_0 = arith.constant 0 : i32
    %c0_i32_1 = arith.constant 0 : i32
    return %arg0, %c0_i32, %c0_i32_0 : i32, i32, i32
  }
  func.func @transform_2(%arg0: i32) -> (i32, i32) {
    %c0_i32 = arith.constant 0 : i32
    %c0_i32_0 = arith.constant 0 : i32
    %c0_i32_1 = arith.constant 0 : i32
    return %c0_i32, %c0_i32_0 : i32, i32
  }
  func.func @transform_3(%arg0: i32) -> (i32, i32) {
    %c0_i32 = arith.constant 0 : i32
    %c0_i32_0 = arith.constant 0 : i32
    %c0_i32_1 = arith.constant 0 : i32
    return %c0_i32, %c0_i32_0 : i32, i32
  }
  func.func @transform_4(%arg0: i32) -> (i32, i32) {
    %c0_i32 = arith.constant 0 : i32
    %c0_i32_0 = arith.constant 0 : i32
    %c0_i32_1 = arith.constant 0 : i32
    return %c0_i32, %c0_i32_0 : i32, i32
  }
  func.func @transform_5(%arg0: i32) -> (i32, i32) {
    %c0_i32 = arith.constant 0 : i32
    %c0_i32_0 = arith.constant 0 : i32
    %c0_i32_1 = arith.constant 0 : i32
    return %c0_i32, %c0_i32_0 : i32, i32
  }
  func.func @transform_6(%arg0: i32) -> (i32, i32) {
    %c0_i32 = arith.constant 0 : i32
    %c0_i32_0 = arith.constant 0 : i32
    %c0_i32_1 = arith.constant 0 : i32
    return %c0_i32, %c0_i32_0 : i32, i32
  }
  func.func @transform_7(%arg0: i32) -> (i32, i32) {
    %c0_i32 = arith.constant 0 : i32
    %c0_i32_0 = arith.constant 0 : i32
    %c0_i32_1 = arith.constant 0 : i32
    return %c0_i32, %c0_i32_0 : i32, i32
  }
  func.func @transform_8(%arg0: i32) -> (i32, i32) {
    %c0_i32 = arith.constant 0 : i32
    %c0_i32_0 = arith.constant 0 : i32
    %c0_i32_1 = arith.constant 0 : i32
    return %c0_i32, %c0_i32_0 : i32, i32
  }
  func.func @transform_9(%arg0: i32) -> (i32, i32) {
    %c0_i32 = arith.constant 0 : i32
    %c0_i32_0 = arith.constant 0 : i32
    %c0_i32_1 = arith.constant 0 : i32
    return %c0_i32, %c0_i32_0 : i32, i32
  }
  func.func @transform_10(%arg0: i32) -> (i32, i32) {
    %c0_i32 = arith.constant 0 : i32
    %c0_i32_0 = arith.constant 0 : i32
    %c0_i32_1 = arith.constant 0 : i32
    return %c0_i32, %c0_i32_0 : i32, i32
  }
  func.func @transform_11(%arg0: i32) -> (i32, i32) {
    %c0_i32 = arith.constant 0 : i32
    %c0_i32_0 = arith.constant 0 : i32
    %c0_i32_1 = arith.constant 0 : i32
    return %c0_i32, %c0_i32_0 : i32, i32
  }
  func.func @transform_12(%arg0: i32) -> (i32, i32) {
    %c0_i32 = arith.constant 0 : i32
    %c0_i32_0 = arith.constant 0 : i32
    %c0_i32_1 = arith.constant 0 : i32
    return %c0_i32, %c0_i32_0 : i32, i32
  }
  func.func @transform_13(%arg0: i32) -> (i32, i32) {
    %c0_i32 = arith.constant 0 : i32
    %c0_i32_0 = arith.constant 0 : i32
    %c0_i32_1 = arith.constant 0 : i32
    return %c0_i32, %c0_i32_0 : i32, i32
  }
  func.func @transform_14(%arg0: i32) -> (i32, i32, i32) {
    %c0_i32 = arith.constant 0 : i32
    %c0_i32_0 = arith.constant 0 : i32
    %c0_i32_1 = arith.constant 0 : i32
    return %arg0, %c0_i32, %c0_i32_0 : i32, i32, i32
  }
}

</mosaic_0001>

<bundles_post_ra>
// kernel: tpu_custom_call.1
= control target key start
LH: loop header
LB: loop body
LE: loop exit
PB: predicated region body
PF: predicated region fallthrough
CT: control target
= control target key end

     0   :  { %s26500_s0 = inlined_call_operand.hbm [shape: f32[2,8,768], index: 0, kind: input, shape index: {}]   ;;  %s26501_s1 = inlined_call_operand.hbm [shape: f32[2,1,8], index: 1, kind: input, shape index: {}]   ;;  %s26502_s2 = inlined_call_operand.hbm [shape: bf16[768,2304], index: 2, kind: input, shape index: {}]   ;;  %s26503_s3 = inlined_call_operand.hbm [shape: f32[1,2304], index: 3, kind: input, shape index: {}]   ;;  %s26504_s4 = inlined_call_operand.hbm [shape: bf16[768,768], index: 4, kind: input, shape index: {}]   ;;  %s26505_s5 = inlined_call_operand.hbm [shape: f32[1,768], index: 5, kind: input, shape index: {}]   ;;  %s26506_s6 = inlined_call_operand.hbm [shape: f32[1,768], index: 6, kind: input, shape index: {}]   ;;  %s26507_s7 = inlined_call_operand.hbm [shape: f32[1,768], index: 7, kind: input, shape index: {}]   ;;  %s26508_s8 = inlined_call_operand.hbm [shape: bf16[768,1536], index: 8, kind: input, shape index: {}]   ;;  %s26509_s9 = inlined_call_operand.hbm [shape: f32[1,1536], index: 9, kind: input, shape index: {}]   ;;  %s26510_s10 = inlined_call_operand.hbm [shape: bf16[1536,768], index: 10, kind: input, shape index: {}]   ;;  %s26511_s11 = inlined_call_operand.hbm [shape: f32[1,768], index: 11, kind: input, shape index: {}]   ;;  %s26512_s12 = inlined_call_operand.hbm [shape: f32[1,768], index: 12, kind: input, shape index: {}]   ;;  %s26513_s13 = inlined_call_operand.hbm [shape: f32[1,768], index: 13, kind: input, shape index: {}]   ;;  %s26514_s14 = inlined_call_operand.hbm [shape: bf16[2,8,768], index: 14, kind: output, shape index: {}]  }
   0x1   :  { %26528 = sst [smem:[#allocation39_spill]] %s26500_s0 }
   0x2   :  { %26529 = sst [smem:[#allocation40_spill]] %s26501_s1 }
   0x3   :  { %26530 = sst [smem:[#allocation41_spill]] %s26502_s2 }
   0x4   :  { %26531 = sst [smem:[#allocation42_spill]] %s26503_s3 }
   0x5   :  { %26532 = sst [smem:[#allocation43_spill]] %s26504_s4 }
   0x6   :  { %26533 = sst [smem:[#allocation44_spill]] %s26505_s5 }
   0x7   :  { %26534 = sst [smem:[#allocation45_spill]] %s26506_s6 }
   0x8   :  { %26535 = sst [smem:[#allocation46_spill]] %s26514_s14 }
   0x9   :  { %19 = vsyncpa [#allocation3], 0 }
   0xa   :  { %21 = vsyncpa [#allocation3 + $0x1], 0 }
   0xb   :  { %22 = vsyncpa [#allocation6], 0 }
   0xc   :  { %24 = vsyncpa [#allocation6 + $0x1], 0 }
   0xd   :  { %25 = vsyncpa [#allocation9], 0 }
   0xe   :  { %26 = vsyncpa [#allocation12], 0 }
   0xf   :  { %27 = vsyncpa [#allocation15], 0 }
  0x10   :  { %28 = vsyncpa [#allocation18], 0 }
  0x11   :  { %29 = vsyncpa [#allocation21], 0 }
  0x12   :  { %30 = vsyncpa [#allocation24], 0 }
  0x13   :  { %31 = vsyncpa [#allocation4], 0 }
  0x14   :  { %33 = vsyncpa [#allocation4 + $0x1], 0  ;;  %s25390_s29 = smov 0   ;;  %s25392_s30 = smov 0  }
  0x15   :  { %s25394_s15 = smov 0   ;;  %s25396_s16 = smov 0  }
  0x16 LB: > { %26536 = sst [smem:[#allocation36_spill]] %s25279_s29  ;;  %s25293_s17 = smov [#allocation7]   ;;  %s25291_s16 = sphi %s25396_s16, %s26585_s16   ;;  %s25287_s15 = sphi %s25394_s15, %s26584_s15   ;;  %s25283_s30 = sphi %s25392_s30, %s26583_s30   ;;  %s25279_s29 = sphi %s25390_s29, %s26582_s29  }
  0x17   : > { %s386_s18 = sshll.u32 %s25293_s17, 4  ;;  %s25411_s19 = sadd.s32 4294967295, %s25291_s16   ;;  %s25416_s18 = int_to_ptr.vmem [resolvable:$true] %s386_s18 }
  0x18   : > { %26537 = sst [smem:[#allocation37_spill]] %s25411_s19  ;;  %p18612_p0 = scmp.ge.s32.totalorder %s25291_s16, 1 }
  0x19   : > { %p26522_p1 = scmp.eq.s32.totalorder %s25411_s19, 0  ;;  %p374_p2 = scmp.lt.s32.totalorder %s25291_s16, 3 }
  0x1a   : > { %s25294_s21 = smov [#allocation8]   ;;  %s25295_s24 = smov [#allocation11]  }
  0x1b   : > { %p25418_p3 = pnand %p18612_p0, %p374_p2  ;;  %s400_s22 = sshll.u32 %s25294_s21, 4  ;;  %s25431_s22 = int_to_ptr.vmem [resolvable:$true] %s400_s22 }
  0x1c   : > { %s424_s25 = sshll.u32 %s25295_s24, 4  ;;  %s26541_s2 = sld [smem:[#allocation41_spill]]  ;;  %s25433_s25 = int_to_ptr.vmem [resolvable:$true] %s424_s25 }
  0x1d   : > { %s26538_s20 = scalar_select %p25418_p3, 1, 0 }
  0x1e   : > { %p21177_p5 = pneg %p25418_p3 }
  0x1f   : > { %26539 = sst [smem:[#allocation38_spill]] %s26538_s20 }
  0x20   : > { %p25427_p6 = pnand %p21177_p5, %p26522_p1 }
  0x22   : > { %s24797_s28 = scalar_lea.hbm %s26541_s2, 110592  ;;  %p25443_p8 = pneg %p25427_p6 }
  0x23   : > { %p24798_p7 = scmp.ne.s32.totalorder %s26541_s2, %s24797_s28  ;;  %p24804_p11 = scmp.lt.u32.totalorder %s24797_s28, %s26541_s2 }
  0x25   : > { %p24800_p9 = pnand %p25443_p8, %p24798_p7 }
  0x27   : > { %p24801_p10 = pneg %p24800_p9 }
  0x29   : > { %p24806_p12 = pnand %p24804_p11, %p24801_p10 }
  0x2b   : > { %24809 = shalt.err (!%p24806_p12)
}
  0x2c   : > { %s24810_s14 = scalar_lea.vmem %s25416_s18, 110592  ;;  %p24818_p5 = scmp.lt.s32.totalorder %s25416_s18, %s25416_s18 }
  0x2d   : > { %p24811_p13 = scmp.ne.s32.totalorder %s25416_s18, %s24810_s14  ;;  %p24819_p4 = scmp.lt.s32.totalorder %s24810_s14, %s24810_s14 }
  0x2f   : > { %p24813_p0 = pnand %p24811_p13, %p25443_p8  ;;  %p24820_p7 = por %p24819_p4, %p24818_p5 }
  0x31   : > { %p24814_p2 = pneg %p24813_p0 }
  0x33   : > { %p24821_p9 = pnand %p24820_p7, %p24814_p2 }
  0x35   : > { %24824 = shalt.err (!%p24821_p9)
}
  0x36   : > { %s25296_s26 = smov 1152   ;;  %s25297_s20 = smov 72  }
  0x37   : > { %21180 = dma.hbm_to_vmem [thread:$0]  (!%p25427_p6), %s26541_s2, 110592, %s25416_s18, [#allocation6], %s25296_s26, %s25296_s26, %s25297_s20  }
  0x38   : > { %s26543_s3 = sld [smem:[#allocation42_spill]] }
  0x3e   : > { %s24825_s1 = scalar_lea.hbm %s26543_s3, 288 }
  0x3f   : > { %p24826_p4 = scmp.ne.s32.totalorder %s26543_s3, %s24825_s1  ;;  %p24832_p12 = scmp.lt.u32.totalorder %s24825_s1, %s26543_s3 }
  0x41   : > { %p24828_p10 = pnand %p24826_p4, %p25443_p8 }
  0x43   : > { %p24829_p11 = pneg %p24828_p10 }
  0x45   : > { %p24834_p13 = pnand %p24832_p12, %p24829_p11 }
  0x47   : > { %24837 = shalt.err (!%p24834_p13)
}
  0x48   : > { %s24838_s18 = scalar_lea.vmem %s25431_s22, 288  ;;  %p24846_p7 = scmp.lt.s32.totalorder %s25431_s22, %s25431_s22 }
  0x49   : > { %p24839_p0 = scmp.ne.s32.totalorder %s25431_s22, %s24838_s18  ;;  %p24847_p9 = scmp.lt.s32.totalorder %s24838_s18, %s24838_s18 }
  0x4b   : > { %p24841_p2 = pnand %p24839_p0, %p25443_p8  ;;  %p24848_p4 = por %p24847_p9, %p24846_p7 }
  0x4d   : > { %p24842_p5 = pneg %p24841_p2 }
  0x4f   : > { %p24849_p10 = pnand %p24848_p4, %p24842_p5 }
  0x51   : > { %24852 = shalt.err (!%p24849_p10)
}
  0x52   : > { %21183 = dma.hbm_to_vmem [thread:$0]  (!%p25427_p6), %s26543_s3, 288, %s25431_s22, [#allocation9]  }
  0x53   : > { %s26544_s5 = sld [smem:[#allocation44_spill]] }
  0x59   : > { %s24853_s26 = scalar_lea.hbm %s26544_s5, 96 }
  0x5a   : > { %p24854_p11 = scmp.ne.s32.totalorder %s26544_s5, %s24853_s26  ;;  %p24860_p0 = scmp.lt.u32.totalorder %s24853_s26, %s26544_s5 }
  0x5c   : > { %p24856_p12 = pnand %p24854_p11, %p25443_p8 }
  0x5e   : > { %p24857_p13 = pneg %p24856_p12 }
  0x60   : > { %p24862_p2 = pnand %p24860_p0, %p24857_p13 }
  0x62   : > { %24865 = shalt.err (!%p24862_p2)
}
  0x63   : > { %s24866_s22 = scalar_lea.vmem %s25433_s25, 96  ;;  %p24874_p4 = scmp.lt.s32.totalorder %s25433_s25, %s25433_s25 }
  0x64   : > { %p24867_p5 = scmp.ne.s32.totalorder %s25433_s25, %s24866_s22  ;;  %p24875_p10 = scmp.lt.s32.totalorder %s24866_s22, %s24866_s22 }
  0x66   : > { %p24869_p7 = pnand %p24867_p5, %p25443_p8  ;;  %p24876_p11 = por %p24875_p10, %p24874_p4 }
  0x68   : > { %p24870_p9 = pneg %p24869_p7 }
  0x6a   : > { %p24877_p12 = pnand %p24876_p11, %p24870_p9 }
  0x6c   : > { %24880 = shalt.err (!%p24877_p12)
}
  0x6d   : > { %21189 = dma.hbm_to_vmem [thread:$0]  (!%p25427_p6), %s26544_s5, 96, %s25433_s25, [#allocation12]  }
  0x6e   : > { %s25298_s18 = smov [#allocation14]   ;;  %s25299_s1 = smov [#allocation17]  }
  0x6f   : > { %s446_s0 = sshll.u32 %s25298_s18, 4  ;;  %s470_s29 = sshll.u32 %s25299_s1, 4  ;;  %s447_s0 = int_to_ptr.vmem [resolvable:$true] %s446_s0  ;;  %s471_s29 = int_to_ptr.vmem [resolvable:$true] %s470_s29 }
  0x70   : > { %s24881_s20 = scalar_lea.hbm %s26507_s7, 96 }
  0x71   : > { %p24882_p13 = scmp.ne.s32.totalorder %s26507_s7, %s24881_s20  ;;  %p24888_p5 = scmp.lt.u32.totalorder %s24881_s20, %s26507_s7 }
  0x73   : > { %p24884_p0 = pnand %p24882_p13, %p25443_p8 }
  0x75   : > { %p24885_p2 = pneg %p24884_p0 }
  0x77   : > { %p24890_p7 = pnand %p24888_p5, %p24885_p2 }
  0x79   : > { %24893 = shalt.err (!%p24890_p7)
}
  0x7a   : > { %s24894_s25 = scalar_lea.vmem %s447_s0, 96  ;;  %p24902_p11 = scmp.lt.s32.totalorder %s447_s0, %s447_s0 }
  0x7b   : > { %p24895_p9 = scmp.ne.s32.totalorder %s447_s0, %s24894_s25  ;;  %p24903_p12 = scmp.lt.s32.totalorder %s24894_s25, %s24894_s25 }
  0x7d   : > { %p24897_p4 = pnand %p24895_p9, %p25443_p8  ;;  %p24904_p1 = por %p24903_p12, %p24902_p11 }
  0x7f   : > { %p24898_p10 = pneg %p24897_p4 }
  0x81   : > { %p24905_p3 = pnand %p24904_p1, %p24898_p10 }
  0x83   : > { %24908 = shalt.err (!%p24905_p3)
}
  0x84   : > { %21195 = dma.hbm_to_vmem [thread:$0]  (!%p25427_p6), %s26507_s7, 96, %s447_s0, [#allocation15]  }
  0x85   : > { %s24909_s19 = scalar_lea.hbm %s26509_s9, 192 }
  0x86   : > { %p24910_p13 = scmp.ne.s32.totalorder %s26509_s9, %s24909_s19  ;;  %p24916_p3 = scmp.lt.u32.totalorder %s24909_s19, %s26509_s9 }
  0x88   : > { %p24912_p0 = pnand %p24910_p13, %p25443_p8 }
  0x8a   : > { %p24913_p1 = pneg %p24912_p0 }
  0x8c   : > { %p24918_p2 = pnand %p24916_p3, %p24913_p1 }
  0x8e   : > { %24921 = shalt.err (!%p24918_p2)
}
  0x8f   : > { %s24922_s17 = scalar_lea.vmem %s471_s29, 192  ;;  %p24930_p4 = scmp.lt.s32.totalorder %s471_s29, %s471_s29 }
  0x90   : > { %p24923_p5 = scmp.ne.s32.totalorder %s471_s29, %s24922_s17  ;;  %p24931_p10 = scmp.lt.s32.totalorder %s24922_s17, %s24922_s17 }
  0x92   : > { %p24925_p7 = pnand %p24923_p5, %p25443_p8  ;;  %p24932_p11 = por %p24931_p10, %p24930_p4 }
  0x94   : > { %p24926_p9 = pneg %p24925_p7 }
  0x96   : > { %p24933_p12 = pnand %p24932_p11, %p24926_p9 }
  0x98   : > { %24936 = shalt.err (!%p24933_p12)
}
  0x99   : > { %21201 = dma.hbm_to_vmem [thread:$0]  (!%p25427_p6), %s26509_s9, 192, %s471_s29, [#allocation18]  }
  0x9a   : > { %s25300_s25 = smov [#allocation20]   ;;  %s25301_s14 = smov [#allocation10]  }
  0x9b   : > { %s494_s24 = sshll.u32 %s25300_s25, 4  ;;  %s410_s18 = sshll.u32 %s25301_s14, 4  ;;  %s495_s24 = int_to_ptr.vmem [resolvable:$true] %s494_s24  ;;  %s411_s18 = int_to_ptr.vmem [resolvable:$true] %s410_s18 }
  0x9c   : > { %s24937_s26 = scalar_lea.hbm %s26511_s11, 96 }
  0x9d   : > { %p24938_p13 = scmp.ne.s32.totalorder %s26511_s11, %s24937_s26  ;;  %p24944_p3 = scmp.lt.u32.totalorder %s24937_s26, %s26511_s11 }
  0x9f   : > { %p24940_p0 = pnand %p24938_p13, %p25443_p8 }
  0xa1   : > { %p24941_p1 = pneg %p24940_p0 }
  0xa3   : > { %p24946_p2 = pnand %p24944_p3, %p24941_p1 }
  0xa5   : > { %24949 = shalt.err (!%p24946_p2)
}
  0xa6   : > { %s24950_s29 = scalar_lea.vmem %s495_s24, 96  ;;  %p24958_p4 = scmp.lt.s32.totalorder %s495_s24, %s495_s24 }
  0xa7   : > { %p24951_p5 = scmp.ne.s32.totalorder %s495_s24, %s24950_s29  ;;  %p24959_p10 = scmp.lt.s32.totalorder %s24950_s29, %s24950_s29 }
  0xa9   : > { %p24953_p7 = pnand %p24951_p5, %p25443_p8  ;;  %p24960_p11 = por %p24959_p10, %p24958_p4 }
  0xab   : > { %p24954_p9 = pneg %p24953_p7 }
  0xad   : > { %p24961_p12 = pnand %p24960_p11, %p24954_p9 }
  0xaf   : > { %24964 = shalt.err (!%p24961_p12)
}
  0xb0   : > { %21207 = dma.hbm_to_vmem [thread:$0]  (!%p25427_p6), %s26511_s11, 96, %s495_s24, [#allocation21]  }
  0xb1   : > { %s26545_s4 = sld [smem:[#allocation43_spill]] }
  0xb7   : > { %s24965_s1 = scalar_lea.hbm %s26545_s4, 36864 }
  0xb8   : > { %p24966_p13 = scmp.ne.s32.totalorder %s26545_s4, %s24965_s1  ;;  %p24972_p3 = scmp.lt.u32.totalorder %s24965_s1, %s26545_s4 }
  0xba   : > { %p24968_p0 = pnand %p24966_p13, %p25443_p8 }
  0xbc   : > { %p24969_p1 = pneg %p24968_p0 }
  0xbe   : > { %p24974_p2 = pnand %p24972_p3, %p24969_p1 }
  0xc0   : > { %24977 = shalt.err (!%p24974_p2)
}
  0xc1   : > { %s24978_s28 = scalar_lea.vmem %s411_s18, 36864  ;;  %p24986_p4 = scmp.lt.s32.totalorder %s411_s18, %s411_s18 }
  0xc2   : > { %p24979_p5 = scmp.ne.s32.totalorder %s411_s18, %s24978_s28  ;;  %p24987_p10 = scmp.lt.s32.totalorder %s24978_s28, %s24978_s28 }
  0xc4   : > { %p24981_p7 = pnand %p24979_p5, %p25443_p8  ;;  %p24988_p11 = por %p24987_p10, %p24986_p4 }
  0xc6   : > { %p24982_p9 = pneg %p24981_p7 }
  0xc8   : > { %p24989_p12 = pnand %p24988_p11, %p24982_p9 }
  0xca   : > { %24992 = shalt.err (!%p24989_p12)
}
  0xcb   : > { %s26524_s24 = smov 384   ;;  %s26525_s17 = smov 24  }
  0xcc   : > { %21186 = dma.hbm_to_vmem [thread:$0]  (!%p25427_p6), %s26545_s4, 36864, %s411_s18, [#allocation9], %s26524_s24, %s26524_s24, %s26525_s17  }
  0xcd   : > { %s25304_s22 = smov [#allocation13]   ;;  %s25305_s14 = smov [#allocation16]  }
  0xce   : > { %s435_s25 = sshll.u32 %s25304_s22, 4  ;;  %s456_s1 = sshll.u32 %s25305_s14, 4  ;;  %s436_s25 = int_to_ptr.vmem [resolvable:$true] %s435_s25  ;;  %s457_s1 = int_to_ptr.vmem [resolvable:$true] %s456_s1 }
  0xcf   : > { %s26546_s6 = sld [smem:[#allocation45_spill]] }
  0xd5   : > { %s24993_s20 = scalar_lea.hbm %s26546_s6, 96 }
  0xd6   : > { %p24994_p13 = scmp.ne.s32.totalorder %s26546_s6, %s24993_s20  ;;  %p25000_p3 = scmp.lt.u32.totalorder %s24993_s20, %s26546_s6 }
  0xd8   : > { %p24996_p0 = pnand %p24994_p13, %p25443_p8 }
  0xda   : > { %p24997_p1 = pneg %p24996_p0 }
  0xdc   : > { %p25002_p2 = pnand %p25000_p3, %p24997_p1 }
  0xde   : > { %25005 = shalt.err (!%p25002_p2)
}
  0xdf   : > { %s25006_s18 = scalar_lea.vmem %s436_s25, 96  ;;  %p25014_p4 = scmp.lt.s32.totalorder %s436_s25, %s436_s25 }
  0xe0   : > { %p25007_p5 = scmp.ne.s32.totalorder %s436_s25, %s25006_s18  ;;  %p25015_p10 = scmp.lt.s32.totalorder %s25006_s18, %s25006_s18 }
  0xe2   : > { %p25009_p7 = pnand %p25007_p5, %p25443_p8  ;;  %p25016_p11 = por %p25015_p10, %p25014_p4 }
  0xe4   : > { %p25010_p9 = pneg %p25009_p7 }
  0xe6   : > { %p25017_p12 = pnand %p25016_p11, %p25010_p9 }
  0xe8   : > { %25020 = shalt.err (!%p25017_p12)
}
  0xe9   : > { %21192 = dma.hbm_to_vmem [thread:$0]  (!%p25427_p6), %s26546_s6, 96, %s436_s25, [#allocation12]  }
  0xea   : > { %s25021_s22 = scalar_lea.hbm %s26508_s8, 73728 }
  0xeb   : > { %p25022_p13 = scmp.ne.s32.totalorder %s26508_s8, %s25021_s22  ;;  %p25028_p3 = scmp.lt.u32.totalorder %s25021_s22, %s26508_s8 }
  0xed   : > { %p25024_p0 = pnand %p25022_p13, %p25443_p8 }
  0xef   : > { %p25025_p1 = pneg %p25024_p0 }
  0xf1   : > { %p25030_p2 = pnand %p25028_p3, %p25025_p1 }
  0xf3   : > { %25033 = shalt.err (!%p25030_p2)
}
  0xf4   : > { %s25034_s27 = scalar_lea.vmem %s457_s1, 73728  ;;  %p25042_p4 = scmp.lt.s32.totalorder %s457_s1, %s457_s1 }
  0xf5   : > { %p25035_p5 = scmp.ne.s32.totalorder %s457_s1, %s25034_s27  ;;  %p25043_p10 = scmp.lt.s32.totalorder %s25034_s27, %s25034_s27 }
  0xf7   : > { %p25037_p7 = pnand %p25035_p5, %p25443_p8  ;;  %p25044_p11 = por %p25043_p10, %p25042_p4 }
  0xf9   : > { %p25038_p9 = pneg %p25037_p7 }
  0xfb   : > { %p25045_p12 = pnand %p25044_p11, %p25038_p9 }
  0xfd   : > { %25048 = shalt.err (!%p25045_p12)
}
  0xfe   : > { %s25306_s25 = smov 768   ;;  %s25307_s28 = smov 48  }
  0xff   : > { %21198 = dma.hbm_to_vmem [thread:$0]  (!%p25427_p6), %s26508_s8, 73728, %s457_s1, [#allocation15], %s25306_s25, %s25306_s25, %s25307_s28  }
 0x100   : > { %s25308_s0 = smov [#allocation19]   ;;  %s25309_s3 = smov [#allocation22]  }
 0x101   : > { %s480_s2 = sshll.u32 %s25308_s0, 4  ;;  %s505_s22 = sshll.u32 %s25309_s3, 4  ;;  %s481_s2 = int_to_ptr.vmem [resolvable:$true] %s480_s2  ;;  %s506_s22 = int_to_ptr.vmem [resolvable:$true] %s505_s22 }
 0x102   : > { %s25049_s26 = scalar_lea.hbm %s26510_s10, 73728 }
 0x103   : > { %p25050_p13 = scmp.ne.s32.totalorder %s26510_s10, %s25049_s26  ;;  %p25056_p3 = scmp.lt.u32.totalorder %s25049_s26, %s26510_s10 }
 0x105   : > { %p25052_p0 = pnand %p25050_p13, %p25443_p8 }
 0x107   : > { %p25053_p1 = pneg %p25052_p0 }
 0x109   : > { %p25058_p2 = pnand %p25056_p3, %p25053_p1 }
 0x10b   : > { %25061 = shalt.err (!%p25058_p2)
}
 0x10c   : > { %s25062_s1 = scalar_lea.vmem %s481_s2, 73728  ;;  %p25070_p4 = scmp.lt.s32.totalorder %s481_s2, %s481_s2 }
 0x10d   : > { %p25063_p5 = scmp.ne.s32.totalorder %s481_s2, %s25062_s1  ;;  %p25071_p10 = scmp.lt.s32.totalorder %s25062_s1, %s25062_s1 }
 0x10f   : > { %p25065_p7 = pnand %p25063_p5, %p25443_p8  ;;  %p25072_p11 = por %p25071_p10, %p25070_p4 }
 0x111   : > { %p25066_p9 = pneg %p25065_p7 }
 0x113   : > { %p25073_p12 = pnand %p25072_p11, %p25066_p9 }
 0x115   : > { %25076 = shalt.err (!%p25073_p12)
}
 0x116   : > { %s26547_s25 = smov 24   ;;  %s26548_s28 = smov 384  }
 0x117   : > { %21204 = dma.hbm_to_vmem [thread:$0]  (!%p25427_p6), %s26510_s10, 73728, %s481_s2, [#allocation18], %s26548_s28, %s26548_s28, %s26547_s25  }
 0x118   : > { %s25077_s0 = scalar_lea.hbm %s26512_s12, 96 }
 0x119   : > { %p25078_p13 = scmp.ne.s32.totalorder %s26512_s12, %s25077_s0  ;;  %p25084_p3 = scmp.lt.u32.totalorder %s25077_s0, %s26512_s12 }
 0x11b   : > { %p25080_p0 = pnand %p25078_p13, %p25443_p8 }
 0x11d   : > { %p25081_p1 = pneg %p25080_p0 }
 0x11f   : > { %p25086_p2 = pnand %p25084_p3, %p25081_p1 }
 0x121   : > { %25089 = shalt.err (!%p25086_p2)
}
 0x122   : > { %s25090_s20 = scalar_lea.vmem %s506_s22, 96  ;;  %p25098_p4 = scmp.lt.s32.totalorder %s506_s22, %s506_s22 }
 0x123   : > { %p25091_p5 = scmp.ne.s32.totalorder %s506_s22, %s25090_s20  ;;  %p25099_p10 = scmp.lt.s32.totalorder %s25090_s20, %s25090_s20 }
 0x125   : > { %p25093_p7 = pnand %p25091_p5, %p25443_p8  ;;  %p25100_p11 = por %p25099_p10, %p25098_p4 }
 0x127   : > { %p25094_p9 = pneg %p25093_p7 }
 0x129   : > { %p25101_p12 = pnand %p25100_p11, %p25094_p9 }
 0x12b   : > { %25104 = shalt.err (!%p25101_p12)
}
 0x12c   : > { %21210 = dma.hbm_to_vmem [thread:$0]  (!%p25427_p6), %s26512_s12, 96, %s506_s22, [#allocation21]  }
 0x12d   : > { %s25310_s1 = smov [#allocation23]   ;;  %s25105_s17 = scalar_lea.hbm %s26513_s13, 96 }
 0x12e   : > { %s516_s25 = sshll.u32 %s25310_s1, 4  ;;  %p25106_p13 = scmp.ne.s32.totalorder %s26513_s13, %s25105_s17  ;;  %s517_s25 = int_to_ptr.vmem [resolvable:$true] %s516_s25 }
 0x12f   : > { %p25112_p3 = scmp.lt.u32.totalorder %s25105_s17, %s26513_s13 }
 0x130   : > { %p25108_p0 = pnand %p25106_p13, %p25443_p8 }
 0x132   : > { %p25109_p1 = pneg %p25108_p0 }
 0x134   : > { %p25114_p2 = pnand %p25112_p3, %p25109_p1 }
 0x136   : > { %25117 = shalt.err (!%p25114_p2)
}
 0x137   : > { %s25118_s22 = scalar_lea.vmem %s517_s25, 96  ;;  %p25126_p4 = scmp.lt.s32.totalorder %s517_s25, %s517_s25 }
 0x138   : > { %p25119_p5 = scmp.ne.s32.totalorder %s517_s25, %s25118_s22  ;;  %p25127_p10 = scmp.lt.s32.totalorder %s25118_s22, %s25118_s22 }
 0x13a   : > { %p25121_p7 = pnand %p25119_p5, %p25443_p8  ;;  %p25128_p11 = por %p25127_p10, %p25126_p4 }
 0x13c   : > { %p25122_p9 = pneg %p25121_p7 }
 0x13e   : > { %p25129_p12 = pnand %p25128_p11, %p25122_p9 }
 0x140   : > { %25132 = shalt.err (!%p25129_p12)
}
 0x141   : > { %s26549_s21 = sld [smem:[#allocation36_spill]]  ;;  %s26550_s26 = sld [smem:[#allocation37_spill]] }
 0x142   : > { %21213 = dma.hbm_to_vmem [thread:$0]  (!%p25427_p6), %s26513_s13, 96, %s517_s25, [#allocation24]  }
 0x143   : > { %s18611_s20 = sadd.s32 4294967294, %s25291_s16   ;;  %s25680_s23 = sadd.s32 1, %s25291_s16  }
 0x144   : > { %s43_s2 = ssub.s32 %s25291_s16, %s25680_s23  ;;  %s46_s27 = sadd.s32 1, %s25287_s15 }
 0x145   : > { %p44_p8 = scmp.eq.s32.totalorder %s43_s2, 0  ;;  %p53_p13 = scmp.ne.s32.totalorder %s25287_s15, %s25283_s30 }
 0x146   : > { %p54_p0 = scmp.eq.s32.totalorder %s25291_s16, 0  ;;  %p367_p7 = scmp.eq.s32.totalorder %s18611_s20, 1 }
 0x147   : > { %p59_p1 = scmp.ne.s32.totalorder %s25283_s30, %s26549_s21  ;;  %p26551_p2 = scmp.eq.s32.totalorder %s26550_s26, 0 }
 0x148   : > { %s25691_s1 = scalar_select %p44_p8, %s25287_s15, %s46_s27  }
 0x149   : > { %p55_p3 = por %p54_p0, %p53_p13  ;;  %p25695_p5 = por %p26551_p2, %p59_p1 }
 0x14a   : > { %p361_p6 = scmp.eq.s32.totalorder %s26550_s26, 1  ;;  %p21237_p9 = scmp.lt.s32.totalorder %s25291_s16, 2 }
 0x14b   : > { %s26552_s28 = scalar_select %p25695_p5, 1, 0 }
 0x14c   : > { %s25702_s25 = sand.u32 1, %s25287_s15   ;;  %p25704_p4 = por %p361_p6, %p53_p13 }
 0x14d   : > { %p25708_p10 = por %p367_p7, %p59_p1  ;;  %s21118_s18 = smul.u32 48, %s25702_s25 }
 0x14e   : > { %s26553_s24 = scalar_select %p25704_p4, 1, 0 }
 0x14f   : > { %s26554_s17 = scalar_select %p25708_p10, 1, 0 }
 0x150   : > { %s21119_s29 = smul.u32 768, %s25291_s16  ;;  %p25714_p11 = pnand %p21237_p9, %p55_p3 }
 0x151   : > { %s26556_s19 = sld [smem:[#allocation39_spill]]  ;;  %s531_s26 = scalar_lea.vmem [#allocation2], %s21118_s18 }
 0x152   : > { %s539_s20 = sshll.u32 %s531_s26, 4  ;;  %s528_s2 = scalar_lea.sflag [#allocation3], %s25702_s25  ;;  %s25724_s20 = int_to_ptr.vmem [resolvable:$true] %s539_s20 }
 0x153   : > { %p25135_p8 = pneg %p25714_p11 }
 0x157   : > { %s25722_s21 = scalar_lea.hbm %s26556_s19, %s21119_s29  ;;  %s25138_s14 = scalar_lea.hbm %s26556_s19, 1536 }
 0x158   : > { %s25133_s27 = scalar_lea.hbm %s25722_s21, 768  ;;  %p25139_p1 = scmp.lt.u32.totalorder %s25722_s21, %s26556_s19 }
 0x159   : > { %p25134_p12 = scmp.ne.s32.totalorder %s25722_s21, %s25133_s27  ;;  %p25140_p3 = scmp.lt.u32.totalorder %s25138_s14, %s25133_s27 }
 0x15a   : > { %p25142_p6 = scmp.lt.u32.totalorder %s25133_s27, %s25722_s21 }
 0x15b   : > { %p25136_p13 = pnand %p25135_p8, %p25134_p12  ;;  %p25141_p2 = por %p25140_p3, %p25139_p1 }
 0x15d   : > { %p25137_p0 = pneg %p25136_p13  ;;  %p25143_p7 = por %p25142_p6, %p25141_p2 }
 0x15f   : > { %p25144_p9 = pnand %p25143_p7, %p25137_p0 }
 0x161   : > { %25147 = shalt.err (!%p25144_p9)
}
 0x162   : > { %s25148_s18 = scalar_lea.vmem %s25724_s20, 768  ;;  %s25311_s26 = smov [#allocation2]  }
 0x163   : > { %p25149_p12 = scmp.ne.s32.totalorder %s25724_s20, %s25148_s18  ;;  %s25153_s22 = sshll.u32 %s25311_s26, 4  ;;  %s25154_s22 = int_to_ptr.vmem [resolvable:$false] %s25153_s22 }
 0x164   : > { %s25155_s4 = scalar_lea.vmem %s25154_s22, 1536  ;;  %p25156_p4 = scmp.lt.s32.totalorder %s25724_s20, %s25154_s22 }
 0x165   : > { %p25151_p13 = pnand %p25149_p12, %p25135_p8  ;;  %p25157_p1 = scmp.lt.s32.totalorder %s25155_s4, %s25148_s18 }
 0x167   : > { %p25152_p10 = pneg %p25151_p13  ;;  %p25158_p3 = por %p25157_p1, %p25156_p4 }
 0x169   : > { %p25159_p2 = pnand %p25158_p3, %p25152_p10 }
 0x16b   : > { %25162 = shalt.err (!%p25159_p2)
}
 0x16c   : > { %21217 = dma.hbm_to_vmem [thread:$0]  (!%p25714_p11), %s25722_s21, 768, %s25724_s20, %s528_s2  }
 0x16d   : > { %s18627_s3 = sshll.u32 %s25291_s16, 4  ;;  %s549_s27 = scalar_lea.vmem [#allocation5], %s25702_s25 }
 0x16e   : > { %s556_s29 = sshll.u32 %s549_s27, 4  ;;  %s26557_s5 = sld [smem:[#allocation40_spill]]  ;;  %s557_s29 = int_to_ptr.vmem [resolvable:$true] %s556_s29 }
 0x16f   : > { %s26558_s18 = sand.u32 1, %s25291_s16  }
 0x170   : > { %s547_s4 = scalar_lea.sflag [#allocation6], %s26558_s18 }
 0x174   : > { %s25757_s22 = scalar_lea.hbm %s26557_s5, %s18627_s3  ;;  %s25168_s20 = scalar_lea.hbm %s26557_s5, 32 }
 0x175   : > { %s25163_s6 = scalar_lea.hbm %s25757_s22, 16  ;;  %p25169_p6 = scmp.lt.u32.totalorder %s25757_s22, %s26557_s5 }
 0x176   : > { %p25164_p4 = scmp.ne.s32.totalorder %s25757_s22, %s25163_s6  ;;  %p25170_p7 = scmp.lt.u32.totalorder %s25168_s20, %s25163_s6 }
 0x177   : > { %p25172_p12 = scmp.lt.u32.totalorder %s25163_s6, %s25757_s22 }
 0x178   : > { %p25166_p10 = pnand %p25164_p4, %p25135_p8  ;;  %p25171_p9 = por %p25170_p7, %p25169_p6 }
 0x17a   : > { %p25167_p0 = pneg %p25166_p10  ;;  %p25173_p13 = por %p25172_p12, %p25171_p9 }
 0x17c   : > { %p25174_p1 = pnand %p25173_p13, %p25167_p0 }
 0x17e   : > { %25177 = shalt.err (!%p25174_p1)
}
 0x17f   : > { %s25178_s27 = scalar_lea.vmem %s557_s29, 16  ;;  %s25312_s14 = smov [#allocation5]  }
 0x180   : > { %p25179_p3 = scmp.ne.s32.totalorder %s557_s29, %s25178_s27  ;;  %s25183_s26 = sshll.u32 %s25312_s14, 4  ;;  %s25184_s26 = int_to_ptr.vmem [resolvable:$false] %s25183_s26 }
 0x181   : > { %s25185_s18 = scalar_lea.vmem %s25184_s26, 32  ;;  %p25186_p10 = scmp.lt.s32.totalorder %s557_s29, %s25184_s26 }
 0x182   : > { %p25181_p2 = pnand %p25179_p3, %p25135_p8  ;;  %p25187_p5 = scmp.lt.s32.totalorder %s25185_s18, %s25178_s27 }
 0x184   : > { %p25182_p4 = pneg %p25181_p2  ;;  %p25188_p6 = por %p25187_p5, %p25186_p10 }
 0x186   : > { %p25189_p7 = pnand %p25188_p6, %p25182_p4 }
 0x188   : > { %25192 = shalt.err (!%p25189_p7)
}
 0x189   : > { %21220 = dma.hbm_to_vmem [thread:$0]  (!%p25714_p11), %s25757_s22, 16, %s557_s29, %s547_s4  }
 0x18a   : > { %s26559_s6 = sld [smem:[#allocation38_spill]] }
 0x190   : > { %p26560_p0 = scmp.ne.s32.totalorder %s26559_s6, 0 }
 0x191   : > { %s25783_s25 = sand.u32 (!%p26560_p0), 1, %s25283_s30   ;;  %p26561_p5 = scmp.ne.s32.totalorder (!%p26560_p0), %s26552_s28, 0 }
 0x192   : > { %565 = sbr.rel (%p26560_p0) target bundleno = 4753 (0x1291), region = 76  ;;  %s568_s20 = scalar_lea.sflag (!%p26560_p0), [#allocation3], %s25783_s25 }
 0x193   : > { %s21120_s21 = smul.u32 (!%p26560_p0), 48, %s25783_s25 }
 0x195   : > { %s25787_s2 = scalar_lea.vmem (!%p26560_p0), [#allocation2], %s21120_s21 }
 0x199   : > { %25238 = dma.done.wait (%p26561_p5), %s568_s20, 768  }
 0x19a   : > { %25240 = vsyncadd (%p26561_p5), %s568_s20, 4294966528  ;;  %s26562_s0 = sld [smem:[#allocation37_spill]]  ;;  %s579_s4 = scalar_lea.vmem [#allocation5], %s25783_s25 }
 0x1a0   : > { %s576_s29 = sand.u32 1, %s26562_s0  }
 0x1a1   : > { %s577_s22 = scalar_lea.sflag [#allocation6], %s576_s29 }
 0x1a2   : > { %25242 = dma.done.wait (%p26561_p5), %s577_s22, 16  }
 0x1a3   : > { %25244 = vsyncadd (%p26561_p5), %s577_s22, 4294967280  ;;  %p26563_p11 = scmp.eq.s32.totalorder %s26562_s0, 0 }
 0x1a5   : > { %25246 = dma.done.wait (%p26563_p11), [#allocation6], 110592   ;;  %p26564_p8 = pmov %p26563_p11 }
 0x1a7   : > { %25248 = vsyncadd (%p26564_p8), [#allocation6], 4294856704  ;;  %p26565_p9 = pmov %p26564_p8 }
 0x1a8   : > { %p26566_p12 = pmov %p26564_p8 }
 0x1a9   : > { %25250 = dma.done.wait (%p26565_p9), [#allocation9], 37152  }
 0x1aa   : > { %25252 = vsyncadd (%p26566_p12), [#allocation9], 4294930144  ;;  %p26567_p13 = pmov %p26564_p8 }
 0x1ab   : > { %p26568_p1 = pmov %p26564_p8 }
 0x1ac   : > { %25254 = dma.done.wait (%p26567_p13), [#allocation12], 192  }
 0x1ad   : > { %25256 = vsyncadd (%p26568_p1), [#allocation12], 4294967104  ;;  %p26569_p3 = pmov %p26568_p1 }
 0x1ae   : > { %p26570_p2 = pmov %p26568_p1 }
 0x1af   : > { %25258 = dma.done.wait (%p26569_p3), [#allocation15], 73824  }
 0x1b0   : > { %25260 = vsyncadd (%p26570_p2), [#allocation15], 4294893472  ;;  %p26571_p4 = pmov %p26568_p1 }
 0x1b1   : > { %p26572_p10 = pmov %p26568_p1 }
 0x1b2   : > { %25262 = dma.done.wait (%p26571_p4), [#allocation18], 73920  }
 0x1b3   : > { %25264 = vsyncadd (%p26572_p10), [#allocation18], 4294893376  ;;  %p26573_p6 = pmov %p26568_p1 }
 0x1b4   : > { %p26574_p7 = pmov %p26568_p1 }
 0x1b5   : > { %25266 = dma.done.wait (%p26573_p6), [#allocation21], 192  }
 0x1b6   : > { %25268 = vsyncadd (%p26574_p7), [#allocation21], 4294967104  ;;  %p26575_p0 = pmov %p26568_p1 }
 0x1b8   : > { %25270 = dma.done.wait (%p26575_p0), [#allocation24], 96   ;;  %p26576_p5 = pmov %p26575_p0 }
 0x1b9   : > { %v21302_v0 = vld [vmem:[#allocation7 + $0x4] ss:$72 sps:$4 sm:$0xff]   ;;  %v21304_v1 = vld [vmem:[#allocation7] ss:$72 sps:$4 sm:$0xff]   ;;  %v21305_v2 = vld [vmem:[#allocation7 + $0x94] ss:$72 sps:$4 sm:$0xff]  }
 0x1ba   : > { %25272 = vsyncadd (%p26576_p5), [#allocation24], 4294967200  ;;  %5969 = vmatprep.subr.bf16.mxu0 %v21302_v0  ;;  %v21307_v3 = vld [vmem:[#allocation7 + $0x90] ss:$72 sps:$4 sm:$0xff]   ;;  %v21308_v4 = vld [vmem:[#allocation7 + $0x124] ss:$72 sps:$4 sm:$0xff]  }
 0x1bb   : > { %5970 = vmatpush1.bf16.msra.mxu0 %v21304_v1  ;;  %v21310_v5 = vld [vmem:[#allocation7 + $0x120] ss:$72 sps:$4 sm:$0xff]   ;;  %v21311_v6 = vld [vmem:[#allocation7 + $0x1b4] ss:$72 sps:$4 sm:$0xff]   ;;  %v21313_v7 = vld [vmem:[#allocation7 + $0x1b0] ss:$72 sps:$4 sm:$0xff]  }
 0x1bc   : > { %5971 = vmatprep.subr.bf16.mxu0 %v21305_v2  ;;  %v21314_v8 = vld [vmem:[#allocation7 + $0x244] ss:$72 sps:$4 sm:$0xff]   ;;  %v21316_v9 = vld [vmem:[#allocation7 + $0x240] ss:$72 sps:$4 sm:$0xff]   ;;  %v21317_v10 = vld [vmem:[#allocation7 + $0x2d4] ss:$72 sps:$4 sm:$0xff]  }
 0x1bd   : > { %v21319_v11 = vld [vmem:[#allocation7 + $0x2d0] ss:$72 sps:$4 sm:$0xff]   ;;  %v21320_v12 = vld [vmem:[#allocation7 + $0x364] ss:$72 sps:$4 sm:$0xff]   ;;  %v21322_v16 = vld [vmem:[#allocation7 + $0x360] ss:$72 sps:$4 sm:$0xff]  }
 0x1be   : > { %v21350_v13 = vld [vmem:[#allocation7 + $0xc] ss:$72 sps:$4 sm:$0xff]   ;;  %v21352_v14 = vld [vmem:[#allocation7 + $0x8] ss:$72 sps:$4 sm:$0xff]   ;;  %v21356_v19 = vld [vmem:[#allocation7 + $0x9c] ss:$72 sps:$4 sm:$0xff]  }
 0x1bf   : > { %5972 = vmatpush1.bf16.msra.mxu0 %v21307_v3  ;;  %v678_v15 = vld [vmem:[%s25787_s2 + $0x8] sm:$0xff]  ;;  %6092 = vmatprep.subr.bf16.mxu1 %v21350_v13  ;;  %v677_v55 = vld [vmem:[%s25787_s2] sm:$0xff]  ;;  %v680_v0 = vld [vmem:[%s25787_s2 + $0x18] sm:$0xff]  ;;  %vm7241_vm0 = vcmask 1043456   ;;  %vm7225_vm1 = vcmask 64512   ;;  %s21121_s28 = smul.u32 24, %s25783_s25 }
 0x1c0   : > { %5973 = vmatprep.subr.bf16.mxu0 %v21308_v4  ;;  %v25828_v17 = vpack.c.bf16 %v678_v15, %v678_v15  ;;  %v21323_v18 = vld [vmem:[#allocation7 + $0x3f4] ss:$72 sps:$4 sm:$0xff]   ;;  %6093 = vmatpush1.bf16.msra.mxu1 %v21352_v14  ;;  %v21358_v20 = vld [vmem:[#allocation7 + $0x98] ss:$72 sps:$4 sm:$0xff]   ;;  %v21326_v22 = vld [vmem:[#allocation7 + $0x484] ss:$72 sps:$4 sm:$0xff]   ;;  %v25833_v58 = vpack.c.bf16 %v677_v55, %v677_v55  ;;  %v25837_v2 = vpack.c.bf16 %v680_v0, %v680_v0 }
 0x1c1   : > { %v21325_v21 = vld [vmem:[#allocation7 + $0x3f0] ss:$72 sps:$4 sm:$0xff]   ;;  %6094 = vmatprep.subr.bf16.mxu1 %v21356_v19  ;;  %v21362_v23 = vld [vmem:[#allocation7 + $0x12c] ss:$72 sps:$4 sm:$0xff]   ;;  %v21368_v25 = vld [vmem:[#allocation7 + $0x1bc] ss:$72 sps:$4 sm:$0xff]  }
 0x1c2   : > { %6001 = vmatprep.mubr.bf16.mxu0 %v25828_v17  ;;  %6124 = vmatprep.mubr.bf16.mxu1 %v25828_v17  ;;  %v21364_v24 = vld [vmem:[#allocation7 + $0x128] ss:$72 sps:$4 sm:$0xff]   ;;  %v21329_v27 = vld [vmem:[#allocation7 + $0x514] ss:$72 sps:$4 sm:$0xff]   ;;  %v21370_v28 = vld [vmem:[#allocation7 + $0x1b8] ss:$72 sps:$4 sm:$0xff]  }
 0x1c3   : > { %5974 = vmatpush1.bf16.msra.mxu0 %v21310_v5  ;;  %v21328_v26 = vld [vmem:[#allocation7 + $0x480] ss:$72 sps:$4 sm:$0xff]   ;;  %v21374_v29 = vld [vmem:[#allocation7 + $0x24c] ss:$72 sps:$4 sm:$0xff]   ;;  %v21331_v30 = vld [vmem:[#allocation7 + $0x510] ss:$72 sps:$4 sm:$0xff]  }
 0x1c4   : > { %5975 = vmatprep.subr.bf16.mxu0 %v21311_v6  ;;  %6095 = vmatpush1.bf16.msra.mxu1 %v21358_v20  ;;  %v21332_v31 = vld [vmem:[#allocation7 + $0x5a4] ss:$72 sps:$4 sm:$0xff]   ;;  %v21376_v32 = vld [vmem:[#allocation7 + $0x248] ss:$72 sps:$4 sm:$0xff]   ;;  %v21335_v35 = vld [vmem:[#allocation7 + $0x634] ss:$72 sps:$4 sm:$0xff]  }
 0x1c5   : > { %6096 = vmatprep.subr.bf16.mxu1 %v21362_v23  ;;  %v21380_v33 = vld [vmem:[#allocation7 + $0x2dc] ss:$72 sps:$4 sm:$0xff]   ;;  %v21334_v34 = vld [vmem:[#allocation7 + $0x5a0] ss:$72 sps:$4 sm:$0xff]   ;;  %v21386_v37 = vld [vmem:[#allocation7 + $0x36c] ss:$72 sps:$4 sm:$0xff]  }
 0x1c6   : > { %v21382_v36 = vld [vmem:[#allocation7 + $0x2d8] ss:$72 sps:$4 sm:$0xff]   ;;  %v21338_v39 = vld [vmem:[#allocation7 + $0x6c4] ss:$72 sps:$4 sm:$0xff]   ;;  %v21388_v40 = vld [vmem:[#allocation7 + $0x368] ss:$72 sps:$4 sm:$0xff]  }
 0x1c7   : > { %5976 = vmatpush1.bf16.msra.mxu0 %v21313_v7  ;;  %v21337_v38 = vld [vmem:[#allocation7 + $0x630] ss:$72 sps:$4 sm:$0xff]   ;;  %v21392_v41 = vld [vmem:[#allocation7 + $0x3fc] ss:$72 sps:$4 sm:$0xff]   ;;  %v21340_v42 = vld [vmem:[#allocation7 + $0x6c0] ss:$72 sps:$4 sm:$0xff]  }
 0x1c8   : > { %5977 = vmatprep.subr.bf16.mxu0 %v21314_v8  ;;  %6097 = vmatpush1.bf16.msra.mxu1 %v21364_v24  ;;  %v21341_v43 = vld [vmem:[#allocation7 + $0x754] ss:$72 sps:$4 sm:$0xff]   ;;  %v21394_v44 = vld [vmem:[#allocation7 + $0x3f8] ss:$72 sps:$4 sm:$0xff]   ;;  %v21344_v47 = vld [vmem:[#allocation7 + $0x7e4] ss:$72 sps:$4 sm:$0xff]  }
 0x1c9   : > { %6098 = vmatprep.subr.bf16.mxu1 %v21368_v25  ;;  %v21398_v45 = vld [vmem:[#allocation7 + $0x48c] ss:$72 sps:$4 sm:$0xff]   ;;  %v21343_v46 = vld [vmem:[#allocation7 + $0x750] ss:$72 sps:$4 sm:$0xff]   ;;  %v21404_v49 = vld [vmem:[#allocation7 + $0x51c] ss:$72 sps:$4 sm:$0xff]  }
 0x1ca   : > { %v21400_v48 = vld [vmem:[#allocation7 + $0x488] ss:$72 sps:$4 sm:$0xff]   ;;  %v21347_v51 = vld [vmem:[#allocation7 + $0x874] ss:$72 sps:$4 sm:$0xff]   ;;  %v21406_v53 = vld [vmem:[#allocation7 + $0x518] ss:$72 sps:$4 sm:$0xff]  }
 0x1cb   : > { %5978 = vmatpush1.bf16.msra.mxu0 %v21316_v9  ;;  %v21346_v50 = vld [vmem:[#allocation7 + $0x7e0] ss:$72 sps:$4 sm:$0xff]   ;;  %v21349_v52 = vld [vmem:[#allocation7 + $0x870] ss:$72 sps:$4 sm:$0xff]   ;;  %v21410_v54 = vld [vmem:[#allocation7 + $0x5ac] ss:$72 sps:$4 sm:$0xff]  }
 0x1cc   : > { %5979 = vmatprep.subr.bf16.mxu0 %v21317_v10  ;;  %6099 = vmatpush1.bf16.msra.mxu1 %v21370_v28  ;;  %v21355_v56 = vld [vmem:[#allocation7 + $0x904] ss:$72 sps:$4 sm:$0xff]   ;;  %v21412_v57 = vld [vmem:[#allocation7 + $0x5a8] ss:$72 sps:$4 sm:$0xff]   ;;  %v21361_v61 = vld [vmem:[#allocation7 + $0x994] ss:$72 sps:$4 sm:$0xff]  }
 0x1cd   : > { %6100 = vmatprep.subr.bf16.mxu1 %v21374_v29  ;;  %v21416_v59 = vld [vmem:[#allocation7 + $0x63c] ss:$72 sps:$4 sm:$0xff]   ;;  %v21353_v60 = vld [vmem:[#allocation7 + $0x900] ss:$72 sps:$4 sm:$0xff]   ;;  %v21422_v63 = vld [vmem:[#allocation7 + $0x6cc] ss:$72 sps:$4 sm:$0xff]  }
 0x1ce   : > { %v21418_v62 = vld [vmem:[#allocation7 + $0x638] ss:$72 sps:$4 sm:$0xff]   ;;  %v21367_v3 = vld [vmem:[#allocation7 + $0xa24] ss:$72 sps:$4 sm:$0xff]   ;;  %v21424_v4 = vld [vmem:[#allocation7 + $0x6c8] ss:$72 sps:$4 sm:$0xff]  }
 0x1cf   : > { %5980 = vmatpush1.bf16.msra.mxu0 %v21319_v11  ;;  %v21359_v1 = vld [vmem:[#allocation7 + $0x990] ss:$72 sps:$4 sm:$0xff]   ;;  %v21428_v5 = vld [vmem:[#allocation7 + $0x75c] ss:$72 sps:$4 sm:$0xff]   ;;  %v21365_v6 = vld [vmem:[#allocation7 + $0xa20] ss:$72 sps:$4 sm:$0xff]  }
 0x1d0   : > { %5981 = vmatprep.subr.bf16.mxu0 %v21320_v12  ;;  %6101 = vmatpush1.bf16.msra.mxu1 %v21376_v32  ;;  %v21373_v7 = vld [vmem:[#allocation7 + $0xab4] ss:$72 sps:$4 sm:$0xff]   ;;  %v21430_v8 = vld [vmem:[#allocation7 + $0x758] ss:$72 sps:$4 sm:$0xff]   ;;  %v21379_v11 = vld [vmem:[#allocation7 + $0xb44] ss:$72 sps:$4 sm:$0xff]  }
 0x1d1   : > { %6102 = vmatprep.subr.bf16.mxu1 %v21380_v33  ;;  %v21434_v9 = vld [vmem:[#allocation7 + $0x7ec] ss:$72 sps:$4 sm:$0xff]   ;;  %v21371_v10 = vld [vmem:[#allocation7 + $0xab0] ss:$72 sps:$4 sm:$0xff]   ;;  %v21440_v13 = vld [vmem:[#allocation7 + $0x87c] ss:$72 sps:$4 sm:$0xff]  }
 0x1d2   : > { %v21436_v12 = vld [vmem:[#allocation7 + $0x7e8] ss:$72 sps:$4 sm:$0xff]   ;;  %v21385_v15 = vld [vmem:[#allocation7 + $0xbd4] ss:$72 sps:$4 sm:$0xff]   ;;  %v21391_v20 = vld [vmem:[#allocation7 + $0xc64] ss:$72 sps:$4 sm:$0xff]  }
 0x1d3   : > { %5982 = vmatpush1.bf16.msra.mxu0 %v21322_v16  ;;  %v21377_v14 = vld [vmem:[#allocation7 + $0xb40] ss:$72 sps:$4 sm:$0xff]   ;;  %v21383_v19 = vld [vmem:[#allocation7 + $0xbd0] ss:$72 sps:$4 sm:$0xff]   ;;  %v21397_v24 = vld [vmem:[#allocation7 + $0xcf4] ss:$72 sps:$4 sm:$0xff]  }
 0x1d4   : > { %5983 = vmatprep.subr.bf16.mxu0 %v21323_v18  ;;  %6103 = vmatpush1.bf16.msra.mxu1 %v21382_v36  ;;  %v21442_v16 = vld [vmem:[#allocation7 + $0x878] ss:$72 sps:$4 sm:$0xff]   ;;  %v21448_v18 = vld [vmem:[#allocation7 + $0x90c] ss:$72 sps:$4 sm:$0xff]   ;;  %v21458_v29 = vld [vmem:[#allocation7 + $0xa28] ss:$72 sps:$4 sm:$0xff]  }
 0x1d5   : > { %6104 = vmatprep.subr.bf16.mxu1 %v21386_v37  ;;  %v21389_v23 = vld [vmem:[#allocation7 + $0xc60] ss:$72 sps:$4 sm:$0xff]   ;;  %v21403_v28 = vld [vmem:[#allocation7 + $0xd84] ss:$72 sps:$4 sm:$0xff]   ;;  %v21409_v32 = vld [vmem:[#allocation7 + $0xe14] ss:$72 sps:$4 sm:$0xff]  }
 0x1d6   : > { %v21452_v25 = vld [vmem:[#allocation7 + $0x998] ss:$72 sps:$4 sm:$0xff]   ;;  %v21415_v36 = vld [vmem:[#allocation7 + $0xea4] ss:$72 sps:$4 sm:$0xff]   ;;  %v21470_v37 = vld [vmem:[#allocation7 + $0xb48] ss:$72 sps:$4 sm:$0xff]  }
 0x1d7   : > { %5984 = vmatpush1.bf16.msra.mxu0 %v21325_v21  ;;  %v21446_v21 = vld [vmem:[#allocation7 + $0x908] ss:$72 sps:$4 sm:$0xff]   ;;  %v21464_v33 = vld [vmem:[#allocation7 + $0xab8] ss:$72 sps:$4 sm:$0xff]   ;;  %s21122_s3 = smul.u32 384, %s26562_s0  ;;  %s675_s27 = scalar_lea.vmem [#allocation25], %s21121_s28 }
 0x1d8   : > { %5985 = vmatprep.subr.bf16.mxu0 %v21326_v22  ;;  %6105 = vmatpush1.bf16.msra.mxu1 %v21388_v40  ;;  %v21454_v22 = vld [vmem:[#allocation7 + $0x99c] ss:$72 sps:$4 sm:$0xff]   ;;  %v21437_v55 = vld [vmem:[#allocation7 + $0x10e0] ss:$72 sps:$4 sm:$0xff]   ;;  %s18407_s14 = sshll.u32 %s675_s27, 4  ;;  %s26577_s6 = sld [smem:[#allocation46_spill]]  ;;  %s26458_s14 = int_to_ptr.vmem [resolvable:$true] %s18407_s14 }
 0x1d9   : > { %6106 = vmatprep.subr.bf16.mxu1 %v21392_v41  ;;  %v21421_v40 = vld [vmem:[#allocation7 + $0xf34] ss:$72 sps:$4 sm:$0xff]   ;;  %v21476_v41 = vld [vmem:[#allocation7 + $0xbd8] ss:$72 sps:$4 sm:$0xff]   ;;  %v21506_v0 = vld [vmem:[#allocation7 + $0xea8] ss:$72 sps:$4 sm:$0xff]  }
 0x1da   : > { %s18393_s20 = scalar_lea.sflag [#allocation4], %s25783_s25  ;;  %p26578_p8 = scmp.ne.s32.totalorder %s26553_s24, 0 }
 0x1db   : > { %5986 = vmatpush1.bf16.msra.mxu0 %v21328_v26  ;;  %v21460_v26 = vld [vmem:[#allocation7 + $0xa2c] ss:$72 sps:$4 sm:$0xff]   ;;  %s25314_s0 = smov [#allocation25]  }
 0x1dc   : > { %5987 = vmatprep.subr.bf16.mxu0 %v21329_v27  ;;  %6107 = vmatpush1.bf16.msra.mxu1 %v21394_v44  ;;  %v21395_v27 = vld [vmem:[#allocation7 + $0xcf0] ss:$72 sps:$4 sm:$0xff]   ;;  %v21427_v44 = vld [vmem:[#allocation7 + $0xfc4] ss:$72 sps:$4 sm:$0xff]   ;;  %s25197_s29 = sshll.u32 %s25314_s0, 4  ;;  %s25198_s29 = int_to_ptr.vmem [resolvable:$false] %s25197_s29 }
 0x1dd   : > { %6108 = vmatprep.subr.bf16.mxu1 %v21398_v45  ;;  %v21482_v45 = vld [vmem:[#allocation7 + $0xc68] ss:$72 sps:$4 sm:$0xff]   ;;  %s25199_s22 = scalar_lea.vmem %s25198_s29, 768  ;;  %p25200_p13 = scmp.lt.s32.totalorder %s26458_s14, %s25198_s29 }
 0x1de   : > { %s26456_s21 = scalar_lea.hbm %s26577_s6, %s21122_s3 }
 0x1df   : > { %5988 = vmatpush1.bf16.msra.mxu0 %v21331_v30  ;;  %v21466_v30 = vld [vmem:[#allocation7 + $0xabc] ss:$72 sps:$4 sm:$0xff]  }
 0x1e0   : > { %5989 = vmatprep.subr.bf16.mxu0 %v21332_v31  ;;  %6109 = vmatpush1.bf16.msra.mxu1 %v21400_v48  ;;  %v21401_v31 = vld [vmem:[#allocation7 + $0xd80] ss:$72 sps:$4 sm:$0xff]   ;;  %v21433_v48 = vld [vmem:[#allocation7 + $0x1054] ss:$72 sps:$4 sm:$0xff]  }
 0x1e1   : > { %6110 = vmatprep.subr.bf16.mxu1 %v21404_v49  ;;  %v21488_v49 = vld [vmem:[#allocation7 + $0xcf8] ss:$72 sps:$4 sm:$0xff]  }
 0x1e3   : > { %5990 = vmatpush1.bf16.msra.mxu0 %v21334_v34  ;;  %v21472_v34 = vld [vmem:[#allocation7 + $0xb4c] ss:$72 sps:$4 sm:$0xff]  }
 0x1e4   : > { %5991 = vmatprep.subr.bf16.mxu0 %v21335_v35  ;;  %6111 = vmatpush1.bf16.msra.mxu1 %v21406_v53  ;;  %v21407_v35 = vld [vmem:[#allocation7 + $0xe10] ss:$72 sps:$4 sm:$0xff]  }
 0x1e5   : > { %6112 = vmatprep.subr.bf16.mxu1 %v21410_v54  ;;  %v21494_v53 = vld [vmem:[#allocation7 + $0xd88] ss:$72 sps:$4 sm:$0xff]   ;;  %v21502_v54 = vld [vmem:[#allocation7 + $0xe1c] ss:$72 sps:$4 sm:$0xff]  }
 0x1e7   : > { %5992 = vmatpush1.bf16.msra.mxu0 %v21337_v38  ;;  %v21478_v38 = vld [vmem:[#allocation7 + $0xbdc] ss:$72 sps:$4 sm:$0xff]  }
 0x1e8   : > { %5993 = vmatprep.subr.bf16.mxu0 %v21338_v39  ;;  %6113 = vmatpush1.bf16.msra.mxu1 %v21412_v57  ;;  %v21413_v39 = vld [vmem:[#allocation7 + $0xea0] ss:$72 sps:$4 sm:$0xff]   ;;  %v21443_v57 = vld [vmem:[#allocation7 + $0x1170] ss:$72 sps:$4 sm:$0xff]  }
 0x1e9   : > { %6114 = vmatprep.subr.bf16.mxu1 %v21416_v59  ;;  %v21500_v59 = vld [vmem:[#allocation7 + $0xe18] ss:$72 sps:$4 sm:$0xff]  }
 0x1eb   : > { %5994 = vmatpush1.bf16.msra.mxu0 %v21340_v42  ;;  %v21484_v42 = vld [vmem:[#allocation7 + $0xc6c] ss:$72 sps:$4 sm:$0xff]  }
 0x1ec   : > { %5995 = vmatprep.subr.bf16.mxu0 %v21341_v43  ;;  %6115 = vmatpush1.bf16.msra.mxu1 %v21418_v62  ;;  %v21419_v43 = vld [vmem:[#allocation7 + $0xf30] ss:$72 sps:$4 sm:$0xff]   ;;  %v21451_v62 = vld [vmem:[#allocation7 + $0x1204] ss:$72 sps:$4 sm:$0xff]  }
 0x1ed   : > { %6116 = vmatprep.subr.bf16.mxu1 %v21422_v63  ;;  %v682_v63 = vld [vmem:[%s25787_s2 + $0x28] sm:$0xff] }
 0x1ef   : > { %5996 = vmatpush1.bf16.msra.mxu0 %v21343_v46  ;;  %v21490_v46 = vld [vmem:[#allocation7 + $0xcfc] ss:$72 sps:$4 sm:$0xff]  }
 0x1f0   : > { %5997 = vmatprep.subr.bf16.mxu0 %v21344_v47  ;;  %6117 = vmatpush1.bf16.msra.mxu1 %v21424_v4  ;;  %v21425_v47 = vld [vmem:[#allocation7 + $0xfc0] ss:$72 sps:$4 sm:$0xff]  }
 0x1f1   : > { %6118 = vmatprep.subr.bf16.mxu1 %v21428_v5  ;;  %v21449_v4 = vld [vmem:[#allocation7 + $0x1200] ss:$72 sps:$4 sm:$0xff]   ;;  %v25846_v5 = vpack.c.bf16 %v682_v63, %v682_v63 }
 0x1f2   : > { %v21533_v63 = vld [vmem:[#allocation7 + $0x19e0] ss:$72 sps:$4 sm:$0xff]  }
 0x1f3   : > { %5998 = vmatpush1.bf16.msra.mxu0 %v21346_v50  ;;  %v21496_v50 = vld [vmem:[#allocation7 + $0xd8c] ss:$72 sps:$4 sm:$0xff]  }
 0x1f4   : > { %5999 = vmatprep.subr.bf16.mxu0 %v21347_v51  ;;  %6119 = vmatpush1.bf16.msra.mxu1 %v21430_v8  ;;  %v21431_v51 = vld [vmem:[#allocation7 + $0x1050] ss:$72 sps:$4 sm:$0xff]   ;;  %v21520_v8 = vld [vmem:[#allocation7 + $0xfcc] ss:$72 sps:$4 sm:$0xff]  }
 0x1f5   : > { %6120 = vmatprep.subr.bf16.mxu1 %v21434_v9  ;;  %v21455_v9 = vld [vmem:[#allocation7 + $0x1290] ss:$72 sps:$4 sm:$0xff]  }
 0x1f7   : > { %6000 = vmatpush1.bf16.msra.mxu0 %v21349_v52  ;;  %v21439_v52 = vld [vmem:[#allocation7 + $0x10e4] ss:$72 sps:$4 sm:$0xff]  }
 0x1f8   : > { %6010 = vmatprep.subr.bf16.mxu0 %v21355_v56  ;;  %6121 = vmatpush1.bf16.msra.mxu1 %v21436_v12  ;;  %v21445_v56 = vld [vmem:[#allocation7 + $0x1174] ss:$72 sps:$4 sm:$0xff]  }
 0x1f9   : > { %6122 = vmatprep.subr.bf16.mxu1 %v21440_v13  ;;  %v21526_v12 = vld [vmem:[#allocation7 + $0x105c] ss:$72 sps:$4 sm:$0xff]   ;;  %v21461_v13 = vld [vmem:[#allocation7 + $0x1320] ss:$72 sps:$4 sm:$0xff]  }
 0x1fa   : > { %6002 = vmatmul.mubr.bf16.vlgmr.msra.gmra.mrb[0].mxu0 %v25833_v58 }
 0x1fb   : > { %6011 = vmatpush1.bf16.msra.mxu0 %v21353_v60  ;;  %6042 = vmatprep.mubr.bf16.mxu0 %v25837_v2  ;;  %v21508_v60 = vld [vmem:[#allocation7 + $0xeac] ss:$72 sps:$4 sm:$0xff]  }
 0x1fc   : > { %6012 = vmatprep.subr.bf16.mxu0 %v21361_v61  ;;  %6123 = vmatpush1.bf16.msra.mxu1 %v21442_v16  ;;  %v679_v61 = vld [vmem:[%s25787_s2 + $0x10] sm:$0xff] }
 0x1fd   : > { %6133 = vmatprep.subr.bf16.mxu1 %v21448_v18  ;;  %v21532_v16 = vld [vmem:[#allocation7 + $0x10ec] ss:$72 sps:$4 sm:$0xff]   ;;  %v21467_v18 = vld [vmem:[#allocation7 + $0x13b0] ss:$72 sps:$4 sm:$0xff]  }
 0x1ff   : > { %6013 = vmatpush1.bf16.msra.mxu0 %v21359_v1  ;;  %6125 = vmatmul.mubr.bf16.vlgmr.msra.gmra.mrb[0].mxu1 %v25833_v58  ;;  %v25844_v1 = vpack.c.bf16 %v679_v61, %v679_v61  ;;  %v21590_v61 = vld [vmem:[#allocation7 + $0x1688] ss:$72 sps:$4 sm:$0xff]  }
 0x200   : > { %6014 = vmatprep.subr.bf16.mxu0 %v21367_v3  ;;  %6134 = vmatpush1.bf16.msra.mxu1 %v21446_v21  ;;  %v21514_v3 = vld [vmem:[#allocation7 + $0xf3c] ss:$72 sps:$4 sm:$0xff]  }
 0x201   : > { %6165 = vmatprep.mubr.bf16.mxu1 %v25837_v2  ;;  %6135 = vmatprep.subr.bf16.mxu1 %v21454_v22  ;;  %v21538_v21 = vld [vmem:[#allocation7 + $0x117c] ss:$72 sps:$4 sm:$0xff]   ;;  %v21473_v22 = vld [vmem:[#allocation7 + $0x1440] ss:$72 sps:$4 sm:$0xff]  }
 0x203   : > { %6015 = vmatpush1.bf16.msra.mxu0 %v21365_v6  ;;  %v21457_v6 = vld [vmem:[#allocation7 + $0x1294] ss:$72 sps:$4 sm:$0xff]  }
 0x204   : > { %6016 = vmatprep.subr.bf16.mxu0 %v21373_v7  ;;  %6136 = vmatpush1.bf16.msra.mxu1 %v21452_v25  ;;  %v21512_v7 = vld [vmem:[#allocation7 + $0xf38] ss:$72 sps:$4 sm:$0xff]   ;;  %v21544_v25 = vld [vmem:[#allocation7 + $0x120c] ss:$72 sps:$4 sm:$0xff]  }
 0x205   : > { %6137 = vmatprep.subr.bf16.mxu1 %v21460_v26  ;;  %v21479_v26 = vld [vmem:[#allocation7 + $0x14d0] ss:$72 sps:$4 sm:$0xff]  }
 0x207   : > { %6017 = vmatpush1.bf16.msra.mxu0 %v21371_v10  ;;  %v21463_v10 = vld [vmem:[#allocation7 + $0x1324] ss:$72 sps:$4 sm:$0xff]  }
 0x208   : > { %6018 = vmatprep.subr.bf16.mxu0 %v21379_v11  ;;  %6138 = vmatpush1.bf16.msra.mxu1 %v21458_v29  ;;  %v21518_v11 = vld [vmem:[#allocation7 + $0xfc8] ss:$72 sps:$4 sm:$0xff]   ;;  %v21550_v29 = vld [vmem:[#allocation7 + $0x129c] ss:$72 sps:$4 sm:$0xff]  }
 0x209   : > { %6139 = vmatprep.subr.bf16.mxu1 %v21466_v30  ;;  %v21485_v30 = vld [vmem:[#allocation7 + $0x1560] ss:$72 sps:$4 sm:$0xff]  }
 0x20b   : > { %6019 = vmatpush1.bf16.msra.mxu0 %v21377_v14  ;;  %v21469_v14 = vld [vmem:[#allocation7 + $0x13b4] ss:$72 sps:$4 sm:$0xff]  }
 0x20c   : > { %6020 = vmatprep.subr.bf16.mxu0 %v21385_v15  ;;  %6140 = vmatpush1.bf16.msra.mxu1 %v21464_v33  ;;  %v21524_v15 = vld [vmem:[#allocation7 + $0x1058] ss:$72 sps:$4 sm:$0xff]   ;;  %v21556_v33 = vld [vmem:[#allocation7 + $0x132c] ss:$72 sps:$4 sm:$0xff]  }
 0x20d   : > { %6141 = vmatprep.subr.bf16.mxu1 %v21472_v34  ;;  %v21491_v34 = vld [vmem:[#allocation7 + $0x15f0] ss:$72 sps:$4 sm:$0xff]  }
 0x20f   : > { %6021 = vmatpush1.bf16.msra.mxu0 %v21383_v19  ;;  %v21475_v19 = vld [vmem:[#allocation7 + $0x1444] ss:$72 sps:$4 sm:$0xff]  }
 0x210   : > { %6022 = vmatprep.subr.bf16.mxu0 %v21391_v20  ;;  %6142 = vmatpush1.bf16.msra.mxu1 %v21470_v37  ;;  %v21530_v20 = vld [vmem:[#allocation7 + $0x10e8] ss:$72 sps:$4 sm:$0xff]   ;;  %v21562_v37 = vld [vmem:[#allocation7 + $0x13bc] ss:$72 sps:$4 sm:$0xff]  }
 0x211   : > { %6143 = vmatprep.subr.bf16.mxu1 %v21478_v38  ;;  %v21497_v38 = vld [vmem:[#allocation7 + $0x1680] ss:$72 sps:$4 sm:$0xff]  }
 0x213   : > { %6023 = vmatpush1.bf16.msra.mxu0 %v21389_v23  ;;  %v21481_v23 = vld [vmem:[#allocation7 + $0x14d4] ss:$72 sps:$4 sm:$0xff]  }
 0x214   : > { %6024 = vmatprep.subr.bf16.mxu0 %v21397_v24  ;;  %6144 = vmatpush1.bf16.msra.mxu1 %v21476_v41  ;;  %v21536_v24 = vld [vmem:[#allocation7 + $0x1178] ss:$72 sps:$4 sm:$0xff]   ;;  %v21568_v41 = vld [vmem:[#allocation7 + $0x144c] ss:$72 sps:$4 sm:$0xff]  }
 0x215   : > { %6145 = vmatprep.subr.bf16.mxu1 %v21484_v42  ;;  %v21503_v42 = vld [vmem:[#allocation7 + $0x1710] ss:$72 sps:$4 sm:$0xff]  }
 0x217   : > { %6025 = vmatpush1.bf16.msra.mxu0 %v21395_v27  ;;  %v21487_v27 = vld [vmem:[#allocation7 + $0x1564] ss:$72 sps:$4 sm:$0xff]  }
 0x218   : > { %6026 = vmatprep.subr.bf16.mxu0 %v21403_v28  ;;  %6146 = vmatpush1.bf16.msra.mxu1 %v21482_v45  ;;  %v21542_v28 = vld [vmem:[#allocation7 + $0x1208] ss:$72 sps:$4 sm:$0xff]   ;;  %v21574_v45 = vld [vmem:[#allocation7 + $0x14dc] ss:$72 sps:$4 sm:$0xff]  }
 0x219   : > { %6147 = vmatprep.subr.bf16.mxu1 %v21490_v46  ;;  %v21509_v46 = vld [vmem:[#allocation7 + $0x17a0] ss:$72 sps:$4 sm:$0xff]  }
 0x21b   : > { %6027 = vmatpush1.bf16.msra.mxu0 %v21401_v31  ;;  %v21493_v31 = vld [vmem:[#allocation7 + $0x15f4] ss:$72 sps:$4 sm:$0xff]  }
 0x21c   : > { %6028 = vmatprep.subr.bf16.mxu0 %v21409_v32  ;;  %6148 = vmatpush1.bf16.msra.mxu1 %v21488_v49  ;;  %v21548_v32 = vld [vmem:[#allocation7 + $0x1298] ss:$72 sps:$4 sm:$0xff]   ;;  %v21580_v49 = vld [vmem:[#allocation7 + $0x156c] ss:$72 sps:$4 sm:$0xff]  }
 0x21d   : > { %6149 = vmatprep.subr.bf16.mxu1 %v21496_v50  ;;  %v21515_v50 = vld [vmem:[#allocation7 + $0x1830] ss:$72 sps:$4 sm:$0xff]  }
 0x21f   : > { %6029 = vmatpush1.bf16.msra.mxu0 %v21407_v35  ;;  %v21499_v35 = vld [vmem:[#allocation7 + $0x1684] ss:$72 sps:$4 sm:$0xff]  }
 0x220   : > { %6030 = vmatprep.subr.bf16.mxu0 %v21415_v36  ;;  %6150 = vmatpush1.bf16.msra.mxu1 %v21494_v53  ;;  %v21554_v36 = vld [vmem:[#allocation7 + $0x1328] ss:$72 sps:$4 sm:$0xff]   ;;  %v21586_v53 = vld [vmem:[#allocation7 + $0x15fc] ss:$72 sps:$4 sm:$0xff]  }
 0x221   : > { %6151 = vmatprep.subr.bf16.mxu1 %v21502_v54  ;;  %v21521_v54 = vld [vmem:[#allocation7 + $0x18c0] ss:$72 sps:$4 sm:$0xff]  }
 0x223   : > { %6031 = vmatpush1.bf16.msra.mxu0 %v21413_v39  ;;  %v21505_v39 = vld [vmem:[#allocation7 + $0x1714] ss:$72 sps:$4 sm:$0xff]  }
 0x224   : > { %6032 = vmatprep.subr.bf16.mxu0 %v21421_v40  ;;  %6152 = vmatpush1.bf16.msra.mxu1 %v21500_v59  ;;  %v21560_v40 = vld [vmem:[#allocation7 + $0x13b8] ss:$72 sps:$4 sm:$0xff]  }
 0x225   : > { %6153 = vmatprep.subr.bf16.mxu1 %v21508_v60  ;;  %v21527_v59 = vld [vmem:[#allocation7 + $0x1950] ss:$72 sps:$4 sm:$0xff]   ;;  %v21535_v60 = vld [vmem:[#allocation7 + $0x19e4] ss:$72 sps:$4 sm:$0xff]  }
 0x227   : > { %6033 = vmatpush1.bf16.msra.mxu0 %v21419_v43  ;;  %v21511_v43 = vld [vmem:[#allocation7 + $0x17a4] ss:$72 sps:$4 sm:$0xff]  }
 0x228   : > { %6034 = vmatprep.subr.bf16.mxu0 %v21427_v44  ;;  %6154 = vmatpush1.bf16.msra.mxu1 %v21506_v0  ;;  %v21566_v44 = vld [vmem:[#allocation7 + $0x1448] ss:$72 sps:$4 sm:$0xff]   ;;  %v21541_v0 = vld [vmem:[#allocation7 + $0x1a74] ss:$72 sps:$4 sm:$0xff]  }
 0x229   : > { %6155 = vmatprep.subr.bf16.mxu1 %v21514_v3  ;;  %v21539_v3 = vld [vmem:[#allocation7 + $0x1a70] ss:$72 sps:$4 sm:$0xff]  }
 0x22b   : > { %6035 = vmatpush1.bf16.msra.mxu0 %v21425_v47  ;;  %v21517_v47 = vld [vmem:[#allocation7 + $0x1834] ss:$72 sps:$4 sm:$0xff]  }
 0x22c   : > { %6036 = vmatprep.subr.bf16.mxu0 %v21433_v48  ;;  %6156 = vmatpush1.bf16.msra.mxu1 %v21512_v7  ;;  %v21572_v48 = vld [vmem:[#allocation7 + $0x14d8] ss:$72 sps:$4 sm:$0xff]  }
 0x22d   : > { %6157 = vmatprep.subr.bf16.mxu1 %v21520_v8  ;;  %v681_v7 = vld [vmem:[%s25787_s2 + $0x20] sm:$0xff] }
 0x22e   : > { %v21547_v8 = vld [vmem:[#allocation7 + $0x14] ss:$72 sps:$4 sm:$0xff]  }
 0x22f   : > { %6037 = vmatpush1.bf16.msra.mxu0 %v21431_v51  ;;  %v21523_v51 = vld [vmem:[#allocation7 + $0x18c4] ss:$72 sps:$4 sm:$0xff]  }
 0x230   : > { %6038 = vmatprep.subr.bf16.mxu0 %v21439_v52  ;;  %6158 = vmatpush1.bf16.msra.mxu1 %v21518_v11  ;;  %v21578_v52 = vld [vmem:[#allocation7 + $0x1568] ss:$72 sps:$4 sm:$0xff]   ;;  %v21610_v11 = vld [vmem:[#allocation7 + $0x183c] ss:$72 sps:$4 sm:$0xff]  }
 0x231   : > { %6159 = vmatprep.subr.bf16.mxu1 %v21526_v12  ;;  %v21545_v12 = vld [vmem:[#allocation7 + $0x10] ss:$72 sps:$4 sm:$0xff]  }
 0x233   : > { %6039 = vmatpush1.bf16.msra.mxu0 %v21437_v55  ;;  %v21529_v55 = vld [vmem:[#allocation7 + $0x1954] ss:$72 sps:$4 sm:$0xff]  }
 0x234   : > { %6040 = vmatprep.subr.bf16.mxu0 %v21445_v56  ;;  %6160 = vmatpush1.bf16.msra.mxu1 %v21524_v15  ;;  %v21584_v56 = vld [vmem:[#allocation7 + $0x15f8] ss:$72 sps:$4 sm:$0xff]   ;;  %v21616_v15 = vld [vmem:[#allocation7 + $0x18cc] ss:$72 sps:$4 sm:$0xff]  }
 0x235   : > { %6161 = vmatprep.subr.bf16.mxu1 %v21532_v16  ;;  %v21551_v16 = vld [vmem:[#allocation7 + $0xa0] ss:$72 sps:$4 sm:$0xff]  }
 0x237   : > { %6041 = vmatpush1.bf16.msra.mxu0 %v21443_v57  ;;  %v21592_v57 = vld [vmem:[#allocation7 + $0x168c] ss:$72 sps:$4 sm:$0xff]  }
 0x238   : > { %6051 = vmatprep.subr.bf16.mxu0 %v21451_v62  ;;  %6162 = vmatpush1.bf16.msra.mxu1 %v21530_v20  ;;  %v21598_v62 = vld [vmem:[#allocation7 + $0x171c] ss:$72 sps:$4 sm:$0xff]  }
 0x239   : > { %6163 = vmatprep.subr.bf16.mxu1 %v21538_v21  ;;  %v21622_v20 = vld [vmem:[#allocation7 + $0x195c] ss:$72 sps:$4 sm:$0xff]   ;;  %v21557_v21 = vld [vmem:[#allocation7 + $0x130] ss:$72 sps:$4 sm:$0xff]  }
 0x23a   : > { %6043 = vmatmul.mubr.bf16.vlgmr.msra.gmra.mrb[0].mxu0 %v25844_v1 }
 0x23b   : > { %6052 = vmatpush1.bf16.msra.mxu0 %v21449_v4  ;;  %6083 = vmatprep.mubr.bf16.mxu0 %v25846_v5  ;;  %v21596_v4 = vld [vmem:[#allocation7 + $0x1718] ss:$72 sps:$4 sm:$0xff]  }
 0x23c   : > { %6053 = vmatprep.subr.bf16.mxu0 %v21457_v6  ;;  %6164 = vmatpush1.bf16.msra.mxu1 %v21536_v24  ;;  %v21604_v6 = vld [vmem:[#allocation7 + $0x17ac] ss:$72 sps:$4 sm:$0xff]  }
 0x23d   : > { %6174 = vmatprep.subr.bf16.mxu1 %v21544_v25  ;;  %v21628_v24 = vld [vmem:[#allocation7 + $0x19ec] ss:$72 sps:$4 sm:$0xff]   ;;  %v21563_v25 = vld [vmem:[#allocation7 + $0x1c0] ss:$72 sps:$4 sm:$0xff]  }
 0x23f   : > { %6054 = vmatpush1.bf16.msra.mxu0 %v21455_v9  ;;  %6166 = vmatmul.mubr.bf16.vlgmr.msra.gmra.mrb[0].mxu1 %v25844_v1  ;;  %v21602_v9 = vld [vmem:[#allocation7 + $0x17a8] ss:$72 sps:$4 sm:$0xff]  }
 0x240   : > { %6055 = vmatprep.subr.bf16.mxu0 %v21463_v10  ;;  %6175 = vmatpush1.bf16.msra.mxu1 %v21542_v28  ;;  %v25853_v10 = vpack.c.bf16 %v681_v7, %v681_v7  ;;  %v21634_v28 = vld [vmem:[#allocation7 + $0x1a7c] ss:$72 sps:$4 sm:$0xff]   ;;  %v21686_v7 = vld [vmem:[#allocation7 + $0x498] ss:$72 sps:$4 sm:$0xff]  }
 0x241   : > { %6206 = vmatprep.mubr.bf16.mxu1 %v25846_v5  ;;  %6176 = vmatprep.subr.bf16.mxu1 %v21550_v29  ;;  %v21569_v29 = vld [vmem:[#allocation7 + $0x250] ss:$72 sps:$4 sm:$0xff]  }
 0x243   : > { %6056 = vmatpush1.bf16.msra.mxu0 %v21461_v13  ;;  %v21553_v13 = vld [vmem:[#allocation7 + $0xa4] ss:$72 sps:$4 sm:$0xff]  }
 0x244   : > { %6057 = vmatprep.subr.bf16.mxu0 %v21469_v14  ;;  %6177 = vmatpush1.bf16.msra.mxu1 %v21548_v32  ;;  %v21608_v14 = vld [vmem:[#allocation7 + $0x1838] ss:$72 sps:$4 sm:$0xff]   ;;  %v21640_v32 = vld [vmem:[#allocation7 + $0x1c] ss:$72 sps:$4 sm:$0xff]  }
 0x245   : > { %6178 = vmatprep.subr.bf16.mxu1 %v21556_v33  ;;  %v21575_v33 = vld [vmem:[#allocation7 + $0x2e0] ss:$72 sps:$4 sm:$0xff]  }
 0x247   : > { %6058 = vmatpush1.bf16.msra.mxu0 %v21467_v18  ;;  %v21559_v18 = vld [vmem:[#allocation7 + $0x134] ss:$72 sps:$4 sm:$0xff]  }
 0x248   : > { %6059 = vmatprep.subr.bf16.mxu0 %v21475_v19  ;;  %6179 = vmatpush1.bf16.msra.mxu1 %v21554_v36  ;;  %v21614_v19 = vld [vmem:[#allocation7 + $0x18c8] ss:$72 sps:$4 sm:$0xff]   ;;  %v21646_v36 = vld [vmem:[#allocation7 + $0xac] ss:$72 sps:$4 sm:$0xff]  }
 0x249   : > { %6180 = vmatprep.subr.bf16.mxu1 %v21562_v37  ;;  %v21581_v37 = vld [vmem:[#allocation7 + $0x370] ss:$72 sps:$4 sm:$0xff]  }
 0x24b   : > { %6060 = vmatpush1.bf16.msra.mxu0 %v21473_v22  ;;  %v21565_v22 = vld [vmem:[#allocation7 + $0x1c4] ss:$72 sps:$4 sm:$0xff]  }
 0x24c   : > { %6061 = vmatprep.subr.bf16.mxu0 %v21481_v23  ;;  %6181 = vmatpush1.bf16.msra.mxu1 %v21560_v40  ;;  %v21620_v23 = vld [vmem:[#allocation7 + $0x1958] ss:$72 sps:$4 sm:$0xff]   ;;  %v21652_v40 = vld [vmem:[#allocation7 + $0x13c] ss:$72 sps:$4 sm:$0xff]  }
 0x24d   : > { %6182 = vmatprep.subr.bf16.mxu1 %v21568_v41  ;;  %v21587_v41 = vld [vmem:[#allocation7 + $0x400] ss:$72 sps:$4 sm:$0xff]  }
 0x24f   : > { %6062 = vmatpush1.bf16.msra.mxu0 %v21479_v26  ;;  %v21571_v26 = vld [vmem:[#allocation7 + $0x254] ss:$72 sps:$4 sm:$0xff]  }
 0x250   : > { %6063 = vmatprep.subr.bf16.mxu0 %v21487_v27  ;;  %6183 = vmatpush1.bf16.msra.mxu1 %v21566_v44  ;;  %v21626_v27 = vld [vmem:[#allocation7 + $0x19e8] ss:$72 sps:$4 sm:$0xff]   ;;  %v21658_v44 = vld [vmem:[#allocation7 + $0x1cc] ss:$72 sps:$4 sm:$0xff]  }
 0x251   : > { %6184 = vmatprep.subr.bf16.mxu1 %v21574_v45  ;;  %v21593_v45 = vld [vmem:[#allocation7 + $0x490] ss:$72 sps:$4 sm:$0xff]  }
 0x253   : > { %6064 = vmatpush1.bf16.msra.mxu0 %v21485_v30  ;;  %v21577_v30 = vld [vmem:[#allocation7 + $0x2e4] ss:$72 sps:$4 sm:$0xff]  }
 0x254   : > { %6065 = vmatprep.subr.bf16.mxu0 %v21493_v31  ;;  %6185 = vmatpush1.bf16.msra.mxu1 %v21572_v48  ;;  %v21632_v31 = vld [vmem:[#allocation7 + $0x1a78] ss:$72 sps:$4 sm:$0xff]   ;;  %v21664_v48 = vld [vmem:[#allocation7 + $0x25c] ss:$72 sps:$4 sm:$0xff]  }
 0x255   : > { %6186 = vmatprep.subr.bf16.mxu1 %v21580_v49  ;;  %v21599_v49 = vld [vmem:[#allocation7 + $0x520] ss:$72 sps:$4 sm:$0xff]  }
 0x257   : > { %6066 = vmatpush1.bf16.msra.mxu0 %v21491_v34  ;;  %v21583_v34 = vld [vmem:[#allocation7 + $0x374] ss:$72 sps:$4 sm:$0xff]  }
 0x258   : > { %6067 = vmatprep.subr.bf16.mxu0 %v21499_v35  ;;  %6187 = vmatpush1.bf16.msra.mxu1 %v21578_v52  ;;  %v21638_v35 = vld [vmem:[#allocation7 + $0x18] ss:$72 sps:$4 sm:$0xff]   ;;  %v21670_v52 = vld [vmem:[#allocation7 + $0x2ec] ss:$72 sps:$4 sm:$0xff]  }
 0x259   : > { %6188 = vmatprep.subr.bf16.mxu1 %v21586_v53  ;;  %v21605_v53 = vld [vmem:[#allocation7 + $0x5b0] ss:$72 sps:$4 sm:$0xff]  }
 0x25b   : > { %6068 = vmatpush1.bf16.msra.mxu0 %v21497_v38  ;;  %v21589_v38 = vld [vmem:[#allocation7 + $0x404] ss:$72 sps:$4 sm:$0xff]  }
 0x25c   : > { %6069 = vmatprep.subr.bf16.mxu0 %v21505_v39  ;;  %6189 = vmatpush1.bf16.msra.mxu1 %v21584_v56  ;;  %v21644_v39 = vld [vmem:[#allocation7 + $0xa8] ss:$72 sps:$4 sm:$0xff]   ;;  %v21676_v56 = vld [vmem:[#allocation7 + $0x37c] ss:$72 sps:$4 sm:$0xff]  }
 0x25d   : > { %6190 = vmatprep.subr.bf16.mxu1 %v21592_v57  ;;  %v21611_v57 = vld [vmem:[#allocation7 + $0x640] ss:$72 sps:$4 sm:$0xff]  }
 0x25f   : > { %6070 = vmatpush1.bf16.msra.mxu0 %v21503_v42  ;;  %v21595_v42 = vld [vmem:[#allocation7 + $0x494] ss:$72 sps:$4 sm:$0xff]  }
 0x260   : > { %6071 = vmatprep.subr.bf16.mxu0 %v21511_v43  ;;  %6191 = vmatpush1.bf16.msra.mxu1 %v21590_v61  ;;  %v21650_v43 = vld [vmem:[#allocation7 + $0x138] ss:$72 sps:$4 sm:$0xff]   ;;  %v21682_v61 = vld [vmem:[#allocation7 + $0x40c] ss:$72 sps:$4 sm:$0xff]  }
 0x261   : > { %6192 = vmatprep.subr.bf16.mxu1 %v21598_v62  ;;  %v21617_v62 = vld [vmem:[#allocation7 + $0x6d0] ss:$72 sps:$4 sm:$0xff]  }
 0x263   : > { %6072 = vmatpush1.bf16.msra.mxu0 %v21509_v46  ;;  %v21601_v46 = vld [vmem:[#allocation7 + $0x524] ss:$72 sps:$4 sm:$0xff]  }
 0x264   : > { %6073 = vmatprep.subr.bf16.mxu0 %v21517_v47  ;;  %6193 = vmatpush1.bf16.msra.mxu1 %v21596_v4  ;;  %v21656_v47 = vld [vmem:[#allocation7 + $0x1c8] ss:$72 sps:$4 sm:$0xff]  }
 0x265   : > { %6194 = vmatprep.subr.bf16.mxu1 %v21604_v6  ;;  %v21623_v4 = vld [vmem:[#allocation7 + $0x760] ss:$72 sps:$4 sm:$0xff]   ;;  %v21631_v6 = vld [vmem:[#allocation7 + $0x7f4] ss:$72 sps:$4 sm:$0xff]  }
 0x267   : > { %6074 = vmatpush1.bf16.msra.mxu0 %v21515_v50  ;;  %v21607_v50 = vld [vmem:[#allocation7 + $0x5b4] ss:$72 sps:$4 sm:$0xff]  }
 0x268   : > { %6075 = vmatprep.subr.bf16.mxu0 %v21523_v51  ;;  %6195 = vmatpush1.bf16.msra.mxu1 %v21602_v9  ;;  %v21662_v51 = vld [vmem:[#allocation7 + $0x258] ss:$72 sps:$4 sm:$0xff]  }
 0x269   : > { %6196 = vmatprep.subr.bf16.mxu1 %v21610_v11  ;;  %v21629_v9 = vld [vmem:[#allocation7 + $0x7f0] ss:$72 sps:$4 sm:$0xff]   ;;  %v21637_v11 = vld [vmem:[#allocation7 + $0x884] ss:$72 sps:$4 sm:$0xff]  }
 0x26b   : > { %6076 = vmatpush1.bf16.msra.mxu0 %v21521_v54  ;;  %v21613_v54 = vld [vmem:[#allocation7 + $0x644] ss:$72 sps:$4 sm:$0xff]  }
 0x26c   : > { %6077 = vmatprep.subr.bf16.mxu0 %v21529_v55  ;;  %6197 = vmatpush1.bf16.msra.mxu1 %v21608_v14  ;;  %v21668_v55 = vld [vmem:[#allocation7 + $0x2e8] ss:$72 sps:$4 sm:$0xff]  }
 0x26d   : > { %6198 = vmatprep.subr.bf16.mxu1 %v21616_v15  ;;  %v21635_v14 = vld [vmem:[#allocation7 + $0x880] ss:$72 sps:$4 sm:$0xff]   ;;  %v21643_v15 = vld [vmem:[#allocation7 + $0x914] ss:$72 sps:$4 sm:$0xff]  }
 0x26f   : > { %6078 = vmatpush1.bf16.msra.mxu0 %v21527_v59  ;;  %v21619_v59 = vld [vmem:[#allocation7 + $0x6d4] ss:$72 sps:$4 sm:$0xff]  }
 0x270   : > { %6079 = vmatprep.subr.bf16.mxu0 %v21535_v60  ;;  %6199 = vmatpush1.bf16.msra.mxu1 %v21614_v19  ;;  %v21674_v60 = vld [vmem:[#allocation7 + $0x378] ss:$72 sps:$4 sm:$0xff]  }
 0x271   : > { %6200 = vmatprep.subr.bf16.mxu1 %v21622_v20  ;;  %v21641_v19 = vld [vmem:[#allocation7 + $0x910] ss:$72 sps:$4 sm:$0xff]   ;;  %v21649_v20 = vld [vmem:[#allocation7 + $0x9a4] ss:$72 sps:$4 sm:$0xff]  }
 0x273   : > { %6080 = vmatpush1.bf16.msra.mxu0 %v21533_v63  ;;  %v21625_v63 = vld [vmem:[#allocation7 + $0x764] ss:$72 sps:$4 sm:$0xff]  }
 0x274   : > { %6081 = vmatprep.subr.bf16.mxu0 %v21541_v0  ;;  %6201 = vmatpush1.bf16.msra.mxu1 %v21620_v23  ;;  %v21680_v0 = vld [vmem:[#allocation7 + $0x408] ss:$72 sps:$4 sm:$0xff]  }
 0x275   : > { %6202 = vmatprep.subr.bf16.mxu1 %v21628_v24  ;;  %v21647_v23 = vld [vmem:[#allocation7 + $0x9a0] ss:$72 sps:$4 sm:$0xff]   ;;  %v21655_v24 = vld [vmem:[#allocation7 + $0xa34] ss:$72 sps:$4 sm:$0xff]  }
 0x277   : > { %6082 = vmatpush1.bf16.msra.mxu0 %v21539_v3  ;;  %v21688_v3 = vld [vmem:[#allocation7 + $0x49c] ss:$72 sps:$4 sm:$0xff]  }
 0x278   : > { %6215 = vmatprep.subr.bf16.mxu0 %v21547_v8  ;;  %6203 = vmatpush1.bf16.msra.mxu1 %v21626_v27  ;;  %v21694_v8 = vld [vmem:[#allocation7 + $0x52c] ss:$72 sps:$4 sm:$0xff]   ;;  %v21653_v27 = vld [vmem:[#allocation7 + $0xa30] ss:$72 sps:$4 sm:$0xff]  }
 0x279   : > { %6204 = vmatprep.subr.bf16.mxu1 %v21634_v28  ;;  %v21661_v28 = vld [vmem:[#allocation7 + $0xac4] ss:$72 sps:$4 sm:$0xff]  }
 0x27a   : > { %6084 = vmatmul.mubr.bf16.vlgmr.msra.gmra.mrb[0].mxu0 %v25853_v10 }
 0x27b   : > { %6216 = vmatpush1.bf16.msra.mxu0 %v21545_v12  ;;  %6247 = vmatprep.mubr.bf16.mxu0 %v25828_v17  ;;  %v21692_v12 = vld [vmem:[#allocation7 + $0x528] ss:$72 sps:$4 sm:$0xff]  }
 0x27c   : > { %6217 = vmatprep.subr.bf16.mxu0 %v21553_v13  ;;  %6205 = vmatpush1.bf16.msra.mxu1 %v21632_v31  ;;  %v21700_v13 = vld [vmem:[#allocation7 + $0x5bc] ss:$72 sps:$4 sm:$0xff]   ;;  %v21659_v31 = vld [vmem:[#allocation7 + $0xac0] ss:$72 sps:$4 sm:$0xff]  }
 0x27d   : > { %6338 = vmatprep.subr.bf16.mxu1 %v21640_v32  ;;  %v21667_v32 = vld [vmem:[#allocation7 + $0xb54] ss:$72 sps:$4 sm:$0xff]  }
 0x27f   : > { %6218 = vmatpush1.bf16.msra.mxu0 %v21551_v16  ;;  %6207 = vmatmul.mubr.bf16.vlgmr.msra.gmra.mrb[0].mxu1 %v25853_v10  ;;  %v21698_v16 = vld [vmem:[#allocation7 + $0x5b8] ss:$72 sps:$4 sm:$0xff]  }
 0x280   : > { %6219 = vmatprep.subr.bf16.mxu0 %v21559_v18  ;;  %6339 = vmatpush1.bf16.msra.mxu1 %v21638_v35  ;;  %v21706_v18 = vld [vmem:[#allocation7 + $0x64c] ss:$72 sps:$4 sm:$0xff]   ;;  %v21665_v35 = vld [vmem:[#allocation7 + $0xb50] ss:$72 sps:$4 sm:$0xff]  }
 0x281   : > { %6370 = vmatprep.mubr.bf16.mxu1 %v25828_v17  ;;  %6340 = vmatprep.subr.bf16.mxu1 %v21646_v36  ;;  %v21673_v36 = vld [vmem:[#allocation7 + $0xbe4] ss:$72 sps:$4 sm:$0xff]  }
 0x283   : > { %6220 = vmatpush1.bf16.msra.mxu0 %v21557_v21  ;;  %v21704_v21 = vld [vmem:[#allocation7 + $0x648] ss:$72 sps:$4 sm:$0xff]  }
 0x284   : > { %6221 = vmatprep.subr.bf16.mxu0 %v21565_v22  ;;  %6341 = vmatpush1.bf16.msra.mxu1 %v21644_v39  ;;  %v21712_v22 = vld [vmem:[#allocation7 + $0x6dc] ss:$72 sps:$4 sm:$0xff]   ;;  %v21671_v39 = vld [vmem:[#allocation7 + $0xbe0] ss:$72 sps:$4 sm:$0xff]  }
 0x285   : > { %6342 = vmatprep.subr.bf16.mxu1 %v21652_v40  ;;  %v21679_v40 = vld [vmem:[#allocation7 + $0xc74] ss:$72 sps:$4 sm:$0xff]  }
 0x287   : > { %6222 = vmatpush1.bf16.msra.mxu0 %v21563_v25  ;;  %v21710_v25 = vld [vmem:[#allocation7 + $0x6d8] ss:$72 sps:$4 sm:$0xff]  }
 0x288   : > { %6223 = vmatprep.subr.bf16.mxu0 %v21571_v26  ;;  %6343 = vmatpush1.bf16.msra.mxu1 %v21650_v43  ;;  %v21718_v26 = vld [vmem:[#allocation7 + $0x76c] ss:$72 sps:$4 sm:$0xff]  }
 0x289   : > { %6344 = vmatprep.subr.bf16.mxu1 %v21658_v44  ;;  %v21742_v43 = vld [vmem:[#allocation7 + $0x9ac] ss:$72 sps:$4 sm:$0xff]  }
 0x28a   : > { %v21685_v44 = vld [vmem:[#allocation7 + $0xd04] ss:$72 sps:$4 sm:$0xff]  }
 0x28b   : > { %6224 = vmatpush1.bf16.msra.mxu0 %v21569_v29  ;;  %v21716_v29 = vld [vmem:[#allocation7 + $0x768] ss:$72 sps:$4 sm:$0xff]  }
 0x28c   : > { %6225 = vmatprep.subr.bf16.mxu0 %v21577_v30  ;;  %6345 = vmatpush1.bf16.msra.mxu1 %v21656_v47  ;;  %v21724_v30 = vld [vmem:[#allocation7 + $0x7fc] ss:$72 sps:$4 sm:$0xff]   ;;  %v21683_v47 = vld [vmem:[#allocation7 + $0xd00] ss:$72 sps:$4 sm:$0xff]  }
 0x28d   : > { %6346 = vmatprep.subr.bf16.mxu1 %v21664_v48  ;;  %v21691_v48 = vld [vmem:[#allocation7 + $0xd94] ss:$72 sps:$4 sm:$0xff]  }
 0x28f   : > { %6226 = vmatpush1.bf16.msra.mxu0 %v21575_v33  ;;  %v21722_v33 = vld [vmem:[#allocation7 + $0x7f8] ss:$72 sps:$4 sm:$0xff]  }
 0x290   : > { %6227 = vmatprep.subr.bf16.mxu0 %v21583_v34  ;;  %6347 = vmatpush1.bf16.msra.mxu1 %v21662_v51  ;;  %v21730_v34 = vld [vmem:[#allocation7 + $0x88c] ss:$72 sps:$4 sm:$0xff]   ;;  %v21689_v51 = vld [vmem:[#allocation7 + $0xd90] ss:$72 sps:$4 sm:$0xff]  }
 0x291   : > { %6348 = vmatprep.subr.bf16.mxu1 %v21670_v52  ;;  %v21697_v52 = vld [vmem:[#allocation7 + $0xe24] ss:$72 sps:$4 sm:$0xff]  }
 0x293   : > { %6228 = vmatpush1.bf16.msra.mxu0 %v21581_v37  ;;  %v21728_v37 = vld [vmem:[#allocation7 + $0x888] ss:$72 sps:$4 sm:$0xff]  }
 0x294   : > { %6229 = vmatprep.subr.bf16.mxu0 %v21589_v38  ;;  %6349 = vmatpush1.bf16.msra.mxu1 %v21668_v55  ;;  %v21736_v38 = vld [vmem:[#allocation7 + $0x91c] ss:$72 sps:$4 sm:$0xff]   ;;  %v21695_v55 = vld [vmem:[#allocation7 + $0xe20] ss:$72 sps:$4 sm:$0xff]  }
 0x295   : > { %6350 = vmatprep.subr.bf16.mxu1 %v21676_v56  ;;  %v21703_v56 = vld [vmem:[#allocation7 + $0xeb4] ss:$72 sps:$4 sm:$0xff]  }
 0x297   : > { %6230 = vmatpush1.bf16.msra.mxu0 %v21587_v41  ;;  %v21734_v41 = vld [vmem:[#allocation7 + $0x918] ss:$72 sps:$4 sm:$0xff]  }
 0x298   : > { %6231 = vmatprep.subr.bf16.mxu0 %v21595_v42  ;;  %6351 = vmatpush1.bf16.msra.mxu1 %v21674_v60  ;;  %v21677_v42 = vld [vmem:[#allocation7 + $0xc70] ss:$72 sps:$4 sm:$0xff]  }
 0x299   : > { %6352 = vmatprep.subr.bf16.mxu1 %v21682_v61  ;;  %v21701_v60 = vld [vmem:[#allocation7 + $0xeb0] ss:$72 sps:$4 sm:$0xff]   ;;  %v21709_v61 = vld [vmem:[#allocation7 + $0xf44] ss:$72 sps:$4 sm:$0xff]  }
 0x29b   : > { %6232 = vmatpush1.bf16.msra.mxu0 %v21593_v45  ;;  %v21740_v45 = vld [vmem:[#allocation7 + $0x9a8] ss:$72 sps:$4 sm:$0xff]  }
 0x29c   : > { %6233 = vmatprep.subr.bf16.mxu0 %v21601_v46  ;;  %6353 = vmatpush1.bf16.msra.mxu1 %v21680_v0  ;;  %v21748_v46 = vld [vmem:[#allocation7 + $0xa3c] ss:$72 sps:$4 sm:$0xff]   ;;  %v21707_v0 = vld [vmem:[#allocation7 + $0xf40] ss:$72 sps:$4 sm:$0xff]  }
 0x29d   : > { %6354 = vmatprep.subr.bf16.mxu1 %v21688_v3  ;;  %v21715_v3 = vld [vmem:[#allocation7 + $0xfd4] ss:$72 sps:$4 sm:$0xff]  }
 0x29f   : > { %6234 = vmatpush1.bf16.msra.mxu0 %v21599_v49  ;;  %v21746_v49 = vld [vmem:[#allocation7 + $0xa38] ss:$72 sps:$4 sm:$0xff]  }
 0x2a0   : > { %6235 = vmatprep.subr.bf16.mxu0 %v21607_v50  ;;  %6355 = vmatpush1.bf16.msra.mxu1 %v21686_v7  ;;  %v21754_v50 = vld [vmem:[#allocation7 + $0xacc] ss:$72 sps:$4 sm:$0xff]   ;;  %v21713_v7 = vld [vmem:[#allocation7 + $0xfd0] ss:$72 sps:$4 sm:$0xff]  }
 0x2a1   : > { %6356 = vmatprep.subr.bf16.mxu1 %v21694_v8  ;;  %v21721_v8 = vld [vmem:[#allocation7 + $0x1064] ss:$72 sps:$4 sm:$0xff]  }
 0x2a3   : > { %6236 = vmatpush1.bf16.msra.mxu0 %v21605_v53  ;;  %v21752_v53 = vld [vmem:[#allocation7 + $0xac8] ss:$72 sps:$4 sm:$0xff]  }
 0x2a4   : > { %6237 = vmatprep.subr.bf16.mxu0 %v21613_v54  ;;  %6357 = vmatpush1.bf16.msra.mxu1 %v21692_v12  ;;  %v21760_v54 = vld [vmem:[#allocation7 + $0xb5c] ss:$72 sps:$4 sm:$0xff]   ;;  %v21719_v12 = vld [vmem:[#allocation7 + $0x1060] ss:$72 sps:$4 sm:$0xff]  }
 0x2a5   : > { %6358 = vmatprep.subr.bf16.mxu1 %v21700_v13  ;;  %v21727_v13 = vld [vmem:[#allocation7 + $0x10f4] ss:$72 sps:$4 sm:$0xff]  }
 0x2a7   : > { %6238 = vmatpush1.bf16.msra.mxu0 %v21611_v57  ;;  %v21758_v57 = vld [vmem:[#allocation7 + $0xb58] ss:$72 sps:$4 sm:$0xff]  }
 0x2a8   : > { %6239 = vmatprep.subr.bf16.mxu0 %v21619_v59  ;;  %6359 = vmatpush1.bf16.msra.mxu1 %v21698_v16  ;;  %v21766_v59 = vld [vmem:[#allocation7 + $0xbec] ss:$72 sps:$4 sm:$0xff]   ;;  %v21725_v16 = vld [vmem:[#allocation7 + $0x10f0] ss:$72 sps:$4 sm:$0xff]  }
 0x2a9   : > { %6360 = vmatprep.subr.bf16.mxu1 %v21706_v18  ;;  %v21733_v18 = vld [vmem:[#allocation7 + $0x1184] ss:$72 sps:$4 sm:$0xff]  }
 0x2ab   : > { %6240 = vmatpush1.bf16.msra.mxu0 %v21617_v62  ;;  %v21764_v62 = vld [vmem:[#allocation7 + $0xbe8] ss:$72 sps:$4 sm:$0xff]  }
 0x2ac   : > { %6241 = vmatprep.subr.bf16.mxu0 %v21625_v63  ;;  %6361 = vmatpush1.bf16.msra.mxu1 %v21704_v21  ;;  %v21772_v63 = vld [vmem:[#allocation7 + $0xc7c] ss:$72 sps:$4 sm:$0xff]   ;;  %v21731_v21 = vld [vmem:[#allocation7 + $0x1180] ss:$72 sps:$4 sm:$0xff]  }
 0x2ad   : > { %6362 = vmatprep.subr.bf16.mxu1 %v21712_v22  ;;  %v21739_v22 = vld [vmem:[#allocation7 + $0x1214] ss:$72 sps:$4 sm:$0xff]  }
 0x2af   : > { %6242 = vmatpush1.bf16.msra.mxu0 %v21623_v4  ;;  %v21770_v4 = vld [vmem:[#allocation7 + $0xc78] ss:$72 sps:$4 sm:$0xff]  }
 0x2b0   : > { %6243 = vmatprep.subr.bf16.mxu0 %v21631_v6  ;;  %6363 = vmatpush1.bf16.msra.mxu1 %v21710_v25  ;;  %v21778_v6 = vld [vmem:[#allocation7 + $0xd0c] ss:$72 sps:$4 sm:$0xff]   ;;  %v21737_v25 = vld [vmem:[#allocation7 + $0x1210] ss:$72 sps:$4 sm:$0xff]  }
 0x2b1   : > { %6364 = vmatprep.subr.bf16.mxu1 %v21718_v26  ;;  %v21745_v26 = vld [vmem:[#allocation7 + $0x12a4] ss:$72 sps:$4 sm:$0xff]  }
 0x2b3   : > { %6244 = vmatpush1.bf16.msra.mxu0 %v21629_v9  ;;  %v21776_v9 = vld [vmem:[#allocation7 + $0xd08] ss:$72 sps:$4 sm:$0xff]  }
 0x2b4   : > { %6245 = vmatprep.subr.bf16.mxu0 %v21637_v11  ;;  %6365 = vmatpush1.bf16.msra.mxu1 %v21716_v29  ;;  %v21784_v11 = vld [vmem:[#allocation7 + $0xd9c] ss:$72 sps:$4 sm:$0xff]   ;;  %v21743_v29 = vld [vmem:[#allocation7 + $0x12a0] ss:$72 sps:$4 sm:$0xff]  }
 0x2b5   : > { %6366 = vmatprep.subr.bf16.mxu1 %v21724_v30  ;;  %v21751_v30 = vld [vmem:[#allocation7 + $0x1334] ss:$72 sps:$4 sm:$0xff]  }
 0x2b7   : > { %6246 = vmatpush1.bf16.msra.mxu0 %v21635_v14  ;;  %v21782_v14 = vld [vmem:[#allocation7 + $0xd98] ss:$72 sps:$4 sm:$0xff]  }
 0x2b8   : > { %6256 = vmatprep.subr.bf16.mxu0 %v21643_v15  ;;  %6367 = vmatpush1.bf16.msra.mxu1 %v21722_v33  ;;  %v21790_v15 = vld [vmem:[#allocation7 + $0xe2c] ss:$72 sps:$4 sm:$0xff]   ;;  %v21749_v33 = vld [vmem:[#allocation7 + $0x1330] ss:$72 sps:$4 sm:$0xff]  }
 0x2b9   : > { %6368 = vmatprep.subr.bf16.mxu1 %v21730_v34  ;;  %v21757_v34 = vld [vmem:[#allocation7 + $0x13c4] ss:$72 sps:$4 sm:$0xff]  }
 0x2ba   : > { %6248 = vmatmul.mubr.bf16.vlgmr.msra.gmra.mrb[4].mxu0 %v25833_v58 }
 0x2bb   : > { %6257 = vmatpush1.bf16.msra.mxu0 %v21641_v19  ;;  %6288 = vmatprep.mubr.bf16.mxu0 %v25837_v2  ;;  %v21788_v19 = vld [vmem:[#allocation7 + $0xe28] ss:$72 sps:$4 sm:$0xff]  }
 0x2bc   : > { %6258 = vmatprep.subr.bf16.mxu0 %v21649_v20  ;;  %6369 = vmatpush1.bf16.msra.mxu1 %v21728_v37  ;;  %v21796_v20 = vld [vmem:[#allocation7 + $0xebc] ss:$72 sps:$4 sm:$0xff]   ;;  %v21755_v37 = vld [vmem:[#allocation7 + $0x13c0] ss:$72 sps:$4 sm:$0xff]  }
 0x2bd   : > { %6379 = vmatprep.subr.bf16.mxu1 %v21736_v38  ;;  %v21763_v38 = vld [vmem:[#allocation7 + $0x1454] ss:$72 sps:$4 sm:$0xff]  }
 0x2bf   : > { %6259 = vmatpush1.bf16.msra.mxu0 %v21647_v23  ;;  %6371 = vmatmul.mubr.bf16.vlgmr.msra.gmra.mrb[4].mxu1 %v25833_v58  ;;  %v21794_v23 = vld [vmem:[#allocation7 + $0xeb8] ss:$72 sps:$4 sm:$0xff]  }
 0x2c0   : > { %6260 = vmatprep.subr.bf16.mxu0 %v21655_v24  ;;  %6380 = vmatpush1.bf16.msra.mxu1 %v21734_v41  ;;  %v21802_v24 = vld [vmem:[#allocation7 + $0xf4c] ss:$72 sps:$4 sm:$0xff]   ;;  %v21761_v41 = vld [vmem:[#allocation7 + $0x1450] ss:$72 sps:$4 sm:$0xff]  }
 0x2c1   : > { %6411 = vmatprep.mubr.bf16.mxu1 %v25837_v2  ;;  %6381 = vmatprep.subr.bf16.mxu1 %v21742_v43  ;;  %v21824_v43 = vld [vmem:[#allocation7 + $0x1188] ss:$72 sps:$4 sm:$0xff]  }
 0x2c3   : > { %6261 = vmatpush1.bf16.msra.mxu0 %v21653_v27  ;;  %v21800_v27 = vld [vmem:[#allocation7 + $0xf48] ss:$72 sps:$4 sm:$0xff]  }
 0x2c4   : > { %6262 = vmatprep.subr.bf16.mxu0 %v21661_v28  ;;  %6382 = vmatpush1.bf16.msra.mxu1 %v21740_v45  ;;  %v21808_v28 = vld [vmem:[#allocation7 + $0xfdc] ss:$72 sps:$4 sm:$0xff]   ;;  %v21767_v45 = vld [vmem:[#allocation7 + $0x14e0] ss:$72 sps:$4 sm:$0xff]  }
 0x2c5   : > { %6383 = vmatprep.subr.bf16.mxu1 %v21748_v46  ;;  %v21775_v46 = vld [vmem:[#allocation7 + $0x1574] ss:$72 sps:$4 sm:$0xff]  }
 0x2c7   : > { %6263 = vmatpush1.bf16.msra.mxu0 %v21659_v31  ;;  %v21806_v31 = vld [vmem:[#allocation7 + $0xfd8] ss:$72 sps:$4 sm:$0xff]  }
 0x2c8   : > { %6264 = vmatprep.subr.bf16.mxu0 %v21667_v32  ;;  %6384 = vmatpush1.bf16.msra.mxu1 %v21746_v49  ;;  %v21814_v32 = vld [vmem:[#allocation7 + $0x106c] ss:$72 sps:$4 sm:$0xff]   ;;  %v21773_v49 = vld [vmem:[#allocation7 + $0x1570] ss:$72 sps:$4 sm:$0xff]  }
 0x2c9   : > { %6385 = vmatprep.subr.bf16.mxu1 %v21754_v50  ;;  %v21781_v50 = vld [vmem:[#allocation7 + $0x1604] ss:$72 sps:$4 sm:$0xff]  }
 0x2cb   : > { %6265 = vmatpush1.bf16.msra.mxu0 %v21665_v35  ;;  %v21812_v35 = vld [vmem:[#allocation7 + $0x1068] ss:$72 sps:$4 sm:$0xff]  }
 0x2cc   : > { %6266 = vmatprep.subr.bf16.mxu0 %v21673_v36  ;;  %6386 = vmatpush1.bf16.msra.mxu1 %v21752_v53  ;;  %v21820_v36 = vld [vmem:[#allocation7 + $0x10fc] ss:$72 sps:$4 sm:$0xff]   ;;  %v21779_v53 = vld [vmem:[#allocation7 + $0x1600] ss:$72 sps:$4 sm:$0xff]  }
 0x2cd   : > { %6387 = vmatprep.subr.bf16.mxu1 %v21760_v54  ;;  %v21787_v54 = vld [vmem:[#allocation7 + $0x1694] ss:$72 sps:$4 sm:$0xff]  }
 0x2cf   : > { %6267 = vmatpush1.bf16.msra.mxu0 %v21671_v39  ;;  %v21818_v39 = vld [vmem:[#allocation7 + $0x10f8] ss:$72 sps:$4 sm:$0xff]  }
 0x2d0   : > { %6268 = vmatprep.subr.bf16.mxu0 %v21679_v40  ;;  %6388 = vmatpush1.bf16.msra.mxu1 %v21758_v57  ;;  %v21826_v40 = vld [vmem:[#allocation7 + $0x118c] ss:$72 sps:$4 sm:$0xff]   ;;  %v21785_v57 = vld [vmem:[#allocation7 + $0x1690] ss:$72 sps:$4 sm:$0xff]  }
 0x2d1   : > { %6389 = vmatprep.subr.bf16.mxu1 %v21766_v59  ;;  %v21793_v59 = vld [vmem:[#allocation7 + $0x1724] ss:$72 sps:$4 sm:$0xff]  }
 0x2d3   : > { %6269 = vmatpush1.bf16.msra.mxu0 %v21677_v42  ;;  %v21769_v42 = vld [vmem:[#allocation7 + $0x14e4] ss:$72 sps:$4 sm:$0xff]  }
 0x2d4   : > { %6270 = vmatprep.subr.bf16.mxu0 %v21685_v44  ;;  %6390 = vmatpush1.bf16.msra.mxu1 %v21764_v62  ;;  %v21832_v44 = vld [vmem:[#allocation7 + $0x121c] ss:$72 sps:$4 sm:$0xff]   ;;  %v21791_v62 = vld [vmem:[#allocation7 + $0x1720] ss:$72 sps:$4 sm:$0xff]  }
 0x2d5   : > { %6391 = vmatprep.subr.bf16.mxu1 %v21772_v63  ;;  %v21799_v63 = vld [vmem:[#allocation7 + $0x17b4] ss:$72 sps:$4 sm:$0xff]  }
 0x2d7   : > { %6271 = vmatpush1.bf16.msra.mxu0 %v21683_v47  ;;  %v21830_v47 = vld [vmem:[#allocation7 + $0x1218] ss:$72 sps:$4 sm:$0xff]  }
 0x2d8   : > { %6272 = vmatprep.subr.bf16.mxu0 %v21691_v48  ;;  %6392 = vmatpush1.bf16.msra.mxu1 %v21770_v4  ;;  %v21838_v48 = vld [vmem:[#allocation7 + $0x12ac] ss:$72 sps:$4 sm:$0xff]   ;;  %v21797_v4 = vld [vmem:[#allocation7 + $0x17b0] ss:$72 sps:$4 sm:$0xff]  }
 0x2d9   : > { %6393 = vmatprep.subr.bf16.mxu1 %v21778_v6  ;;  %v21805_v6 = vld [vmem:[#allocation7 + $0x1844] ss:$72 sps:$4 sm:$0xff]  }
 0x2db   : > { %6273 = vmatpush1.bf16.msra.mxu0 %v21689_v51  ;;  %v21836_v51 = vld [vmem:[#allocation7 + $0x12a8] ss:$72 sps:$4 sm:$0xff]  }
 0x2dc   : > { %6274 = vmatprep.subr.bf16.mxu0 %v21697_v52  ;;  %6394 = vmatpush1.bf16.msra.mxu1 %v21776_v9  ;;  %v21844_v52 = vld [vmem:[#allocation7 + $0x133c] ss:$72 sps:$4 sm:$0xff]   ;;  %v21803_v9 = vld [vmem:[#allocation7 + $0x1840] ss:$72 sps:$4 sm:$0xff]  }
 0x2dd   : > { %6395 = vmatprep.subr.bf16.mxu1 %v21784_v11  ;;  %v21811_v11 = vld [vmem:[#allocation7 + $0x18d4] ss:$72 sps:$4 sm:$0xff]  }
 0x2df   : > { %6275 = vmatpush1.bf16.msra.mxu0 %v21695_v55  ;;  %v21842_v55 = vld [vmem:[#allocation7 + $0x1338] ss:$72 sps:$4 sm:$0xff]  }
 0x2e0   : > { %6276 = vmatprep.subr.bf16.mxu0 %v21703_v56  ;;  %6396 = vmatpush1.bf16.msra.mxu1 %v21782_v14  ;;  %v21850_v56 = vld [vmem:[#allocation7 + $0x13cc] ss:$72 sps:$4 sm:$0xff]   ;;  %v21809_v14 = vld [vmem:[#allocation7 + $0x18d0] ss:$72 sps:$4 sm:$0xff]  }
 0x2e1   : > { %6397 = vmatprep.subr.bf16.mxu1 %v21790_v15  ;;  %v21817_v15 = vld [vmem:[#allocation7 + $0x1964] ss:$72 sps:$4 sm:$0xff]  }
 0x2e3   : > { %6277 = vmatpush1.bf16.msra.mxu0 %v21701_v60  ;;  %v21848_v60 = vld [vmem:[#allocation7 + $0x13c8] ss:$72 sps:$4 sm:$0xff]  }
 0x2e4   : > { %6278 = vmatprep.subr.bf16.mxu0 %v21709_v61  ;;  %6398 = vmatpush1.bf16.msra.mxu1 %v21788_v19  ;;  %v21856_v61 = vld [vmem:[#allocation7 + $0x145c] ss:$72 sps:$4 sm:$0xff]   ;;  %v21815_v19 = vld [vmem:[#allocation7 + $0x1960] ss:$72 sps:$4 sm:$0xff]  }
 0x2e5   : > { %6399 = vmatprep.subr.bf16.mxu1 %v21796_v20  ;;  %v21823_v20 = vld [vmem:[#allocation7 + $0x19f4] ss:$72 sps:$4 sm:$0xff]  }
 0x2e7   : > { %6279 = vmatpush1.bf16.msra.mxu0 %v21707_v0  ;;  %v21854_v0 = vld [vmem:[#allocation7 + $0x1458] ss:$72 sps:$4 sm:$0xff]  }
 0x2e8   : > { %6280 = vmatprep.subr.bf16.mxu0 %v21715_v3  ;;  %6400 = vmatpush1.bf16.msra.mxu1 %v21794_v23  ;;  %v21862_v3 = vld [vmem:[#allocation7 + $0x14ec] ss:$72 sps:$4 sm:$0xff]   ;;  %v21821_v23 = vld [vmem:[#allocation7 + $0x19f0] ss:$72 sps:$4 sm:$0xff]  }
 0x2e9   : > { %6401 = vmatprep.subr.bf16.mxu1 %v21802_v24  ;;  %v21829_v24 = vld [vmem:[#allocation7 + $0x1a84] ss:$72 sps:$4 sm:$0xff]  }
 0x2eb   : > { %6281 = vmatpush1.bf16.msra.mxu0 %v21713_v7  ;;  %v21860_v7 = vld [vmem:[#allocation7 + $0x14e8] ss:$72 sps:$4 sm:$0xff]  }
 0x2ec   : > { %6282 = vmatprep.subr.bf16.mxu0 %v21721_v8  ;;  %6402 = vmatpush1.bf16.msra.mxu1 %v21800_v27  ;;  %v21868_v8 = vld [vmem:[#allocation7 + $0x157c] ss:$72 sps:$4 sm:$0xff]   ;;  %v21827_v27 = vld [vmem:[#allocation7 + $0x1a80] ss:$72 sps:$4 sm:$0xff]  }
 0x2ed   : > { %6403 = vmatprep.subr.bf16.mxu1 %v21808_v28  ;;  %v21835_v28 = vld [vmem:[#allocation7 + $0x24] ss:$72 sps:$4 sm:$0xff]  }
 0x2ef   : > { %6283 = vmatpush1.bf16.msra.mxu0 %v21719_v12  ;;  %v21866_v12 = vld [vmem:[#allocation7 + $0x1578] ss:$72 sps:$4 sm:$0xff]  }
 0x2f0   : > { %6284 = vmatprep.subr.bf16.mxu0 %v21727_v13  ;;  %6404 = vmatpush1.bf16.msra.mxu1 %v21806_v31  ;;  %v21874_v13 = vld [vmem:[#allocation7 + $0x160c] ss:$72 sps:$4 sm:$0xff]   ;;  %v21833_v31 = vld [vmem:[#allocation7 + $0x20] ss:$72 sps:$4 sm:$0xff]  }
 0x2f1   : > { %6405 = vmatprep.subr.bf16.mxu1 %v21814_v32  ;;  %v21841_v32 = vld [vmem:[#allocation7 + $0xb4] ss:$72 sps:$4 sm:$0xff]  }
 0x2f3   : > { %6285 = vmatpush1.bf16.msra.mxu0 %v21725_v16  ;;  %v21872_v16 = vld [vmem:[#allocation7 + $0x1608] ss:$72 sps:$4 sm:$0xff]  }
 0x2f4   : > { %6286 = vmatprep.subr.bf16.mxu0 %v21733_v18  ;;  %6406 = vmatpush1.bf16.msra.mxu1 %v21812_v35  ;;  %v21880_v18 = vld [vmem:[#allocation7 + $0x169c] ss:$72 sps:$4 sm:$0xff]   ;;  %v21839_v35 = vld [vmem:[#allocation7 + $0xb0] ss:$72 sps:$4 sm:$0xff]  }
 0x2f5   : > { %6407 = vmatprep.subr.bf16.mxu1 %v21820_v36  ;;  %v21847_v36 = vld [vmem:[#allocation7 + $0x144] ss:$72 sps:$4 sm:$0xff]  }
 0x2f7   : > { %6287 = vmatpush1.bf16.msra.mxu0 %v21731_v21  ;;  %v21878_v21 = vld [vmem:[#allocation7 + $0x1698] ss:$72 sps:$4 sm:$0xff]  }
 0x2f8   : > { %6297 = vmatprep.subr.bf16.mxu0 %v21739_v22  ;;  %6408 = vmatpush1.bf16.msra.mxu1 %v21818_v39  ;;  %v21886_v22 = vld [vmem:[#allocation7 + $0x172c] ss:$72 sps:$4 sm:$0xff]   ;;  %v21845_v39 = vld [vmem:[#allocation7 + $0x140] ss:$72 sps:$4 sm:$0xff]  }
 0x2f9   : > { %6409 = vmatprep.subr.bf16.mxu1 %v21826_v40  ;;  %v21853_v40 = vld [vmem:[#allocation7 + $0x1d4] ss:$72 sps:$4 sm:$0xff]  }
 0x2fa   : > { %6289 = vmatmul.mubr.bf16.vlgmr.msra.gmra.mrb[4].mxu0 %v25844_v1 }
 0x2fb   : > { %6298 = vmatpush1.bf16.msra.mxu0 %v21737_v25  ;;  %6329 = vmatprep.mubr.bf16.mxu0 %v25846_v5  ;;  %v21884_v25 = vld [vmem:[#allocation7 + $0x1728] ss:$72 sps:$4 sm:$0xff]  }
 0x2fc   : > { %6299 = vmatprep.subr.bf16.mxu0 %v21745_v26  ;;  %6410 = vmatpush1.bf16.msra.mxu1 %v21824_v43  ;;  %v21892_v26 = vld [vmem:[#allocation7 + $0x17bc] ss:$72 sps:$4 sm:$0xff]   ;;  %v21851_v43 = vld [vmem:[#allocation7 + $0x1d0] ss:$72 sps:$4 sm:$0xff]  }
 0x2fd   : > { %6420 = vmatprep.subr.bf16.mxu1 %v21832_v44  ;;  %v21859_v44 = vld [vmem:[#allocation7 + $0x264] ss:$72 sps:$4 sm:$0xff]  }
 0x2ff   : > { %6300 = vmatpush1.bf16.msra.mxu0 %v21743_v29  ;;  %6412 = vmatmul.mubr.bf16.vlgmr.msra.gmra.mrb[4].mxu1 %v25844_v1  ;;  %v21890_v29 = vld [vmem:[#allocation7 + $0x17b8] ss:$72 sps:$4 sm:$0xff]  }
 0x300   : > { %6301 = vmatprep.subr.bf16.mxu0 %v21751_v30  ;;  %6421 = vmatpush1.bf16.msra.mxu1 %v21830_v47  ;;  %v21898_v30 = vld [vmem:[#allocation7 + $0x184c] ss:$72 sps:$4 sm:$0xff]   ;;  %v21857_v47 = vld [vmem:[#allocation7 + $0x260] ss:$72 sps:$4 sm:$0xff]  }
 0x301   : > { %6452 = vmatprep.mubr.bf16.mxu1 %v25846_v5  ;;  %6422 = vmatprep.subr.bf16.mxu1 %v21838_v48  ;;  %v21865_v48 = vld [vmem:[#allocation7 + $0x2f4] ss:$72 sps:$4 sm:$0xff]  }
 0x303   : > { %6302 = vmatpush1.bf16.msra.mxu0 %v21749_v33  ;;  %v21896_v33 = vld [vmem:[#allocation7 + $0x1848] ss:$72 sps:$4 sm:$0xff]  }
 0x304   : > { %6303 = vmatprep.subr.bf16.mxu0 %v21757_v34  ;;  %6423 = vmatpush1.bf16.msra.mxu1 %v21836_v51  ;;  %v21904_v34 = vld [vmem:[#allocation7 + $0x18dc] ss:$72 sps:$4 sm:$0xff]   ;;  %v21863_v51 = vld [vmem:[#allocation7 + $0x2f0] ss:$72 sps:$4 sm:$0xff]  }
 0x305   : > { %6424 = vmatprep.subr.bf16.mxu1 %v21844_v52  ;;  %v21871_v52 = vld [vmem:[#allocation7 + $0x384] ss:$72 sps:$4 sm:$0xff]  }
 0x307   : > { %6304 = vmatpush1.bf16.msra.mxu0 %v21755_v37  ;;  %v21902_v37 = vld [vmem:[#allocation7 + $0x18d8] ss:$72 sps:$4 sm:$0xff]  }
 0x308   : > { %6305 = vmatprep.subr.bf16.mxu0 %v21763_v38  ;;  %6425 = vmatpush1.bf16.msra.mxu1 %v21842_v55  ;;  %v21910_v38 = vld [vmem:[#allocation7 + $0x196c] ss:$72 sps:$4 sm:$0xff]  }
 0x309   : > { %6426 = vmatprep.subr.bf16.mxu1 %v21850_v56 }
 0x30b   : > { %6306 = vmatpush1.bf16.msra.mxu0 %v21761_v41  ;;  %v21908_v41 = vld [vmem:[#allocation7 + $0x1968] ss:$72 sps:$4 sm:$0xff]  }
 0x30c   : > { %6307 = vmatprep.subr.bf16.mxu0 %v21769_v42  ;;  %6427 = vmatpush1.bf16.msra.mxu1 %v21848_v60  ;;  %v21916_v42 = vld [vmem:[#allocation7 + $0x19fc] ss:$72 sps:$4 sm:$0xff]  }
 0x30d   : > { %6428 = vmatprep.subr.bf16.mxu1 %v21856_v61  ;;  %v21877_v60 = vld [vmem:[#allocation7 + $0x414] ss:$72 sps:$4 sm:$0xff]  }
 0x30f   : > { %6308 = vmatpush1.bf16.msra.mxu0 %v21767_v45  ;;  %v21914_v45 = vld [vmem:[#allocation7 + $0x19f8] ss:$72 sps:$4 sm:$0xff]  }
 0x310   : > { %6309 = vmatprep.subr.bf16.mxu0 %v21775_v46  ;;  %6429 = vmatpush1.bf16.msra.mxu1 %v21854_v0  ;;  %v21922_v46 = vld [vmem:[#allocation7 + $0x1a8c] ss:$72 sps:$4 sm:$0xff]   ;;  %v21875_v0 = vld [vmem:[#allocation7 + $0x410] ss:$72 sps:$4 sm:$0xff]  }
 0x311   : > { %6430 = vmatprep.subr.bf16.mxu1 %v21862_v3  ;;  %v21883_v3 = vld [vmem:[#allocation7 + $0x4a4] ss:$72 sps:$4 sm:$0xff]  }
 0x313   : > { %6310 = vmatpush1.bf16.msra.mxu0 %v21773_v49  ;;  %v21920_v49 = vld [vmem:[#allocation7 + $0x1a88] ss:$72 sps:$4 sm:$0xff]  }
 0x314   : > { %6311 = vmatprep.subr.bf16.mxu0 %v21781_v50  ;;  %6431 = vmatpush1.bf16.msra.mxu1 %v21860_v7  ;;  %v21928_v50 = vld [vmem:[#allocation7 + $0x2c] ss:$72 sps:$4 sm:$0xff]   ;;  %v21881_v7 = vld [vmem:[#allocation7 + $0x4a0] ss:$72 sps:$4 sm:$0xff]  }
 0x315   : > { %6432 = vmatprep.subr.bf16.mxu1 %v21868_v8  ;;  %v21889_v8 = vld [vmem:[#allocation7 + $0x534] ss:$72 sps:$4 sm:$0xff]  }
 0x317   : > { %6312 = vmatpush1.bf16.msra.mxu0 %v21779_v53  ;;  %v21926_v53 = vld [vmem:[#allocation7 + $0x28] ss:$72 sps:$4 sm:$0xff]  }
 0x318   : > { %6313 = vmatprep.subr.bf16.mxu0 %v21787_v54  ;;  %6433 = vmatpush1.bf16.msra.mxu1 %v21866_v12  ;;  %v21934_v54 = vld [vmem:[#allocation7 + $0xbc] ss:$72 sps:$4 sm:$0xff]   ;;  %v21887_v12 = vld [vmem:[#allocation7 + $0x530] ss:$72 sps:$4 sm:$0xff]  }
 0x319   : > { %6434 = vmatprep.subr.bf16.mxu1 %v21874_v13  ;;  %v21895_v13 = vld [vmem:[#allocation7 + $0x5c4] ss:$72 sps:$4 sm:$0xff]  }
 0x31b   : > { %6314 = vmatpush1.bf16.msra.mxu0 %v21785_v57 }
 0x31c   : > { %6315 = vmatprep.subr.bf16.mxu0 %v21793_v59  ;;  %6435 = vmatpush1.bf16.msra.mxu1 %v21872_v16  ;;  %v21869_v59 = vld [vmem:[#allocation7 + $0x380] ss:$72 sps:$4 sm:$0xff]  }
 0x31d   : > { %6436 = vmatprep.subr.bf16.mxu1 %v21880_v18  ;;  %v21893_v16 = vld [vmem:[#allocation7 + $0x5c0] ss:$72 sps:$4 sm:$0xff]   ;;  %v21901_v18 = vld [vmem:[#allocation7 + $0x654] ss:$72 sps:$4 sm:$0xff]  }
 0x31f   : > { %6316 = vmatpush1.bf16.msra.mxu0 %v21791_v62  ;;  %v21932_v62 = vld [vmem:[#allocation7 + $0xb8] ss:$72 sps:$4 sm:$0xff]  }
 0x320   : > { %6317 = vmatprep.subr.bf16.mxu0 %v21799_v63  ;;  %6437 = vmatpush1.bf16.msra.mxu1 %v21878_v21  ;;  %v21940_v63 = vld [vmem:[#allocation7 + $0x14c] ss:$72 sps:$4 sm:$0xff]   ;;  %v21899_v21 = vld [vmem:[#allocation7 + $0x650] ss:$72 sps:$4 sm:$0xff]  }
 0x321   : > { %6438 = vmatprep.subr.bf16.mxu1 %v21886_v22  ;;  %v21907_v22 = vld [vmem:[#allocation7 + $0x6e4] ss:$72 sps:$4 sm:$0xff]  }
 0x323   : > { %6318 = vmatpush1.bf16.msra.mxu0 %v21797_v4  ;;  %v21938_v4 = vld [vmem:[#allocation7 + $0x148] ss:$72 sps:$4 sm:$0xff]  }
 0x324   : > { %6319 = vmatprep.subr.bf16.mxu0 %v21805_v6  ;;  %6439 = vmatpush1.bf16.msra.mxu1 %v21884_v25  ;;  %v21946_v6 = vld [vmem:[#allocation7 + $0x1dc] ss:$72 sps:$4 sm:$0xff]   ;;  %v21962_v25 = vld [vmem:[#allocation7 + $0x388] ss:$72 sps:$4 sm:$0xff]  }
 0x325   : > { %6440 = vmatprep.subr.bf16.mxu1 %v21892_v26  ;;  %v21970_v26 = vld [vmem:[#allocation7 + $0x41c] ss:$72 sps:$4 sm:$0xff]  }
 0x327   : > { %6320 = vmatpush1.bf16.msra.mxu0 %v21803_v9  ;;  %v21944_v9 = vld [vmem:[#allocation7 + $0x1d8] ss:$72 sps:$4 sm:$0xff]  }
 0x328   : > { %6321 = vmatprep.subr.bf16.mxu0 %v21811_v11  ;;  %6441 = vmatpush1.bf16.msra.mxu1 %v21890_v29  ;;  %v21952_v11 = vld [vmem:[#allocation7 + $0x26c] ss:$72 sps:$4 sm:$0xff]   ;;  %v21905_v29 = vld [vmem:[#allocation7 + $0x6e0] ss:$72 sps:$4 sm:$0xff]  }
 0x329   : > { %6442 = vmatprep.subr.bf16.mxu1 %v21898_v30  ;;  %v21913_v30 = vld [vmem:[#allocation7 + $0x774] ss:$72 sps:$4 sm:$0xff]  }
 0x32b   : > { %6322 = vmatpush1.bf16.msra.mxu0 %v21809_v14  ;;  %v21950_v14 = vld [vmem:[#allocation7 + $0x268] ss:$72 sps:$4 sm:$0xff]  }
 0x32c   : > { %6323 = vmatprep.subr.bf16.mxu0 %v21817_v15  ;;  %6443 = vmatpush1.bf16.msra.mxu1 %v21896_v33  ;;  %v21958_v15 = vld [vmem:[#allocation7 + $0x2fc] ss:$72 sps:$4 sm:$0xff]   ;;  %v21911_v33 = vld [vmem:[#allocation7 + $0x770] ss:$72 sps:$4 sm:$0xff]  }
 0x32d   : > { %6444 = vmatprep.subr.bf16.mxu1 %v21904_v34  ;;  %v21919_v34 = vld [vmem:[#allocation7 + $0x804] ss:$72 sps:$4 sm:$0xff]  }
 0x32f   : > { %6324 = vmatpush1.bf16.msra.mxu0 %v21815_v19  ;;  %v21956_v19 = vld [vmem:[#allocation7 + $0x2f8] ss:$72 sps:$4 sm:$0xff]  }
 0x330   : > { %6325 = vmatprep.subr.bf16.mxu0 %v21823_v20  ;;  %6445 = vmatpush1.bf16.msra.mxu1 %v21902_v37  ;;  %v21964_v20 = vld [vmem:[#allocation7 + $0x38c] ss:$72 sps:$4 sm:$0xff]   ;;  %v21917_v37 = vld [vmem:[#allocation7 + $0x800] ss:$72 sps:$4 sm:$0xff]  }
 0x331   : > { %6446 = vmatprep.subr.bf16.mxu1 %v21910_v38  ;;  %v21925_v38 = vld [vmem:[#allocation7 + $0x894] ss:$72 sps:$4 sm:$0xff]  }
 0x333   : > { %6326 = vmatpush1.bf16.msra.mxu0 %v21821_v23 }
 0x334   : > { %6327 = vmatprep.subr.bf16.mxu0 %v21829_v24  ;;  %6447 = vmatpush1.bf16.msra.mxu1 %v21908_v41  ;;  %v21923_v41 = vld [vmem:[#allocation7 + $0x890] ss:$72 sps:$4 sm:$0xff]  }
 0x335   : > { %6448 = vmatprep.subr.bf16.mxu1 %v21916_v42  ;;  %v21931_v42 = vld [vmem:[#allocation7 + $0x924] ss:$72 sps:$4 sm:$0xff]  }
 0x337   : > { %6328 = vmatpush1.bf16.msra.mxu0 %v21827_v27 }
 0x338   : > { %6461 = vmatprep.subr.bf16.mxu0 %v21835_v28  ;;  %6449 = vmatpush1.bf16.msra.mxu1 %v21914_v45  ;;  %v21929_v45 = vld [vmem:[#allocation7 + $0x920] ss:$72 sps:$4 sm:$0xff]  }
 0x339   : > { %6450 = vmatprep.subr.bf16.mxu1 %v21922_v46  ;;  %v21937_v46 = vld [vmem:[#allocation7 + $0x9b4] ss:$72 sps:$4 sm:$0xff]  }
 0x33a   : > { %6330 = vmatmul.mubr.bf16.vlgmr.msra.gmra.mrb[4].mxu0 %v25853_v10 }
 0x33b   : > { %6462 = vmatpush1.bf16.msra.mxu0 %v21833_v31  ;;  %6493 = vmatprep.mubr.bf16.mxu0 %v25828_v17  ;;  %v21968_v31 = vld [vmem:[#allocation7 + $0x418] ss:$72 sps:$4 sm:$0xff]  }
 0x33c   : > { %6463 = vmatprep.subr.bf16.mxu0 %v21841_v32  ;;  %6451 = vmatpush1.bf16.msra.mxu1 %v21920_v49  ;;  %v21976_v32 = vld [vmem:[#allocation7 + $0x4ac] ss:$72 sps:$4 sm:$0xff]   ;;  %v21935_v49 = vld [vmem:[#allocation7 + $0x9b0] ss:$72 sps:$4 sm:$0xff]  }
 0x33d   : > { %6584 = vmatprep.subr.bf16.mxu1 %v21928_v50  ;;  %v21943_v50 = vld [vmem:[#allocation7 + $0xa44] ss:$72 sps:$4 sm:$0xff]  }
 0x33f   : > { %6464 = vmatpush1.bf16.msra.mxu0 %v21839_v35  ;;  %6453 = vmatmul.mubr.bf16.vlgmr.msra.gmra.mrb[4].mxu1 %v25853_v10  ;;  %v21974_v35 = vld [vmem:[#allocation7 + $0x4a8] ss:$72 sps:$4 sm:$0xff]  }
 0x340   : > { %6465 = vmatprep.subr.bf16.mxu0 %v21847_v36  ;;  %6585 = vmatpush1.bf16.msra.mxu1 %v21926_v53  ;;  %v21982_v36 = vld [vmem:[#allocation7 + $0x53c] ss:$72 sps:$4 sm:$0xff]   ;;  %v21941_v53 = vld [vmem:[#allocation7 + $0xa40] ss:$72 sps:$4 sm:$0xff]  }
 0x341   : > { %6616 = vmatprep.mubr.bf16.mxu1 %v25828_v17  ;;  %6586 = vmatprep.subr.bf16.mxu1 %v21934_v54  ;;  %v21949_v54 = vld [vmem:[#allocation7 + $0xad4] ss:$72 sps:$4 sm:$0xff]  }
 0x343   : > { %6466 = vmatpush1.bf16.msra.mxu0 %v21845_v39  ;;  %v21980_v39 = vld [vmem:[#allocation7 + $0x538] ss:$72 sps:$4 sm:$0xff]  }
 0x344   : > { %6467 = vmatprep.subr.bf16.mxu0 %v21853_v40  ;;  %6587 = vmatpush1.bf16.msra.mxu1 %v21932_v62  ;;  %v21988_v40 = vld [vmem:[#allocation7 + $0x5cc] ss:$72 sps:$4 sm:$0xff]   ;;  %v22010_v62 = vld [vmem:[#allocation7 + $0x808] ss:$72 sps:$4 sm:$0xff]  }
 0x345   : > { %6588 = vmatprep.subr.bf16.mxu1 %v21940_v63  ;;  %v22018_v63 = vld [vmem:[#allocation7 + $0x89c] ss:$72 sps:$4 sm:$0xff]  }
 0x347   : > { %6468 = vmatpush1.bf16.msra.mxu0 %v21851_v43  ;;  %v21986_v43 = vld [vmem:[#allocation7 + $0x5c8] ss:$72 sps:$4 sm:$0xff]  }
 0x348   : > { %6469 = vmatprep.subr.bf16.mxu0 %v21859_v44  ;;  %6589 = vmatpush1.bf16.msra.mxu1 %v21938_v4  ;;  %v21994_v44 = vld [vmem:[#allocation7 + $0x65c] ss:$72 sps:$4 sm:$0xff]   ;;  %v22016_v4 = vld [vmem:[#allocation7 + $0x898] ss:$72 sps:$4 sm:$0xff]  }
 0x349   : > { %6590 = vmatprep.subr.bf16.mxu1 %v21946_v6  ;;  %v22024_v6 = vld [vmem:[#allocation7 + $0x92c] ss:$72 sps:$4 sm:$0xff]  }
 0x34b   : > { %6470 = vmatpush1.bf16.msra.mxu0 %v21857_v47  ;;  %v21992_v47 = vld [vmem:[#allocation7 + $0x658] ss:$72 sps:$4 sm:$0xff]  }
 0x34c   : > { %6471 = vmatprep.subr.bf16.mxu0 %v21865_v48  ;;  %6591 = vmatpush1.bf16.msra.mxu1 %v21944_v9  ;;  %v22000_v48 = vld [vmem:[#allocation7 + $0x6ec] ss:$72 sps:$4 sm:$0xff]   ;;  %v22022_v9 = vld [vmem:[#allocation7 + $0x928] ss:$72 sps:$4 sm:$0xff]  }
 0x34d   : > { %v25869_v55 = vpop.f32.mrb[0].mxu0  ;;  %6592 = vmatprep.subr.bf16.mxu1 %v21952_v11  ;;  %v21965_v11 = vld [vmem:[#allocation7 + $0xc80] ss:$72 sps:$4 sm:$0xff]  }
 0x34e   : > { %v25871_v56 = vpop.f32.mrb[1].mxu0 }
 0x34f   : > { %v6089_v57 = vpop.f32.mrb[2].mxu0  ;;  %6472 = vmatpush1.bf16.msra.mxu0 %v21863_v51  ;;  %v21998_v51 = vld [vmem:[#allocation7 + $0x6e8] ss:$72 sps:$4 sm:$0xff]  }
 0x350   : > { %v6090_v61 = vpop.f32.mrb[3].mxu0  ;;  %6473 = vmatprep.subr.bf16.mxu0 %v21871_v52  ;;  %6593 = vmatpush1.bf16.msra.mxu1 %v21950_v14  ;;  %v22006_v52 = vld [vmem:[#allocation7 + $0x77c] ss:$72 sps:$4 sm:$0xff]   ;;  %v22004_v57 = vld [vmem:[#allocation7 + $0x778] ss:$72 sps:$4 sm:$0xff]  }
 0x351   : > { %6594 = vmatprep.subr.bf16.mxu1 %v21958_v15  ;;  %v21955_v61 = vld [vmem:[#allocation7 + $0xb64] ss:$72 sps:$4 sm:$0xff]   ;;  %v22028_v14 = vld [vmem:[#allocation7 + $0x9b8] ss:$72 sps:$4 sm:$0xff]  }
 0x352   : > { %v25875_v23 = vpop.f32.mrb[0].mxu1  ;;  %v22036_v15 = vld [vmem:[#allocation7 + $0xa4c] ss:$72 sps:$4 sm:$0xff]  }
 0x353   : > { %6474 = vmatpush1.bf16.msra.mxu0 %v21869_v59  ;;  %v25877_v24 = vpop.f32.mrb[1].mxu1  ;;  %v22012_v59 = vld [vmem:[#allocation7 + $0x80c] ss:$72 sps:$4 sm:$0xff]  }
 0x354   : > { %6475 = vmatprep.subr.bf16.mxu0 %v21877_v60  ;;  %v6212_v27 = vpop.f32.mrb[2].mxu1  ;;  %6595 = vmatpush1.bf16.msra.mxu1 %v21956_v19  ;;  %v21947_v60 = vld [vmem:[#allocation7 + $0xad0] ss:$72 sps:$4 sm:$0xff]  }
 0x355   : > { %v6213_v28 = vpop.f32.mrb[3].mxu1  ;;  %6596 = vmatprep.subr.bf16.mxu1 %v21964_v20  ;;  %v22034_v19 = vld [vmem:[#allocation7 + $0xa48] ss:$72 sps:$4 sm:$0xff]   ;;  %v22042_v20 = vld [vmem:[#allocation7 + $0xadc] ss:$72 sps:$4 sm:$0xff]  }
 0x356   : > { %v21983_v27 = vld [vmem:[#allocation7 + $0xe30] ss:$72 sps:$4 sm:$0xff]   ;;  %v21991_v28 = vld [vmem:[#allocation7 + $0xec4] ss:$72 sps:$4 sm:$0xff]  }
 0x357   : > { %6476 = vmatpush1.bf16.msra.mxu0 %v21875_v0  ;;  %v21953_v0 = vld [vmem:[#allocation7 + $0xb60] ss:$72 sps:$4 sm:$0xff]  }
 0x358   : > { %6477 = vmatprep.subr.bf16.mxu0 %v21883_v3  ;;  %6597 = vmatpush1.bf16.msra.mxu1 %v21962_v25  ;;  %v21961_v3 = vld [vmem:[#allocation7 + $0xbf4] ss:$72 sps:$4 sm:$0xff]   ;;  %v22040_v25 = vld [vmem:[#allocation7 + $0xad8] ss:$72 sps:$4 sm:$0xff]  }
 0x359   : > { %6598 = vmatprep.subr.bf16.mxu1 %v21970_v26  ;;  %v22048_v26 = vld [vmem:[#allocation7 + $0xb6c] ss:$72 sps:$4 sm:$0xff]  }
 0x35b   : > { %6478 = vmatpush1.bf16.msra.mxu0 %v21881_v7  ;;  %v21959_v7 = vld [vmem:[#allocation7 + $0xbf0] ss:$72 sps:$4 sm:$0xff]  }
 0x35c   : > { %6479 = vmatprep.subr.bf16.mxu0 %v21889_v8  ;;  %6599 = vmatpush1.bf16.msra.mxu1 %v21968_v31  ;;  %v21967_v8 = vld [vmem:[#allocation7 + $0xc84] ss:$72 sps:$4 sm:$0xff]   ;;  %v21989_v31 = vld [vmem:[#allocation7 + $0xec0] ss:$72 sps:$4 sm:$0xff]  }
 0x35d   : > { %6600 = vmatprep.subr.bf16.mxu1 %v21976_v32  ;;  %v21997_v32 = vld [vmem:[#allocation7 + $0xf54] ss:$72 sps:$4 sm:$0xff]  }
 0x35f   : > { %6480 = vmatpush1.bf16.msra.mxu0 %v21887_v12  ;;  %v22030_v12 = vld [vmem:[#allocation7 + $0x9bc] ss:$72 sps:$4 sm:$0xff]  }
 0x360   : > { %6481 = vmatprep.subr.bf16.mxu0 %v21895_v13  ;;  %6601 = vmatpush1.bf16.msra.mxu1 %v21974_v35  ;;  %v21973_v13 = vld [vmem:[#allocation7 + $0xd14] ss:$72 sps:$4 sm:$0xff]   ;;  %v21995_v35 = vld [vmem:[#allocation7 + $0xf50] ss:$72 sps:$4 sm:$0xff]  }
 0x361   : > { %6602 = vmatprep.subr.bf16.mxu1 %v21982_v36  ;;  %v22003_v36 = vld [vmem:[#allocation7 + $0xfe4] ss:$72 sps:$4 sm:$0xff]  }
 0x363   : > { %6482 = vmatpush1.bf16.msra.mxu0 %v21893_v16  ;;  %v21971_v16 = vld [vmem:[#allocation7 + $0xd10] ss:$72 sps:$4 sm:$0xff]  }
 0x364   : > { %6483 = vmatprep.subr.bf16.mxu0 %v21901_v18  ;;  %6603 = vmatpush1.bf16.msra.mxu1 %v21980_v39  ;;  %v21979_v18 = vld [vmem:[#allocation7 + $0xda4] ss:$72 sps:$4 sm:$0xff]   ;;  %v22001_v39 = vld [vmem:[#allocation7 + $0xfe0] ss:$72 sps:$4 sm:$0xff]  }
 0x365   : > { %6604 = vmatprep.subr.bf16.mxu1 %v21988_v40  ;;  %v22009_v40 = vld [vmem:[#allocation7 + $0x1074] ss:$72 sps:$4 sm:$0xff]  }
 0x367   : > { %6484 = vmatpush1.bf16.msra.mxu0 %v21899_v21  ;;  %v21977_v21 = vld [vmem:[#allocation7 + $0xda0] ss:$72 sps:$4 sm:$0xff]  }
 0x368   : > { %6485 = vmatprep.subr.bf16.mxu0 %v21907_v22  ;;  %6605 = vmatpush1.bf16.msra.mxu1 %v21986_v43  ;;  %v21985_v22 = vld [vmem:[#allocation7 + $0xe34] ss:$72 sps:$4 sm:$0xff]   ;;  %v22007_v43 = vld [vmem:[#allocation7 + $0x1070] ss:$72 sps:$4 sm:$0xff]  }
 0x369   : > { %6606 = vmatprep.subr.bf16.mxu1 %v21994_v44  ;;  %v22015_v44 = vld [vmem:[#allocation7 + $0x1104] ss:$72 sps:$4 sm:$0xff]  }
 0x36b   : > { %6486 = vmatpush1.bf16.msra.mxu0 %v21905_v29  ;;  %v22046_v29 = vld [vmem:[#allocation7 + $0xb68] ss:$72 sps:$4 sm:$0xff]  }
 0x36c   : > { %6487 = vmatprep.subr.bf16.mxu0 %v21913_v30  ;;  %6607 = vmatpush1.bf16.msra.mxu1 %v21992_v47  ;;  %v22054_v30 = vld [vmem:[#allocation7 + $0xbfc] ss:$72 sps:$4 sm:$0xff]   ;;  %v22013_v47 = vld [vmem:[#allocation7 + $0x1100] ss:$72 sps:$4 sm:$0xff]  }
 0x36d   : > { %6608 = vmatprep.subr.bf16.mxu1 %v22000_v48  ;;  %v22021_v48 = vld [vmem:[#allocation7 + $0x1194] ss:$72 sps:$4 sm:$0xff]  }
 0x36f   : > { %6488 = vmatpush1.bf16.msra.mxu0 %v21911_v33  ;;  %v22052_v33 = vld [vmem:[#allocation7 + $0xbf8] ss:$72 sps:$4 sm:$0xff]  }
 0x370   : > { %6489 = vmatprep.subr.bf16.mxu0 %v21919_v34  ;;  %6609 = vmatpush1.bf16.msra.mxu1 %v21998_v51  ;;  %v22060_v34 = vld [vmem:[#allocation7 + $0xc8c] ss:$72 sps:$4 sm:$0xff]   ;;  %v22019_v51 = vld [vmem:[#allocation7 + $0x1190] ss:$72 sps:$4 sm:$0xff]  }
 0x371   : > { %6610 = vmatprep.subr.bf16.mxu1 %v22006_v52  ;;  %v22027_v52 = vld [vmem:[#allocation7 + $0x1224] ss:$72 sps:$4 sm:$0xff]  }
 0x373   : > { %6490 = vmatpush1.bf16.msra.mxu0 %v21917_v37  ;;  %v22058_v37 = vld [vmem:[#allocation7 + $0xc88] ss:$72 sps:$4 sm:$0xff]  }
 0x374   : > { %6491 = vmatprep.subr.bf16.mxu0 %v21925_v38  ;;  %6611 = vmatpush1.bf16.msra.mxu1 %v22004_v57  ;;  %v22066_v38 = vld [vmem:[#allocation7 + $0xd1c] ss:$72 sps:$4 sm:$0xff]   ;;  %v22025_v57 = vld [vmem:[#allocation7 + $0x1220] ss:$72 sps:$4 sm:$0xff]  }
 0x375   : > { %6612 = vmatprep.subr.bf16.mxu1 %v22012_v59  ;;  %v22033_v59 = vld [vmem:[#allocation7 + $0x12b4] ss:$72 sps:$4 sm:$0xff]  }
 0x377   : > { %6492 = vmatpush1.bf16.msra.mxu0 %v21923_v41  ;;  %v22064_v41 = vld [vmem:[#allocation7 + $0xd18] ss:$72 sps:$4 sm:$0xff]  }
 0x378   : > { %6502 = vmatprep.subr.bf16.mxu0 %v21931_v42  ;;  %6613 = vmatpush1.bf16.msra.mxu1 %v22010_v62  ;;  %v22072_v42 = vld [vmem:[#allocation7 + $0xdac] ss:$72 sps:$4 sm:$0xff]   ;;  %v22031_v62 = vld [vmem:[#allocation7 + $0x12b0] ss:$72 sps:$4 sm:$0xff]  }
 0x379   : > { %6614 = vmatprep.subr.bf16.mxu1 %v22018_v63  ;;  %v22039_v63 = vld [vmem:[#allocation7 + $0x1344] ss:$72 sps:$4 sm:$0xff]  }
 0x37a   : > { %6494 = vmatmul.mubr.bf16.vlgmr.msra.gmra.mrb[8].mxu0 %v25833_v58 }
 0x37b   : > { %6503 = vmatpush1.bf16.msra.mxu0 %v21929_v45  ;;  %6534 = vmatprep.mubr.bf16.mxu0 %v25837_v2  ;;  %v22070_v45 = vld [vmem:[#allocation7 + $0xda8] ss:$72 sps:$4 sm:$0xff]  }
 0x37c   : > { %6504 = vmatprep.subr.bf16.mxu0 %v21937_v46  ;;  %6615 = vmatpush1.bf16.msra.mxu1 %v22016_v4  ;;  %v22078_v46 = vld [vmem:[#allocation7 + $0xe3c] ss:$72 sps:$4 sm:$0xff]   ;;  %v22037_v4 = vld [vmem:[#allocation7 + $0x1340] ss:$72 sps:$4 sm:$0xff]  }
 0x37d   : > { %6625 = vmatprep.subr.bf16.mxu1 %v22024_v6  ;;  %v22045_v6 = vld [vmem:[#allocation7 + $0x13d4] ss:$72 sps:$4 sm:$0xff]  }
 0x37f   : > { %6505 = vmatpush1.bf16.msra.mxu0 %v21935_v49  ;;  %6617 = vmatmul.mubr.bf16.vlgmr.msra.gmra.mrb[8].mxu1 %v25833_v58  ;;  %v22076_v49 = vld [vmem:[#allocation7 + $0xe38] ss:$72 sps:$4 sm:$0xff]  }
 0x380   : > { %6506 = vmatprep.subr.bf16.mxu0 %v21943_v50  ;;  %6626 = vmatpush1.bf16.msra.mxu1 %v22022_v9  ;;  %v22084_v50 = vld [vmem:[#allocation7 + $0xecc] ss:$72 sps:$4 sm:$0xff]   ;;  %v22043_v9 = vld [vmem:[#allocation7 + $0x13d0] ss:$72 sps:$4 sm:$0xff]  }
 0x381   : > { %6657 = vmatprep.mubr.bf16.mxu1 %v25837_v2  ;;  %6627 = vmatprep.subr.bf16.mxu1 %v22030_v12  ;;  %v22106_v12 = vld [vmem:[#allocation7 + $0x1108] ss:$72 sps:$4 sm:$0xff]  }
 0x383   : > { %6507 = vmatpush1.bf16.msra.mxu0 %v21941_v53  ;;  %v22082_v53 = vld [vmem:[#allocation7 + $0xec8] ss:$72 sps:$4 sm:$0xff]  }
 0x384   : > { %6508 = vmatprep.subr.bf16.mxu0 %v21949_v54  ;;  %6628 = vmatpush1.bf16.msra.mxu1 %v22028_v14  ;;  %v22090_v54 = vld [vmem:[#allocation7 + $0xf5c] ss:$72 sps:$4 sm:$0xff]   ;;  %v22049_v14 = vld [vmem:[#allocation7 + $0x1460] ss:$72 sps:$4 sm:$0xff]  }
 0x385   : > { %6629 = vmatprep.subr.bf16.mxu1 %v22036_v15  ;;  %v22057_v15 = vld [vmem:[#allocation7 + $0x14f4] ss:$72 sps:$4 sm:$0xff]  }
 0x387   : > { %6509 = vmatpush1.bf16.msra.mxu0 %v21947_v60  ;;  %v22088_v60 = vld [vmem:[#allocation7 + $0xf58] ss:$72 sps:$4 sm:$0xff]  }
 0x388   : > { %6510 = vmatprep.subr.bf16.mxu0 %v21955_v61  ;;  %6630 = vmatpush1.bf16.msra.mxu1 %v22034_v19  ;;  %v22096_v61 = vld [vmem:[#allocation7 + $0xfec] ss:$72 sps:$4 sm:$0xff]   ;;  %v22055_v19 = vld [vmem:[#allocation7 + $0x14f0] ss:$72 sps:$4 sm:$0xff]  }
 0x389   : > { %6631 = vmatprep.subr.bf16.mxu1 %v22042_v20  ;;  %v22063_v20 = vld [vmem:[#allocation7 + $0x1584] ss:$72 sps:$4 sm:$0xff]  }
 0x38b   : > { %6511 = vmatpush1.bf16.msra.mxu0 %v21953_v0  ;;  %v22094_v0 = vld [vmem:[#allocation7 + $0xfe8] ss:$72 sps:$4 sm:$0xff]  }
 0x38c   : > { %6512 = vmatprep.subr.bf16.mxu0 %v21961_v3  ;;  %6632 = vmatpush1.bf16.msra.mxu1 %v22040_v25  ;;  %v22102_v3 = vld [vmem:[#allocation7 + $0x107c] ss:$72 sps:$4 sm:$0xff]   ;;  %v22061_v25 = vld [vmem:[#allocation7 + $0x1580] ss:$72 sps:$4 sm:$0xff]  }
 0x38d   : > { %6633 = vmatprep.subr.bf16.mxu1 %v22048_v26  ;;  %v22069_v26 = vld [vmem:[#allocation7 + $0x1614] ss:$72 sps:$4 sm:$0xff]  }
 0x38f   : > { %6513 = vmatpush1.bf16.msra.mxu0 %v21959_v7  ;;  %v22100_v7 = vld [vmem:[#allocation7 + $0x1078] ss:$72 sps:$4 sm:$0xff]  }
 0x390   : > { %6514 = vmatprep.subr.bf16.mxu0 %v21967_v8  ;;  %6634 = vmatpush1.bf16.msra.mxu1 %v22046_v29  ;;  %v22108_v8 = vld [vmem:[#allocation7 + $0x110c] ss:$72 sps:$4 sm:$0xff]   ;;  %v22067_v29 = vld [vmem:[#allocation7 + $0x1610] ss:$72 sps:$4 sm:$0xff]  }
 0x391   : > { %6635 = vmatprep.subr.bf16.mxu1 %v22054_v30  ;;  %v22075_v30 = vld [vmem:[#allocation7 + $0x16a4] ss:$72 sps:$4 sm:$0xff]  }
 0x393   : > { %6515 = vmatpush1.bf16.msra.mxu0 %v21965_v11  ;;  %v22051_v11 = vld [vmem:[#allocation7 + $0x1464] ss:$72 sps:$4 sm:$0xff]  }
 0x394   : > { %6516 = vmatprep.subr.bf16.mxu0 %v21973_v13  ;;  %6636 = vmatpush1.bf16.msra.mxu1 %v22052_v33  ;;  %v22114_v13 = vld [vmem:[#allocation7 + $0x119c] ss:$72 sps:$4 sm:$0xff]   ;;  %v22073_v33 = vld [vmem:[#allocation7 + $0x16a0] ss:$72 sps:$4 sm:$0xff]  }
 0x395   : > { %6637 = vmatprep.subr.bf16.mxu1 %v22060_v34  ;;  %v22081_v34 = vld [vmem:[#allocation7 + $0x1734] ss:$72 sps:$4 sm:$0xff]  }
 0x397   : > { %6517 = vmatpush1.bf16.msra.mxu0 %v21971_v16  ;;  %v22112_v16 = vld [vmem:[#allocation7 + $0x1198] ss:$72 sps:$4 sm:$0xff]  }
 0x398   : > { %6518 = vmatprep.subr.bf16.mxu0 %v21979_v18  ;;  %6638 = vmatpush1.bf16.msra.mxu1 %v22058_v37  ;;  %v22120_v18 = vld [vmem:[#allocation7 + $0x122c] ss:$72 sps:$4 sm:$0xff]   ;;  %v22079_v37 = vld [vmem:[#allocation7 + $0x1730] ss:$72 sps:$4 sm:$0xff]  }
 0x399   : > { %6639 = vmatprep.subr.bf16.mxu1 %v22066_v38  ;;  %v22087_v38 = vld [vmem:[#allocation7 + $0x17c4] ss:$72 sps:$4 sm:$0xff]  }
 0x39b   : > { %6519 = vmatpush1.bf16.msra.mxu0 %v21977_v21  ;;  %v22118_v21 = vld [vmem:[#allocation7 + $0x1228] ss:$72 sps:$4 sm:$0xff]  }
 0x39c   : > { %6520 = vmatprep.subr.bf16.mxu0 %v21985_v22  ;;  %6640 = vmatpush1.bf16.msra.mxu1 %v22064_v41  ;;  %v22126_v22 = vld [vmem:[#allocation7 + $0x12bc] ss:$72 sps:$4 sm:$0xff]   ;;  %v22085_v41 = vld [vmem:[#allocation7 + $0x17c0] ss:$72 sps:$4 sm:$0xff]  }
 0x39d   : > { %6641 = vmatprep.subr.bf16.mxu1 %v22072_v42  ;;  %v22093_v42 = vld [vmem:[#allocation7 + $0x1854] ss:$72 sps:$4 sm:$0xff]  }
 0x39f   : > { %6521 = vmatpush1.bf16.msra.mxu0 %v21983_v27  ;;  %v22124_v27 = vld [vmem:[#allocation7 + $0x12b8] ss:$72 sps:$4 sm:$0xff]  }
 0x3a0   : > { %6522 = vmatprep.subr.bf16.mxu0 %v21991_v28  ;;  %6642 = vmatpush1.bf16.msra.mxu1 %v22070_v45  ;;  %v22132_v28 = vld [vmem:[#allocation7 + $0x134c] ss:$72 sps:$4 sm:$0xff]   ;;  %v22091_v45 = vld [vmem:[#allocation7 + $0x1850] ss:$72 sps:$4 sm:$0xff]  }
 0x3a1   : > { %6643 = vmatprep.subr.bf16.mxu1 %v22078_v46  ;;  %v22099_v46 = vld [vmem:[#allocation7 + $0x18e4] ss:$72 sps:$4 sm:$0xff]  }
 0x3a3   : > { %6523 = vmatpush1.bf16.msra.mxu0 %v21989_v31  ;;  %v22130_v31 = vld [vmem:[#allocation7 + $0x1348] ss:$72 sps:$4 sm:$0xff]  }
 0x3a4   : > { %6524 = vmatprep.subr.bf16.mxu0 %v21997_v32  ;;  %6644 = vmatpush1.bf16.msra.mxu1 %v22076_v49  ;;  %v22138_v32 = vld [vmem:[#allocation7 + $0x13dc] ss:$72 sps:$4 sm:$0xff]   ;;  %v22097_v49 = vld [vmem:[#allocation7 + $0x18e0] ss:$72 sps:$4 sm:$0xff]  }
 0x3a5   : > { %6645 = vmatprep.subr.bf16.mxu1 %v22084_v50  ;;  %v22105_v50 = vld [vmem:[#allocation7 + $0x1974] ss:$72 sps:$4 sm:$0xff]  }
 0x3a7   : > { %6525 = vmatpush1.bf16.msra.mxu0 %v21995_v35  ;;  %v22136_v35 = vld [vmem:[#allocation7 + $0x13d8] ss:$72 sps:$4 sm:$0xff]  }
 0x3a8   : > { %6526 = vmatprep.subr.bf16.mxu0 %v22003_v36  ;;  %6646 = vmatpush1.bf16.msra.mxu1 %v22082_v53  ;;  %v22144_v36 = vld [vmem:[#allocation7 + $0x146c] ss:$72 sps:$4 sm:$0xff]   ;;  %v22103_v53 = vld [vmem:[#allocation7 + $0x1970] ss:$72 sps:$4 sm:$0xff]  }
 0x3a9   : > { %6647 = vmatprep.subr.bf16.mxu1 %v22090_v54  ;;  %v22111_v54 = vld [vmem:[#allocation7 + $0x1a04] ss:$72 sps:$4 sm:$0xff]  }
 0x3ab   : > { %6527 = vmatpush1.bf16.msra.mxu0 %v22001_v39  ;;  %v22142_v39 = vld [vmem:[#allocation7 + $0x1468] ss:$72 sps:$4 sm:$0xff]  }
 0x3ac   : > { %6528 = vmatprep.subr.bf16.mxu0 %v22009_v40  ;;  %6648 = vmatpush1.bf16.msra.mxu1 %v22088_v60  ;;  %v22150_v40 = vld [vmem:[#allocation7 + $0x14fc] ss:$72 sps:$4 sm:$0xff]   ;;  %v22109_v60 = vld [vmem:[#allocation7 + $0x1a00] ss:$72 sps:$4 sm:$0xff]  }
 0x3ad   : > { %6649 = vmatprep.subr.bf16.mxu1 %v22096_v61  ;;  %v22117_v61 = vld [vmem:[#allocation7 + $0x1a94] ss:$72 sps:$4 sm:$0xff]  }
 0x3af   : > { %6529 = vmatpush1.bf16.msra.mxu0 %v22007_v43  ;;  %v22148_v43 = vld [vmem:[#allocation7 + $0x14f8] ss:$72 sps:$4 sm:$0xff]  }
 0x3b0   : > { %6530 = vmatprep.subr.bf16.mxu0 %v22015_v44  ;;  %6650 = vmatpush1.bf16.msra.mxu1 %v22094_v0  ;;  %v22156_v44 = vld [vmem:[#allocation7 + $0x158c] ss:$72 sps:$4 sm:$0xff]   ;;  %v22115_v0 = vld [vmem:[#allocation7 + $0x1a90] ss:$72 sps:$4 sm:$0xff]  }
 0x3b1   : > { %6651 = vmatprep.subr.bf16.mxu1 %v22102_v3  ;;  %v22123_v3 = vld [vmem:[#allocation7 + $0x34] ss:$72 sps:$4 sm:$0xff]  }
 0x3b3   : > { %6531 = vmatpush1.bf16.msra.mxu0 %v22013_v47  ;;  %v22154_v47 = vld [vmem:[#allocation7 + $0x1588] ss:$72 sps:$4 sm:$0xff]  }
 0x3b4   : > { %6532 = vmatprep.subr.bf16.mxu0 %v22021_v48  ;;  %6652 = vmatpush1.bf16.msra.mxu1 %v22100_v7  ;;  %v22162_v48 = vld [vmem:[#allocation7 + $0x161c] ss:$72 sps:$4 sm:$0xff]   ;;  %v22121_v7 = vld [vmem:[#allocation7 + $0x30] ss:$72 sps:$4 sm:$0xff]  }
 0x3b5   : > { %6653 = vmatprep.subr.bf16.mxu1 %v22108_v8  ;;  %v22129_v8 = vld [vmem:[#allocation7 + $0xc4] ss:$72 sps:$4 sm:$0xff]  }
 0x3b7   : > { %6533 = vmatpush1.bf16.msra.mxu0 %v22019_v51  ;;  %v22160_v51 = vld [vmem:[#allocation7 + $0x1618] ss:$72 sps:$4 sm:$0xff]  }
 0x3b8   : > { %6543 = vmatprep.subr.bf16.mxu0 %v22027_v52  ;;  %6654 = vmatpush1.bf16.msra.mxu1 %v22106_v12  ;;  %v22168_v52 = vld [vmem:[#allocation7 + $0x16ac] ss:$72 sps:$4 sm:$0xff]   ;;  %v22127_v12 = vld [vmem:[#allocation7 + $0xc0] ss:$72 sps:$4 sm:$0xff]  }
 0x3b9   : > { %6655 = vmatprep.subr.bf16.mxu1 %v22114_v13  ;;  %v22135_v13 = vld [vmem:[#allocation7 + $0x154] ss:$72 sps:$4 sm:$0xff]  }
 0x3ba   : > { %6535 = vmatmul.mubr.bf16.vlgmr.msra.gmra.mrb[8].mxu0 %v25844_v1 }
 0x3bb   : > { %6544 = vmatpush1.bf16.msra.mxu0 %v22025_v57  ;;  %6575 = vmatprep.mubr.bf16.mxu0 %v25846_v5  ;;  %v22166_v57 = vld [vmem:[#allocation7 + $0x16a8] ss:$72 sps:$4 sm:$0xff]  }
 0x3bc   : > { %6545 = vmatprep.subr.bf16.mxu0 %v22033_v59  ;;  %6656 = vmatpush1.bf16.msra.mxu1 %v22112_v16  ;;  %v22174_v59 = vld [vmem:[#allocation7 + $0x173c] ss:$72 sps:$4 sm:$0xff]   ;;  %v22133_v16 = vld [vmem:[#allocation7 + $0x150] ss:$72 sps:$4 sm:$0xff]  }
 0x3bd   : > { %6666 = vmatprep.subr.bf16.mxu1 %v22120_v18  ;;  %v22141_v18 = vld [vmem:[#allocation7 + $0x1e4] ss:$72 sps:$4 sm:$0xff]  }
 0x3bf   : > { %6546 = vmatpush1.bf16.msra.mxu0 %v22031_v62  ;;  %6658 = vmatmul.mubr.bf16.vlgmr.msra.gmra.mrb[8].mxu1 %v25844_v1  ;;  %v22172_v62 = vld [vmem:[#allocation7 + $0x1738] ss:$72 sps:$4 sm:$0xff]  }
 0x3c0   : > { %6547 = vmatprep.subr.bf16.mxu0 %v22039_v63  ;;  %6667 = vmatpush1.bf16.msra.mxu1 %v22118_v21  ;;  %v22180_v63 = vld [vmem:[#allocation7 + $0x17cc] ss:$72 sps:$4 sm:$0xff]   ;;  %v22139_v21 = vld [vmem:[#allocation7 + $0x1e0] ss:$72 sps:$4 sm:$0xff]  }
 0x3c1   : > { %6698 = vmatprep.mubr.bf16.mxu1 %v25846_v5  ;;  %6668 = vmatprep.subr.bf16.mxu1 %v22126_v22  ;;  %v22147_v22 = vld [vmem:[#allocation7 + $0x274] ss:$72 sps:$4 sm:$0xff]  }
 0x3c3   : > { %6548 = vmatpush1.bf16.msra.mxu0 %v22037_v4  ;;  %v22178_v4 = vld [vmem:[#allocation7 + $0x17c8] ss:$72 sps:$4 sm:$0xff]  }
 0x3c4   : > { %6549 = vmatprep.subr.bf16.mxu0 %v22045_v6  ;;  %6669 = vmatpush1.bf16.msra.mxu1 %v22124_v27  ;;  %v22186_v6 = vld [vmem:[#allocation7 + $0x185c] ss:$72 sps:$4 sm:$0xff]   ;;  %v22145_v27 = vld [vmem:[#allocation7 + $0x270] ss:$72 sps:$4 sm:$0xff]  }
 0x3c5   : > { %6670 = vmatprep.subr.bf16.mxu1 %v22132_v28  ;;  %v22153_v28 = vld [vmem:[#allocation7 + $0x304] ss:$72 sps:$4 sm:$0xff]  }
 0x3c7   : > { %6550 = vmatpush1.bf16.msra.mxu0 %v22043_v9  ;;  %v22184_v9 = vld [vmem:[#allocation7 + $0x1858] ss:$72 sps:$4 sm:$0xff]  }
 0x3c8   : > { %6551 = vmatprep.subr.bf16.mxu0 %v22051_v11  ;;  %6671 = vmatpush1.bf16.msra.mxu1 %v22130_v31  ;;  %v22192_v11 = vld [vmem:[#allocation7 + $0x18ec] ss:$72 sps:$4 sm:$0xff]  }
 0x3c9   : > { %6672 = vmatprep.subr.bf16.mxu1 %v22138_v32  ;;  %v22159_v31 = vld [vmem:[#allocation7 + $0x394] ss:$72 sps:$4 sm:$0xff]  }
 0x3cb   : > { %6552 = vmatpush1.bf16.msra.mxu0 %v22049_v14  ;;  %v22190_v14 = vld [vmem:[#allocation7 + $0x18e8] ss:$72 sps:$4 sm:$0xff]  }
 0x3cc   : > { %6553 = vmatprep.subr.bf16.mxu0 %v22057_v15  ;;  %6673 = vmatpush1.bf16.msra.mxu1 %v22136_v35  ;;  %v22198_v15 = vld [vmem:[#allocation7 + $0x197c] ss:$72 sps:$4 sm:$0xff]   ;;  %v22157_v35 = vld [vmem:[#allocation7 + $0x390] ss:$72 sps:$4 sm:$0xff]  }
 0x3cd   : > { %6674 = vmatprep.subr.bf16.mxu1 %v22144_v36  ;;  %v22165_v36 = vld [vmem:[#allocation7 + $0x424] ss:$72 sps:$4 sm:$0xff]  }
 0x3cf   : > { %6554 = vmatpush1.bf16.msra.mxu0 %v22055_v19  ;;  %v22196_v19 = vld [vmem:[#allocation7 + $0x1978] ss:$72 sps:$4 sm:$0xff]  }
 0x3d0   : > { %6555 = vmatprep.subr.bf16.mxu0 %v22063_v20  ;;  %6675 = vmatpush1.bf16.msra.mxu1 %v22142_v39  ;;  %v22204_v20 = vld [vmem:[#allocation7 + $0x1a0c] ss:$72 sps:$4 sm:$0xff]  }
 0x3d1   : > { %6676 = vmatprep.subr.bf16.mxu1 %v22150_v40  ;;  %v22171_v39 = vld [vmem:[#allocation7 + $0x4b4] ss:$72 sps:$4 sm:$0xff]   ;;  %v22169_v40 = vld [vmem:[#allocation7 + $0x4b0] ss:$72 sps:$4 sm:$0xff]  }
 0x3d3   : > { %6556 = vmatpush1.bf16.msra.mxu0 %v22061_v25  ;;  %v22202_v25 = vld [vmem:[#allocation7 + $0x1a08] ss:$72 sps:$4 sm:$0xff]  }
 0x3d4   : > { %6557 = vmatprep.subr.bf16.mxu0 %v22069_v26  ;;  %6677 = vmatpush1.bf16.msra.mxu1 %v22148_v43  ;;  %v22210_v26 = vld [vmem:[#allocation7 + $0x1a9c] ss:$72 sps:$4 sm:$0xff]  }
 0x3d5   : > { %6678 = vmatprep.subr.bf16.mxu1 %v22156_v44  ;;  %v22183_v43 = vld [vmem:[#allocation7 + $0x5d4] ss:$72 sps:$4 sm:$0xff]   ;;  %v22181_v44 = vld [vmem:[#allocation7 + $0x5d0] ss:$72 sps:$4 sm:$0xff]  }
 0x3d7   : > { %6558 = vmatpush1.bf16.msra.mxu0 %v22067_v29  ;;  %v22208_v29 = vld [vmem:[#allocation7 + $0x1a98] ss:$72 sps:$4 sm:$0xff]  }
 0x3d8   : > { %6559 = vmatprep.subr.bf16.mxu0 %v22075_v30  ;;  %6679 = vmatpush1.bf16.msra.mxu1 %v22154_v47  ;;  %v22151_v30 = vld [vmem:[#allocation7 + $0x300] ss:$72 sps:$4 sm:$0xff]   ;;  %v22195_v47 = vld [vmem:[#allocation7 + $0x6f4] ss:$72 sps:$4 sm:$0xff]  }
 0x3d9   : > { %6680 = vmatprep.subr.bf16.mxu1 %v22162_v48 }
 0x3db   : > { %6560 = vmatpush1.bf16.msra.mxu0 %v22073_v33 }
 0x3dc   : > { %6561 = vmatprep.subr.bf16.mxu0 %v22081_v34  ;;  %6681 = vmatpush1.bf16.msra.mxu1 %v22160_v51 }
 0x3dd   : > { %6682 = vmatprep.subr.bf16.mxu1 %v22168_v52  ;;  %v22193_v52 = vld [vmem:[#allocation7 + $0x6f0] ss:$72 sps:$4 sm:$0xff]  }
 0x3df   : > { %6562 = vmatpush1.bf16.msra.mxu0 %v22079_v37 }
 0x3e0   : > { %6563 = vmatprep.subr.bf16.mxu0 %v22087_v38  ;;  %6683 = vmatpush1.bf16.msra.mxu1 %v22166_v57  ;;  %v22163_v38 = vld [vmem:[#allocation7 + $0x420] ss:$72 sps:$4 sm:$0xff]   ;;  %v22207_v57 = vld [vmem:[#allocation7 + $0x814] ss:$72 sps:$4 sm:$0xff]  }
 0x3e1   : > { %6684 = vmatprep.subr.bf16.mxu1 %v22174_v59  ;;  %v22205_v59 = vld [vmem:[#allocation7 + $0x810] ss:$72 sps:$4 sm:$0xff]  }
 0x3e3   : > { %6564 = vmatpush1.bf16.msra.mxu0 %v22085_v41  ;;  %v22177_v41 = vld [vmem:[#allocation7 + $0x544] ss:$72 sps:$4 sm:$0xff]  }
 0x3e4   : > { %6565 = vmatprep.subr.bf16.mxu0 %v22093_v42  ;;  %6685 = vmatpush1.bf16.msra.mxu1 %v22172_v62  ;;  %v22175_v42 = vld [vmem:[#allocation7 + $0x540] ss:$72 sps:$4 sm:$0xff]   ;;  %v22216_v62 = vld [vmem:[#allocation7 + $0x934] ss:$72 sps:$4 sm:$0xff]  }
 0x3e5   : > { %6686 = vmatprep.subr.bf16.mxu1 %v22180_v63  ;;  %v22214_v63 = vld [vmem:[#allocation7 + $0x930] ss:$72 sps:$4 sm:$0xff]  }
 0x3e7   : > { %6566 = vmatpush1.bf16.msra.mxu0 %v22091_v45  ;;  %v22189_v45 = vld [vmem:[#allocation7 + $0x664] ss:$72 sps:$4 sm:$0xff]  }
 0x3e8   : > { %6567 = vmatprep.subr.bf16.mxu0 %v22099_v46  ;;  %6687 = vmatpush1.bf16.msra.mxu1 %v22178_v4  ;;  %v22187_v46 = vld [vmem:[#allocation7 + $0x660] ss:$72 sps:$4 sm:$0xff]   ;;  %v22222_v4 = vld [vmem:[#allocation7 + $0xa54] ss:$72 sps:$4 sm:$0xff]  }
 0x3e9   : > { %6688 = vmatprep.subr.bf16.mxu1 %v22186_v6  ;;  %v22220_v6 = vld [vmem:[#allocation7 + $0xa50] ss:$72 sps:$4 sm:$0xff]  }
 0x3eb   : > { %6568 = vmatpush1.bf16.msra.mxu0 %v22097_v49 }
 0x3ec   : > { %6569 = vmatprep.subr.bf16.mxu0 %v22105_v50  ;;  %6689 = vmatpush1.bf16.msra.mxu1 %v22184_v9  ;;  %v22228_v9 = vld [vmem:[#allocation7 + $0xb74] ss:$72 sps:$4 sm:$0xff]  }
 0x3ed   : > { %6690 = vmatprep.subr.bf16.mxu1 %v22192_v11  ;;  %v22226_v11 = vld [vmem:[#allocation7 + $0xb70] ss:$72 sps:$4 sm:$0xff]  }
 0x3ef   : > { %6570 = vmatpush1.bf16.msra.mxu0 %v22103_v53  ;;  %v22201_v53 = vld [vmem:[#allocation7 + $0x784] ss:$72 sps:$4 sm:$0xff]  }
 0x3f0   : > { %6571 = vmatprep.subr.bf16.mxu0 %v22111_v54  ;;  %6691 = vmatpush1.bf16.msra.mxu1 %v22190_v14  ;;  %v22199_v54 = vld [vmem:[#allocation7 + $0x780] ss:$72 sps:$4 sm:$0xff]   ;;  %v22234_v14 = vld [vmem:[#allocation7 + $0xc94] ss:$72 sps:$4 sm:$0xff]  }
 0x3f1   : > { %6692 = vmatprep.subr.bf16.mxu1 %v22198_v15  ;;  %v22232_v15 = vld [vmem:[#allocation7 + $0xc90] ss:$72 sps:$4 sm:$0xff]  }
 0x3f3   : > { %6572 = vmatpush1.bf16.msra.mxu0 %v22109_v60  ;;  %v22213_v60 = vld [vmem:[#allocation7 + $0x8a4] ss:$72 sps:$4 sm:$0xff]  }
 0x3f4   : > { %6573 = vmatprep.subr.bf16.mxu0 %v22117_v61  ;;  %6693 = vmatpush1.bf16.msra.mxu1 %v22196_v19  ;;  %v22211_v61 = vld [vmem:[#allocation7 + $0x8a0] ss:$72 sps:$4 sm:$0xff]   ;;  %v22333_v19 = vld [vmem:[#allocation7 + $0x3c] ss:$72 sps:$4 sm:$0xff]  }
 0x3f5   : > { %6694 = vmatprep.subr.bf16.mxu1 %v22204_v20  ;;  %v22235_v20 = vld [vmem:[#allocation7 + $0xd20] ss:$72 sps:$4 sm:$0xff]  }
 0x3f7   : > { %6574 = vmatpush1.bf16.msra.mxu0 %v22115_v0  ;;  %v22219_v0 = vld [vmem:[#allocation7 + $0x9c4] ss:$72 sps:$4 sm:$0xff]  }
 0x3f8   : > { %6707 = vmatprep.subr.bf16.mxu0 %v22123_v3  ;;  %6695 = vmatpush1.bf16.msra.mxu1 %v22202_v25  ;;  %v22217_v3 = vld [vmem:[#allocation7 + $0x9c0] ss:$72 sps:$4 sm:$0xff]   ;;  %v22339_v25 = vld [vmem:[#allocation7 + $0xcc] ss:$72 sps:$4 sm:$0xff]  }
 0x3f9   : > { %6696 = vmatprep.subr.bf16.mxu1 %v22210_v26  ;;  %v22238_v26 = vld [vmem:[#allocation7 + $0xdb0] ss:$72 sps:$4 sm:$0xff]  }
 0x3fa   : > { %6576 = vmatmul.mubr.bf16.vlgmr.msra.gmra.mrb[8].mxu0 %v25853_v10 }
 0x3fb   : > { %6708 = vmatpush1.bf16.msra.mxu0 %v22121_v7  ;;  %6739 = vmatprep.mubr.bf16.mxu0 %v25828_v17  ;;  %v22225_v7 = vld [vmem:[#allocation7 + $0xae4] ss:$72 sps:$4 sm:$0xff]  }
 0x3fc   : > { %6709 = vmatprep.subr.bf16.mxu0 %v22129_v8  ;;  %6697 = vmatpush1.bf16.msra.mxu1 %v22208_v29  ;;  %v22223_v8 = vld [vmem:[#allocation7 + $0xae0] ss:$72 sps:$4 sm:$0xff]   ;;  %v22345_v29 = vld [vmem:[#allocation7 + $0x15c] ss:$72 sps:$4 sm:$0xff]  }
 0x3fd   : > { %6830 = vmatprep.subr.bf16.mxu1 %v22333_v19  ;;  %v22276_v19 = vld [vmem:[#allocation7 + $0x1474] ss:$72 sps:$4 sm:$0xff]  }
 0x3ff   : > { %6710 = vmatpush1.bf16.msra.mxu0 %v22127_v12  ;;  %6699 = vmatmul.mubr.bf16.vlgmr.msra.gmra.mrb[8].mxu1 %v25853_v10  ;;  %v22231_v12 = vld [vmem:[#allocation7 + $0xc04] ss:$72 sps:$4 sm:$0xff]  }
 0x400   : > { %6711 = vmatprep.subr.bf16.mxu0 %v22135_v13  ;;  %6862 = vmatprep.mubr.bf16.mxu1 %v25828_v17  ;;  %v22229_v13 = vld [vmem:[#allocation7 + $0xc00] ss:$72 sps:$4 sm:$0xff]  }
 0x403   : > { %6712 = vmatpush1.bf16.msra.mxu0 %v22133_v16  ;;  %v22237_v16 = vld [vmem:[#allocation7 + $0xd24] ss:$72 sps:$4 sm:$0xff]  }
 0x404   : > { %6713 = vmatprep.subr.bf16.mxu0 %v22141_v18  ;;  %v22331_v18 = vld [vmem:[#allocation7 + $0x38] ss:$72 sps:$4 sm:$0xff]  }
 0x405   : > { %6831 = vmatpush1.bf16.msra.mxu1 %v22331_v18  ;;  %v22271_v18 = vld [vmem:[#allocation7 + $0x13e0] ss:$72 sps:$4 sm:$0xff]  }
 0x406   : > { %6832 = vmatprep.subr.bf16.mxu1 %v22339_v25  ;;  %v22279_v25 = vld [vmem:[#allocation7 + $0x1504] ss:$72 sps:$4 sm:$0xff]  }
 0x407   : > { %6714 = vmatpush1.bf16.msra.mxu0 %v22139_v21  ;;  %v22240_v21 = vld [vmem:[#allocation7 + $0xdb4] ss:$72 sps:$4 sm:$0xff]  }
 0x408   : > { %6715 = vmatprep.subr.bf16.mxu0 %v22147_v22  ;;  %v22337_v22 = vld [vmem:[#allocation7 + $0xc8] ss:$72 sps:$4 sm:$0xff]  }
 0x409   : > { %6833 = vmatpush1.bf16.msra.mxu1 %v22337_v22  ;;  %v22274_v22 = vld [vmem:[#allocation7 + $0x1470] ss:$72 sps:$4 sm:$0xff]  }
 0x40a   : > { %6834 = vmatprep.subr.bf16.mxu1 %v22345_v29  ;;  %v22282_v29 = vld [vmem:[#allocation7 + $0x1594] ss:$72 sps:$4 sm:$0xff]  }
 0x40b   : > { %6716 = vmatpush1.bf16.msra.mxu0 %v22145_v27  ;;  %v22243_v27 = vld [vmem:[#allocation7 + $0xe44] ss:$72 sps:$4 sm:$0xff]  }
 0x40c   : > { %6717 = vmatprep.subr.bf16.mxu0 %v22153_v28  ;;  %v22343_v28 = vld [vmem:[#allocation7 + $0x158] ss:$72 sps:$4 sm:$0xff]  }
 0x40d   : > { %v25889_v32 = vpop.f32.mrb[4].mxu0  ;;  %6835 = vmatpush1.bf16.msra.mxu1 %v22343_v28  ;;  %v22277_v28 = vld [vmem:[#allocation7 + $0x1500] ss:$72 sps:$4 sm:$0xff]  }
 0x40e   : > { %v25891_v33 = vpop.f32.mrb[5].mxu0 }
 0x40f   : > { %v6335_v34 = vpop.f32.mrb[6].mxu0  ;;  %6718 = vmatpush1.bf16.msra.mxu0 %v22151_v30  ;;  %v22241_v30 = vld [vmem:[#allocation7 + $0xe40] ss:$72 sps:$4 sm:$0xff]  }
 0x410   : > { %v6336_v37 = vpop.f32.mrb[7].mxu0  ;;  %6719 = vmatprep.subr.bf16.mxu0 %v22159_v31  ;;  %v22246_v31 = vld [vmem:[#allocation7 + $0xed4] ss:$72 sps:$4 sm:$0xff]   ;;  %v22349_v34 = vld [vmem:[#allocation7 + $0x1e8] ss:$72 sps:$4 sm:$0xff]  }
 0x411   : > { %v22249_v37 = vld [vmem:[#allocation7 + $0xf64] ss:$72 sps:$4 sm:$0xff]  }
 0x412   : > { %v25895_v48 = vpop.f32.mrb[4].mxu1 }
 0x413   : > { %6720 = vmatpush1.bf16.msra.mxu0 %v22157_v35  ;;  %v25897_v49 = vpop.f32.mrb[5].mxu1  ;;  %v22351_v35 = vld [vmem:[#allocation7 + $0x1ec] ss:$72 sps:$4 sm:$0xff]  }
 0x414   : > { %6721 = vmatprep.subr.bf16.mxu0 %v22165_v36  ;;  %v6458_v50 = vpop.f32.mrb[6].mxu1  ;;  %6836 = vmatprep.subr.bf16.mxu1 %v22351_v35  ;;  %v22244_v36 = vld [vmem:[#allocation7 + $0xed0] ss:$72 sps:$4 sm:$0xff]   ;;  %v22285_v35 = vld [vmem:[#allocation7 + $0x1624] ss:$72 sps:$4 sm:$0xff]  }
 0x415   : > { %v6459_v51 = vpop.f32.mrb[7].mxu1  ;;  %6837 = vmatpush1.bf16.msra.mxu1 %v22349_v34  ;;  %v22253_v50 = vld [vmem:[#allocation7 + $0x1080] ss:$72 sps:$4 sm:$0xff]   ;;  %v22280_v34 = vld [vmem:[#allocation7 + $0x1590] ss:$72 sps:$4 sm:$0xff]  }
 0x416   : > { %v22258_v51 = vld [vmem:[#allocation7 + $0x1114] ss:$72 sps:$4 sm:$0xff]  }
 0x417   : > { %6722 = vmatpush1.bf16.msra.mxu0 %v22163_v38  ;;  %v22355_v38 = vld [vmem:[#allocation7 + $0x278] ss:$72 sps:$4 sm:$0xff]  }
 0x418   : > { %6723 = vmatprep.subr.bf16.mxu0 %v22171_v39  ;;  %v22357_v39 = vld [vmem:[#allocation7 + $0x27c] ss:$72 sps:$4 sm:$0xff]  }
 0x419   : > { %6838 = vmatprep.subr.bf16.mxu1 %v22357_v39  ;;  %v22288_v39 = vld [vmem:[#allocation7 + $0x16b4] ss:$72 sps:$4 sm:$0xff]  }
 0x41a   : > { %6839 = vmatpush1.bf16.msra.mxu1 %v22355_v38  ;;  %v22283_v38 = vld [vmem:[#allocation7 + $0x1620] ss:$72 sps:$4 sm:$0xff]  }
 0x41b   : > { %6724 = vmatpush1.bf16.msra.mxu0 %v22169_v40  ;;  %v22247_v40 = vld [vmem:[#allocation7 + $0xf60] ss:$72 sps:$4 sm:$0xff]  }
 0x41c   : > { %6725 = vmatprep.subr.bf16.mxu0 %v22177_v41  ;;  %v22252_v41 = vld [vmem:[#allocation7 + $0xff4] ss:$72 sps:$4 sm:$0xff]  }
 0x41f   : > { %6726 = vmatpush1.bf16.msra.mxu0 %v22175_v42  ;;  %v22361_v42 = vld [vmem:[#allocation7 + $0x308] ss:$72 sps:$4 sm:$0xff]  }
 0x420   : > { %6727 = vmatprep.subr.bf16.mxu0 %v22183_v43  ;;  %v22363_v43 = vld [vmem:[#allocation7 + $0x30c] ss:$72 sps:$4 sm:$0xff]  }
 0x421   : > { %6840 = vmatprep.subr.bf16.mxu1 %v22363_v43  ;;  %v22291_v43 = vld [vmem:[#allocation7 + $0x1744] ss:$72 sps:$4 sm:$0xff]  }
 0x422   : > { %6841 = vmatpush1.bf16.msra.mxu1 %v22361_v42  ;;  %v22286_v42 = vld [vmem:[#allocation7 + $0x16b0] ss:$72 sps:$4 sm:$0xff]  }
 0x423   : > { %6728 = vmatpush1.bf16.msra.mxu0 %v22181_v44  ;;  %v22250_v44 = vld [vmem:[#allocation7 + $0xff0] ss:$72 sps:$4 sm:$0xff]  }
 0x424   : > { %6729 = vmatprep.subr.bf16.mxu0 %v22189_v45  ;;  %v22255_v45 = vld [vmem:[#allocation7 + $0x1084] ss:$72 sps:$4 sm:$0xff]  }
 0x427   : > { %6730 = vmatpush1.bf16.msra.mxu0 %v22187_v46  ;;  %v22367_v46 = vld [vmem:[#allocation7 + $0x398] ss:$72 sps:$4 sm:$0xff]  }
 0x428   : > { %6731 = vmatprep.subr.bf16.mxu0 %v22195_v47  ;;  %v22369_v47 = vld [vmem:[#allocation7 + $0x39c] ss:$72 sps:$4 sm:$0xff]  }
 0x429   : > { %6842 = vmatprep.subr.bf16.mxu1 %v22369_v47  ;;  %v22294_v47 = vld [vmem:[#allocation7 + $0x17d4] ss:$72 sps:$4 sm:$0xff]  }
 0x42a   : > { %6843 = vmatpush1.bf16.msra.mxu1 %v22367_v46  ;;  %v22289_v46 = vld [vmem:[#allocation7 + $0x1740] ss:$72 sps:$4 sm:$0xff]  }
 0x42b   : > { %6732 = vmatpush1.bf16.msra.mxu0 %v22193_v52  ;;  %v22373_v52 = vld [vmem:[#allocation7 + $0x428] ss:$72 sps:$4 sm:$0xff]  }
 0x42c   : > { %6733 = vmatprep.subr.bf16.mxu0 %v22201_v53  ;;  %v22375_v53 = vld [vmem:[#allocation7 + $0x42c] ss:$72 sps:$4 sm:$0xff]  }
 0x42d   : > { %6844 = vmatprep.subr.bf16.mxu1 %v22375_v53  ;;  %v22297_v53 = vld [vmem:[#allocation7 + $0x1864] ss:$72 sps:$4 sm:$0xff]  }
 0x42e   : > { %6845 = vmatpush1.bf16.msra.mxu1 %v22373_v52  ;;  %v22292_v52 = vld [vmem:[#allocation7 + $0x17d0] ss:$72 sps:$4 sm:$0xff]  }
 0x42f   : > { %6734 = vmatpush1.bf16.msra.mxu0 %v22199_v54  ;;  %v22256_v54 = vld [vmem:[#allocation7 + $0x1110] ss:$72 sps:$4 sm:$0xff]  }
 0x430   : > { %6735 = vmatprep.subr.bf16.mxu0 %v22207_v57  ;;  %v22261_v57 = vld [vmem:[#allocation7 + $0x11a4] ss:$72 sps:$4 sm:$0xff]  }
 0x433   : > { %6736 = vmatpush1.bf16.msra.mxu0 %v22205_v59  ;;  %v22379_v59 = vld [vmem:[#allocation7 + $0x4b8] ss:$72 sps:$4 sm:$0xff]  }
 0x434   : > { %6737 = vmatprep.subr.bf16.mxu0 %v22213_v60  ;;  %v22381_v60 = vld [vmem:[#allocation7 + $0x4bc] ss:$72 sps:$4 sm:$0xff]  }
 0x435   : > { %6846 = vmatprep.subr.bf16.mxu1 %v22381_v60  ;;  %v22300_v60 = vld [vmem:[#allocation7 + $0x18f4] ss:$72 sps:$4 sm:$0xff]  }
 0x436   : > { %6847 = vmatpush1.bf16.msra.mxu1 %v22379_v59  ;;  %v22295_v59 = vld [vmem:[#allocation7 + $0x1860] ss:$72 sps:$4 sm:$0xff]  }
 0x437   : > { %6738 = vmatpush1.bf16.msra.mxu0 %v22211_v61  ;;  %v22259_v61 = vld [vmem:[#allocation7 + $0x11a0] ss:$72 sps:$4 sm:$0xff]  }
 0x438   : > { %6748 = vmatprep.subr.bf16.mxu0 %v22216_v62  ;;  %v22264_v62 = vld [vmem:[#allocation7 + $0x1234] ss:$72 sps:$4 sm:$0xff]  }
 0x43a   : > { %6740 = vmatmul.mubr.bf16.vlgmr.msra.gmra.mrb[12].mxu0 %v25833_v58 }
 0x43b   : > { %6749 = vmatpush1.bf16.msra.mxu0 %v22214_v63  ;;  %6780 = vmatprep.mubr.bf16.mxu0 %v25837_v2  ;;  %v22385_v63 = vld [vmem:[#allocation7 + $0x548] ss:$72 sps:$4 sm:$0xff]  }
 0x43c   : > { %6750 = vmatprep.subr.bf16.mxu0 %v22219_v0  ;;  %v22387_v0 = vld [vmem:[#allocation7 + $0x54c] ss:$72 sps:$4 sm:$0xff]  }
 0x43d   : > { %6848 = vmatprep.subr.bf16.mxu1 %v22387_v0  ;;  %v22303_v0 = vld [vmem:[#allocation7 + $0x1984] ss:$72 sps:$4 sm:$0xff]  }
 0x43e   : > { %6849 = vmatpush1.bf16.msra.mxu1 %v22385_v63  ;;  %v22298_v63 = vld [vmem:[#allocation7 + $0x18f0] ss:$72 sps:$4 sm:$0xff]  }
 0x43f   : > { %6751 = vmatpush1.bf16.msra.mxu0 %v22217_v3  ;;  %v22262_v3 = vld [vmem:[#allocation7 + $0x1230] ss:$72 sps:$4 sm:$0xff]  }
 0x440   : > { %6752 = vmatprep.subr.bf16.mxu0 %v22222_v4  ;;  %v22267_v4 = vld [vmem:[#allocation7 + $0x12c4] ss:$72 sps:$4 sm:$0xff]  }
 0x443   : > { %6753 = vmatpush1.bf16.msra.mxu0 %v22220_v6  ;;  %v22391_v6 = vld [vmem:[#allocation7 + $0x5d8] ss:$72 sps:$4 sm:$0xff]  }
 0x444   : > { %6754 = vmatprep.subr.bf16.mxu0 %v22225_v7  ;;  %v22393_v7 = vld [vmem:[#allocation7 + $0x5dc] ss:$72 sps:$4 sm:$0xff]  }
 0x445   : > { %6850 = vmatprep.subr.bf16.mxu1 %v22393_v7  ;;  %v22306_v7 = vld [vmem:[#allocation7 + $0x1a14] ss:$72 sps:$4 sm:$0xff]  }
 0x446   : > { %6851 = vmatpush1.bf16.msra.mxu1 %v22391_v6  ;;  %v22301_v6 = vld [vmem:[#allocation7 + $0x1980] ss:$72 sps:$4 sm:$0xff]  }
 0x447   : > { %6755 = vmatpush1.bf16.msra.mxu0 %v22223_v8  ;;  %v22265_v8 = vld [vmem:[#allocation7 + $0x12c0] ss:$72 sps:$4 sm:$0xff]  }
 0x448   : > { %6756 = vmatprep.subr.bf16.mxu0 %v22228_v9  ;;  %v22270_v9 = vld [vmem:[#allocation7 + $0x1354] ss:$72 sps:$4 sm:$0xff]  }
 0x44b   : > { %6757 = vmatpush1.bf16.msra.mxu0 %v22226_v11  ;;  %v22397_v11 = vld [vmem:[#allocation7 + $0x668] ss:$72 sps:$4 sm:$0xff]  }
 0x44c   : > { %6758 = vmatprep.subr.bf16.mxu0 %v22231_v12  ;;  %v22399_v12 = vld [vmem:[#allocation7 + $0x66c] ss:$72 sps:$4 sm:$0xff]  }
 0x44d   : > { %6852 = vmatprep.subr.bf16.mxu1 %v22399_v12  ;;  %v22309_v12 = vld [vmem:[#allocation7 + $0x1aa4] ss:$72 sps:$4 sm:$0xff]  }
 0x44e   : > { %6853 = vmatpush1.bf16.msra.mxu1 %v22397_v11  ;;  %v22304_v11 = vld [vmem:[#allocation7 + $0x1a10] ss:$72 sps:$4 sm:$0xff]  }
 0x44f   : > { %6759 = vmatpush1.bf16.msra.mxu0 %v22229_v13  ;;  %v22268_v13 = vld [vmem:[#allocation7 + $0x1350] ss:$72 sps:$4 sm:$0xff]  }
 0x450   : > { %6760 = vmatprep.subr.bf16.mxu0 %v22234_v14  ;;  %v22273_v14 = vld [vmem:[#allocation7 + $0x13e4] ss:$72 sps:$4 sm:$0xff]  }
 0x453   : > { %6761 = vmatpush1.bf16.msra.mxu0 %v22232_v15  ;;  %v22403_v15 = vld [vmem:[#allocation7 + $0x6f8] ss:$72 sps:$4 sm:$0xff]  }
 0x454   : > { %6762 = vmatprep.subr.bf16.mxu0 %v22237_v16  ;;  %v22405_v16 = vld [vmem:[#allocation7 + $0x6fc] ss:$72 sps:$4 sm:$0xff]  }
 0x455   : > { %6854 = vmatprep.subr.bf16.mxu1 %v22405_v16  ;;  %v22312_v16 = vld [vmem:[#allocation7 + $0x44] ss:$72 sps:$4 sm:$0xff]  }
 0x456   : > { %6855 = vmatpush1.bf16.msra.mxu1 %v22403_v15  ;;  %v22307_v15 = vld [vmem:[#allocation7 + $0x1aa0] ss:$72 sps:$4 sm:$0xff]  }
 0x457   : > { %6763 = vmatpush1.bf16.msra.mxu0 %v22235_v20  ;;  %v22409_v20 = vld [vmem:[#allocation7 + $0x788] ss:$72 sps:$4 sm:$0xff]  }
 0x458   : > { %6764 = vmatprep.subr.bf16.mxu0 %v22240_v21  ;;  %v22411_v21 = vld [vmem:[#allocation7 + $0x78c] ss:$72 sps:$4 sm:$0xff]  }
 0x459   : > { %6856 = vmatprep.subr.bf16.mxu1 %v22411_v21  ;;  %v22315_v21 = vld [vmem:[#allocation7 + $0xd4] ss:$72 sps:$4 sm:$0xff]  }
 0x45a   : > { %6857 = vmatpush1.bf16.msra.mxu1 %v22409_v20  ;;  %v22310_v20 = vld [vmem:[#allocation7 + $0x40] ss:$72 sps:$4 sm:$0xff]  }
 0x45b   : > { %6765 = vmatpush1.bf16.msra.mxu0 %v22238_v26  ;;  %v22415_v26 = vld [vmem:[#allocation7 + $0x818] ss:$72 sps:$4 sm:$0xff]  }
 0x45c   : > { %6766 = vmatprep.subr.bf16.mxu0 %v22243_v27  ;;  %v22417_v27 = vld [vmem:[#allocation7 + $0x81c] ss:$72 sps:$4 sm:$0xff]  }
 0x45d   : > { %6858 = vmatprep.subr.bf16.mxu1 %v22417_v27  ;;  %v22318_v27 = vld [vmem:[#allocation7 + $0x164] ss:$72 sps:$4 sm:$0xff]  }
 0x45e   : > { %6859 = vmatpush1.bf16.msra.mxu1 %v22415_v26  ;;  %v22313_v26 = vld [vmem:[#allocation7 + $0xd0] ss:$72 sps:$4 sm:$0xff]  }
 0x45f   : > { %6767 = vmatpush1.bf16.msra.mxu0 %v22241_v30  ;;  %v22421_v30 = vld [vmem:[#allocation7 + $0x8a8] ss:$72 sps:$4 sm:$0xff]  }
 0x460   : > { %6768 = vmatprep.subr.bf16.mxu0 %v22246_v31  ;;  %v22423_v31 = vld [vmem:[#allocation7 + $0x8ac] ss:$72 sps:$4 sm:$0xff]  }
 0x461   : > { %6860 = vmatprep.subr.bf16.mxu1 %v22423_v31  ;;  %v22321_v31 = vld [vmem:[#allocation7 + $0x1f4] ss:$72 sps:$4 sm:$0xff]  }
 0x462   : > { %6861 = vmatpush1.bf16.msra.mxu1 %v22421_v30  ;;  %v22316_v30 = vld [vmem:[#allocation7 + $0x160] ss:$72 sps:$4 sm:$0xff]  }
 0x463   : > { %6769 = vmatpush1.bf16.msra.mxu0 %v22244_v36  ;;  %v22427_v36 = vld [vmem:[#allocation7 + $0x938] ss:$72 sps:$4 sm:$0xff]  }
 0x464   : > { %6770 = vmatprep.subr.bf16.mxu0 %v22249_v37  ;;  %v22429_v37 = vld [vmem:[#allocation7 + $0x93c] ss:$72 sps:$4 sm:$0xff]  }
 0x465   : > { %6871 = vmatprep.subr.bf16.mxu1 %v22429_v37  ;;  %6863 = vmatmul.mubr.bf16.vlgmr.msra.gmra.mrb[12].mxu1 %v25833_v58  ;;  %v22324_v37 = vld [vmem:[#allocation7 + $0x284] ss:$72 sps:$4 sm:$0xff]  }
 0x466   : > { %6872 = vmatpush1.bf16.msra.mxu1 %v22427_v36  ;;  %6903 = vmatprep.mubr.bf16.mxu1 %v25837_v2  ;;  %v22319_v36 = vld [vmem:[#allocation7 + $0x1f0] ss:$72 sps:$4 sm:$0xff]  }
 0x467   : > { %6771 = vmatpush1.bf16.msra.mxu0 %v22247_v40  ;;  %v22433_v40 = vld [vmem:[#allocation7 + $0x9c8] ss:$72 sps:$4 sm:$0xff]  }
 0x468   : > { %6772 = vmatprep.subr.bf16.mxu0 %v22252_v41  ;;  %v22435_v41 = vld [vmem:[#allocation7 + $0x9cc] ss:$72 sps:$4 sm:$0xff]  }
 0x469   : > { %6873 = vmatprep.subr.bf16.mxu1 %v22435_v41  ;;  %v22511_v41 = vld [vmem:[#allocation7 + $0x1118] ss:$72 sps:$4 sm:$0xff]  }
 0x46a   : > { %6874 = vmatpush1.bf16.msra.mxu1 %v22433_v40  ;;  %v22327_v40 = vld [vmem:[#allocation7 + $0x314] ss:$72 sps:$4 sm:$0xff]  }
 0x46b   : > { %6773 = vmatpush1.bf16.msra.mxu0 %v22250_v44  ;;  %v22439_v44 = vld [vmem:[#allocation7 + $0xa58] ss:$72 sps:$4 sm:$0xff]  }
 0x46c   : > { %6774 = vmatprep.subr.bf16.mxu0 %v22255_v45  ;;  %v22441_v45 = vld [vmem:[#allocation7 + $0xa5c] ss:$72 sps:$4 sm:$0xff]  }
 0x46d   : > { %6875 = vmatprep.subr.bf16.mxu1 %v22441_v45  ;;  %v22517_v45 = vld [vmem:[#allocation7 + $0x11a8] ss:$72 sps:$4 sm:$0xff]  }
 0x46e   : > { %6876 = vmatpush1.bf16.msra.mxu1 %v22439_v44  ;;  %v22330_v44 = vld [vmem:[#allocation7 + $0x3a4] ss:$72 sps:$4 sm:$0xff]  }
 0x46f   : > { %6775 = vmatpush1.bf16.msra.mxu0 %v22253_v50  ;;  %v22445_v50 = vld [vmem:[#allocation7 + $0xae8] ss:$72 sps:$4 sm:$0xff]  }
 0x470   : > { %6776 = vmatprep.subr.bf16.mxu0 %v22258_v51  ;;  %v22447_v51 = vld [vmem:[#allocation7 + $0xaec] ss:$72 sps:$4 sm:$0xff]  }
 0x471   : > { %6877 = vmatprep.subr.bf16.mxu1 %v22447_v51 }
 0x472   : > { %6878 = vmatpush1.bf16.msra.mxu1 %v22445_v50 }
 0x473   : > { %6777 = vmatpush1.bf16.msra.mxu0 %v22256_v54  ;;  %v22451_v54 = vld [vmem:[#allocation7 + $0xb78] ss:$72 sps:$4 sm:$0xff]  }
 0x474   : > { %6778 = vmatprep.subr.bf16.mxu0 %v22261_v57  ;;  %v22453_v57 = vld [vmem:[#allocation7 + $0xb7c] ss:$72 sps:$4 sm:$0xff]  }
 0x475   : > { %6879 = vmatprep.subr.bf16.mxu1 %v22453_v57  ;;  %v22523_v57 = vld [vmem:[#allocation7 + $0x1238] ss:$72 sps:$4 sm:$0xff]  }
 0x476   : > { %6880 = vmatpush1.bf16.msra.mxu1 %v22451_v54 }
 0x477   : > { %6779 = vmatpush1.bf16.msra.mxu0 %v22259_v61  ;;  %v22457_v61 = vld [vmem:[#allocation7 + $0xc08] ss:$72 sps:$4 sm:$0xff]  }
 0x478   : > { %6789 = vmatprep.subr.bf16.mxu0 %v22264_v62  ;;  %v22459_v62 = vld [vmem:[#allocation7 + $0xc0c] ss:$72 sps:$4 sm:$0xff]  }
 0x479   : > { %6881 = vmatprep.subr.bf16.mxu1 %v22459_v62  ;;  %v22529_v62 = vld [vmem:[#allocation7 + $0x12c8] ss:$72 sps:$4 sm:$0xff]  }
 0x47a   : > { %6781 = vmatmul.mubr.bf16.vlgmr.msra.gmra.mrb[12].mxu0 %v25844_v1  ;;  %6882 = vmatpush1.bf16.msra.mxu1 %v22457_v61  ;;  %v22342_v61 = vld [vmem:[#allocation7 + $0x4c4] ss:$72 sps:$4 sm:$0xff]  }
 0x47b   : > { %6790 = vmatpush1.bf16.msra.mxu0 %v22262_v3  ;;  %6821 = vmatprep.mubr.bf16.mxu0 %v25846_v5  ;;  %v22463_v3 = vld [vmem:[#allocation7 + $0xc98] ss:$72 sps:$4 sm:$0xff]  }
 0x47c   : > { %6791 = vmatprep.subr.bf16.mxu0 %v22267_v4  ;;  %v22465_v4 = vld [vmem:[#allocation7 + $0xc9c] ss:$72 sps:$4 sm:$0xff]  }
 0x47d   : > { %6883 = vmatprep.subr.bf16.mxu1 %v22465_v4  ;;  %v22535_v4 = vld [vmem:[#allocation7 + $0x1358] ss:$72 sps:$4 sm:$0xff]  }
 0x47e   : > { %6884 = vmatpush1.bf16.msra.mxu1 %v22463_v3  ;;  %v22348_v3 = vld [vmem:[#allocation7 + $0x554] ss:$72 sps:$4 sm:$0xff]  }
 0x47f   : > { %6792 = vmatpush1.bf16.msra.mxu0 %v22265_v8  ;;  %v22469_v8 = vld [vmem:[#allocation7 + $0xd28] ss:$72 sps:$4 sm:$0xff]  }
 0x480   : > { %6793 = vmatprep.subr.bf16.mxu0 %v22270_v9  ;;  %v22471_v9 = vld [vmem:[#allocation7 + $0xd2c] ss:$72 sps:$4 sm:$0xff]  }
 0x481   : > { %6885 = vmatprep.subr.bf16.mxu1 %v22471_v9  ;;  %v22541_v9 = vld [vmem:[#allocation7 + $0x13e8] ss:$72 sps:$4 sm:$0xff]  }
 0x482   : > { %6886 = vmatpush1.bf16.msra.mxu1 %v22469_v8  ;;  %v22354_v8 = vld [vmem:[#allocation7 + $0x5e4] ss:$72 sps:$4 sm:$0xff]  }
 0x483   : > { %6794 = vmatpush1.bf16.msra.mxu0 %v22268_v13  ;;  %v22475_v13 = vld [vmem:[#allocation7 + $0xdb8] ss:$72 sps:$4 sm:$0xff]  }
 0x484   : > { %6795 = vmatprep.subr.bf16.mxu0 %v22273_v14  ;;  %v22477_v14 = vld [vmem:[#allocation7 + $0xdbc] ss:$72 sps:$4 sm:$0xff]  }
 0x485   : > { %6887 = vmatprep.subr.bf16.mxu1 %v22477_v14  ;;  %v22547_v14 = vld [vmem:[#allocation7 + $0x1478] ss:$72 sps:$4 sm:$0xff]  }
 0x486   : > { %6888 = vmatpush1.bf16.msra.mxu1 %v22475_v13  ;;  %v22360_v13 = vld [vmem:[#allocation7 + $0x674] ss:$72 sps:$4 sm:$0xff]  }
 0x487   : > { %6796 = vmatpush1.bf16.msra.mxu0 %v22271_v18  ;;  %v22481_v18 = vld [vmem:[#allocation7 + $0xe48] ss:$72 sps:$4 sm:$0xff]  }
 0x488   : > { %6797 = vmatprep.subr.bf16.mxu0 %v22276_v19  ;;  %v22483_v19 = vld [vmem:[#allocation7 + $0xe4c] ss:$72 sps:$4 sm:$0xff]  }
 0x489   : > { %6889 = vmatprep.subr.bf16.mxu1 %v22483_v19 }
 0x48a   : > { %6890 = vmatpush1.bf16.msra.mxu1 %v22481_v18  ;;  %v22366_v18 = vld [vmem:[#allocation7 + $0x704] ss:$72 sps:$4 sm:$0xff]  }
 0x48b   : > { %6798 = vmatpush1.bf16.msra.mxu0 %v22274_v22  ;;  %v22487_v22 = vld [vmem:[#allocation7 + $0xed8] ss:$72 sps:$4 sm:$0xff]  }
 0x48c   : > { %6799 = vmatprep.subr.bf16.mxu0 %v22279_v25  ;;  %v22489_v25 = vld [vmem:[#allocation7 + $0xedc] ss:$72 sps:$4 sm:$0xff]  }
 0x48d   : > { %6891 = vmatprep.subr.bf16.mxu1 %v22489_v25 }
 0x48e   : > { %6892 = vmatpush1.bf16.msra.mxu1 %v22487_v22  ;;  %v22555_v22 = vld [vmem:[#allocation7 + $0x150c] ss:$72 sps:$4 sm:$0xff]  }
 0x48f   : > { %6800 = vmatpush1.bf16.msra.mxu0 %v22277_v28  ;;  %v22493_v28 = vld [vmem:[#allocation7 + $0xf68] ss:$72 sps:$4 sm:$0xff]  }
 0x490   : > { %6801 = vmatprep.subr.bf16.mxu0 %v22282_v29  ;;  %v22495_v29 = vld [vmem:[#allocation7 + $0xf6c] ss:$72 sps:$4 sm:$0xff]  }
 0x491   : > { %6893 = vmatprep.subr.bf16.mxu1 %v22495_v29  ;;  %v22559_v29 = vld [vmem:[#allocation7 + $0x1598] ss:$72 sps:$4 sm:$0xff]  }
 0x492   : > { %6894 = vmatpush1.bf16.msra.mxu1 %v22493_v28  ;;  %v22372_v28 = vld [vmem:[#allocation7 + $0x794] ss:$72 sps:$4 sm:$0xff]  }
 0x493   : > { %6802 = vmatpush1.bf16.msra.mxu0 %v22280_v34  ;;  %v22499_v34 = vld [vmem:[#allocation7 + $0xff8] ss:$72 sps:$4 sm:$0xff]  }
 0x494   : > { %6803 = vmatprep.subr.bf16.mxu0 %v22285_v35  ;;  %v22501_v35 = vld [vmem:[#allocation7 + $0xffc] ss:$72 sps:$4 sm:$0xff]  }
 0x495   : > { %6895 = vmatprep.subr.bf16.mxu1 %v22501_v35  ;;  %v22565_v35 = vld [vmem:[#allocation7 + $0x1628] ss:$72 sps:$4 sm:$0xff]  }
 0x496   : > { %6896 = vmatpush1.bf16.msra.mxu1 %v22499_v34  ;;  %v22378_v34 = vld [vmem:[#allocation7 + $0x824] ss:$72 sps:$4 sm:$0xff]  }
 0x497   : > { %6804 = vmatpush1.bf16.msra.mxu0 %v22283_v38  ;;  %v22505_v38 = vld [vmem:[#allocation7 + $0x1088] ss:$72 sps:$4 sm:$0xff]  }
 0x498   : > { %6805 = vmatprep.subr.bf16.mxu0 %v22288_v39  ;;  %v22322_v39 = vld [vmem:[#allocation7 + $0x280] ss:$72 sps:$4 sm:$0xff]  }
 0x49b   : > { %6806 = vmatpush1.bf16.msra.mxu0 %v22286_v42  ;;  %v22513_v42 = vld [vmem:[#allocation7 + $0x111c] ss:$72 sps:$4 sm:$0xff]  }
 0x49c   : > { %6807 = vmatprep.subr.bf16.mxu0 %v22291_v43  ;;  %v22325_v43 = vld [vmem:[#allocation7 + $0x310] ss:$72 sps:$4 sm:$0xff]  }
 0x49f   : > { %6808 = vmatpush1.bf16.msra.mxu0 %v22289_v46  ;;  %v22519_v46 = vld [vmem:[#allocation7 + $0x11ac] ss:$72 sps:$4 sm:$0xff]  }
 0x4a0   : > { %6809 = vmatprep.subr.bf16.mxu0 %v22294_v47 }
 0x4a3   : > { %6810 = vmatpush1.bf16.msra.mxu0 %v22292_v52  ;;  %v22328_v52 = vld [vmem:[#allocation7 + $0x3a0] ss:$72 sps:$4 sm:$0xff]  }
 0x4a4   : > { %6811 = vmatprep.subr.bf16.mxu0 %v22297_v53  ;;  %v22336_v53 = vld [vmem:[#allocation7 + $0x434] ss:$72 sps:$4 sm:$0xff]  }
 0x4a7   : > { %6812 = vmatpush1.bf16.msra.mxu0 %v22295_v59  ;;  %v22525_v59 = vld [vmem:[#allocation7 + $0x123c] ss:$72 sps:$4 sm:$0xff]  }
 0x4a8   : > { %6813 = vmatprep.subr.bf16.mxu0 %v22300_v60  ;;  %v22334_v60 = vld [vmem:[#allocation7 + $0x430] ss:$72 sps:$4 sm:$0xff]  }
 0x4ab   : > { %6814 = vmatpush1.bf16.msra.mxu0 %v22298_v63  ;;  %v22531_v63 = vld [vmem:[#allocation7 + $0x12cc] ss:$72 sps:$4 sm:$0xff]  }
 0x4ac   : > { %6815 = vmatprep.subr.bf16.mxu0 %v22303_v0  ;;  %v22340_v0 = vld [vmem:[#allocation7 + $0x4c0] ss:$72 sps:$4 sm:$0xff]  }
 0x4af   : > { %6816 = vmatpush1.bf16.msra.mxu0 %v22301_v6  ;;  %v22537_v6 = vld [vmem:[#allocation7 + $0x135c] ss:$72 sps:$4 sm:$0xff]  }
 0x4b0   : > { %6817 = vmatprep.subr.bf16.mxu0 %v22306_v7  ;;  %v22346_v7 = vld [vmem:[#allocation7 + $0x550] ss:$72 sps:$4 sm:$0xff]  }
 0x4b3   : > { %6818 = vmatpush1.bf16.msra.mxu0 %v22304_v11  ;;  %v22543_v11 = vld [vmem:[#allocation7 + $0x13ec] ss:$72 sps:$4 sm:$0xff]  }
 0x4b4   : > { %6819 = vmatprep.subr.bf16.mxu0 %v22309_v12  ;;  %v22352_v12 = vld [vmem:[#allocation7 + $0x5e0] ss:$72 sps:$4 sm:$0xff]  }
 0x4b7   : > { %6820 = vmatpush1.bf16.msra.mxu0 %v22307_v15  ;;  %v22549_v15 = vld [vmem:[#allocation7 + $0x147c] ss:$72 sps:$4 sm:$0xff]  }
 0x4b8   : > { %6953 = vmatprep.subr.bf16.mxu0 %v22312_v16  ;;  %v22358_v16 = vld [vmem:[#allocation7 + $0x670] ss:$72 sps:$4 sm:$0xff]  }
 0x4ba   : > { %6822 = vmatmul.mubr.bf16.vlgmr.msra.gmra.mrb[12].mxu0 %v25853_v10 }
 0x4bb   : > { %6954 = vmatpush1.bf16.msra.mxu0 %v22310_v20  ;;  %6985 = vmatprep.mubr.bf16.mxu0 %v25828_v17  ;;  %v22507_v17 = vld [vmem:[#allocation7 + $0x108c] ss:$72 sps:$4 sm:$0xff]  }
 0x4bc   : > { %6955 = vmatprep.subr.bf16.mxu0 %v22315_v21  ;;  %6897 = vmatprep.subr.bf16.mxu1 %v22507_v17  ;;  %v22553_v21 = vld [vmem:[#allocation7 + $0x1508] ss:$72 sps:$4 sm:$0xff]   ;;  %v22571_v17 = vld [vmem:[#allocation7 + $0x16b8] ss:$72 sps:$4 sm:$0xff]  }
 0x4bd   : > { %6898 = vmatpush1.bf16.msra.mxu1 %v22505_v38  ;;  %v22384_v38 = vld [vmem:[#allocation7 + $0x8b4] ss:$72 sps:$4 sm:$0xff]  }
 0x4be   : > { %6899 = vmatprep.subr.bf16.mxu1 %v22513_v42  ;;  %v22577_v42 = vld [vmem:[#allocation7 + $0x1748] ss:$72 sps:$4 sm:$0xff]  }
 0x4bf   : > { %6956 = vmatpush1.bf16.msra.mxu0 %v22313_v26 }
 0x4c0   : > { %6957 = vmatprep.subr.bf16.mxu0 %v22318_v27  ;;  %v22364_v27 = vld [vmem:[#allocation7 + $0x700] ss:$72 sps:$4 sm:$0xff]  }
 0x4c1   : > { %6900 = vmatpush1.bf16.msra.mxu1 %v22511_v41  ;;  %v22390_v41 = vld [vmem:[#allocation7 + $0x944] ss:$72 sps:$4 sm:$0xff]  }
 0x4c2   : > { %6901 = vmatprep.subr.bf16.mxu1 %v22519_v46  ;;  %v22394_v46 = vld [vmem:[#allocation7 + $0x9d0] ss:$72 sps:$4 sm:$0xff]  }
 0x4c3   : > { %6958 = vmatpush1.bf16.msra.mxu0 %v22316_v30  ;;  %v22561_v30 = vld [vmem:[#allocation7 + $0x159c] ss:$72 sps:$4 sm:$0xff]  }
 0x4c4   : > { %6959 = vmatprep.subr.bf16.mxu0 %v22321_v31  ;;  %v22370_v31 = vld [vmem:[#allocation7 + $0x790] ss:$72 sps:$4 sm:$0xff]  }
 0x4c5   : > { %6902 = vmatpush1.bf16.msra.mxu1 %v22517_v45  ;;  %v22396_v45 = vld [vmem:[#allocation7 + $0x9d4] ss:$72 sps:$4 sm:$0xff]  }
 0x4c6   : > { %6912 = vmatprep.subr.bf16.mxu1 %v22525_v59  ;;  %v22400_v59 = vld [vmem:[#allocation7 + $0xa60] ss:$72 sps:$4 sm:$0xff]  }
 0x4c7   : > { %6960 = vmatpush1.bf16.msra.mxu0 %v22319_v36  ;;  %v22567_v36 = vld [vmem:[#allocation7 + $0x162c] ss:$72 sps:$4 sm:$0xff]  }
 0x4c8   : > { %6961 = vmatprep.subr.bf16.mxu0 %v22324_v37  ;;  %6904 = vmatmul.mubr.bf16.vlgmr.msra.gmra.mrb[12].mxu1 %v25844_v1  ;;  %v22376_v37 = vld [vmem:[#allocation7 + $0x820] ss:$72 sps:$4 sm:$0xff]  }
 0x4c9   : > { %6913 = vmatpush1.bf16.msra.mxu1 %v22523_v57  ;;  %6944 = vmatprep.mubr.bf16.mxu1 %v25846_v5  ;;  %v22585_v57 = vld [vmem:[#allocation7 + $0x186c] ss:$72 sps:$4 sm:$0xff]  }
 0x4ca   : > { %6914 = vmatprep.subr.bf16.mxu1 %v22531_v63  ;;  %v22588_v63 = vld [vmem:[#allocation7 + $0x18fc] ss:$72 sps:$4 sm:$0xff]  }
 0x4cb   : > { %6962 = vmatpush1.bf16.msra.mxu0 %v22322_v39  ;;  %v22573_v39 = vld [vmem:[#allocation7 + $0x16bc] ss:$72 sps:$4 sm:$0xff]  }
 0x4cc   : > { %6963 = vmatprep.subr.bf16.mxu0 %v22327_v40  ;;  %v22382_v40 = vld [vmem:[#allocation7 + $0x8b0] ss:$72 sps:$4 sm:$0xff]  }
 0x4cd   : > { %v25907_v47 = vpop.f32.mrb[8].mxu0  ;;  %6915 = vmatpush1.bf16.msra.mxu1 %v22529_v62  ;;  %v22586_v62 = vld [vmem:[#allocation7 + $0x18f8] ss:$72 sps:$4 sm:$0xff]  }
 0x4ce   : > { %v25909_v50 = vpop.f32.mrb[9].mxu0  ;;  %6916 = vmatprep.subr.bf16.mxu1 %v22537_v6  ;;  %v22418_v6 = vld [vmem:[#allocation7 + $0xc10] ss:$72 sps:$4 sm:$0xff]  }
 0x4cf   : > { %v6581_v51 = vpop.f32.mrb[10].mxu0  ;;  %6964 = vmatpush1.bf16.msra.mxu0 %v22325_v43  ;;  %v22579_v43 = vld [vmem:[#allocation7 + $0x174c] ss:$72 sps:$4 sm:$0xff]  }
 0x4d0   : > { %v6582_v54 = vpop.f32.mrb[11].mxu0  ;;  %6965 = vmatprep.subr.bf16.mxu0 %v22330_v44  ;;  %v22388_v44 = vld [vmem:[#allocation7 + $0x940] ss:$72 sps:$4 sm:$0xff]   ;;  %v22582_v51 = vld [vmem:[#allocation7 + $0x17dc] ss:$72 sps:$4 sm:$0xff]  }
 0x4d1   : > { %6917 = vmatpush1.bf16.msra.mxu1 %v22535_v4  ;;  %v22583_v54 = vld [vmem:[#allocation7 + $0x1868] ss:$72 sps:$4 sm:$0xff]   ;;  %v22420_v4 = vld [vmem:[#allocation7 + $0xc14] ss:$72 sps:$4 sm:$0xff]  }
 0x4d2   : > { %6918 = vmatprep.subr.bf16.mxu1 %v22543_v11  ;;  %v25913_v19 = vpop.f32.mrb[8].mxu1  ;;  %v22424_v11 = vld [vmem:[#allocation7 + $0xca0] ss:$72 sps:$4 sm:$0xff]  }
 0x4d3   : > { %6966 = vmatpush1.bf16.msra.mxu0 %v22328_v52  ;;  %v25915_v20 = vpop.f32.mrb[9].mxu1  ;;  %v22402_v52 = vld [vmem:[#allocation7 + $0xa64] ss:$72 sps:$4 sm:$0xff]  }
 0x4d4   : > { %6967 = vmatprep.subr.bf16.mxu0 %v22336_v53  ;;  %v6704_v25 = vpop.f32.mrb[10].mxu1  ;;  %v22580_v53 = vld [vmem:[#allocation7 + $0x17d8] ss:$72 sps:$4 sm:$0xff]  }
 0x4d5   : > { %6919 = vmatpush1.bf16.msra.mxu1 %v22541_v9  ;;  %v6705_v26 = vpop.f32.mrb[11].mxu1  ;;  %v22426_v9 = vld [vmem:[#allocation7 + $0xca4] ss:$72 sps:$4 sm:$0xff]  }
 0x4d6   : > { %6920 = vmatprep.subr.bf16.mxu1 %v22549_v15  ;;  %v22430_v15 = vld [vmem:[#allocation7 + $0xd30] ss:$72 sps:$4 sm:$0xff]   ;;  %v22450_v25 = vld [vmem:[#allocation7 + $0xee4] ss:$72 sps:$4 sm:$0xff]   ;;  %v22448_v26 = vld [vmem:[#allocation7 + $0xee0] ss:$72 sps:$4 sm:$0xff]  }
 0x4d7   : > { %6968 = vmatpush1.bf16.msra.mxu0 %v22334_v60  ;;  %v22408_v60 = vld [vmem:[#allocation7 + $0xaf4] ss:$72 sps:$4 sm:$0xff]  }
 0x4d8   : > { %6969 = vmatprep.subr.bf16.mxu0 %v22342_v61  ;;  %v22406_v61 = vld [vmem:[#allocation7 + $0xaf0] ss:$72 sps:$4 sm:$0xff]  }
 0x4d9   : > { %6921 = vmatpush1.bf16.msra.mxu1 %v22547_v14  ;;  %v22595_v14 = vld [vmem:[#allocation7 + $0x1aa8] ss:$72 sps:$4 sm:$0xff]  }
 0x4da   : > { %6922 = vmatprep.subr.bf16.mxu1 %v22555_v22  ;;  %v22442_v22 = vld [vmem:[#allocation7 + $0xe50] ss:$72 sps:$4 sm:$0xff]  }
 0x4db   : > { %6970 = vmatpush1.bf16.msra.mxu0 %v22340_v0  ;;  %v22591_v0 = vld [vmem:[#allocation7 + $0x198c] ss:$72 sps:$4 sm:$0xff]  }
 0x4dc   : > { %6971 = vmatprep.subr.bf16.mxu0 %v22348_v3  ;;  %v22589_v3 = vld [vmem:[#allocation7 + $0x1988] ss:$72 sps:$4 sm:$0xff]  }
 0x4dd   : > { %6923 = vmatpush1.bf16.msra.mxu1 %v22553_v21  ;;  %v22444_v21 = vld [vmem:[#allocation7 + $0xe54] ss:$72 sps:$4 sm:$0xff]  }
 0x4de   : > { %6924 = vmatprep.subr.bf16.mxu1 %v22561_v30  ;;  %v22460_v30 = vld [vmem:[#allocation7 + $0x1000] ss:$72 sps:$4 sm:$0xff]  }
 0x4df   : > { %6972 = vmatpush1.bf16.msra.mxu0 %v22346_v7  ;;  %v22592_v7 = vld [vmem:[#allocation7 + $0x1a18] ss:$72 sps:$4 sm:$0xff]  }
 0x4e0   : > { %6973 = vmatprep.subr.bf16.mxu0 %v22354_v8  ;;  %v22594_v8 = vld [vmem:[#allocation7 + $0x1a1c] ss:$72 sps:$4 sm:$0xff]  }
 0x4e1   : > { %6925 = vmatpush1.bf16.msra.mxu1 %v22559_v29  ;;  %v22462_v29 = vld [vmem:[#allocation7 + $0x1004] ss:$72 sps:$4 sm:$0xff]  }
 0x4e2   : > { %6926 = vmatprep.subr.bf16.mxu1 %v22567_v36  ;;  %v22472_v36 = vld [vmem:[#allocation7 + $0x1120] ss:$72 sps:$4 sm:$0xff]  }
 0x4e3   : > { %6974 = vmatpush1.bf16.msra.mxu0 %v22352_v12  ;;  %v22597_v12 = vld [vmem:[#allocation7 + $0x1aac] ss:$72 sps:$4 sm:$0xff]  }
 0x4e4   : > { %6975 = vmatprep.subr.bf16.mxu0 %v22360_v13  ;;  %v22432_v13 = vld [vmem:[#allocation7 + $0xd34] ss:$72 sps:$4 sm:$0xff]  }
 0x4e5   : > { %6927 = vmatpush1.bf16.msra.mxu1 %v22565_v35  ;;  %v22474_v35 = vld [vmem:[#allocation7 + $0x1124] ss:$72 sps:$4 sm:$0xff]  }
 0x4e6   : > { %6928 = vmatprep.subr.bf16.mxu1 %v22573_v39  ;;  %v22484_v39 = vld [vmem:[#allocation7 + $0x1240] ss:$72 sps:$4 sm:$0xff]  }
 0x4e7   : > { %6976 = vmatpush1.bf16.msra.mxu0 %v22358_v16  ;;  %v22438_v16 = vld [vmem:[#allocation7 + $0xdc4] ss:$72 sps:$4 sm:$0xff]  }
 0x4e8   : > { %6977 = vmatprep.subr.bf16.mxu0 %v22366_v18  ;;  %v22436_v18 = vld [vmem:[#allocation7 + $0xdc0] ss:$72 sps:$4 sm:$0xff]  }
 0x4e9   : > { %6929 = vmatpush1.bf16.msra.mxu1 %v22571_v17  ;;  %v22486_v17 = vld [vmem:[#allocation7 + $0x1244] ss:$72 sps:$4 sm:$0xff]  }
 0x4ea   : > { %6930 = vmatprep.subr.bf16.mxu1 %v22579_v43  ;;  %v22496_v43 = vld [vmem:[#allocation7 + $0x1360] ss:$72 sps:$4 sm:$0xff]  }
 0x4eb   : > { %6978 = vmatpush1.bf16.msra.mxu0 %v22364_v27  ;;  %v22456_v27 = vld [vmem:[#allocation7 + $0xf74] ss:$72 sps:$4 sm:$0xff]  }
 0x4ec   : > { %6979 = vmatprep.subr.bf16.mxu0 %v22372_v28  ;;  %v22454_v28 = vld [vmem:[#allocation7 + $0xf70] ss:$72 sps:$4 sm:$0xff]  }
 0x4ed   : > { %6931 = vmatpush1.bf16.msra.mxu1 %v22577_v42  ;;  %v22498_v42 = vld [vmem:[#allocation7 + $0x1364] ss:$72 sps:$4 sm:$0xff]  }
 0x4ee   : > { %6932 = vmatprep.subr.bf16.mxu1 %v22582_v51  ;;  %v22508_v51 = vld [vmem:[#allocation7 + $0x1480] ss:$72 sps:$4 sm:$0xff]  }
 0x4ef   : > { %6980 = vmatpush1.bf16.msra.mxu0 %v22370_v31  ;;  %v22468_v31 = vld [vmem:[#allocation7 + $0x1094] ss:$72 sps:$4 sm:$0xff]  }
 0x4f0   : > { %6981 = vmatprep.subr.bf16.mxu0 %v22378_v34  ;;  %v22466_v34 = vld [vmem:[#allocation7 + $0x1090] ss:$72 sps:$4 sm:$0xff]  }
 0x4f1   : > { %6933 = vmatpush1.bf16.msra.mxu1 %v22580_v53  ;;  %v22514_v53 = vld [vmem:[#allocation7 + $0x1510] ss:$72 sps:$4 sm:$0xff]  }
 0x4f2   : > { %6934 = vmatprep.subr.bf16.mxu1 %v22585_v57  ;;  %v22528_v57 = vld [vmem:[#allocation7 + $0x1634] ss:$72 sps:$4 sm:$0xff]  }
 0x4f3   : > { %6982 = vmatpush1.bf16.msra.mxu0 %v22376_v37  ;;  %v22480_v37 = vld [vmem:[#allocation7 + $0x11b4] ss:$72 sps:$4 sm:$0xff]  }
 0x4f4   : > { %6983 = vmatprep.subr.bf16.mxu0 %v22384_v38  ;;  %v22478_v38 = vld [vmem:[#allocation7 + $0x11b0] ss:$72 sps:$4 sm:$0xff]  }
 0x4f5   : > { %6935 = vmatpush1.bf16.msra.mxu1 %v22583_v54  ;;  %v22522_v54 = vld [vmem:[#allocation7 + $0x15a4] ss:$72 sps:$4 sm:$0xff]  }
 0x4f6   : > { %6936 = vmatprep.subr.bf16.mxu1 %v22588_v63  ;;  %v22546_v63 = vld [vmem:[#allocation7 + $0x17e4] ss:$72 sps:$4 sm:$0xff]  }
 0x4f7   : > { %6984 = vmatpush1.bf16.msra.mxu0 %v22382_v40  ;;  %v22492_v40 = vld [vmem:[#allocation7 + $0x12d4] ss:$72 sps:$4 sm:$0xff]  }
 0x4f8   : > { %6994 = vmatprep.subr.bf16.mxu0 %v22390_v41  ;;  %v22490_v41 = vld [vmem:[#allocation7 + $0x12d0] ss:$72 sps:$4 sm:$0xff]  }
 0x4f9   : > { %6937 = vmatpush1.bf16.msra.mxu1 %v22586_v62  ;;  %v22538_v62 = vld [vmem:[#allocation7 + $0x1750] ss:$72 sps:$4 sm:$0xff]  }
 0x4fa   : > { %6986 = vmatmul.mubr.bf16.vlgmr.msra.gmra.mrb[16].mxu0 %v25833_v58  ;;  %v22414_v58 = vld [vmem:[#allocation7 + $0xb84] ss:$72 sps:$4 sm:$0xff]   ;;  %6938 = vmatprep.subr.bf16.mxu1 %v22591_v0  ;;  %v22552_v0 = vld [vmem:[#allocation7 + $0x1874] ss:$72 sps:$4 sm:$0xff]  }
 0x4fb   : > { %6995 = vmatpush1.bf16.msra.mxu0 %v22388_v44  ;;  %7026 = vmatprep.mubr.bf16.mxu0 %v25837_v2  ;;  %v22412_v2 = vld [vmem:[#allocation7 + $0xb80] ss:$72 sps:$4 sm:$0xff]   ;;  %v22504_v44 = vld [vmem:[#allocation7 + $0x13f4] ss:$72 sps:$4 sm:$0xff]  }
 0x4fc   : > { %6996 = vmatprep.subr.bf16.mxu0 %v22396_v45  ;;  %v22502_v45 = vld [vmem:[#allocation7 + $0x13f0] ss:$72 sps:$4 sm:$0xff]  }
 0x4fd   : > { %6939 = vmatpush1.bf16.msra.mxu1 %v22589_v3  ;;  %v22550_v3 = vld [vmem:[#allocation7 + $0x1870] ss:$72 sps:$4 sm:$0xff]  }
 0x4fe   : > { %6940 = vmatprep.subr.bf16.mxu1 %v22594_v8 }
 0x4ff   : > { %6997 = vmatpush1.bf16.msra.mxu0 %v22394_v46  ;;  %v22510_v46 = vld [vmem:[#allocation7 + $0x1484] ss:$72 sps:$4 sm:$0xff]  }
 0x500   : > { %6998 = vmatprep.subr.bf16.mxu0 %v22402_v52  ;;  %v22516_v52 = vld [vmem:[#allocation7 + $0x1514] ss:$72 sps:$4 sm:$0xff]  }
 0x501   : > { %6941 = vmatpush1.bf16.msra.mxu1 %v22592_v7  ;;  %v22564_v7 = vld [vmem:[#allocation7 + $0x1994] ss:$72 sps:$4 sm:$0xff]  }
 0x502   : > { %6942 = vmatprep.subr.bf16.mxu1 %v22597_v12  ;;  %v22570_v12 = vld [vmem:[#allocation7 + $0x1a24] ss:$72 sps:$4 sm:$0xff]  }
 0x503   : > { %6999 = vmatpush1.bf16.msra.mxu0 %v22400_v59  ;;  %v22534_v59 = vld [vmem:[#allocation7 + $0x16c4] ss:$72 sps:$4 sm:$0xff]  }
 0x504   : > { %7000 = vmatprep.subr.bf16.mxu0 %v22408_v60  ;;  %v22532_v60 = vld [vmem:[#allocation7 + $0x16c0] ss:$72 sps:$4 sm:$0xff]  }
 0x505   : > { %6943 = vmatpush1.bf16.msra.mxu1 %v22595_v14 }
 0x507   : > { %7001 = vmatpush1.bf16.msra.mxu0 %v22406_v61  ;;  %v22540_v61 = vld [vmem:[#allocation7 + $0x1754] ss:$72 sps:$4 sm:$0xff]  }
 0x508   : > { %7002 = vmatprep.subr.bf16.mxu0 %v22414_v58  ;;  %6945 = vmatmul.mubr.bf16.vlgmr.msra.gmra.mrb[12].mxu1 %v25853_v10  ;;  %v22544_v58 = vld [vmem:[#allocation7 + $0x17e0] ss:$72 sps:$4 sm:$0xff]  }
 0x50b   : > { %7003 = vmatpush1.bf16.msra.mxu0 %v22412_v2  ;;  %v22558_v2 = vld [vmem:[#allocation7 + $0x1904] ss:$72 sps:$4 sm:$0xff]  }
 0x50c   : > { %7004 = vmatprep.subr.bf16.mxu0 %v22420_v4  ;;  %v1559_v4 = vlaneseq }
 0x50e   : > { %v1560_v8 = vshrl.u32 %v1559_v4, 7 }
 0x50f   : > { %7005 = vmatpush1.bf16.msra.mxu0 %v22418_v6  ;;  %v22556_v6 = vld [vmem:[#allocation7 + $0x1900] ss:$72 sps:$4 sm:$0xff]  }
 0x510   : > { %7006 = vmatprep.subr.bf16.mxu0 %v22426_v9  ;;  %v22562_v9 = vld [vmem:[#allocation7 + $0x1990] ss:$72 sps:$4 sm:$0xff]   ;;  %v25926_v14 = vsub.s32 1, %v1560_v8 }
 0x513   : > { %7007 = vmatpush1.bf16.msra.mxu0 %v22424_v11  ;;  %v25922_v11 = vsub.s32 7, %v1560_v8 }
 0x514   : > { %7008 = vmatprep.subr.bf16.mxu0 %v22432_v13  ;;  %v25924_v13 = vld [vmem:[#allocation8] sm:$0xff] }
 0x517   : > { %7009 = vmatpush1.bf16.msra.mxu0 %v22430_v15  ;;  %v22568_v15 = vld [vmem:[#allocation7 + $0x1a20] ss:$72 sps:$4 sm:$0xff]  }
 0x518   : > { %7010 = vmatprep.subr.bf16.mxu0 %v22438_v16  ;;  %v1590_v16 = vrot.slane %v25924_v13, %v25922_v11 }
 0x51b   : > { %7011 = vmatpush1.bf16.msra.mxu0 %v22436_v18  ;;  %v22576_v18 = vld [vmem:[#allocation7 + $0x1ab4] ss:$72 sps:$4 sm:$0xff]  }
 0x51c   : > { %7012 = vmatprep.subr.bf16.mxu0 %v22444_v21  ;;  %v1566_v21 = vrot.slane %v25924_v13, %v25926_v14 }
 0x51f   : > { %7013 = vmatpush1.bf16.msra.mxu0 %v22442_v22  ;;  %v22574_v22 = vld [vmem:[#allocation7 + $0x1ab0] ss:$72 sps:$4 sm:$0xff]  }
 0x520   : > { %7014 = vmatprep.subr.bf16.mxu0 %v22450_v25  ;;  %v25932_v25 = vsub.s32 6, %v1560_v8 }
 0x523   : > { %7015 = vmatpush1.bf16.msra.mxu0 %v22448_v26  ;;  %v20967_v26 = vadd.f32 %v25897_v49, %v1590_v16  ;;  %v7215_v16 = vld [vmem:[%s579_s4] sm:$0x1] }
 0x524   : > { %7016 = vmatprep.subr.bf16.mxu0 %v22456_v27  ;;  %v25935_v27 = vld [vmem:[#allocation8 + $0x8] sm:$0xff] }
 0x527   : > { %7017 = vmatpush1.bf16.msra.mxu0 %v22454_v28  ;;  %v20961_v28 = vadd.f32 %v25871_v56, %v1566_v21 }
 0x528   : > { %7018 = vmatprep.subr.bf16.mxu0 %v22462_v29  ;;  %v1586_v29 = vrot.slane %v25924_v13, %v25932_v25 }
 0x52a   : > { %v20966_v49 = vadd.f32 %v25895_v48, %v1586_v29 }
 0x52b   : > { %7019 = vmatpush1.bf16.msra.mxu0 %v22460_v30  ;;  %v7083_v30 = vpack.c.bf16 %v20967_v26, %v20967_v26 }
 0x52c   : > { %7020 = vmatprep.subr.bf16.mxu0 %v22468_v31  ;;  %v1598_v31 = vrot.slane %v25935_v27, %v25926_v14 }
 0x52e   : > { %v20969_v56 = vadd.f32 %v25909_v50, %v1598_v31 }
 0x52f   : > { %7021 = vmatpush1.bf16.msra.mxu0 %v22466_v34  ;;  %v25942_v34 = vsub.s32 0, %v1560_v8 }
 0x530   : > { %7022 = vmatprep.subr.bf16.mxu0 %v22474_v35  ;;  %v7077_v35 = vpack.c.bf16 %v20961_v28, %v20961_v28 }
 0x533   : > { %7023 = vmatpush1.bf16.msra.mxu0 %v22472_v36  ;;  %v25944_v36 = vsub.s32 3, %v1560_v8 }
 0x534   : > { %7024 = vmatprep.subr.bf16.mxu0 %v22480_v37  ;;  %v1562_v37 = vrot.slane %v25924_v13, %v25942_v34 }
 0x537   : > { %7025 = vmatpush1.bf16.msra.mxu0 %v22478_v38  ;;  %v1574_v38 = vrot.slane %v25924_v13, %v25944_v36 }
 0x538   : > { %7035 = vmatprep.subr.bf16.mxu0 %v22486_v17  ;;  %v7082_v17 = vpack.c.bf16 %v20966_v49, %v20966_v49  ;;  %v1622_v49 = vrot.slane %v25935_v27, %v25922_v11 }
 0x539   : > { %v20963_v48 = vadd.f32 %v25877_v24, %v1574_v38 }
 0x53a   : > { %7027 = vmatmul.mubr.bf16.vlgmr.msra.gmra.mrb[16].mxu0 %v25844_v1  ;;  %v22520_v1 = vld [vmem:[#allocation7 + $0x15a0] ss:$72 sps:$4 sm:$0xff]  }
 0x53b   : > { %7036 = vmatpush1.bf16.msra.mxu0 %v22484_v39  ;;  %7067 = vmatprep.mubr.bf16.mxu0 %v25846_v5  ;;  %v22526_v5 = vld [vmem:[#allocation7 + $0x1630] ss:$72 sps:$4 sm:$0xff]   ;;  %v1594_v39 = vrot.slane %v25935_v27, %v25942_v34 }
 0x53c   : > { %7037 = vmatprep.subr.bf16.mxu0 %v22492_v40  ;;  %v7085_v40 = vpack.c.bf16 %v20969_v56, %v20969_v56 }
 0x53d   : > { %v20968_v50 = vadd.f32 %v25907_v47, %v1594_v39 }
 0x53f   : > { %7038 = vmatpush1.bf16.msra.mxu0 %v22490_v41  ;;  %v1606_v41 = vrot.slane %v25935_v27, %v25944_v36 }
 0x540   : > { %7039 = vmatprep.subr.bf16.mxu0 %v22498_v42 }
 0x541   : > { %v20971_v42 = vadd.f32 %v25915_v20, %v1606_v41 }
 0x543   : > { %7040 = vmatpush1.bf16.msra.mxu0 %v22496_v43 }
 0x544   : > { %7041 = vmatprep.subr.bf16.mxu0 %v22504_v44  ;;  %v25961_v44 = vsub.s32 2, %v1560_v8 }
 0x546   : > { %v1602_v47 = vrot.slane %v25935_v27, %v25961_v44 }
 0x547   : > { %7042 = vmatpush1.bf16.msra.mxu0 %v22502_v45  ;;  %v7079_v45 = vpack.c.bf16 %v20963_v48, %v20963_v48 }
 0x548   : > { %7043 = vmatprep.subr.bf16.mxu0 %v22510_v46  ;;  %v25963_v46 = vsub.s32 5, %v1560_v8 }
 0x54a   : > { %v1582_v24 = vrot.slane %v25924_v13, %v25963_v46 }
 0x54b   : > { %7044 = vmatpush1.bf16.msra.mxu0 %v22508_v51  ;;  %v7084_v51 = vpack.c.bf16 %v20968_v50, %v20968_v50 }
 0x54c   : > { %7045 = vmatprep.subr.bf16.mxu0 %v22516_v52  ;;  %v7087_v52 = vpack.c.bf16 %v20971_v42, %v20971_v42  ;;  %v25313_v42 = vmov 0  }
 0x54d   : > { %7292 = vmatprep.mubr.bf16.mxu1 %v25313_v42 }
 0x54f   : > { %7046 = vmatpush1.bf16.msra.mxu0 %v22514_v53  ;;  %v25965_v53 = vsub.s32 4, %v1560_v8 }
 0x550   : > { %7047 = vmatprep.subr.bf16.mxu0 %v22522_v54  ;;  %v1614_v54 = vrot.slane %v25935_v27, %v25963_v46 }
 0x551   : > { %v1610_v20 = vrot.slane %v25935_v27, %v25965_v53 }
 0x553   : > { %7048 = vmatpush1.bf16.msra.mxu0 %v22520_v1 }
 0x554   : > { %7049 = vmatprep.subr.bf16.mxu0 %v22528_v57 }
 0x557   : > { %7050 = vmatpush1.bf16.msra.mxu0 %v22526_v5  ;;  %v20965_v5 = vadd.f32 %v25891_v33, %v1582_v24  ;;  %v22613_v24 = vld [vmem:[#allocation10 + $0x68] ss:$24 sps:$4 sm:$0xff]  }
 0x558   : > { %7051 = vmatprep.subr.bf16.mxu0 %v22534_v59  ;;  %v20970_v59 = vadd.f32 %v25913_v19, %v1602_v47  ;;  %v22621_v47 = vld [vmem:[#allocation10 + $0x9c] ss:$24 sps:$4 sm:$0xff]  }
 0x559   : > { %v7081_v4 = vpack.c.bf16 %v20965_v5, %v20965_v5  ;;  %v22631_v5 = vld [vmem:[#allocation10 + $0xf8] ss:$24 sps:$4 sm:$0xff]  }
 0x55b   : > { %7052 = vmatpush1.bf16.msra.mxu0 %v22532_v60 }
 0x55c   : > { %7053 = vmatprep.subr.bf16.mxu0 %v22540_v61 }
 0x55f   : > { %7054 = vmatpush1.bf16.msra.mxu0 %v22538_v62 }
 0x560   : > { %7055 = vmatprep.subr.bf16.mxu0 %v22546_v63 }
 0x563   : > { %7056 = vmatpush1.bf16.msra.mxu0 %v22544_v58 }
 0x564   : > { %7057 = vmatprep.subr.bf16.mxu0 %v22552_v0 }
 0x567   : > { %7058 = vmatpush1.bf16.msra.mxu0 %v22550_v3 }
 0x568   : > { %7059 = vmatprep.subr.bf16.mxu0 %v22558_v2 }
 0x56b   : > { %7060 = vmatpush1.bf16.msra.mxu0 %v22556_v6  ;;  %v7086_v6 = vpack.c.bf16 %v20970_v59, %v20970_v59  ;;  %v22639_v59 = vld [vmem:[#allocation10 + $0x12c] ss:$24 sps:$4 sm:$0xff]  }
 0x56c   : > { %7061 = vmatprep.subr.bf16.mxu0 %v22564_v7 }
 0x56f   : > { %7062 = vmatpush1.bf16.msra.mxu0 %v22562_v9 }
 0x570   : > { %7063 = vmatprep.subr.bf16.mxu0 %v22570_v12 }
 0x573   : > { %7064 = vmatpush1.bf16.msra.mxu0 %v22568_v15 }
 0x574   : > { %7065 = vmatprep.subr.bf16.mxu0 %v22576_v18  ;;  %v7216_v18 = vsub.f32 1.0, %v7215_v16  ;;  %v22685_v16 = vld [vmem:[#allocation10 + $0x2a8] ss:$24 sps:$4 sm:$0xff]  }
 0x576   : > { %v7217_v21 = vmul.f32 -1e+09, %v7216_v18 }
 0x577   : > { %7066 = vmatpush1.bf16.msra.mxu0 %v22574_v22 }
 0x578   : > { %7094 = vmatprep.subr.bf16.mxu0 %v7083_v30  ;;  %v7222_v22 = vrot.slane %v7217_v21, %v25942_v34  ;;  %v1618_v21 = vrot.slane %v25935_v27, %v25932_v25 }
 0x57a   : > { %7068 = vmatmul.mubr.bf16.vlgmr.msra.gmra.mrb[16].mxu0 %v25853_v10  ;;  %v20960_v10 = vadd.f32 %v25869_v55, %v1562_v37  ;;  %v1570_v55 = vrot.slane %v25924_v13, %v25961_v44 }
 0x57b   : > { %7126 = vmatprep.mubr.bf16.mxu0 %v7077_v35 }
 0x57c   : > { %v7076_v43 = vpack.c.bf16 %v20960_v10, %v20960_v10  ;;  %v20962_v1 = vadd.f32 %v25875_v23, %v1570_v55  ;;  %v1578_v23 = vrot.slane %v25924_v13, %v25965_v53  ;;  %v22615_v55 = vld [vmem:[#allocation10 + $0x6c] ss:$24 sps:$4 sm:$0xff]  }
 0x57e   : > { %v7078_v3 = vpack.c.bf16 %v20962_v1, %v20962_v1  ;;  %v20964_v33 = vadd.f32 %v25889_v32, %v1578_v23  ;;  %v22625_v1 = vld [vmem:[#allocation10 + $0xc8] ss:$24 sps:$4 sm:$0xff]   ;;  %v22675_v23 = vld [vmem:[#allocation10 + $0x24c] ss:$24 sps:$4 sm:$0xff]  }
 0x580   : > { %7095 = vmatpush1.bf16.xpose.msra.mxu0 %v7082_v17  ;;  %v7080_v19 = vpack.c.bf16 %v20964_v33, %v20964_v33  ;;  %v22673_v33 = vld [vmem:[#allocation10 + $0x248] ss:$24 sps:$4 sm:$0xff]  }
 0x581   : > { %7134 = vmatprep.subr.bf16.mxu0 %v7085_v40 }
 0x587   : > { %7127 = vmatmul.mubr.bf16.vlgmr.msra.gmra.mrb[20].mxu0 %v7076_v43  ;;  %v22601_v43 = vld [vmem:[#allocation10 + $0x8] ss:$24 sps:$4 sm:$0xff]  }
 0x588   : > { %7135 = vmatpush1.bf16.xpose.msra.mxu0 %v7084_v51  ;;  %7166 = vmatprep.mubr.bf16.mxu0 %v7079_v45  ;;  %v22603_v45 = vld [vmem:[#allocation10 + $0xc] ss:$24 sps:$4 sm:$0xff]   ;;  %v22609_v51 = vld [vmem:[#allocation10 + $0x3c] ss:$24 sps:$4 sm:$0xff]  }
 0x589   : > { %7174 = vmatprep.subr.bf16.mxu0 %v7087_v52  ;;  %v22607_v52 = vld [vmem:[#allocation10 + $0x38] ss:$24 sps:$4 sm:$0xff]  }
 0x58d   : > { %v6823_v57 = vpop.f32.mrb[12].mxu0 }
 0x58e   : > { %v20972_v60 = vadd.f32 %v6823_v57, %v1610_v20  ;;  %v6825_v61 = vpop.f32.mrb[13].mxu0  ;;  %v22619_v20 = vld [vmem:[#allocation10 + $0x98] ss:$24 sps:$4 sm:$0xff]   ;;  %v22633_v57 = vld [vmem:[#allocation10 + $0xfc] ss:$24 sps:$4 sm:$0xff]  }
 0x58f   : > { %v20973_v62 = vadd.f32 %v6825_v61, %v1614_v54  ;;  %v6827_v63 = vpop.f32.mrb[14].mxu0  ;;  %v22627_v54 = vld [vmem:[#allocation10 + $0xcc] ss:$24 sps:$4 sm:$0xff]   ;;  %v22645_v61 = vld [vmem:[#allocation10 + $0x15c] ss:$24 sps:$4 sm:$0xff]  }
 0x590   : > { %v7088_v58 = vpack.c.bf16 %v20972_v60, %v20972_v60  ;;  %v6828_v0 = vpop.f32.mrb[15].mxu0  ;;  %v22637_v60 = vld [vmem:[#allocation10 + $0x128] ss:$24 sps:$4 sm:$0xff]   ;;  %v22651_v63 = vld [vmem:[#allocation10 + $0x18c] ss:$24 sps:$4 sm:$0xff]  }
 0x591   : > { %v7089_v2 = vpack.c.bf16 %v20973_v62, %v20973_v62  ;;  %v22643_v62 = vld [vmem:[#allocation10 + $0x158] ss:$24 sps:$4 sm:$0xff]   ;;  %v22657_v0 = vld [vmem:[#allocation10 + $0x1bc] ss:$24 sps:$4 sm:$0xff]  }
 0x592   : > { %v7243_v7 = vsel %vm7241_vm0, %v7088_v58, 0  ;;  %v22649_v58 = vld [vmem:[#allocation10 + $0x188] ss:$24 sps:$4 sm:$0xff]  }
 0x593   : > { %7167 = vmatmul.mubr.bf16.vlgmr.msra.gmra.mrb[20].mxu0 %v7078_v3  ;;  %19505 = vmatprep.subr.msk.bf16.mxu1 %vm7241_vm0, %v7089_v2  ;;  %v22655_v3 = vld [vmem:[#allocation10 + $0x1b8] ss:$24 sps:$4 sm:$0xff]   ;;  %v22663_v2 = vld [vmem:[#allocation10 + $0x1ec] ss:$24 sps:$4 sm:$0xff]  }
 0x594   : > { %7175 = vmatpush1.bf16.xpose.msra.mxu0 %v7086_v6  ;;  %7206 = vmatprep.mubr.bf16.mxu0 %v7081_v4  ;;  %v22661_v4 = vld [vmem:[#allocation10 + $0x1e8] ss:$24 sps:$4 sm:$0xff]   ;;  %v22669_v6 = vld [vmem:[#allocation10 + $0x21c] ss:$24 sps:$4 sm:$0xff]  }
 0x595   : > { %7261 = vmatpush1.bf16.msra.mxu1 %v7243_v7  ;;  %9272 = vmatprep.subr.bf16.mxu0 %v22603_v45  ;;  %v22667_v7 = vld [vmem:[#allocation10 + $0x218] ss:$24 sps:$4 sm:$0xff]  }
 0x596   : > { %v22628_v45 = vld [vmem:[#allocation10 + $0xf0] ss:$24 sps:$4 sm:$0xff]  }
 0x59f   : > { %7207 = vmatmul.mubr.bf16.vlgmr.msra.gmra.mrb[20].mxu0 %v7080_v19  ;;  %v22681_v19 = vld [vmem:[#allocation10 + $0x27c] ss:$24 sps:$4 sm:$0xff]  }
 0x5a0   : > { %9273 = vmatpush1.bf16.msra.mxu0 %v22601_v43  ;;  %v22622_v43 = vld [vmem:[#allocation10 + $0xc0] ss:$24 sps:$4 sm:$0xff]  }
 0x5a1   : > { %9274 = vmatprep.subr.bf16.mxu0 %v22609_v51  ;;  %v22636_v51 = vld [vmem:[#allocation10 + $0x124] ss:$24 sps:$4 sm:$0xff]  }
 0x5a4   : > { %9275 = vmatpush1.bf16.msra.mxu0 %v22607_v52  ;;  %v22634_v52 = vld [vmem:[#allocation10 + $0x120] ss:$24 sps:$4 sm:$0xff]  }
 0x5a5   : > { %9276 = vmatprep.subr.bf16.mxu0 %v22615_v55  ;;  %v22642_v55 = vld [vmem:[#allocation10 + $0x154] ss:$24 sps:$4 sm:$0xff]  }
 0x5a8   : > { %9277 = vmatpush1.bf16.msra.mxu0 %v22613_v24  ;;  %v22640_v24 = vld [vmem:[#allocation10 + $0x150] ss:$24 sps:$4 sm:$0xff]  }
 0x5a9   : > { %9278 = vmatprep.subr.bf16.mxu0 %v22621_v47  ;;  %v22648_v47 = vld [vmem:[#allocation10 + $0x184] ss:$24 sps:$4 sm:$0xff]  }
 0x5ac   : > { %9279 = vmatpush1.bf16.msra.mxu0 %v22619_v20  ;;  %v22646_v20 = vld [vmem:[#allocation10 + $0x180] ss:$24 sps:$4 sm:$0xff]  }
 0x5ad   : > { %9280 = vmatprep.subr.bf16.mxu0 %v22627_v54  ;;  %v22654_v54 = vld [vmem:[#allocation10 + $0x1b4] ss:$24 sps:$4 sm:$0xff]  }
 0x5b0   : > { %9281 = vmatpush1.bf16.msra.mxu0 %v22625_v1  ;;  %v22652_v1 = vld [vmem:[#allocation10 + $0x1b0] ss:$24 sps:$4 sm:$0xff]  }
 0x5b1   : > { %9282 = vmatprep.subr.bf16.mxu0 %v22633_v57  ;;  %v22660_v57 = vld [vmem:[#allocation10 + $0x1e4] ss:$24 sps:$4 sm:$0xff]  }
 0x5b4   : > { %9283 = vmatpush1.bf16.msra.mxu0 %v22631_v5  ;;  %v22658_v5 = vld [vmem:[#allocation10 + $0x1e0] ss:$24 sps:$4 sm:$0xff]  }
 0x5b5   : > { %9284 = vmatprep.subr.bf16.mxu0 %v22639_v59  ;;  %v22666_v59 = vld [vmem:[#allocation10 + $0x214] ss:$24 sps:$4 sm:$0xff]  }
 0x5b8   : > { %9285 = vmatpush1.bf16.msra.mxu0 %v22637_v60  ;;  %v22664_v60 = vld [vmem:[#allocation10 + $0x210] ss:$24 sps:$4 sm:$0xff]  }
 0x5b9   : > { %9286 = vmatprep.subr.bf16.mxu0 %v22645_v61  ;;  %v22672_v61 = vld [vmem:[#allocation10 + $0x244] ss:$24 sps:$4 sm:$0xff]  }
 0x5bc   : > { %9287 = vmatpush1.bf16.msra.mxu0 %v22643_v62  ;;  %v22670_v62 = vld [vmem:[#allocation10 + $0x240] ss:$24 sps:$4 sm:$0xff]  }
 0x5bd   : > { %9288 = vmatprep.subr.bf16.mxu0 %v22651_v63  ;;  %v22678_v63 = vld [vmem:[#allocation10 + $0x274] ss:$24 sps:$4 sm:$0xff]  }
 0x5c0   : > { %9289 = vmatpush1.bf16.msra.mxu0 %v22649_v58  ;;  %v22676_v58 = vld [vmem:[#allocation10 + $0x270] ss:$24 sps:$4 sm:$0xff]  }
 0x5c1   : > { %9290 = vmatprep.subr.bf16.mxu0 %v22657_v0  ;;  %v22684_v0 = vld [vmem:[#allocation10 + $0x2a4] ss:$24 sps:$4 sm:$0xff]  }
 0x5c4   : > { %9291 = vmatpush1.bf16.msra.mxu0 %v22655_v3  ;;  %v22682_v3 = vld [vmem:[#allocation10 + $0x2a0] ss:$24 sps:$4 sm:$0xff]  }
 0x5c5   : > { %9292 = vmatprep.subr.bf16.mxu0 %v22663_v2  ;;  %v22690_v2 = vld [vmem:[#allocation10 + $0x2d4] ss:$24 sps:$4 sm:$0xff]  }
 0x5c8   : > { %9293 = vmatpush1.bf16.msra.mxu0 %v22661_v4  ;;  %v22693_v4 = vld [vmem:[#allocation10 + $0x2dc] ss:$24 sps:$4 sm:$0xff]  }
 0x5c9   : > { %9294 = vmatprep.subr.bf16.mxu0 %v22669_v6  ;;  %v22688_v6 = vld [vmem:[#allocation10 + $0x2d0] ss:$24 sps:$4 sm:$0xff]  }
 0x5cc   : > { %9295 = vmatpush1.bf16.msra.mxu0 %v22667_v7  ;;  %v22691_v7 = vld [vmem:[#allocation10 + $0x2d8] ss:$24 sps:$4 sm:$0xff]  }
 0x5cd   : > { %9296 = vmatprep.subr.bf16.mxu0 %v22675_v23  ;;  %v22696_v23 = vld [vmem:[#allocation10 + $0x304] ss:$24 sps:$4 sm:$0xff]  }
 0x5d0   : > { %9297 = vmatpush1.bf16.msra.mxu0 %v22673_v33  ;;  %v22699_v33 = vld [vmem:[#allocation10 + $0x60c] ss:$24 sps:$4 sm:$0xff]  }
 0x5d1   : > { %9298 = vmatprep.subr.bf16.mxu0 %v22681_v19 }
 0x5db   : > { %v25993_v35 = vpop.f32.mrb[12].mxu1 }
 0x5dc   : > { %v6948_v56 = vpop.f32.mrb[13].mxu1 }
 0x5dd   : > { %v20975_v37 = vadd.f32 %v6948_v56, %v1622_v49  ;;  %v6950_v38 = vpop.f32.mrb[14].mxu1 }
 0x5de   : > { %v6951_v17 = vpop.f32.mrb[15].mxu1 }
 0x5df   : > { %v7091_v39 = vpack.c.bf16 %v20975_v37, %v20975_v37  ;;  %v22606_v17 = vld [vmem:[#allocation10 + $0x34] ss:$24 sps:$4 sm:$0xff]  }
 0x5e1   : > { %19507 = vmatprep.subr.msk.bf16.mxu1 %vm7241_vm0, %v7091_v39  ;;  %v22604_v39 = vld [vmem:[#allocation10 + $0x30] ss:$24 sps:$4 sm:$0xff]  }
 0x64d   : > { %v25985_v8 = vpop.f32.mrb[16].mxu0 }
 0x64e   : > { %v25987_v9 = vpop.f32.mrb[17].mxu0 }
 0x64f   : > { %v7073_v12 = vpop.f32.mrb[18].mxu0 }
 0x650   : > { %v7074_v15 = vpop.f32.mrb[19].mxu0  ;;  %v22679_v12 = vld [vmem:[#allocation10 + $0x278] ss:$24 sps:$4 sm:$0xff]  }
 0x651   : > { %v22687_v15 = vld [vmem:[#allocation10 + $0x2ac] ss:$24 sps:$4 sm:$0xff]   ;;  %9299 = vmatpush1.bf16.msra.mxu0 %v22679_v12 }
 0x652   : > { %9300 = vmatprep.subr.bf16.mxu0 %v22687_v15 }
 0x655   : > { %9301 = vmatpush1.bf16.msra.mxu0 %v22685_v16 }
 0x656   : > { %9302 = vmatprep.subr.bf16.mxu0 %v22693_v4  ;;  %v22753_v4 = vld [vmem:[#allocation10 + $0x7bc] ss:$24 sps:$4 sm:$0xff]  }
 0x659   : > { %9303 = vmatpush1.bf16.msra.mxu0 %v22691_v7  ;;  %v22751_v7 = vld [vmem:[#allocation10 + $0x7b8] ss:$24 sps:$4 sm:$0xff]  }
 0x65a   : > { %9354 = vmatprep.subr.bf16.mxu0 %v22699_v33  ;;  %v22759_v33 = vld [vmem:[#allocation10 + $0x7ec] ss:$24 sps:$4 sm:$0xff]  }
 0x672   : > { %v7208_v26 = vpop.f32.mrb[20].mxu0 }
 0x673   : > { %v7214_v28 = vmul.f32 0.03608439, %v7208_v26  ;;  %v7210_v13 = vpop.f32.mrb[21].mxu0 }
 0x674   : > { %v7211_v29 = vpop.f32.mrb[22].mxu0 }
 0x675   : > { %v7212_v32 = vpop.f32.mrb[23].mxu0  ;;  %v7224_v30 = vadd.f32 %v7222_v22, %v7214_v28  ;;  %v1555_v22 = vld [vmem:[#allocation8 + $0x10] sm:$0x3]  ;;  %v20974_v28 = vadd.f32 %v25993_v35, %v1618_v21  ;;  %v22697_v21 = vld [vmem:[#allocation10 + $0x608] ss:$24 sps:$4 sm:$0xff]  }
 0x676   : > { %v1630_v26 = vrot.slane %v1555_v22, %v25926_v14  ;;  %v1626_v29 = vrot.slane %v1555_v22, %v25942_v34  ;;  %v22600_v35 = vld [vmem:[#allocation10 + $0x4] ss:$24 sps:$4 sm:$0xff]  }
 0x677   : > { %v7226_v31 = vsel %vm7225_vm1, %v7224_v30, -inf }
 0x678   : > { %7227 = vmax.xlane.f32.xlu0 %v7226_v31  ;;  %v20977_v32 = vadd.f32 %v25987_v9, %v1630_v26  ;;  %v20976_v56 = vadd.f32 %v25985_v8, %v1626_v29  ;;  %v22598_v8 = vld [vmem:[#allocation10] ss:$24 sps:$4 sm:$0xff]   ;;  %v22700_v29 = vld [vmem:[#allocation10 + $0x330] ss:$24 sps:$4 sm:$0xff]  }
 0x67a   : > { %v7093_v37 = vpack.c.bf16 %v20977_v32, %v20977_v32  ;;  %v7092_v27 = vpack.c.bf16 %v20976_v56, %v20976_v56  ;;  %v22703_v32 = vld [vmem:[#allocation10 + $0x638] ss:$24 sps:$4 sm:$0xff]  }
 0x67c   : > { %v7255_v9 = vsel %vm7241_vm0, %v7092_v27, 0  ;;  %v22706_v27 = vld [vmem:[#allocation10 + $0x360] ss:$24 sps:$4 sm:$0xff]  }
 0x705   : > { %v7228_v40 = vpop.xlane.xlu0 %7227 }
 0x706   : > { %v7229_v41 = vsub.f32 %v7224_v30, %v7228_v40  ;;  %v7090_v30 = vpack.c.bf16 %v20974_v28, %v20974_v28  ;;  %v22612_v40 = vld [vmem:[#allocation10 + $0x64] ss:$24 sps:$4 sm:$0xff]   ;;  %v22702_v28 = vld [vmem:[#allocation10 + $0x334] ss:$24 sps:$4 sm:$0xff]  }
 0x708   : > { %v7230_v10 = vmul.f32 1.442695, %v7229_v41  ;;  %v7249_v38 = vsel %vm7241_vm0, %v7090_v30, 0  ;;  %v22610_v41 = vld [vmem:[#allocation10 + $0x60] ss:$24 sps:$4 sm:$0xff]  }
 0x709   : > { %v22708_v30 = vld [vmem:[#allocation10 + $0x364] ss:$24 sps:$4 sm:$0xff]  }
 0x70a   : > { %24758 = vpow2.f32 %v7230_v10  ;;  %v22618_v10 = vld [vmem:[#allocation10 + $0x94] ss:$24 sps:$4 sm:$0xff]  }
 0x714   : > { %v25998_v48 = vpop.eup %24758 }
 0x715   : > { %v7232_v50 = vsel %vm7225_vm1, %v25998_v48, 0.0 }
 0x716   : > { %7233 = vadd.xlane.f32.xlu0 %v7232_v50  ;;  %v22624_v50 = vld [vmem:[#allocation10 + $0xc4] ss:$24 sps:$4 sm:$0xff]  }
 0x7a3   : > { %v7234_v18 = vpop.xlane.xlu0 %7233 }
 0x7a4   : > { %24760 = vrcp.f32 %v7234_v18  ;;  %v22694_v18 = vld [vmem:[#allocation10 + $0x300] ss:$24 sps:$4 sm:$0xff]  }
 0x7ae   : > { %v24761_v13 = vpop.eup %24760 }
 0x7af   : > { %v7236_v31 = vmul.f32 %v24761_v13, %v25998_v48  ;;  %v22616_v48 = vld [vmem:[#allocation10 + $0x90] ss:$24 sps:$4 sm:$0xff]   ;;  %v22705_v13 = vld [vmem:[#allocation10 + $0x63c] ss:$24 sps:$4 sm:$0xff]  }
 0x7b1   : > { %v7237_v49 = vpack.c.bf16 %v7236_v31, %v7236_v31  ;;  %v22711_v31 = vld [vmem:[#allocation10 + $0x66c] ss:$24 sps:$4 sm:$0xff]  }
 0x7b3   : > { %19506 = vmatmul.mubr.msk.bf16.vlgmr.msra.gmra.mrb[16].mxu1 %vm7225_vm1, %v7237_v49 }
 0x7b4   : > { %7302 = vmatpush1.bf16.msra.mxu1 %v7249_v38  ;;  %7333 = vmatprep.mubr.bf16.mxu1 %v25313_v42 }
 0x7b5   : > { %19509 = vmatprep.subr.msk.bf16.mxu1 %vm7241_vm0, %v7093_v37 }
 0x7bb   : > { %19508 = vmatmul.mubr.msk.bf16.vlgmr.msra.gmra.mrb[20].mxu1 %vm7225_vm1, %v7237_v49 }
 0x7bc   : > { %7343 = vmatpush1.bf16.msra.mxu1 %v7255_v9  ;;  %7374 = vmatprep.mubr.bf16.mxu1 %v25313_v42  ;;  %v22630_v42 = vld [vmem:[#allocation10 + $0xf4] ss:$24 sps:$4 sm:$0xff]  }
 0x7bd   : > { %9149 = vmatprep.subr.bf16.mxu1 %v22600_v35  ;;  %v22709_v35 = vld [vmem:[#allocation10 + $0x668] ss:$24 sps:$4 sm:$0xff]  }
 0x7c3   : > { %19510 = vmatmul.mubr.msk.bf16.vlgmr.msra.gmra.mrb[24].mxu1 %vm7225_vm1, %v7237_v49 }
 0x7c4   : > { %9150 = vmatpush1.bf16.msra.mxu1 %v22598_v8  ;;  %v22714_v8 = vld [vmem:[#allocation10 + $0x394] ss:$24 sps:$4 sm:$0xff]  }
 0x7c5   : > { %9151 = vmatprep.subr.bf16.mxu1 %v22606_v17  ;;  %v22717_v17 = vld [vmem:[#allocation10 + $0x69c] ss:$24 sps:$4 sm:$0xff]  }
 0x7c8   : > { %9152 = vmatpush1.bf16.msra.mxu1 %v22604_v39  ;;  %v22712_v39 = vld [vmem:[#allocation10 + $0x390] ss:$24 sps:$4 sm:$0xff]  }
 0x7c9   : > { %9153 = vmatprep.subr.bf16.mxu1 %v22612_v40  ;;  %v22715_v40 = vld [vmem:[#allocation10 + $0x698] ss:$24 sps:$4 sm:$0xff]  }
 0x7cc   : > { %9154 = vmatpush1.bf16.msra.mxu1 %v22610_v41  ;;  %v22720_v41 = vld [vmem:[#allocation10 + $0x3c4] ss:$24 sps:$4 sm:$0xff]  }
 0x7cd   : > { %9155 = vmatprep.subr.bf16.mxu1 %v22618_v10  ;;  %v22723_v10 = vld [vmem:[#allocation10 + $0x6cc] ss:$24 sps:$4 sm:$0xff]  }
 0x7d0   : > { %9156 = vmatpush1.bf16.msra.mxu1 %v22616_v48 }
 0x7d1   : > { %9157 = vmatprep.subr.bf16.mxu1 %v22624_v50 }
 0x7d4   : > { %9158 = vmatpush1.bf16.msra.mxu1 %v22622_v43 }
 0x7d5   : > { %9159 = vmatprep.subr.bf16.mxu1 %v22630_v42 }
 0x7d8   : > { %9160 = vmatpush1.bf16.msra.mxu1 %v22628_v45  ;;  %v22718_v45 = vld [vmem:[#allocation10 + $0x3c0] ss:$24 sps:$4 sm:$0xff]  }
 0x7d9   : > { %9161 = vmatprep.subr.bf16.mxu1 %v22636_v51  ;;  %v22721_v51 = vld [vmem:[#allocation10 + $0x6c8] ss:$24 sps:$4 sm:$0xff]  }
 0x7dc   : > { %9162 = vmatpush1.bf16.msra.mxu1 %v22634_v52 }
 0x7dd   : > { %9163 = vmatprep.subr.bf16.mxu1 %v22642_v55  ;;  %v22726_v55 = vld [vmem:[#allocation10 + $0x3f4] ss:$24 sps:$4 sm:$0xff]  }
 0x7e0   : > { %9164 = vmatpush1.bf16.msra.mxu1 %v22640_v24  ;;  %v22729_v24 = vld [vmem:[#allocation10 + $0x6fc] ss:$24 sps:$4 sm:$0xff]  }
 0x7e1   : > { %9165 = vmatprep.subr.bf16.mxu1 %v22648_v47  ;;  %v22724_v47 = vld [vmem:[#allocation10 + $0x3f0] ss:$24 sps:$4 sm:$0xff]  }
 0x7e4   : > { %9166 = vmatpush1.bf16.msra.mxu1 %v22646_v20  ;;  %v22727_v20 = vld [vmem:[#allocation10 + $0x6f8] ss:$24 sps:$4 sm:$0xff]  }
 0x7e5   : > { %9167 = vmatprep.subr.bf16.mxu1 %v22654_v54  ;;  %v22732_v54 = vld [vmem:[#allocation10 + $0x424] ss:$24 sps:$4 sm:$0xff]  }
 0x7e8   : > { %9168 = vmatpush1.bf16.msra.mxu1 %v22652_v1  ;;  %v22735_v1 = vld [vmem:[#allocation10 + $0x72c] ss:$24 sps:$4 sm:$0xff]  }
 0x7e9   : > { %9169 = vmatprep.subr.bf16.mxu1 %v22660_v57  ;;  %v22730_v57 = vld [vmem:[#allocation10 + $0x420] ss:$24 sps:$4 sm:$0xff]  }
 0x7ec   : > { %9170 = vmatpush1.bf16.msra.mxu1 %v22658_v5  ;;  %v22733_v5 = vld [vmem:[#allocation10 + $0x728] ss:$24 sps:$4 sm:$0xff]  }
 0x7ed   : > { %9171 = vmatprep.subr.bf16.mxu1 %v22666_v59  ;;  %v22738_v59 = vld [vmem:[#allocation10 + $0x454] ss:$24 sps:$4 sm:$0xff]  }
 0x7f0   : > { %9172 = vmatpush1.bf16.msra.mxu1 %v22664_v60  ;;  %v22741_v60 = vld [vmem:[#allocation10 + $0x75c] ss:$24 sps:$4 sm:$0xff]  }
 0x7f1   : > { %9173 = vmatprep.subr.bf16.mxu1 %v22672_v61  ;;  %v22736_v61 = vld [vmem:[#allocation10 + $0x450] ss:$24 sps:$4 sm:$0xff]  }
 0x7f4   : > { %9174 = vmatpush1.bf16.msra.mxu1 %v22670_v62  ;;  %v22739_v62 = vld [vmem:[#allocation10 + $0x758] ss:$24 sps:$4 sm:$0xff]  }
 0x7f5   : > { %9175 = vmatprep.subr.bf16.mxu1 %v22678_v63  ;;  %v22744_v63 = vld [vmem:[#allocation10 + $0x484] ss:$24 sps:$4 sm:$0xff]  }
 0x7f8   : > { %9176 = vmatpush1.bf16.msra.mxu1 %v22676_v58  ;;  %v22747_v58 = vld [vmem:[#allocation10 + $0x78c] ss:$24 sps:$4 sm:$0xff]  }
 0x7f9   : > { %9177 = vmatprep.subr.bf16.mxu1 %v22684_v0  ;;  %v22742_v0 = vld [vmem:[#allocation10 + $0x480] ss:$24 sps:$4 sm:$0xff]  }
 0x7fc   : > { %9178 = vmatpush1.bf16.msra.mxu1 %v22682_v3  ;;  %v22745_v3 = vld [vmem:[#allocation10 + $0x788] ss:$24 sps:$4 sm:$0xff]  }
 0x7fd   : > { %9179 = vmatprep.subr.bf16.mxu1 %v22690_v2  ;;  %v22750_v2 = vld [vmem:[#allocation10 + $0x4b4] ss:$24 sps:$4 sm:$0xff]  }
 0x800   : > { %9180 = vmatpush1.bf16.msra.mxu1 %v22688_v6  ;;  %v22748_v6 = vld [vmem:[#allocation10 + $0x4b0] ss:$24 sps:$4 sm:$0xff]  }
 0x801   : > { %9190 = vmatprep.subr.bf16.mxu1 %v22696_v23  ;;  %v22756_v23 = vld [vmem:[#allocation10 + $0x4e4] ss:$24 sps:$4 sm:$0xff]  }
 0x886   : > { %v7294_v19 = vpop.f32.mrb[16].mxu1 }
 0x887   : > { %v7296_v12 = vpop.f32.mrb[17].mxu1  ;;  %v26021_v22 = vpack.c.bf16 %v7294_v19, %v7294_v19  ;;  %v22754_v19 = vld [vmem:[#allocation10 + $0x4e0] ss:$24 sps:$4 sm:$0xff]  }
 0x888   : > { %v26019_v15 = vpack.c.bf16 %v7296_v12, %v7296_v12  ;;  %v7298_v16 = vpop.f32.mrb[18].mxu1  ;;  %v22757_v12 = vld [vmem:[#allocation10 + $0x7e8] ss:$24 sps:$4 sm:$0xff]  }
 0x889   : > { %v7299_v26 = vpop.f32.mrb[19].mxu1  ;;  %v22762_v16 = vld [vmem:[#allocation10 + $0x514] ss:$24 sps:$4 sm:$0xff]  }
 0x88a   : > { %9181 = vmatprep.mubr.bf16.mxu1 %v26019_v15  ;;  %9304 = vmatprep.mubr.bf16.mxu0 %v26019_v15  ;;  %v22763_v26 = vld [vmem:[#allocation10 + $0x818] ss:$24 sps:$4 sm:$0xff]  }
 0x88b   : > { %9182 = vmatmul.mubr.bf16.vlgmr.msra.gmra.mrb[28].mxu1 %v26021_v22  ;;  %9305 = vmatmul.mubr.bf16.vlgmr.msra.gmra.mrb[24].mxu0 %v26021_v22 }
 0x88c   : > { %9191 = vmatpush1.bf16.msra.mxu1 %v22694_v18  ;;  %9355 = vmatpush1.bf16.msra.mxu0 %v22697_v21  ;;  %v22765_v18 = vld [vmem:[#allocation10 + $0x81c] ss:$24 sps:$4 sm:$0xff]   ;;  %v22760_v21 = vld [vmem:[#allocation10 + $0x510] ss:$24 sps:$4 sm:$0xff]  }
 0x88d   : > { %9192 = vmatprep.subr.bf16.mxu1 %v22702_v28  ;;  %9356 = vmatprep.subr.bf16.mxu0 %v22705_v13  ;;  %v22768_v28 = vld [vmem:[#allocation10 + $0x544] ss:$24 sps:$4 sm:$0xff]  }
 0x88e   : > { %v26027_v49 = vpop.f32.mrb[20].mxu1  ;;  %v22771_v13 = vld [vmem:[#allocation10 + $0x84c] ss:$24 sps:$4 sm:$0xff]  }
 0x88f   : > { %v7337_v56 = vpop.f32.mrb[21].mxu1 }
 0x890   : > { %v26029_v37 = vpack.c.bf16 %v7337_v56, %v7337_v56  ;;  %9193 = vmatpush1.bf16.msra.mxu1 %v22700_v29  ;;  %9357 = vmatpush1.bf16.msra.mxu0 %v22703_v32  ;;  %v7339_v38 = vpop.f32.mrb[22].mxu1  ;;  %v22766_v29 = vld [vmem:[#allocation10 + $0x540] ss:$24 sps:$4 sm:$0xff]   ;;  %v22772_v56 = vld [vmem:[#allocation10 + $0x570] ss:$24 sps:$4 sm:$0xff]  }
 0x891   : > { %v7340_v9 = vpop.f32.mrb[23].mxu1  ;;  %9194 = vmatprep.subr.bf16.mxu1 %v22708_v30  ;;  %9358 = vmatprep.subr.bf16.mxu0 %v22711_v31  ;;  %v22769_v32 = vld [vmem:[#allocation10 + $0x848] ss:$24 sps:$4 sm:$0xff]   ;;  %v22774_v30 = vld [vmem:[#allocation10 + $0x574] ss:$24 sps:$4 sm:$0xff]  }
 0x892   : > { %9222 = vmatprep.mubr.bf16.mxu1 %v26029_v37  ;;  %v22777_v31 = vld [vmem:[#allocation10 + $0x87c] ss:$24 sps:$4 sm:$0xff]   ;;  %v22775_v38 = vld [vmem:[#allocation10 + $0x878] ss:$24 sps:$4 sm:$0xff]  }
 0x893   : > { %v22778_v9 = vld [vmem:[#allocation10 + $0x5a0] ss:$24 sps:$4 sm:$0xff]  }
 0x894   : > { %9195 = vmatpush1.bf16.msra.mxu1 %v22706_v27  ;;  %9359 = vmatpush1.bf16.msra.mxu0 %v22709_v35  ;;  %v22780_v27 = vld [vmem:[#allocation10 + $0x5a4] ss:$24 sps:$4 sm:$0xff]  }
 0x895   : > { %9196 = vmatprep.subr.bf16.mxu1 %v22714_v8  ;;  %9360 = vmatprep.subr.bf16.mxu0 %v22717_v17  ;;  %v22783_v35 = vld [vmem:[#allocation10 + $0x8ac] ss:$24 sps:$4 sm:$0xff]   ;;  %v22781_v8 = vld [vmem:[#allocation10 + $0x8a8] ss:$24 sps:$4 sm:$0xff]  }
 0x896   : > { %v26032_v48 = vpop.f32.mrb[24].mxu1  ;;  %v22786_v17 = vld [vmem:[#allocation10 + $0x5d4] ss:$24 sps:$4 sm:$0xff]  }
 0x897   : > { %v7378_v50 = vpop.f32.mrb[25].mxu1 }
 0x898   : > { %v26034_v43 = vpack.c.bf16 %v7378_v50, %v7378_v50  ;;  %9197 = vmatpush1.bf16.msra.mxu1 %v22712_v39  ;;  %9361 = vmatpush1.bf16.msra.mxu0 %v22715_v40  ;;  %v7380_v42 = vpop.f32.mrb[26].mxu1  ;;  %v22789_v39 = vld [vmem:[#allocation10 + $0x8dc] ss:$24 sps:$4 sm:$0xff]   ;;  %v22784_v40 = vld [vmem:[#allocation10 + $0x5d0] ss:$24 sps:$4 sm:$0xff]  }
 0x899   : > { %v7381_v52 = vpop.f32.mrb[27].mxu1  ;;  %9198 = vmatprep.subr.bf16.mxu1 %v22720_v41  ;;  %9362 = vmatprep.subr.bf16.mxu0 %v22723_v10  ;;  %v22787_v41 = vld [vmem:[#allocation10 + $0x8d8] ss:$24 sps:$4 sm:$0xff]   ;;  %v22792_v10 = vld [vmem:[#allocation10 + $0x604] ss:$24 sps:$4 sm:$0xff]  }
 0x89a   : > { %9386 = vmatprep.mubr.bf16.mxu0 %v26034_v43  ;;  %v22795_v50 = vld [vmem:[#allocation10 + $0x314] ss:$24 sps:$4 sm:$0xff]   ;;  %v22790_v42 = vld [vmem:[#allocation10 + $0x600] ss:$24 sps:$4 sm:$0xff]   ;;  %v22793_v52 = vld [vmem:[#allocation10 + $0x310] ss:$24 sps:$4 sm:$0xff]  }
 0x89c   : > { %9199 = vmatpush1.bf16.msra.mxu1 %v22718_v45  ;;  %9363 = vmatpush1.bf16.msra.mxu0 %v22721_v51  ;;  %v26039_v45 = vpack.c.bf16 %v26027_v49, %v26027_v49  ;;  %v26043_v51 = vpack.c.bf16 %v26032_v48, %v26032_v48  ;;  %v22799_v49 = vld [vmem:[#allocation10 + $0x340] ss:$24 sps:$4 sm:$0xff]   ;;  %v22807_v48 = vld [vmem:[#allocation10 + $0x374] ss:$24 sps:$4 sm:$0xff]  }
 0x89d   : > { %9200 = vmatprep.subr.bf16.mxu1 %v22726_v55  ;;  %9364 = vmatprep.subr.bf16.mxu0 %v22729_v24  ;;  %v22798_v55 = vld [vmem:[#allocation10 + $0x634] ss:$24 sps:$4 sm:$0xff]   ;;  %v22801_v24 = vld [vmem:[#allocation10 + $0x344] ss:$24 sps:$4 sm:$0xff]  }
 0x8a0   : > { %9201 = vmatpush1.bf16.msra.mxu1 %v22724_v47  ;;  %9365 = vmatpush1.bf16.msra.mxu0 %v22727_v20  ;;  %v22796_v47 = vld [vmem:[#allocation10 + $0x630] ss:$24 sps:$4 sm:$0xff]   ;;  %v22804_v20 = vld [vmem:[#allocation10 + $0x664] ss:$24 sps:$4 sm:$0xff]  }
 0x8a1   : > { %9202 = vmatprep.subr.bf16.mxu1 %v22732_v54  ;;  %9366 = vmatprep.subr.bf16.mxu0 %v22735_v1  ;;  %v22802_v54 = vld [vmem:[#allocation10 + $0x660] ss:$24 sps:$4 sm:$0xff]   ;;  %v22805_v1 = vld [vmem:[#allocation10 + $0x370] ss:$24 sps:$4 sm:$0xff]  }
 0x8a4   : > { %9203 = vmatpush1.bf16.msra.mxu1 %v22730_v57  ;;  %9367 = vmatpush1.bf16.msra.mxu0 %v22733_v5  ;;  %v22810_v57 = vld [vmem:[#allocation10 + $0x694] ss:$24 sps:$4 sm:$0xff]   ;;  %v22813_v5 = vld [vmem:[#allocation10 + $0x3a4] ss:$24 sps:$4 sm:$0xff]  }
 0x8a5   : > { %9204 = vmatprep.subr.bf16.mxu1 %v22738_v59  ;;  %9368 = vmatprep.subr.bf16.mxu0 %v22741_v60  ;;  %v22808_v59 = vld [vmem:[#allocation10 + $0x690] ss:$24 sps:$4 sm:$0xff]   ;;  %v22811_v60 = vld [vmem:[#allocation10 + $0x3a0] ss:$24 sps:$4 sm:$0xff]  }
 0x8a8   : > { %9205 = vmatpush1.bf16.msra.mxu1 %v22736_v61  ;;  %9369 = vmatpush1.bf16.msra.mxu0 %v22739_v62  ;;  %v22816_v61 = vld [vmem:[#allocation10 + $0x6c4] ss:$24 sps:$4 sm:$0xff]   ;;  %v22819_v62 = vld [vmem:[#allocation10 + $0x3d4] ss:$24 sps:$4 sm:$0xff]  }
 0x8a9   : > { %9206 = vmatprep.subr.bf16.mxu1 %v22744_v63  ;;  %9370 = vmatprep.subr.bf16.mxu0 %v22747_v58  ;;  %v22814_v63 = vld [vmem:[#allocation10 + $0x6c0] ss:$24 sps:$4 sm:$0xff]   ;;  %v22817_v58 = vld [vmem:[#allocation10 + $0x3d0] ss:$24 sps:$4 sm:$0xff]  }
 0x8ac   : > { %9207 = vmatpush1.bf16.msra.mxu1 %v22742_v0  ;;  %9371 = vmatpush1.bf16.msra.mxu0 %v22745_v3  ;;  %v22822_v0 = vld [vmem:[#allocation10 + $0x6f4] ss:$24 sps:$4 sm:$0xff]   ;;  %v22825_v3 = vld [vmem:[#allocation10 + $0x404] ss:$24 sps:$4 sm:$0xff]  }
 0x8ad   : > { %9208 = vmatprep.subr.bf16.mxu1 %v22750_v2  ;;  %9372 = vmatprep.subr.bf16.mxu0 %v22753_v4  ;;  %v22820_v2 = vld [vmem:[#allocation10 + $0x6f0] ss:$24 sps:$4 sm:$0xff]   ;;  %v22823_v4 = vld [vmem:[#allocation10 + $0x400] ss:$24 sps:$4 sm:$0xff]  }
 0x8b0   : > { %9209 = vmatpush1.bf16.msra.mxu1 %v22748_v6  ;;  %9373 = vmatpush1.bf16.msra.mxu0 %v22751_v7  ;;  %v22828_v6 = vld [vmem:[#allocation10 + $0x724] ss:$24 sps:$4 sm:$0xff]   ;;  %v22831_v7 = vld [vmem:[#allocation10 + $0x434] ss:$24 sps:$4 sm:$0xff]  }
 0x8b1   : > { %9210 = vmatprep.subr.bf16.mxu1 %v22756_v23  ;;  %9374 = vmatprep.subr.bf16.mxu0 %v22759_v33  ;;  %v22826_v23 = vld [vmem:[#allocation10 + $0x720] ss:$24 sps:$4 sm:$0xff]   ;;  %v22829_v33 = vld [vmem:[#allocation10 + $0x430] ss:$24 sps:$4 sm:$0xff]  }
 0x8b4   : > { %9211 = vmatpush1.bf16.msra.mxu1 %v22754_v19  ;;  %9375 = vmatpush1.bf16.msra.mxu0 %v22757_v12  ;;  %v22834_v19 = vld [vmem:[#allocation10 + $0x754] ss:$24 sps:$4 sm:$0xff]   ;;  %v22837_v12 = vld [vmem:[#allocation10 + $0x464] ss:$24 sps:$4 sm:$0xff]  }
 0x8b5   : > { %9212 = vmatprep.subr.bf16.mxu1 %v22762_v16  ;;  %9376 = vmatprep.subr.bf16.mxu0 %v22765_v18  ;;  %v22832_v16 = vld [vmem:[#allocation10 + $0x750] ss:$24 sps:$4 sm:$0xff]   ;;  %v22835_v18 = vld [vmem:[#allocation10 + $0x460] ss:$24 sps:$4 sm:$0xff]  }
 0x8b8   : > { %9213 = vmatpush1.bf16.msra.mxu1 %v22760_v21  ;;  %9377 = vmatpush1.bf16.msra.mxu0 %v22763_v26  ;;  %v22840_v21 = vld [vmem:[#allocation10 + $0x784] ss:$24 sps:$4 sm:$0xff]   ;;  %v22843_v26 = vld [vmem:[#allocation10 + $0x494] ss:$24 sps:$4 sm:$0xff]  }
 0x8b9   : > { %9214 = vmatprep.subr.bf16.mxu1 %v22768_v28  ;;  %9378 = vmatprep.subr.bf16.mxu0 %v22771_v13  ;;  %v22838_v28 = vld [vmem:[#allocation10 + $0x780] ss:$24 sps:$4 sm:$0xff]   ;;  %v22841_v13 = vld [vmem:[#allocation10 + $0x490] ss:$24 sps:$4 sm:$0xff]  }
 0x8bc   : > { %9215 = vmatpush1.bf16.msra.mxu1 %v22766_v29  ;;  %9379 = vmatpush1.bf16.msra.mxu0 %v22769_v32  ;;  %v22846_v29 = vld [vmem:[#allocation10 + $0x7b4] ss:$24 sps:$4 sm:$0xff]   ;;  %v22849_v32 = vld [vmem:[#allocation10 + $0x4c4] ss:$24 sps:$4 sm:$0xff]  }
 0x8bd   : > { %9216 = vmatprep.subr.bf16.mxu1 %v22774_v30  ;;  %9380 = vmatprep.subr.bf16.mxu0 %v22777_v31  ;;  %v22844_v30 = vld [vmem:[#allocation10 + $0x7b0] ss:$24 sps:$4 sm:$0xff]   ;;  %v22847_v31 = vld [vmem:[#allocation10 + $0x4c0] ss:$24 sps:$4 sm:$0xff]  }
 0x8c0   : > { %9217 = vmatpush1.bf16.msra.mxu1 %v22772_v56  ;;  %9381 = vmatpush1.bf16.msra.mxu0 %v22775_v38  ;;  %v22852_v56 = vld [vmem:[#allocation10 + $0x7e4] ss:$24 sps:$4 sm:$0xff]   ;;  %v22855_v38 = vld [vmem:[#allocation10 + $0x4f4] ss:$24 sps:$4 sm:$0xff]  }
 0x8c1   : > { %9218 = vmatprep.subr.bf16.mxu1 %v22780_v27  ;;  %9382 = vmatprep.subr.bf16.mxu0 %v22783_v35  ;;  %v22850_v27 = vld [vmem:[#allocation10 + $0x7e0] ss:$24 sps:$4 sm:$0xff]   ;;  %v22853_v35 = vld [vmem:[#allocation10 + $0x4f0] ss:$24 sps:$4 sm:$0xff]  }
 0x8c4   : > { %9219 = vmatpush1.bf16.msra.mxu1 %v22778_v9  ;;  %9383 = vmatpush1.bf16.msra.mxu0 %v22781_v8  ;;  %v22858_v9 = vld [vmem:[#allocation10 + $0x814] ss:$24 sps:$4 sm:$0xff]   ;;  %v22861_v8 = vld [vmem:[#allocation10 + $0x524] ss:$24 sps:$4 sm:$0xff]  }
 0x8c5   : > { %9220 = vmatprep.subr.bf16.mxu1 %v22786_v17  ;;  %9384 = vmatprep.subr.bf16.mxu0 %v22789_v39  ;;  %v22856_v17 = vld [vmem:[#allocation10 + $0x810] ss:$24 sps:$4 sm:$0xff]   ;;  %v22859_v39 = vld [vmem:[#allocation10 + $0x520] ss:$24 sps:$4 sm:$0xff]  }
 0x8c8   : > { %9221 = vmatpush1.bf16.msra.mxu1 %v22784_v40  ;;  %9385 = vmatpush1.bf16.msra.mxu0 %v22787_v41  ;;  %v22864_v40 = vld [vmem:[#allocation10 + $0x844] ss:$24 sps:$4 sm:$0xff]   ;;  %v22867_v41 = vld [vmem:[#allocation10 + $0x554] ss:$24 sps:$4 sm:$0xff]  }
 0x8c9   : > { %9231 = vmatprep.subr.bf16.mxu1 %v22792_v10  ;;  %9436 = vmatprep.subr.bf16.mxu0 %v22795_v50  ;;  %v22862_v10 = vld [vmem:[#allocation10 + $0x840] ss:$24 sps:$4 sm:$0xff]   ;;  %v22865_v50 = vld [vmem:[#allocation10 + $0x550] ss:$24 sps:$4 sm:$0xff]  }
 0x8cb   : > { %9223 = vmatmul.mubr.bf16.vlgmr.msra.gmra.mrb[32].mxu1 %v26039_v45  ;;  %9387 = vmatmul.mubr.bf16.vlgmr.msra.gmra.mrb[28].mxu0 %v26043_v51 }
 0x8cc   : > { %9232 = vmatpush1.bf16.msra.mxu1 %v22790_v42  ;;  %9263 = vmatprep.mubr.bf16.mxu1 %v26034_v43  ;;  %v22870_v42 = vld [vmem:[#allocation10 + $0x874] ss:$24 sps:$4 sm:$0xff]  }
 0x8cd   : > { %9437 = vmatpush1.bf16.msra.mxu0 %v22793_v52  ;;  %9468 = vmatprep.mubr.bf16.mxu0 %v26029_v37  ;;  %v22873_v52 = vld [vmem:[#allocation10 + $0x584] ss:$24 sps:$4 sm:$0xff]  }
 0x8ce   : > { %9233 = vmatprep.subr.bf16.mxu1 %v22798_v55  ;;  %9438 = vmatprep.subr.bf16.mxu0 %v22801_v24  ;;  %v22868_v55 = vld [vmem:[#allocation10 + $0x870] ss:$24 sps:$4 sm:$0xff]   ;;  %v22871_v24 = vld [vmem:[#allocation10 + $0x580] ss:$24 sps:$4 sm:$0xff]  }
 0x8d0   : > { %9234 = vmatpush1.bf16.msra.mxu1 %v22796_v47  ;;  %v22876_v47 = vld [vmem:[#allocation10 + $0x8a4] ss:$24 sps:$4 sm:$0xff]  }
 0x8d1   : > { %9439 = vmatpush1.bf16.msra.mxu0 %v22799_v49  ;;  %9235 = vmatprep.subr.bf16.mxu1 %v22804_v20  ;;  %v22879_v49 = vld [vmem:[#allocation10 + $0x5b4] ss:$24 sps:$4 sm:$0xff]   ;;  %v22874_v20 = vld [vmem:[#allocation10 + $0x8a0] ss:$24 sps:$4 sm:$0xff]  }
 0x8d2   : > { %9440 = vmatprep.subr.bf16.mxu0 %v22807_v48  ;;  %v22877_v48 = vld [vmem:[#allocation10 + $0x5b0] ss:$24 sps:$4 sm:$0xff]  }
 0x8d4   : > { %9236 = vmatpush1.bf16.msra.mxu1 %v22802_v54  ;;  %v22882_v54 = vld [vmem:[#allocation10 + $0x8d4] ss:$24 sps:$4 sm:$0xff]  }
 0x8d5   : > { %9441 = vmatpush1.bf16.msra.mxu0 %v22805_v1  ;;  %9237 = vmatprep.subr.bf16.mxu1 %v22810_v57  ;;  %v22885_v1 = vld [vmem:[#allocation10 + $0x5e4] ss:$24 sps:$4 sm:$0xff]   ;;  %v22880_v57 = vld [vmem:[#allocation10 + $0x8d0] ss:$24 sps:$4 sm:$0xff]  }
 0x8d6   : > { %9442 = vmatprep.subr.bf16.mxu0 %v22813_v5  ;;  %v22883_v5 = vld [vmem:[#allocation10 + $0x5e0] ss:$24 sps:$4 sm:$0xff]  }
 0x8d8   : > { %9238 = vmatpush1.bf16.msra.mxu1 %v22808_v59  ;;  %v22888_v59 = vld [vmem:[#allocation10 + $0x30c] ss:$24 sps:$4 sm:$0xff]  }
 0x8d9   : > { %9443 = vmatpush1.bf16.msra.mxu0 %v22811_v60  ;;  %9239 = vmatprep.subr.bf16.mxu1 %v22816_v61  ;;  %v22886_v60 = vld [vmem:[#allocation10 + $0x308] ss:$24 sps:$4 sm:$0xff]   ;;  %v22891_v61 = vld [vmem:[#allocation10 + $0x33c] ss:$24 sps:$4 sm:$0xff]  }
 0x8da   : > { %9444 = vmatprep.subr.bf16.mxu0 %v22819_v62  ;;  %v22889_v62 = vld [vmem:[#allocation10 + $0x338] ss:$24 sps:$4 sm:$0xff]  }
 0x8dc   : > { %9240 = vmatpush1.bf16.msra.mxu1 %v22814_v63  ;;  %v22894_v63 = vld [vmem:[#allocation10 + $0x36c] ss:$24 sps:$4 sm:$0xff]  }
 0x8dd   : > { %9445 = vmatpush1.bf16.msra.mxu0 %v22817_v58  ;;  %9241 = vmatprep.subr.bf16.mxu1 %v22822_v0  ;;  %v22892_v58 = vld [vmem:[#allocation10 + $0x368] ss:$24 sps:$4 sm:$0xff]   ;;  %v22897_v0 = vld [vmem:[#allocation10 + $0x39c] ss:$24 sps:$4 sm:$0xff]  }
 0x8de   : > { %9446 = vmatprep.subr.bf16.mxu0 %v22825_v3  ;;  %v22895_v3 = vld [vmem:[#allocation10 + $0x398] ss:$24 sps:$4 sm:$0xff]  }
 0x8e0   : > { %9242 = vmatpush1.bf16.msra.mxu1 %v22820_v2  ;;  %v22900_v2 = vld [vmem:[#allocation10 + $0x3cc] ss:$24 sps:$4 sm:$0xff]  }
 0x8e1   : > { %9447 = vmatpush1.bf16.msra.mxu0 %v22823_v4  ;;  %9243 = vmatprep.subr.bf16.mxu1 %v22828_v6  ;;  %v22898_v4 = vld [vmem:[#allocation10 + $0x3c8] ss:$24 sps:$4 sm:$0xff]   ;;  %v22903_v6 = vld [vmem:[#allocation10 + $0x3fc] ss:$24 sps:$4 sm:$0xff]  }
 0x8e2   : > { %9448 = vmatprep.subr.bf16.mxu0 %v22831_v7  ;;  %v22901_v7 = vld [vmem:[#allocation10 + $0x3f8] ss:$24 sps:$4 sm:$0xff]  }
 0x8e4   : > { %9244 = vmatpush1.bf16.msra.mxu1 %v22826_v23  ;;  %v22906_v23 = vld [vmem:[#allocation10 + $0x42c] ss:$24 sps:$4 sm:$0xff]  }
 0x8e5   : > { %9449 = vmatpush1.bf16.msra.mxu0 %v22829_v33  ;;  %9245 = vmatprep.subr.bf16.mxu1 %v22834_v19  ;;  %v22909_v33 = vld [vmem:[#allocation10 + $0x45c] ss:$24 sps:$4 sm:$0xff]   ;;  %v22907_v19 = vld [vmem:[#allocation10 + $0x458] ss:$24 sps:$4 sm:$0xff]  }
 0x8e6   : > { %9450 = vmatprep.subr.bf16.mxu0 %v22837_v12  ;;  %v22912_v12 = vld [vmem:[#allocation10 + $0x48c] ss:$24 sps:$4 sm:$0xff]  }
 0x8e8   : > { %9246 = vmatpush1.bf16.msra.mxu1 %v22832_v16  ;;  %v22910_v16 = vld [vmem:[#allocation10 + $0x488] ss:$24 sps:$4 sm:$0xff]  }
 0x8e9   : > { %9451 = vmatpush1.bf16.msra.mxu0 %v22835_v18  ;;  %9247 = vmatprep.subr.bf16.mxu1 %v22840_v21  ;;  %v22915_v18 = vld [vmem:[#allocation10 + $0x4bc] ss:$24 sps:$4 sm:$0xff]   ;;  %v22913_v21 = vld [vmem:[#allocation10 + $0x4b8] ss:$24 sps:$4 sm:$0xff]  }
 0x8ea   : > { %9452 = vmatprep.subr.bf16.mxu0 %v22843_v26  ;;  %v22918_v26 = vld [vmem:[#allocation10 + $0x4ec] ss:$24 sps:$4 sm:$0xff]  }
 0x8ec   : > { %9248 = vmatpush1.bf16.msra.mxu1 %v22838_v28  ;;  %v22916_v28 = vld [vmem:[#allocation10 + $0x4e8] ss:$24 sps:$4 sm:$0xff]  }
 0x8ed   : > { %9453 = vmatpush1.bf16.msra.mxu0 %v22841_v13  ;;  %9249 = vmatprep.subr.bf16.mxu1 %v22846_v29  ;;  %v22921_v13 = vld [vmem:[#allocation10 + $0x51c] ss:$24 sps:$4 sm:$0xff]   ;;  %v22919_v29 = vld [vmem:[#allocation10 + $0x518] ss:$24 sps:$4 sm:$0xff]  }
 0x8ee   : > { %9454 = vmatprep.subr.bf16.mxu0 %v22849_v32  ;;  %v22924_v32 = vld [vmem:[#allocation10 + $0x54c] ss:$24 sps:$4 sm:$0xff]  }
 0x8f0   : > { %9250 = vmatpush1.bf16.msra.mxu1 %v22844_v30  ;;  %v22922_v30 = vld [vmem:[#allocation10 + $0x548] ss:$24 sps:$4 sm:$0xff]  }
 0x8f1   : > { %9455 = vmatpush1.bf16.msra.mxu0 %v22847_v31  ;;  %9251 = vmatprep.subr.bf16.mxu1 %v22852_v56  ;;  %v22927_v31 = vld [vmem:[#allocation10 + $0x57c] ss:$24 sps:$4 sm:$0xff]   ;;  %v22925_v56 = vld [vmem:[#allocation10 + $0x578] ss:$24 sps:$4 sm:$0xff]  }
 0x8f2   : > { %9456 = vmatprep.subr.bf16.mxu0 %v22855_v38  ;;  %v22930_v38 = vld [vmem:[#allocation10 + $0x5ac] ss:$24 sps:$4 sm:$0xff]  }
 0x8f4   : > { %9252 = vmatpush1.bf16.msra.mxu1 %v22850_v27  ;;  %v22928_v27 = vld [vmem:[#allocation10 + $0x5a8] ss:$24 sps:$4 sm:$0xff]  }
 0x8f5   : > { %9457 = vmatpush1.bf16.msra.mxu0 %v22853_v35  ;;  %9253 = vmatprep.subr.bf16.mxu1 %v22858_v9  ;;  %v22933_v35 = vld [vmem:[#allocation10 + $0x5dc] ss:$24 sps:$4 sm:$0xff]   ;;  %v22931_v9 = vld [vmem:[#allocation10 + $0x5d8] ss:$24 sps:$4 sm:$0xff]  }
 0x8f6   : > { %9458 = vmatprep.subr.bf16.mxu0 %v22861_v8  ;;  %v22936_v8 = vld [vmem:[#allocation10 + $0x14] ss:$24 sps:$4 sm:$0xff]  }
 0x8f8   : > { %9254 = vmatpush1.bf16.msra.mxu1 %v22856_v17  ;;  %v22934_v17 = vld [vmem:[#allocation10 + $0x10] ss:$24 sps:$4 sm:$0xff]  }
 0x8f9   : > { %9459 = vmatpush1.bf16.msra.mxu0 %v22859_v39  ;;  %9255 = vmatprep.subr.bf16.mxu1 %v22864_v40  ;;  %v22939_v39 = vld [vmem:[#allocation10 + $0x44] ss:$24 sps:$4 sm:$0xff]   ;;  %v22937_v40 = vld [vmem:[#allocation10 + $0x40] ss:$24 sps:$4 sm:$0xff]  }
 0x8fa   : > { %9460 = vmatprep.subr.bf16.mxu0 %v22867_v41  ;;  %v22942_v41 = vld [vmem:[#allocation10 + $0x74] ss:$24 sps:$4 sm:$0xff]  }
 0x8fc   : > { %9256 = vmatpush1.bf16.msra.mxu1 %v22862_v10  ;;  %v22940_v10 = vld [vmem:[#allocation10 + $0x70] ss:$24 sps:$4 sm:$0xff]  }
 0x8fd   : > { %9461 = vmatpush1.bf16.msra.mxu0 %v22865_v50  ;;  %9257 = vmatprep.subr.bf16.mxu1 %v22870_v42  ;;  %v22945_v50 = vld [vmem:[#allocation10 + $0xa4] ss:$24 sps:$4 sm:$0xff]   ;;  %v22943_v42 = vld [vmem:[#allocation10 + $0xa0] ss:$24 sps:$4 sm:$0xff]  }
 0x8fe   : > { %9462 = vmatprep.subr.bf16.mxu0 %v22873_v52  ;;  %v22948_v52 = vld [vmem:[#allocation10 + $0xd4] ss:$24 sps:$4 sm:$0xff]  }
 0x900   : > { %9258 = vmatpush1.bf16.msra.mxu1 %v22868_v55  ;;  %v22946_v55 = vld [vmem:[#allocation10 + $0xd0] ss:$24 sps:$4 sm:$0xff]  }
 0x901   : > { %9463 = vmatpush1.bf16.msra.mxu0 %v22871_v24  ;;  %9259 = vmatprep.subr.bf16.mxu1 %v22876_v47  ;;  %v22951_v24 = vld [vmem:[#allocation10 + $0x104] ss:$24 sps:$4 sm:$0xff]   ;;  %v22954_v47 = vld [vmem:[#allocation10 + $0x134] ss:$24 sps:$4 sm:$0xff]  }
 0x902   : > { %9464 = vmatprep.subr.bf16.mxu0 %v22879_v49 }
 0x904   : > { %9260 = vmatpush1.bf16.msra.mxu1 %v22874_v20 }
 0x905   : > { %9465 = vmatpush1.bf16.msra.mxu0 %v22877_v48  ;;  %9261 = vmatprep.subr.bf16.mxu1 %v22882_v54 }
 0x906   : > { %9466 = vmatprep.subr.bf16.mxu0 %v22885_v1 }
 0x908   : > { %9262 = vmatpush1.bf16.msra.mxu1 %v22880_v57  ;;  %v22952_v57 = vld [vmem:[#allocation10 + $0x130] ss:$24 sps:$4 sm:$0xff]  }
 0x909   : > { %9467 = vmatpush1.bf16.msra.mxu0 %v22883_v5  ;;  %9313 = vmatprep.subr.bf16.mxu1 %v22888_v59 }
 0x90b   : > { %9264 = vmatmul.mubr.bf16.vlgmr.msra.gmra.mrb[36].mxu1 %v26043_v51 }
 0x90c   : > { %9469 = vmatmul.mubr.bf16.vlgmr.msra.gmra.mrb[32].mxu0 %v26039_v45  ;;  %9314 = vmatpush1.bf16.msra.mxu1 %v22886_v60  ;;  %v22957_v60 = vld [vmem:[#allocation10 + $0x164] ss:$24 sps:$4 sm:$0xff]  }
 0x90d   : > { %9345 = vmatprep.mubr.bf16.mxu1 %v26029_v37  ;;  %9315 = vmatprep.subr.bf16.mxu1 %v22891_v61  ;;  %v22904_v37 = vld [vmem:[#allocation10 + $0x428] ss:$24 sps:$4 sm:$0xff]  }
 0x90e   : > { %v22955_v61 = vld [vmem:[#allocation10 + $0x160] ss:$24 sps:$4 sm:$0xff]  }
 0x910   : > { %9316 = vmatpush1.bf16.msra.mxu1 %v22889_v62  ;;  %v22960_v62 = vld [vmem:[#allocation10 + $0x194] ss:$24 sps:$4 sm:$0xff]  }
 0x911   : > { %9317 = vmatprep.subr.bf16.mxu1 %v22894_v63  ;;  %v22958_v63 = vld [vmem:[#allocation10 + $0x190] ss:$24 sps:$4 sm:$0xff]  }
 0x914   : > { %9318 = vmatpush1.bf16.msra.mxu1 %v22892_v58  ;;  %v22963_v58 = vld [vmem:[#allocation10 + $0x1c4] ss:$24 sps:$4 sm:$0xff]  }
 0x915   : > { %9319 = vmatprep.subr.bf16.mxu1 %v22897_v0  ;;  %v22961_v0 = vld [vmem:[#allocation10 + $0x1c0] ss:$24 sps:$4 sm:$0xff]  }
 0x918   : > { %9320 = vmatpush1.bf16.msra.mxu1 %v22895_v3  ;;  %v22966_v3 = vld [vmem:[#allocation10 + $0x1f4] ss:$24 sps:$4 sm:$0xff]  }
 0x919   : > { %9321 = vmatprep.subr.bf16.mxu1 %v22900_v2  ;;  %v22964_v2 = vld [vmem:[#allocation10 + $0x1f0] ss:$24 sps:$4 sm:$0xff]  }
 0x91c   : > { %9322 = vmatpush1.bf16.msra.mxu1 %v22898_v4  ;;  %v22969_v4 = vld [vmem:[#allocation10 + $0x224] ss:$24 sps:$4 sm:$0xff]  }
 0x91d   : > { %9323 = vmatprep.subr.bf16.mxu1 %v22903_v6  ;;  %v22967_v6 = vld [vmem:[#allocation10 + $0x220] ss:$24 sps:$4 sm:$0xff]  }
 0x920   : > { %9324 = vmatpush1.bf16.msra.mxu1 %v22901_v7  ;;  %v22972_v7 = vld [vmem:[#allocation10 + $0x254] ss:$24 sps:$4 sm:$0xff]  }
 0x921   : > { %9325 = vmatprep.subr.bf16.mxu1 %v22906_v23  ;;  %v22970_v23 = vld [vmem:[#allocation10 + $0x250] ss:$24 sps:$4 sm:$0xff]  }
 0x924   : > { %9326 = vmatpush1.bf16.msra.mxu1 %v22904_v37  ;;  %v22975_v37 = vld [vmem:[#allocation10 + $0x284] ss:$24 sps:$4 sm:$0xff]  }
 0x925   : > { %9327 = vmatprep.subr.bf16.mxu1 %v22909_v33  ;;  %v22973_v33 = vld [vmem:[#allocation10 + $0x280] ss:$24 sps:$4 sm:$0xff]  }
 0x928   : > { %9328 = vmatpush1.bf16.msra.mxu1 %v22907_v19  ;;  %v22978_v19 = vld [vmem:[#allocation10 + $0x2b4] ss:$24 sps:$4 sm:$0xff]  }
 0x929   : > { %9329 = vmatprep.subr.bf16.mxu1 %v22912_v12  ;;  %v22976_v12 = vld [vmem:[#allocation10 + $0x2b0] ss:$24 sps:$4 sm:$0xff]  }
 0x92c   : > { %9330 = vmatpush1.bf16.msra.mxu1 %v22910_v16  ;;  %v22981_v16 = vld [vmem:[#allocation10 + $0x2e4] ss:$24 sps:$4 sm:$0xff]  }
 0x92d   : > { %9331 = vmatprep.subr.bf16.mxu1 %v22915_v18  ;;  %v22979_v18 = vld [vmem:[#allocation10 + $0x2e0] ss:$24 sps:$4 sm:$0xff]  }
 0x930   : > { %9332 = vmatpush1.bf16.msra.mxu1 %v22913_v21  ;;  %v22984_v21 = vld [vmem:[#allocation10 + $0x614] ss:$24 sps:$4 sm:$0xff]  }
 0x931   : > { %9333 = vmatprep.subr.bf16.mxu1 %v22918_v26  ;;  %v22982_v26 = vld [vmem:[#allocation10 + $0x610] ss:$24 sps:$4 sm:$0xff]  }
 0x934   : > { %9334 = vmatpush1.bf16.msra.mxu1 %v22916_v28  ;;  %v22987_v28 = vld [vmem:[#allocation10 + $0x644] ss:$24 sps:$4 sm:$0xff]  }
 0x935   : > { %9335 = vmatprep.subr.bf16.mxu1 %v22921_v13  ;;  %v22985_v13 = vld [vmem:[#allocation10 + $0x640] ss:$24 sps:$4 sm:$0xff]  }
 0x938   : > { %9336 = vmatpush1.bf16.msra.mxu1 %v22919_v29  ;;  %v22990_v29 = vld [vmem:[#allocation10 + $0x674] ss:$24 sps:$4 sm:$0xff]  }
 0x939   : > { %9337 = vmatprep.subr.bf16.mxu1 %v22924_v32  ;;  %v22988_v32 = vld [vmem:[#allocation10 + $0x670] ss:$24 sps:$4 sm:$0xff]  }
 0x93c   : > { %9338 = vmatpush1.bf16.msra.mxu1 %v22922_v30  ;;  %v22993_v30 = vld [vmem:[#allocation10 + $0x6a4] ss:$24 sps:$4 sm:$0xff]  }
 0x93d   : > { %9339 = vmatprep.subr.bf16.mxu1 %v22927_v31  ;;  %v22991_v31 = vld [vmem:[#allocation10 + $0x6a0] ss:$24 sps:$4 sm:$0xff]  }
 0x940   : > { %9340 = vmatpush1.bf16.msra.mxu1 %v22925_v56  ;;  %v22996_v56 = vld [vmem:[#allocation10 + $0x6d4] ss:$24 sps:$4 sm:$0xff]  }
 0x941   : > { %9341 = vmatprep.subr.bf16.mxu1 %v22930_v38  ;;  %v26064_v38 = vld [vmem:[#allocation11] sm:$0x3f] }
 0x944   : > { %9342 = vmatpush1.bf16.msra.mxu1 %v22928_v27  ;;  %v22994_v27 = vld [vmem:[#allocation10 + $0x6d0] ss:$24 sps:$4 sm:$0xff]  }
 0x945   : > { %9343 = vmatprep.subr.bf16.mxu1 %v22933_v35  ;;  %v7686_v35 = vrot.slane %v26064_v38, %v25926_v14 }
 0x948   : > { %9344 = vmatpush1.bf16.msra.mxu1 %v22931_v9  ;;  %v22997_v9 = vld [vmem:[#allocation10 + $0x700] ss:$24 sps:$4 sm:$0xff]  }
 0x949   : > { %9395 = vmatprep.subr.bf16.mxu1 %v22936_v8 }
 0x94b   : > { %9346 = vmatmul.mubr.bf16.vlgmr.msra.gmra.mrb[40].mxu1 %v26039_v45  ;;  %v22949_v45 = vld [vmem:[#allocation10 + $0x100] ss:$24 sps:$4 sm:$0xff]  }
 0x94c   : > { %9396 = vmatpush1.bf16.msra.mxu1 %v22934_v17  ;;  %9427 = vmatprep.mubr.bf16.mxu1 %v26019_v15  ;;  %v23002_v17 = vld [vmem:[#allocation10 + $0x734] ss:$24 sps:$4 sm:$0xff]  }
 0x94d   : > { %9397 = vmatprep.subr.bf16.mxu1 %v22939_v39 }
 0x950   : > { %9398 = vmatpush1.bf16.msra.mxu1 %v22937_v40 }
 0x951   : > { %9399 = vmatprep.subr.bf16.mxu1 %v22942_v41 }
 0x954   : > { %9400 = vmatpush1.bf16.msra.mxu1 %v22940_v10 }
 0x955   : > { %9401 = vmatprep.subr.bf16.mxu1 %v22945_v50 }
 0x958   : > { %9402 = vmatpush1.bf16.msra.mxu1 %v22943_v42 }
 0x959   : > { %9403 = vmatprep.subr.bf16.mxu1 %v22948_v52 }
 0x95c   : > { %9404 = vmatpush1.bf16.msra.mxu1 %v22946_v55 }
 0x95d   : > { %9405 = vmatprep.subr.bf16.mxu1 %v22951_v24 }
 0x95e   : > { %v26054_v15 = vpop.f32.mrb[28].mxu1  ;;  %v26056_v49 = vpop.f32.mrb[24].mxu0 }
 0x95f   : > { %v26058_v20 = vpop.f32.mrb[29].mxu1  ;;  %v26060_v48 = vpop.f32.mrb[25].mxu0 }
 0x960   : > { %9406 = vmatpush1.bf16.msra.mxu1 %v22949_v45  ;;  %v9187_v54 = vpop.f32.mrb[30].mxu1  ;;  %v9310_v1 = vpop.f32.mrb[26].mxu0  ;;  %v9186_v39 = vadd.f32 %v26058_v20, %v7686_v35  ;;  %v23000_v45 = vld [vmem:[#allocation10 + $0x730] ss:$24 sps:$4 sm:$0xff]   ;;  %v23008_v20 = vld [vmem:[#allocation10 + $0x794] ss:$24 sps:$4 sm:$0xff]  }
 0x961   : > { %v9188_v5 = vpop.f32.mrb[31].mxu1  ;;  %v9311_v59 = vpop.f32.mrb[27].mxu0  ;;  %9407 = vmatprep.subr.bf16.mxu1 %v22954_v47  ;;  %v23003_v1 = vld [vmem:[#allocation10 + $0x760] ss:$24 sps:$4 sm:$0xff]  }
 0x962   : > { %v23011_v5 = vld [vmem:[#allocation10 + $0x7c4] ss:$24 sps:$4 sm:$0xff]   ;;  %v23009_v59 = vld [vmem:[#allocation10 + $0x7c0] ss:$24 sps:$4 sm:$0xff]  }
 0x964   : > { %9408 = vmatpush1.bf16.msra.mxu1 %v22952_v57  ;;  %v23006_v57 = vld [vmem:[#allocation10 + $0x790] ss:$24 sps:$4 sm:$0xff]  }
 0x965   : > { %9409 = vmatprep.subr.bf16.mxu1 %v22957_v60  ;;  %v23014_v60 = vld [vmem:[#allocation10 + $0x7f4] ss:$24 sps:$4 sm:$0xff]  }
 0x968   : > { %9410 = vmatpush1.bf16.msra.mxu1 %v22955_v61  ;;  %v23012_v61 = vld [vmem:[#allocation10 + $0x7f0] ss:$24 sps:$4 sm:$0xff]  }
 0x969   : > { %9411 = vmatprep.subr.bf16.mxu1 %v22960_v62  ;;  %v23017_v62 = vld [vmem:[#allocation10 + $0x824] ss:$24 sps:$4 sm:$0xff]  }
 0x96c   : > { %9412 = vmatpush1.bf16.msra.mxu1 %v22958_v63  ;;  %v23015_v63 = vld [vmem:[#allocation10 + $0x820] ss:$24 sps:$4 sm:$0xff]  }
 0x96d   : > { %9413 = vmatprep.subr.bf16.mxu1 %v22963_v58  ;;  %v23020_v58 = vld [vmem:[#allocation10 + $0x854] ss:$24 sps:$4 sm:$0xff]  }
 0x970   : > { %9414 = vmatpush1.bf16.msra.mxu1 %v22961_v0  ;;  %v23018_v0 = vld [vmem:[#allocation10 + $0x850] ss:$24 sps:$4 sm:$0xff]  }
 0x971   : > { %9415 = vmatprep.subr.bf16.mxu1 %v22966_v3  ;;  %v23023_v3 = vld [vmem:[#allocation10 + $0x884] ss:$24 sps:$4 sm:$0xff]  }
 0x974   : > { %9416 = vmatpush1.bf16.msra.mxu1 %v22964_v2  ;;  %v23021_v2 = vld [vmem:[#allocation10 + $0x880] ss:$24 sps:$4 sm:$0xff]  }
 0x975   : > { %9417 = vmatprep.subr.bf16.mxu1 %v22969_v4  ;;  %v23026_v4 = vld [vmem:[#allocation10 + $0x8b4] ss:$24 sps:$4 sm:$0xff]  }
 0x978   : > { %9418 = vmatpush1.bf16.msra.mxu1 %v22967_v6  ;;  %v23024_v6 = vld [vmem:[#allocation10 + $0x8b0] ss:$24 sps:$4 sm:$0xff]  }
 0x979   : > { %9419 = vmatprep.subr.bf16.mxu1 %v22972_v7  ;;  %v23029_v7 = vld [vmem:[#allocation10 + $0x8e4] ss:$24 sps:$4 sm:$0xff]  }
 0x97c   : > { %9420 = vmatpush1.bf16.msra.mxu1 %v22970_v23  ;;  %v23027_v23 = vld [vmem:[#allocation10 + $0x8e0] ss:$24 sps:$4 sm:$0xff]  }
 0x97d   : > { %9421 = vmatprep.subr.bf16.mxu1 %v22975_v37 }
 0x980   : > { %9422 = vmatpush1.bf16.msra.mxu1 %v22973_v33 }
 0x981   : > { %9423 = vmatprep.subr.bf16.mxu1 %v22978_v19 }
 0x984   : > { %9424 = vmatpush1.bf16.msra.mxu1 %v22976_v12 }
 0x985   : > { %9425 = vmatprep.subr.bf16.mxu1 %v22981_v16 }
 0x988   : > { %9426 = vmatpush1.bf16.msra.mxu1 %v22979_v18 }
 0x989   : > { %9477 = vmatprep.subr.bf16.mxu1 %v22984_v21 }
 0x98b   : > { %9428 = vmatmul.mubr.bf16.vlgmr.msra.gmra.mrb[44].mxu1 %v26021_v22  ;;  %v7682_v22 = vrot.slane %v26064_v38, %v25942_v34 }
 0x98c   : > { %9478 = vmatpush1.bf16.msra.mxu1 %v22982_v26  ;;  %9509 = vmatprep.mubr.bf16.mxu1 %v26034_v43  ;;  %v22999_v43 = vld [vmem:[#allocation10 + $0x704] ss:$24 sps:$4 sm:$0xff]  }
 0x98d   : > { %9479 = vmatprep.subr.bf16.mxu1 %v22987_v28  ;;  %v9184_v8 = vadd.f32 %v26054_v15, %v7682_v22  ;;  %v23005_v15 = vld [vmem:[#allocation10 + $0x764] ss:$24 sps:$4 sm:$0xff]  }
 0x990   : > { %9480 = vmatpush1.bf16.msra.mxu1 %v22985_v13 }
 0x991   : > { %9481 = vmatprep.subr.bf16.mxu1 %v22990_v29  ;;  %v7690_v29 = vrot.slane %v26064_v38, %v25961_v44 }
 0x994   : > { %9482 = vmatpush1.bf16.msra.mxu1 %v22988_v32  ;;  %v7694_v32 = vrot.slane %v26064_v38, %v25944_v36 }
 0x995   : > { %9483 = vmatprep.subr.bf16.mxu1 %v22993_v30  ;;  %v9307_v30 = vadd.f32 %v26056_v49, %v7690_v29  ;;  %v7702_v49 = vrot.slane %v26064_v38, %v25963_v46  ;;  %v23045_v29 = vld [vmem:[#allocation16 + $0xc8] ss:$48 sps:$4 sm:$0xff]  }
 0x998   : > { %9484 = vmatpush1.bf16.msra.mxu1 %v22991_v31 }
 0x999   : > { %9485 = vmatprep.subr.bf16.mxu1 %v22996_v56 }
 0x99c   : > { %9486 = vmatpush1.bf16.msra.mxu1 %v22994_v27 }
 0x99d   : > { %9487 = vmatprep.subr.bf16.mxu1 %v22999_v43 }
 0x99e   : > { %v9224_v40 = vpop.f32.mrb[32].mxu1  ;;  %v26072_v41 = vpop.f32.mrb[28].mxu0 }
 0x99f   : > { %v9225_v10 = vadd.f32 %v9224_v40, %v9184_v8  ;;  %v9226_v50 = vpop.f32.mrb[33].mxu1  ;;  %v26074_v42 = vpop.f32.mrb[29].mxu0 }
 0x9a0   : > { %v9227_v52 = vadd.f32 %v9226_v50, %v9186_v39  ;;  %v9228_v55 = vpop.f32.mrb[34].mxu1  ;;  %v9392_v24 = vpop.f32.mrb[30].mxu0  ;;  %9488 = vmatpush1.bf16.msra.mxu1 %v22997_v9 }
 0x9a1   : > { %v9229_v47 = vpop.f32.mrb[35].mxu1  ;;  %v9393_v54 = vpop.f32.mrb[31].mxu0  ;;  %9489 = vmatprep.subr.bf16.mxu1 %v23002_v17  ;;  %v7698_v17 = vrot.slane %v26064_v38, %v25965_v53 }
 0x9a2   : > { %v24792_v54 = vld [vmem:[%s25787_s2 + $0x10] sm:$0xff] }
 0x9a4   : > { %9490 = vmatpush1.bf16.msra.mxu1 %v23000_v45 }
 0x9a5   : > { %9491 = vmatprep.subr.bf16.mxu1 %v23005_v15 }
 0x9a8   : > { %9492 = vmatpush1.bf16.msra.mxu1 %v23003_v1  ;;  %v24793_v1 = vld [vmem:[%s25787_s2 + $0x18] sm:$0xff] }
 0x9a9   : > { %9493 = vmatprep.subr.bf16.mxu1 %v23008_v20 }
 0x9ac   : > { %9494 = vmatpush1.bf16.msra.mxu1 %v23006_v57 }
 0x9ad   : > { %9495 = vmatprep.subr.bf16.mxu1 %v23011_v5 }
 0x9b0   : > { %9496 = vmatpush1.bf16.msra.mxu1 %v23009_v59 }
 0x9b1   : > { %9497 = vmatprep.subr.bf16.mxu1 %v23014_v60 }
 0x9b4   : > { %9498 = vmatpush1.bf16.msra.mxu1 %v23012_v61 }
 0x9b5   : > { %9499 = vmatprep.subr.bf16.mxu1 %v23017_v62 }
 0x9b8   : > { %9500 = vmatpush1.bf16.msra.mxu1 %v23015_v63  ;;  %v24794_v63 = vld [vmem:[%s25787_s2 + $0x20] sm:$0xff] }
 0x9b9   : > { %9501 = vmatprep.subr.bf16.mxu1 %v23020_v58 }
 0x9bc   : > { %9502 = vmatpush1.bf16.msra.mxu1 %v23018_v0 }
 0x9bd   : > { %9503 = vmatprep.subr.bf16.mxu1 %v23023_v3 }
 0x9c0   : > { %9504 = vmatpush1.bf16.msra.mxu1 %v23021_v2  ;;  %v24795_v2 = vld [vmem:[%s25787_s2 + $0x28] sm:$0xff] }
 0x9c1   : > { %9505 = vmatprep.subr.bf16.mxu1 %v23026_v4 }
 0x9c4   : > { %9506 = vmatpush1.bf16.msra.mxu1 %v23024_v6 }
 0x9c5   : > { %9507 = vmatprep.subr.bf16.mxu1 %v23029_v7 }
 0x9c8   : > { %9508 = vmatpush1.bf16.msra.mxu1 %v23027_v23  ;;  %v23030_v23 = vld [vmem:[#allocation16] ss:$48 sps:$4 sm:$0xff]  }
 0x9cb   : > { %9510 = vmatmul.mubr.bf16.vlgmr.msra.gmra.mrb[48].mxu1 %v26043_v51  ;;  %v9309_v51 = vadd.f32 %v26060_v48, %v7694_v32  ;;  %v23050_v32 = vld [vmem:[#allocation16 + $0x124] ss:$48 sps:$4 sm:$0xff]  }
 0x9de   : > { %v9265_v37 = vpop.f32.mrb[36].mxu1 }
 0x9df   : > { %v9266_v33 = vadd.f32 %v9265_v37, %v9225_v10  ;;  %v9470_v19 = vpop.f32.mrb[32].mxu0  ;;  %v9267_v12 = vpop.f32.mrb[37].mxu1  ;;  %v23032_v37 = vld [vmem:[#allocation16 + $0x4] ss:$48 sps:$4 sm:$0xff]  }
 0x9e0   : > { %v9268_v16 = vadd.f32 %v9267_v12, %v9227_v52  ;;  %v9472_v18 = vpop.f32.mrb[33].mxu0  ;;  %v9269_v21 = vpop.f32.mrb[38].mxu1  ;;  %v23038_v12 = vld [vmem:[#allocation16 + $0x64] ss:$48 sps:$4 sm:$0xff]   ;;  %13163 = vmatprep.subr.bf16.mxu0 %v23032_v37 }
 0x9e1   : > { %v9474_v26 = vpop.f32.mrb[34].mxu0  ;;  %v9270_v28 = vpop.f32.mrb[39].mxu1  ;;  %13164 = vmatpush1.bf16.msra.mxu0 %v23030_v23  ;;  %v23039_v21 = vld [vmem:[#allocation16 + $0x68] ss:$48 sps:$4 sm:$0xff]  }
 0x9e2   : > { %v9475_v13 = vpop.f32.mrb[35].mxu0  ;;  %13165 = vmatprep.subr.bf16.mxu0 %v23038_v12  ;;  %v23044_v26 = vld [vmem:[#allocation16 + $0xc4] ss:$48 sps:$4 sm:$0xff]   ;;  %v23047_v28 = vld [vmem:[#allocation16 + $0xcc] ss:$48 sps:$4 sm:$0xff]  }
 0x9e3   : > { %v23042_v13 = vld [vmem:[#allocation16 + $0xc0] ss:$48 sps:$4 sm:$0xff]  }
 0xa1e   : > { %v9347_v31 = vpop.f32.mrb[40].mxu1 }
 0xa1f   : > { %v9348_v56 = vadd.f32 %v9347_v31, %v9307_v30  ;;  %v9349_v27 = vpop.f32.mrb[41].mxu1  ;;  %v23053_v30 = vld [vmem:[#allocation16 + $0x12c] ss:$48 sps:$4 sm:$0xff]   ;;  %v23051_v31 = vld [vmem:[#allocation16 + $0x128] ss:$48 sps:$4 sm:$0xff]  }
 0xa20   : > { %v9350_v22 = vadd.f32 %v9349_v27, %v9309_v51  ;;  %v9351_v43 = vpop.f32.mrb[42].mxu1  ;;  %v23048_v51 = vld [vmem:[#allocation16 + $0x120] ss:$48 sps:$4 sm:$0xff]   ;;  %v23059_v27 = vld [vmem:[#allocation16 + $0x18c] ss:$48 sps:$4 sm:$0xff]  }
 0xa21   : > { %v9389_v35 = vadd.f32 %v26072_v41, %v9348_v56  ;;  %v9352_v9 = vpop.f32.mrb[43].mxu1  ;;  %v24790_v41 = vld [vmem:[%s25787_s2] sm:$0xff]  ;;  %v23056_v56 = vld [vmem:[#allocation16 + $0x184] ss:$48 sps:$4 sm:$0xff]  }
 0xa22   : > { %v9391_v8 = vadd.f32 %v26074_v42, %v9350_v22  ;;  %v26090_v45 = vadd.f32 %v24790_v41, %v9266_v33  ;;  %v24791_v42 = vld [vmem:[%s25787_s2 + $0x8] sm:$0xff]  ;;  %v23065_v9 = vld [vmem:[#allocation16 + $0x1ec] ss:$48 sps:$4 sm:$0xff]   ;;  %s25193_s2 = scalar_lea.vmem %s26458_s14, 384 }
 0xa23   : > { %v26093_v47 = vadd.f32 %v24791_v42, %v9268_v16  ;;  %v26096_v15 = vadd.f32 %v24792_v54, %v9389_v35  ;;  %v23033_v33 = vld [vmem:[#allocation16 + $0x8] ss:$48 sps:$4 sm:$0xff]   ;;  %v23041_v16 = vld [vmem:[#allocation16 + $0x6c] ss:$48 sps:$4 sm:$0xff]   ;;  %v23054_v22 = vld [vmem:[#allocation16 + $0x180] ss:$48 sps:$4 sm:$0xff]   ;;  %p25194_p11 = scmp.ne.s32.totalorder %s26458_s14, %s25193_s2  ;;  %p25201_p1 = scmp.lt.s32.totalorder %s25199_s22, %s25193_s2 }
 0xa24   : > { %v26101_v20 = vadd.f32 %v24793_v1, %v9391_v8  ;;  %v23057_v43 = vld [vmem:[#allocation16 + $0x188] ss:$48 sps:$4 sm:$0xff]   ;;  %v23062_v35 = vld [vmem:[#allocation16 + $0x1e4] ss:$48 sps:$4 sm:$0xff]   ;;  %v23060_v8 = vld [vmem:[#allocation16 + $0x1e0] ss:$48 sps:$4 sm:$0xff]  }
 0xa25   : > { %v9524_v38 = vadd.f32 %v26093_v47, %v26090_v45  ;;  %v23083_v41 = vld [vmem:[#allocation16 + $0x30c] ss:$48 sps:$4 sm:$0xff]   ;;  %v23078_v42 = vld [vmem:[#allocation16 + $0x300] ss:$48 sps:$4 sm:$0xff]   ;;  %v23081_v54 = vld [vmem:[#allocation16 + $0x308] ss:$48 sps:$4 sm:$0xff]   ;;  %p25195_p9 = pnand %p25194_p11, %p26578_p8  ;;  %p25202_p3 = por %p25201_p1, %p25200_p13 }
 0xa26   : > { %v23089_v1 = vld [vmem:[#allocation16 + $0x36c] ss:$48 sps:$4 sm:$0xff]  }
 0xa27   : > { %v9525_v57 = vadd.f32 %v9524_v38, %v26096_v15  ;;  %v23086_v38 = vld [vmem:[#allocation16 + $0x364] ss:$48 sps:$4 sm:$0xff]   ;;  %p25196_p12 = pneg %p25195_p9 }
 0xa29   : > { %v9526_v3 = vadd.f32 %v9525_v57, %v26101_v20  ;;  %v23084_v57 = vld [vmem:[#allocation16 + $0x360] ss:$48 sps:$4 sm:$0xff]   ;;  %p25203_p2 = pnand %p25202_p3, %p25196_p12 }
 0xa5e   : > { %v9429_v48 = vpop.f32.mrb[44].mxu1 }
 0xa5f   : > { %v9430_v39 = vadd.f32 %v9429_v48, %v7698_v17  ;;  %v9431_v40 = vpop.f32.mrb[45].mxu1  ;;  %v23063_v17 = vld [vmem:[#allocation16 + $0x1e8] ss:$48 sps:$4 sm:$0xff]   ;;  %v23071_v48 = vld [vmem:[#allocation16 + $0x24c] ss:$48 sps:$4 sm:$0xff]  }
 0xa60   : > { %v9432_v10 = vadd.f32 %v9431_v40, %v7702_v49  ;;  %v9433_v50 = vpop.f32.mrb[46].mxu1  ;;  %v23068_v49 = vld [vmem:[#allocation16 + $0x244] ss:$48 sps:$4 sm:$0xff]   ;;  %v23069_v40 = vld [vmem:[#allocation16 + $0x248] ss:$48 sps:$4 sm:$0xff]  }
 0xa61   : > { %v9434_v52 = vpop.f32.mrb[47].mxu1  ;;  %v9471_v55 = vadd.f32 %v9470_v19, %v9430_v39  ;;  %v23035_v19 = vld [vmem:[#allocation16 + $0xc] ss:$48 sps:$4 sm:$0xff]   ;;  %v23066_v39 = vld [vmem:[#allocation16 + $0x240] ss:$48 sps:$4 sm:$0xff]  }
 0xa62   : > { %v9473_v24 = vadd.f32 %v9472_v18, %v9432_v10  ;;  %13286 = vmatprep.subr.bf16.mxu1 %v23035_v19  ;;  %v23036_v18 = vld [vmem:[#allocation16 + $0x60] ss:$48 sps:$4 sm:$0xff]   ;;  %v23074_v10 = vld [vmem:[#allocation16 + $0x2a4] ss:$48 sps:$4 sm:$0xff]   ;;  %v23077_v50 = vld [vmem:[#allocation16 + $0x2ac] ss:$48 sps:$4 sm:$0xff]  }
 0xa63   : > { %13287 = vmatpush1.bf16.msra.mxu1 %v23033_v33  ;;  %13166 = vmatpush1.bf16.msra.mxu0 %v23036_v18  ;;  %v23072_v52 = vld [vmem:[#allocation16 + $0x2a0] ss:$48 sps:$4 sm:$0xff]  }
 0xa64   : > { %13288 = vmatprep.subr.bf16.mxu1 %v23041_v16  ;;  %13167 = vmatprep.subr.bf16.mxu0 %v23044_v26  ;;  %v23098_v26 = vld [vmem:[#allocation16 + $0x424] ss:$48 sps:$4 sm:$0xff]  }
 0xa67   : > { %13289 = vmatpush1.bf16.msra.mxu1 %v23039_v21  ;;  %13168 = vmatpush1.bf16.msra.mxu0 %v23042_v13  ;;  %v23096_v13 = vld [vmem:[#allocation16 + $0x420] ss:$48 sps:$4 sm:$0xff]  }
 0xa68   : > { %13290 = vmatprep.subr.bf16.mxu1 %v23047_v28  ;;  %13169 = vmatprep.subr.bf16.mxu0 %v23050_v32  ;;  %v23101_v28 = vld [vmem:[#allocation16 + $0x42c] ss:$48 sps:$4 sm:$0xff]   ;;  %v23102_v32 = vld [vmem:[#allocation16 + $0x480] ss:$48 sps:$4 sm:$0xff]  }
 0xa6b   : > { %13291 = vmatpush1.bf16.msra.mxu1 %v23045_v29  ;;  %13170 = vmatpush1.bf16.msra.mxu0 %v23048_v51  ;;  %v23099_v29 = vld [vmem:[#allocation16 + $0x428] ss:$48 sps:$4 sm:$0xff]   ;;  %v23107_v51 = vld [vmem:[#allocation16 + $0x48c] ss:$48 sps:$4 sm:$0xff]  }
 0xa6c   : > { %13292 = vmatprep.subr.bf16.mxu1 %v23053_v30  ;;  %13171 = vmatprep.subr.bf16.mxu0 %v23056_v56  ;;  %v23105_v30 = vld [vmem:[#allocation16 + $0x488] ss:$48 sps:$4 sm:$0xff]   ;;  %v23113_v56 = vld [vmem:[#allocation16 + $0x4ec] ss:$48 sps:$4 sm:$0xff]  }
 0xa6f   : > { %13293 = vmatpush1.bf16.msra.mxu1 %v23051_v31  ;;  %13172 = vmatpush1.bf16.msra.mxu0 %v23054_v22  ;;  %v23110_v31 = vld [vmem:[#allocation16 + $0x4e4] ss:$48 sps:$4 sm:$0xff]   ;;  %v23111_v22 = vld [vmem:[#allocation16 + $0x4e8] ss:$48 sps:$4 sm:$0xff]  }
 0xa70   : > { %13294 = vmatprep.subr.bf16.mxu1 %v23059_v27  ;;  %13173 = vmatprep.subr.bf16.mxu0 %v23062_v35  ;;  %v23108_v27 = vld [vmem:[#allocation16 + $0x4e0] ss:$48 sps:$4 sm:$0xff]   ;;  %v23119_v35 = vld [vmem:[#allocation16 + $0x54c] ss:$48 sps:$4 sm:$0xff]  }
 0xa73   : > { %13295 = vmatpush1.bf16.msra.mxu1 %v23057_v43  ;;  %13174 = vmatpush1.bf16.msra.mxu0 %v23060_v8  ;;  %v23116_v43 = vld [vmem:[#allocation16 + $0x544] ss:$48 sps:$4 sm:$0xff]   ;;  %v23117_v8 = vld [vmem:[#allocation16 + $0x548] ss:$48 sps:$4 sm:$0xff]  }
 0xa74   : > { %13296 = vmatprep.subr.bf16.mxu1 %v23065_v9  ;;  %13175 = vmatprep.subr.bf16.mxu0 %v23068_v49  ;;  %v23114_v9 = vld [vmem:[#allocation16 + $0x540] ss:$48 sps:$4 sm:$0xff]   ;;  %v23125_v49 = vld [vmem:[#allocation16 + $0x5ac] ss:$48 sps:$4 sm:$0xff]  }
 0xa77   : > { %13297 = vmatpush1.bf16.msra.mxu1 %v23063_v17  ;;  %13176 = vmatpush1.bf16.msra.mxu0 %v23066_v39  ;;  %v23122_v17 = vld [vmem:[#allocation16 + $0x5a4] ss:$48 sps:$4 sm:$0xff]   ;;  %v23123_v39 = vld [vmem:[#allocation16 + $0x5a8] ss:$48 sps:$4 sm:$0xff]  }
 0xa78   : > { %13298 = vmatprep.subr.bf16.mxu1 %v23071_v48  ;;  %13177 = vmatprep.subr.bf16.mxu0 %v23074_v10  ;;  %v23120_v48 = vld [vmem:[#allocation16 + $0x5a0] ss:$48 sps:$4 sm:$0xff]   ;;  %v23131_v10 = vld [vmem:[#allocation16 + $0x60c] ss:$48 sps:$4 sm:$0xff]  }
 0xa7b   : > { %13299 = vmatpush1.bf16.msra.mxu1 %v23069_v40  ;;  %13178 = vmatpush1.bf16.msra.mxu0 %v23072_v52  ;;  %v23128_v40 = vld [vmem:[#allocation16 + $0x604] ss:$48 sps:$4 sm:$0xff]  }
 0xa7c   : > { %13300 = vmatprep.subr.bf16.mxu1 %v23077_v50 }
 0xa9e   : > { %v9511_v5 = vpop.f32.mrb[48].mxu1 }
 0xa9f   : > { %v9512_v59 = vadd.f32 %v9511_v5, %v9471_v55  ;;  %v9513_v60 = vpop.f32.mrb[49].mxu1  ;;  %v23075_v55 = vld [vmem:[#allocation16 + $0x2a8] ss:$48 sps:$4 sm:$0xff]  }
 0xaa0   : > { %v9514_v61 = vadd.f32 %v9513_v60, %v9473_v24  ;;  %v9515_v62 = vpop.f32.mrb[50].mxu1  ;;  %v23080_v24 = vld [vmem:[#allocation16 + $0x304] ss:$48 sps:$4 sm:$0xff]   ;;  %13301 = vmatpush1.bf16.msra.mxu1 %v23075_v55  ;;  %v23087_v5 = vld [vmem:[#allocation16 + $0x368] ss:$48 sps:$4 sm:$0xff]  }
 0xaa1   : > { %v26105_v58 = vadd.f32 %v24794_v63, %v9512_v59  ;;  %v9516_v0 = vpop.f32.mrb[51].mxu1  ;;  %13179 = vmatprep.subr.bf16.mxu0 %v23080_v24  ;;  %13302 = vmatprep.subr.bf16.mxu1 %v23083_v41  ;;  %v23092_v59 = vld [vmem:[#allocation16 + $0x3c4] ss:$48 sps:$4 sm:$0xff]   ;;  %v23095_v60 = vld [vmem:[#allocation16 + $0x3cc] ss:$48 sps:$4 sm:$0xff]  }
 0xaa2   : > { %v26109_v4 = vadd.f32 %v24795_v2, %v9514_v61  ;;  %13180 = vmatpush1.bf16.msra.mxu0 %v23078_v42  ;;  %v23090_v61 = vld [vmem:[#allocation16 + $0x3c0] ss:$48 sps:$4 sm:$0xff]   ;;  %v23093_v62 = vld [vmem:[#allocation16 + $0x3c8] ss:$48 sps:$4 sm:$0xff]  }
 0xaa3   : > { %v9527_v6 = vadd.f32 %v9526_v3, %v26105_v58  ;;  %13181 = vmatprep.subr.bf16.mxu0 %v23086_v38  ;;  %v9561_v24 = vld [vmem:[#allocation13] sm:$0x3f]  ;;  %v9599_v41 = vld [vmem:[#allocation14] sm:$0x3f] }
 0xaa4   : > { %13303 = vmatpush1.bf16.msra.mxu1 %v23081_v54  ;;  %v9570_v42 = vrot.slane %v9561_v24, %v25926_v14  ;;  %v9566_v54 = vrot.slane %v9561_v24, %v25942_v34  ;;  %v9578_v38 = vrot.slane %v9561_v24, %v25944_v36 }
 0xaa5   : > { %v9528_v7 = vadd.f32 %v9527_v6, %v26109_v4  ;;  %13304 = vmatprep.subr.bf16.mxu1 %v23089_v1  ;;  %v9574_v1 = vrot.slane %v9561_v24, %v25961_v44 }
 0xaa6   : > { %13182 = vmatpush1.bf16.msra.mxu0 %v23084_v57  ;;  %v9586_v57 = vrot.slane %v9561_v24, %v25963_v46 }
 0xaa7   : > { %9529 = vadd.xlane.f32.xlu1 %v9528_v7  ;;  %13183 = vmatprep.subr.bf16.mxu0 %v23092_v59 }
 0xaa8   : > { %13305 = vmatpush1.bf16.msra.mxu1 %v23087_v5  ;;  %v9582_v5 = vrot.slane %v9561_v24, %v25965_v53  ;;  %v23156_v24 = vld [vmem:[#allocation16 + $0x7e0] ss:$48 sps:$4 sm:$0xff]  }
 0xaa9   : > { %13306 = vmatprep.subr.bf16.mxu1 %v23095_v60  ;;  %v9608_v60 = vrot.slane %v9599_v41, %v25926_v14 }
 0xaaa   : > { %13184 = vmatpush1.bf16.msra.mxu0 %v23090_v61  ;;  %v9604_v61 = vrot.slane %v9599_v41, %v25942_v34 }
 0xaab   : > { %13185 = vmatprep.subr.bf16.mxu0 %v23098_v26 }
 0xaac   : > { %13307 = vmatpush1.bf16.msra.mxu1 %v23093_v62  ;;  %v9616_v62 = vrot.slane %v9599_v41, %v25944_v36 }
 0xaad   : > { %13308 = vmatprep.subr.bf16.mxu1 %v23101_v28 }
 0xaae   : > { %13186 = vmatpush1.bf16.msra.mxu0 %v23096_v13 }
 0xab0   : > { %13309 = vmatpush1.bf16.msra.mxu1 %v23099_v29  ;;  %v23126_v29 = vld [vmem:[#allocation16 + $0x600] ss:$48 sps:$4 sm:$0xff]  }
 0xab1   : > { %13310 = vmatprep.subr.bf16.mxu1 %v23107_v51  ;;  %v23137_v51 = vld [vmem:[#allocation16 + $0x66c] ss:$48 sps:$4 sm:$0xff]  }
 0xab4   : > { %13311 = vmatpush1.bf16.msra.mxu1 %v23105_v30  ;;  %v23134_v30 = vld [vmem:[#allocation16 + $0x664] ss:$48 sps:$4 sm:$0xff]  }
 0xab5   : > { %13312 = vmatprep.subr.bf16.mxu1 %v23113_v56  ;;  %v23132_v56 = vld [vmem:[#allocation16 + $0x660] ss:$48 sps:$4 sm:$0xff]  }
 0xab8   : > { %13313 = vmatpush1.bf16.msra.mxu1 %v23111_v22  ;;  %v23140_v22 = vld [vmem:[#allocation16 + $0x6c4] ss:$48 sps:$4 sm:$0xff]  }
 0xab9   : > { %13314 = vmatprep.subr.bf16.mxu1 %v23119_v35  ;;  %v23138_v35 = vld [vmem:[#allocation16 + $0x6c0] ss:$48 sps:$4 sm:$0xff]  }
 0xabc   : > { %13315 = vmatpush1.bf16.msra.mxu1 %v23117_v8  ;;  %v23146_v8 = vld [vmem:[#allocation16 + $0x724] ss:$48 sps:$4 sm:$0xff]  }
 0xabd   : > { %13316 = vmatprep.subr.bf16.mxu1 %v23125_v49  ;;  %v23144_v49 = vld [vmem:[#allocation16 + $0x720] ss:$48 sps:$4 sm:$0xff]  }
 0xac0   : > { %13317 = vmatpush1.bf16.msra.mxu1 %v23123_v39  ;;  %v23152_v39 = vld [vmem:[#allocation16 + $0x784] ss:$48 sps:$4 sm:$0xff]  }
 0xac1   : > { %13327 = vmatprep.subr.bf16.mxu1 %v23131_v10  ;;  %v23150_v10 = vld [vmem:[#allocation16 + $0x780] ss:$48 sps:$4 sm:$0xff]  }
 0xb34   : > { %v9530_v63 = vpop.xlane.xlu1 %9529 }
 0xb35   : > { %v9532_v0 = vmul.f32 0.0013020834, %v9530_v63  ;;  %v9612_v63 = vrot.slane %v9599_v41, %v25961_v44 }
 0xb37   : > { %v26114_v3 = vsub.f32 %v26090_v45, %v9532_v0  ;;  %v26117_v2 = vsub.f32 %v26093_v47, %v9532_v0  ;;  %v26120_v6 = vsub.f32 %v26096_v15, %v9532_v0  ;;  %v26123_v7 = vsub.f32 %v26101_v20, %v9532_v0 }
 0xb38   : > { %v26130_v33 = vsub.f32 %v26105_v58, %v9532_v0  ;;  %v26135_v19 = vsub.f32 %v26109_v4, %v9532_v0  ;;  %v23104_v4 = vld [vmem:[#allocation16 + $0x484] ss:$48 sps:$4 sm:$0xff]  }
 0xb39   : > { %v9539_v23 = vmul.f32 %v26114_v3, %v26114_v3  ;;  %v9540_v37 = vmul.f32 %v26117_v2, %v26117_v2  ;;  %v9541_v45 = vmul.f32 %v26120_v6, %v26120_v6  ;;  %v9542_v15 = vmul.f32 %v26123_v7, %v26123_v7  ;;  %13187 = vmatprep.subr.bf16.mxu0 %v23104_v4  ;;  %v23129_v4 = vld [vmem:[#allocation16 + $0x608] ss:$48 sps:$4 sm:$0xff]  }
 0xb3a   : > { %v9543_v12 = vmul.f32 %v26130_v33, %v26130_v33  ;;  %v9544_v18 = vmul.f32 %v26135_v19, %v26135_v19  ;;  %13188 = vmatpush1.bf16.msra.mxu0 %v23102_v32 }
 0xb3b   : > { %v9545_v47 = vadd.f32 %v9540_v37, %v9539_v23  ;;  %13189 = vmatprep.subr.bf16.mxu0 %v23110_v31 }
 0xb3d   : > { %v9546_v20 = vadd.f32 %v9545_v47, %v9541_v45 }
 0xb3e   : > { %13190 = vmatpush1.bf16.msra.mxu0 %v23108_v27  ;;  %v23135_v27 = vld [vmem:[#allocation16 + $0x668] ss:$48 sps:$4 sm:$0xff]  }
 0xb3f   : > { %v9547_v16 = vadd.f32 %v9546_v20, %v9542_v15  ;;  %13191 = vmatprep.subr.bf16.mxu0 %v23116_v43  ;;  %v9624_v15 = vrot.slane %v9599_v41, %v25963_v46  ;;  %v23143_v43 = vld [vmem:[#allocation16 + $0x6cc] ss:$48 sps:$4 sm:$0xff]  }
 0xb41   : > { %v9548_v58 = vadd.f32 %v9547_v16, %v9543_v12  ;;  %v9620_v12 = vrot.slane %v9599_v41, %v25965_v53  ;;  %v23159_v41 = vld [vmem:[#allocation16 + $0x7e8] ss:$48 sps:$4 sm:$0xff]  }
 0xb42   : > { %13192 = vmatpush1.bf16.msra.mxu0 %v23114_v9  ;;  %v23141_v9 = vld [vmem:[#allocation16 + $0x6c8] ss:$48 sps:$4 sm:$0xff]  }
 0xb43   : > { %v9549_v21 = vadd.f32 %v9548_v58, %v9544_v18  ;;  %13193 = vmatprep.subr.bf16.mxu0 %v23122_v17  ;;  %v23149_v17 = vld [vmem:[#allocation16 + $0x72c] ss:$48 sps:$4 sm:$0xff]  }
 0xb45   : > { %9550 = vadd.xlane.f32.xlu1 %v9549_v21 }
 0xb46   : > { %13194 = vmatpush1.bf16.msra.mxu0 %v23120_v48  ;;  %v23147_v48 = vld [vmem:[#allocation16 + $0x728] ss:$48 sps:$4 sm:$0xff]  }
 0xb47   : > { %13204 = vmatprep.subr.bf16.mxu0 %v23128_v40  ;;  %v23155_v40 = vld [vmem:[#allocation16 + $0x78c] ss:$48 sps:$4 sm:$0xff]  }
 0xbd2   : > { %v9551_v50 = vpop.xlane.xlu1 %9550 }
 0xbd3   : > { %v9552_v52 = vmul.f32 0.0013020834, %v9551_v50  ;;  %v23153_v50 = vld [vmem:[#allocation16 + $0x788] ss:$48 sps:$4 sm:$0xff]  }
 0xbd5   : > { %v9553_v55 = vadd.f32 1e-12, %v9552_v52  ;;  %v23158_v52 = vld [vmem:[#allocation16 + $0x7e4] ss:$48 sps:$4 sm:$0xff]  }
 0xbd7   : > { %24762 = vrsqrt.f32 %v9553_v55  ;;  %v23161_v55 = vld [vmem:[#allocation16 + $0x7ec] ss:$48 sps:$4 sm:$0xff]  }
 0xbe1   : > { %v24763_v59 = vpop.eup %24762 }
 0xbe2   : > { %v9556_v0 = vmul.f32 %v24763_v59, %v26117_v2  ;;  %v9555_v23 = vmul.f32 %v24763_v59, %v26114_v3  ;;  %v9558_v37 = vmul.f32 %v24763_v59, %v26123_v7  ;;  %v9557_v45 = vmul.f32 %v24763_v59, %v26120_v6 }
 0xbe3   : > { %v9560_v47 = vmul.f32 %v24763_v59, %v26135_v19  ;;  %v9559_v20 = vmul.f32 %v24763_v59, %v26130_v33  ;;  %v23168_v59 = vld [vmem:[#allocation16 + $0x8a0] ss:$48 sps:$4 sm:$0xff]  }
 0xbe4   : > { %v9594_v16 = vmul.f32 %v9570_v42, %v9556_v0  ;;  %v9593_v18 = vmul.f32 %v9566_v54, %v9555_v23  ;;  %v9596_v58 = vmul.f32 %v9578_v38, %v9558_v37  ;;  %v9595_v21 = vmul.f32 %v9574_v1, %v9557_v45  ;;  %v23164_v42 = vld [vmem:[#allocation16 + $0x844] ss:$48 sps:$4 sm:$0xff]   ;;  %v23167_v54 = vld [vmem:[#allocation16 + $0x84c] ss:$48 sps:$4 sm:$0xff]   ;;  %v23162_v38 = vld [vmem:[#allocation16 + $0x840] ss:$48 sps:$4 sm:$0xff]  }
 0xbe5   : > { %v9598_v26 = vmul.f32 %v9586_v57, %v9560_v47  ;;  %v9597_v2 = vmul.f32 %v9582_v5, %v9559_v20  ;;  %v23165_v1 = vld [vmem:[#allocation16 + $0x848] ss:$48 sps:$4 sm:$0xff]   ;;  %v23170_v57 = vld [vmem:[#allocation16 + $0x8a4] ss:$48 sps:$4 sm:$0xff]   ;;  %v23173_v5 = vld [vmem:[#allocation16 + $0x8ac] ss:$48 sps:$4 sm:$0xff]  }
 0xbe6   : > { %v26161_v28 = vadd.f32 %v9608_v60, %v9594_v16  ;;  %v26163_v3 = vadd.f32 %v9604_v61, %v9593_v18  ;;  %v26165_v7 = vadd.f32 %v9612_v63, %v9595_v21  ;;  %v26167_v6 = vadd.f32 %v9616_v62, %v9596_v58  ;;  %v23171_v60 = vld [vmem:[#allocation16 + $0x8a8] ss:$48 sps:$4 sm:$0xff]   ;;  %v23176_v61 = vld [vmem:[#allocation16 + $0x904] ss:$48 sps:$4 sm:$0xff]   ;;  %v23179_v62 = vld [vmem:[#allocation16 + $0x90c] ss:$48 sps:$4 sm:$0xff]  }
 0xbe7   : > { %v26169_v19 = vadd.f32 %v9624_v15, %v9598_v26  ;;  %v26171_v13 = vadd.f32 %v9620_v12, %v9597_v2  ;;  %v23174_v63 = vld [vmem:[#allocation16 + $0x900] ss:$48 sps:$4 sm:$0xff]   ;;  %v23177_v0 = vld [vmem:[#allocation16 + $0x908] ss:$48 sps:$4 sm:$0xff]   ;;  %v23182_v23 = vld [vmem:[#allocation16 + $0x964] ss:$48 sps:$4 sm:$0xff]  }
 0xbe8   : > { %v26175_v33 = vpack.c.bf16 %v26161_v28, %v26161_v28  ;;  %v26179_v32 = vpack.c.bf16 %v26163_v3, %v26163_v3  ;;  %v26187_v31 = vpack.c.bf16 %v26167_v6, %v26167_v6  ;;  %v23185_v37 = vld [vmem:[#allocation16 + $0x96c] ss:$48 sps:$4 sm:$0xff]   ;;  %v23180_v45 = vld [vmem:[#allocation16 + $0x960] ss:$48 sps:$4 sm:$0xff]   ;;  %v23183_v47 = vld [vmem:[#allocation16 + $0x968] ss:$48 sps:$4 sm:$0xff]  }
 0xbe9   : > { %v23188_v15 = vld [vmem:[#allocation16 + $0x9c4] ss:$48 sps:$4 sm:$0xff]   ;;  %v23191_v20 = vld [vmem:[#allocation16 + $0x9cc] ss:$48 sps:$4 sm:$0xff]   ;;  %v23186_v12 = vld [vmem:[#allocation16 + $0x9c0] ss:$48 sps:$4 sm:$0xff]  }
 0xbea   : > { %13195 = vmatprep.mubr.bf16.mxu0 %v26175_v33  ;;  %13318 = vmatprep.mubr.bf16.mxu1 %v26175_v33  ;;  %v23189_v16 = vld [vmem:[#allocation16 + $0x9c8] ss:$48 sps:$4 sm:$0xff]   ;;  %v23194_v18 = vld [vmem:[#allocation16 + $0xa24] ss:$48 sps:$4 sm:$0xff]   ;;  %v23197_v58 = vld [vmem:[#allocation16 + $0xa2c] ss:$48 sps:$4 sm:$0xff]  }
 0xbeb   : > { %13196 = vmatmul.mubr.bf16.vlgmr.msra.gmra.mrb[36].mxu0 %v26179_v32  ;;  %13319 = vmatmul.mubr.bf16.vlgmr.msra.gmra.mrb[52].mxu1 %v26179_v32  ;;  %v23192_v21 = vld [vmem:[#allocation16 + $0xa20] ss:$48 sps:$4 sm:$0xff]   ;;  %v23195_v26 = vld [vmem:[#allocation16 + $0xa28] ss:$48 sps:$4 sm:$0xff]   ;;  %v23200_v2 = vld [vmem:[#allocation16 + $0xa84] ss:$48 sps:$4 sm:$0xff]  }
 0xbec   : > { %13205 = vmatpush1.bf16.msra.mxu0 %v23126_v29  ;;  %13328 = vmatpush1.bf16.msra.mxu1 %v23129_v4  ;;  %v23203_v29 = vld [vmem:[#allocation16 + $0xa8c] ss:$48 sps:$4 sm:$0xff]   ;;  %v23198_v4 = vld [vmem:[#allocation16 + $0xa80] ss:$48 sps:$4 sm:$0xff]  }
 0xbed   : > { %13236 = vmatprep.mubr.bf16.mxu0 %v26187_v31  ;;  %13359 = vmatprep.mubr.bf16.mxu1 %v26187_v31 }
 0xbee   : > { %13206 = vmatprep.subr.bf16.mxu0 %v23134_v30  ;;  %13329 = vmatprep.subr.bf16.mxu1 %v23137_v51  ;;  %v23201_v30 = vld [vmem:[#allocation16 + $0xa88] ss:$48 sps:$4 sm:$0xff]   ;;  %v23206_v51 = vld [vmem:[#allocation16 + $0xae4] ss:$48 sps:$4 sm:$0xff]  }
 0xbf0   : > { %13207 = vmatpush1.bf16.msra.mxu0 %v23132_v56  ;;  %13330 = vmatpush1.bf16.msra.mxu1 %v23135_v27  ;;  %v23209_v56 = vld [vmem:[#allocation16 + $0xaec] ss:$48 sps:$4 sm:$0xff]   ;;  %v23204_v27 = vld [vmem:[#allocation16 + $0xae0] ss:$48 sps:$4 sm:$0xff]  }
 0xbf1   : > { %13208 = vmatprep.subr.bf16.mxu0 %v23140_v22  ;;  %13331 = vmatprep.subr.bf16.mxu1 %v23143_v43  ;;  %v23207_v22 = vld [vmem:[#allocation16 + $0xae8] ss:$48 sps:$4 sm:$0xff]   ;;  %v23212_v43 = vld [vmem:[#allocation16 + $0xb44] ss:$48 sps:$4 sm:$0xff]  }
 0xbf4   : > { %13209 = vmatpush1.bf16.msra.mxu0 %v23138_v35  ;;  %13332 = vmatpush1.bf16.msra.mxu1 %v23141_v9  ;;  %v23215_v35 = vld [vmem:[#allocation16 + $0xb4c] ss:$48 sps:$4 sm:$0xff]   ;;  %v23210_v9 = vld [vmem:[#allocation16 + $0xb40] ss:$48 sps:$4 sm:$0xff]  }
 0xbf5   : > { %13210 = vmatprep.subr.bf16.mxu0 %v23146_v8  ;;  %13333 = vmatprep.subr.bf16.mxu1 %v23149_v17  ;;  %v23213_v8 = vld [vmem:[#allocation16 + $0xb48] ss:$48 sps:$4 sm:$0xff]   ;;  %v23218_v17 = vld [vmem:[#allocation16 + $0xba4] ss:$48 sps:$4 sm:$0xff]  }
 0xbf8   : > { %13211 = vmatpush1.bf16.msra.mxu0 %v23144_v49  ;;  %13334 = vmatpush1.bf16.msra.mxu1 %v23147_v48  ;;  %v23221_v49 = vld [vmem:[#allocation16 + $0xbac] ss:$48 sps:$4 sm:$0xff]   ;;  %v23216_v48 = vld [vmem:[#allocation16 + $0xba0] ss:$48 sps:$4 sm:$0xff]  }
 0xbf9   : > { %13212 = vmatprep.subr.bf16.mxu0 %v23152_v39  ;;  %13335 = vmatprep.subr.bf16.mxu1 %v23155_v40  ;;  %v23219_v39 = vld [vmem:[#allocation16 + $0xba8] ss:$48 sps:$4 sm:$0xff]   ;;  %v23224_v40 = vld [vmem:[#allocation16 + $0xc04] ss:$48 sps:$4 sm:$0xff]  }
 0xbfc   : > { %13213 = vmatpush1.bf16.msra.mxu0 %v23150_v10  ;;  %13336 = vmatpush1.bf16.msra.mxu1 %v23153_v50  ;;  %v23227_v10 = vld [vmem:[#allocation16 + $0xc0c] ss:$48 sps:$4 sm:$0xff]   ;;  %v23222_v50 = vld [vmem:[#allocation16 + $0xc00] ss:$48 sps:$4 sm:$0xff]  }
 0xbfd   : > { %13214 = vmatprep.subr.bf16.mxu0 %v23158_v52  ;;  %13337 = vmatprep.subr.bf16.mxu1 %v23161_v55  ;;  %v26193_v52 = vpack.c.bf16 %v26165_v7, %v26165_v7  ;;  %v23225_v55 = vld [vmem:[#allocation16 + $0xc08] ss:$48 sps:$4 sm:$0xff]  }
 0xc00   : > { %13215 = vmatpush1.bf16.msra.mxu0 %v23156_v24  ;;  %13338 = vmatpush1.bf16.msra.mxu1 %v23159_v41  ;;  %v26197_v24 = vpack.c.bf16 %v26169_v19, %v26169_v19  ;;  %v23230_v41 = vld [vmem:[#allocation16 + $0xc64] ss:$48 sps:$4 sm:$0xff]  }
 0xc01   : > { %13216 = vmatprep.subr.bf16.mxu0 %v23164_v42  ;;  %13339 = vmatprep.subr.bf16.mxu1 %v23167_v54  ;;  %v23233_v42 = vld [vmem:[#allocation16 + $0xc6c] ss:$48 sps:$4 sm:$0xff]   ;;  %v23228_v54 = vld [vmem:[#allocation16 + $0xc60] ss:$48 sps:$4 sm:$0xff]  }
 0xc04   : > { %13217 = vmatpush1.bf16.msra.mxu0 %v23162_v38  ;;  %13340 = vmatpush1.bf16.msra.mxu1 %v23165_v1  ;;  %v23231_v38 = vld [vmem:[#allocation16 + $0xc68] ss:$48 sps:$4 sm:$0xff]   ;;  %v23236_v1 = vld [vmem:[#allocation16 + $0xcc4] ss:$48 sps:$4 sm:$0xff]  }
 0xc05   : > { %13218 = vmatprep.subr.bf16.mxu0 %v23170_v57  ;;  %13341 = vmatprep.subr.bf16.mxu1 %v23173_v5  ;;  %v23239_v57 = vld [vmem:[#allocation16 + $0xccc] ss:$48 sps:$4 sm:$0xff]   ;;  %v23234_v5 = vld [vmem:[#allocation16 + $0xcc0] ss:$48 sps:$4 sm:$0xff]  }
 0xc08   : > { %13219 = vmatpush1.bf16.msra.mxu0 %v23168_v59  ;;  %13342 = vmatpush1.bf16.msra.mxu1 %v23171_v60  ;;  %v23237_v59 = vld [vmem:[#allocation16 + $0xcc8] ss:$48 sps:$4 sm:$0xff]   ;;  %v23242_v60 = vld [vmem:[#allocation16 + $0xd24] ss:$48 sps:$4 sm:$0xff]  }
 0xc09   : > { %13220 = vmatprep.subr.bf16.mxu0 %v23176_v61  ;;  %13343 = vmatprep.subr.bf16.mxu1 %v23179_v62  ;;  %v23245_v61 = vld [vmem:[#allocation16 + $0xd2c] ss:$48 sps:$4 sm:$0xff]   ;;  %v23240_v62 = vld [vmem:[#allocation16 + $0xd20] ss:$48 sps:$4 sm:$0xff]  }
 0xc0c   : > { %13221 = vmatpush1.bf16.msra.mxu0 %v23174_v63  ;;  %13344 = vmatpush1.bf16.msra.mxu1 %v23177_v0  ;;  %v23243_v63 = vld [vmem:[#allocation16 + $0xd28] ss:$48 sps:$4 sm:$0xff]   ;;  %v23248_v0 = vld [vmem:[#allocation16 + $0xd84] ss:$48 sps:$4 sm:$0xff]  }
 0xc0d   : > { %13222 = vmatprep.subr.bf16.mxu0 %v23182_v23  ;;  %13345 = vmatprep.subr.bf16.mxu1 %v23185_v37  ;;  %v23251_v23 = vld [vmem:[#allocation16 + $0xd8c] ss:$48 sps:$4 sm:$0xff]   ;;  %v23246_v37 = vld [vmem:[#allocation16 + $0xd80] ss:$48 sps:$4 sm:$0xff]  }
 0xc10   : > { %13223 = vmatpush1.bf16.msra.mxu0 %v23180_v45  ;;  %13346 = vmatpush1.bf16.msra.mxu1 %v23183_v47  ;;  %v23249_v45 = vld [vmem:[#allocation16 + $0xd88] ss:$48 sps:$4 sm:$0xff]   ;;  %v23254_v47 = vld [vmem:[#allocation16 + $0xde4] ss:$48 sps:$4 sm:$0xff]  }
 0xc11   : > { %13224 = vmatprep.subr.bf16.mxu0 %v23188_v15  ;;  %13347 = vmatprep.subr.bf16.mxu1 %v23191_v20  ;;  %v23257_v15 = vld [vmem:[#allocation16 + $0xdec] ss:$48 sps:$4 sm:$0xff]   ;;  %v23252_v20 = vld [vmem:[#allocation16 + $0xde0] ss:$48 sps:$4 sm:$0xff]  }
 0xc14   : > { %13225 = vmatpush1.bf16.msra.mxu0 %v23186_v12  ;;  %13348 = vmatpush1.bf16.msra.mxu1 %v23189_v16  ;;  %v23255_v12 = vld [vmem:[#allocation16 + $0xde8] ss:$48 sps:$4 sm:$0xff]   ;;  %v23260_v16 = vld [vmem:[#allocation16 + $0xe44] ss:$48 sps:$4 sm:$0xff]  }
 0xc15   : > { %13226 = vmatprep.subr.bf16.mxu0 %v23194_v18  ;;  %13349 = vmatprep.subr.bf16.mxu1 %v23197_v58  ;;  %v23263_v18 = vld [vmem:[#allocation16 + $0xe4c] ss:$48 sps:$4 sm:$0xff]   ;;  %v23258_v58 = vld [vmem:[#allocation16 + $0xe40] ss:$48 sps:$4 sm:$0xff]  }
 0xc18   : > { %13227 = vmatpush1.bf16.msra.mxu0 %v23192_v21  ;;  %13350 = vmatpush1.bf16.msra.mxu1 %v23195_v26  ;;  %v23261_v21 = vld [vmem:[#allocation16 + $0xe48] ss:$48 sps:$4 sm:$0xff]   ;;  %v23266_v26 = vld [vmem:[#allocation16 + $0xea4] ss:$48 sps:$4 sm:$0xff]  }
 0xc19   : > { %13228 = vmatprep.subr.bf16.mxu0 %v23200_v2  ;;  %13351 = vmatprep.subr.bf16.mxu1 %v23203_v29  ;;  %v23269_v2 = vld [vmem:[#allocation16 + $0xeac] ss:$48 sps:$4 sm:$0xff]   ;;  %v23264_v29 = vld [vmem:[#allocation16 + $0xea0] ss:$48 sps:$4 sm:$0xff]  }
 0xc1c   : > { %13229 = vmatpush1.bf16.msra.mxu0 %v23198_v4  ;;  %13352 = vmatpush1.bf16.msra.mxu1 %v23201_v30  ;;  %v23267_v4 = vld [vmem:[#allocation16 + $0xea8] ss:$48 sps:$4 sm:$0xff]   ;;  %v23272_v30 = vld [vmem:[#allocation16 + $0xf04] ss:$48 sps:$4 sm:$0xff]  }
 0xc1d   : > { %13230 = vmatprep.subr.bf16.mxu0 %v23206_v51  ;;  %13353 = vmatprep.subr.bf16.mxu1 %v23209_v56  ;;  %v23275_v51 = vld [vmem:[#allocation16 + $0xf0c] ss:$48 sps:$4 sm:$0xff]   ;;  %v23270_v56 = vld [vmem:[#allocation16 + $0xf00] ss:$48 sps:$4 sm:$0xff]  }
 0xc20   : > { %13231 = vmatpush1.bf16.msra.mxu0 %v23204_v27  ;;  %13354 = vmatpush1.bf16.msra.mxu1 %v23207_v22  ;;  %v23273_v27 = vld [vmem:[#allocation16 + $0xf08] ss:$48 sps:$4 sm:$0xff]   ;;  %v23278_v22 = vld [vmem:[#allocation16 + $0xf64] ss:$48 sps:$4 sm:$0xff]  }
 0xc21   : > { %13232 = vmatprep.subr.bf16.mxu0 %v23212_v43  ;;  %13355 = vmatprep.subr.bf16.mxu1 %v23215_v35  ;;  %v23281_v43 = vld [vmem:[#allocation16 + $0xf6c] ss:$48 sps:$4 sm:$0xff]   ;;  %v23276_v35 = vld [vmem:[#allocation16 + $0xf60] ss:$48 sps:$4 sm:$0xff]  }
 0xc24   : > { %13233 = vmatpush1.bf16.msra.mxu0 %v23210_v9  ;;  %13356 = vmatpush1.bf16.msra.mxu1 %v23213_v8  ;;  %v23279_v9 = vld [vmem:[#allocation16 + $0xf68] ss:$48 sps:$4 sm:$0xff]   ;;  %v23284_v8 = vld [vmem:[#allocation16 + $0xfc4] ss:$48 sps:$4 sm:$0xff]  }
 0xc25   : > { %13234 = vmatprep.subr.bf16.mxu0 %v23218_v17  ;;  %13357 = vmatprep.subr.bf16.mxu1 %v23221_v49  ;;  %v23287_v17 = vld [vmem:[#allocation16 + $0xfcc] ss:$48 sps:$4 sm:$0xff]   ;;  %v23282_v49 = vld [vmem:[#allocation16 + $0xfc0] ss:$48 sps:$4 sm:$0xff]  }
 0xc28   : > { %13235 = vmatpush1.bf16.msra.mxu0 %v23216_v48  ;;  %13358 = vmatpush1.bf16.msra.mxu1 %v23219_v39  ;;  %v23285_v48 = vld [vmem:[#allocation16 + $0xfc8] ss:$48 sps:$4 sm:$0xff]   ;;  %v23290_v39 = vld [vmem:[#allocation16 + $0x1024] ss:$48 sps:$4 sm:$0xff]  }
 0xc29   : > { %13245 = vmatprep.subr.bf16.mxu0 %v23224_v40  ;;  %13368 = vmatprep.subr.bf16.mxu1 %v23227_v10  ;;  %v23293_v40 = vld [vmem:[#allocation16 + $0x102c] ss:$48 sps:$4 sm:$0xff]   ;;  %v23288_v10 = vld [vmem:[#allocation16 + $0x1020] ss:$48 sps:$4 sm:$0xff]  }
 0xc2b   : > { %13237 = vmatmul.mubr.bf16.vlgmr.msra.gmra.mrb[36].mxu0 %v26193_v52  ;;  %13360 = vmatmul.mubr.bf16.vlgmr.msra.gmra.mrb[52].mxu1 %v26193_v52 }
 0xc2c   : > { %13246 = vmatpush1.bf16.msra.mxu0 %v23222_v50  ;;  %13277 = vmatprep.mubr.bf16.mxu0 %v26197_v24  ;;  %v23291_v50 = vld [vmem:[#allocation16 + $0x1028] ss:$48 sps:$4 sm:$0xff]  }
 0xc2d   : > { %13369 = vmatpush1.bf16.msra.mxu1 %v23225_v55  ;;  %13400 = vmatprep.mubr.bf16.mxu1 %v26197_v24  ;;  %v23296_v55 = vld [vmem:[#allocation16 + $0x1084] ss:$48 sps:$4 sm:$0xff]  }
 0xc2e   : > { %13247 = vmatprep.subr.bf16.mxu0 %v23230_v41  ;;  %13370 = vmatprep.subr.bf16.mxu1 %v23233_v42  ;;  %v23299_v41 = vld [vmem:[#allocation16 + $0x108c] ss:$48 sps:$4 sm:$0xff]   ;;  %v23294_v42 = vld [vmem:[#allocation16 + $0x1080] ss:$48 sps:$4 sm:$0xff]  }
 0xc30   : > { %13248 = vmatpush1.bf16.msra.mxu0 %v23228_v54  ;;  %v23297_v54 = vld [vmem:[#allocation16 + $0x1088] ss:$48 sps:$4 sm:$0xff]  }
 0xc31   : > { %13371 = vmatpush1.bf16.msra.mxu1 %v23231_v38  ;;  %13249 = vmatprep.subr.bf16.mxu0 %v23236_v1  ;;  %v23302_v38 = vld [vmem:[#allocation16 + $0x10e4] ss:$48 sps:$4 sm:$0xff]   ;;  %v23305_v1 = vld [vmem:[#allocation16 + $0x10ec] ss:$48 sps:$4 sm:$0xff]  }
 0xc32   : > { %13372 = vmatprep.subr.bf16.mxu1 %v23239_v57  ;;  %v23300_v57 = vld [vmem:[#allocation16 + $0x10e0] ss:$48 sps:$4 sm:$0xff]  }
 0xc34   : > { %13250 = vmatpush1.bf16.msra.mxu0 %v23234_v5  ;;  %v23303_v5 = vld [vmem:[#allocation16 + $0x10e8] ss:$48 sps:$4 sm:$0xff]  }
 0xc35   : > { %13373 = vmatpush1.bf16.msra.mxu1 %v23237_v59  ;;  %13251 = vmatprep.subr.bf16.mxu0 %v23242_v60  ;;  %v23308_v59 = vld [vmem:[#allocation16 + $0x1144] ss:$48 sps:$4 sm:$0xff]   ;;  %v23311_v60 = vld [vmem:[#allocation16 + $0x114c] ss:$48 sps:$4 sm:$0xff]  }
 0xc36   : > { %13374 = vmatprep.subr.bf16.mxu1 %v23245_v61  ;;  %v23306_v61 = vld [vmem:[#allocation16 + $0x1140] ss:$48 sps:$4 sm:$0xff]  }
 0xc38   : > { %13252 = vmatpush1.bf16.msra.mxu0 %v23240_v62  ;;  %v23309_v62 = vld [vmem:[#allocation16 + $0x1148] ss:$48 sps:$4 sm:$0xff]  }
 0xc39   : > { %13375 = vmatpush1.bf16.msra.mxu1 %v23243_v63  ;;  %13253 = vmatprep.subr.bf16.mxu0 %v23248_v0  ;;  %v23314_v63 = vld [vmem:[#allocation16 + $0x11a4] ss:$48 sps:$4 sm:$0xff]   ;;  %v23317_v0 = vld [vmem:[#allocation16 + $0x11ac] ss:$48 sps:$4 sm:$0xff]  }
 0xc3a   : > { %13376 = vmatprep.subr.bf16.mxu1 %v23251_v23  ;;  %v23312_v23 = vld [vmem:[#allocation16 + $0x11a0] ss:$48 sps:$4 sm:$0xff]  }
 0xc3c   : > { %13254 = vmatpush1.bf16.msra.mxu0 %v23246_v37  ;;  %v23315_v37 = vld [vmem:[#allocation16 + $0x11a8] ss:$48 sps:$4 sm:$0xff]  }
 0xc3d   : > { %13377 = vmatpush1.bf16.msra.mxu1 %v23249_v45  ;;  %13255 = vmatprep.subr.bf16.mxu0 %v23254_v47  ;;  %v23320_v45 = vld [vmem:[#allocation16 + $0x14] ss:$48 sps:$4 sm:$0xff]   ;;  %v23323_v47 = vld [vmem:[#allocation16 + $0x1c] ss:$48 sps:$4 sm:$0xff]  }
 0xc3e   : > { %13378 = vmatprep.subr.bf16.mxu1 %v23257_v15  ;;  %v23318_v15 = vld [vmem:[#allocation16 + $0x10] ss:$48 sps:$4 sm:$0xff]  }
 0xc40   : > { %13256 = vmatpush1.bf16.msra.mxu0 %v23252_v20  ;;  %v26205_v20 = vpack.c.bf16 %v26171_v13, %v26171_v13 }
 0xc41   : > { %13379 = vmatpush1.bf16.msra.mxu1 %v23255_v12  ;;  %13257 = vmatprep.subr.bf16.mxu0 %v23260_v16  ;;  %v23321_v12 = vld [vmem:[#allocation16 + $0x18] ss:$48 sps:$4 sm:$0xff]   ;;  %v23326_v16 = vld [vmem:[#allocation16 + $0x74] ss:$48 sps:$4 sm:$0xff]  }
 0xc42   : > { %13380 = vmatprep.subr.bf16.mxu1 %v23263_v18  ;;  %v23329_v18 = vld [vmem:[#allocation16 + $0x7c] ss:$48 sps:$4 sm:$0xff]  }
 0xc44   : > { %13258 = vmatpush1.bf16.msra.mxu0 %v23258_v58  ;;  %v23324_v58 = vld [vmem:[#allocation16 + $0x70] ss:$48 sps:$4 sm:$0xff]  }
 0xc45   : > { %13381 = vmatpush1.bf16.msra.mxu1 %v23261_v21  ;;  %13259 = vmatprep.subr.bf16.mxu0 %v23266_v26  ;;  %v23327_v21 = vld [vmem:[#allocation16 + $0x78] ss:$48 sps:$4 sm:$0xff]   ;;  %v23332_v26 = vld [vmem:[#allocation16 + $0xd4] ss:$48 sps:$4 sm:$0xff]  }
 0xc46   : > { %13382 = vmatprep.subr.bf16.mxu1 %v23269_v2  ;;  %v23335_v2 = vld [vmem:[#allocation16 + $0xdc] ss:$48 sps:$4 sm:$0xff]  }
 0xc48   : > { %13260 = vmatpush1.bf16.msra.mxu0 %v23264_v29  ;;  %v23330_v29 = vld [vmem:[#allocation16 + $0xd0] ss:$48 sps:$4 sm:$0xff]  }
 0xc49   : > { %13383 = vmatpush1.bf16.msra.mxu1 %v23267_v4  ;;  %13261 = vmatprep.subr.bf16.mxu0 %v23272_v30  ;;  %v23333_v4 = vld [vmem:[#allocation16 + $0xd8] ss:$48 sps:$4 sm:$0xff]   ;;  %v23338_v30 = vld [vmem:[#allocation16 + $0x134] ss:$48 sps:$4 sm:$0xff]  }
 0xc4a   : > { %13384 = vmatprep.subr.bf16.mxu1 %v23275_v51  ;;  %v23341_v51 = vld [vmem:[#allocation16 + $0x13c] ss:$48 sps:$4 sm:$0xff]  }
 0xc4c   : > { %13262 = vmatpush1.bf16.msra.mxu0 %v23270_v56  ;;  %v23336_v56 = vld [vmem:[#allocation16 + $0x130] ss:$48 sps:$4 sm:$0xff]  }
 0xc4d   : > { %13385 = vmatpush1.bf16.msra.mxu1 %v23273_v27  ;;  %13263 = vmatprep.subr.bf16.mxu0 %v23278_v22  ;;  %v23339_v27 = vld [vmem:[#allocation16 + $0x138] ss:$48 sps:$4 sm:$0xff]   ;;  %v23344_v22 = vld [vmem:[#allocation16 + $0x194] ss:$48 sps:$4 sm:$0xff]  }
 0xc4e   : > { %13386 = vmatprep.subr.bf16.mxu1 %v23281_v43  ;;  %v23347_v43 = vld [vmem:[#allocation16 + $0x19c] ss:$48 sps:$4 sm:$0xff]  }
 0xc50   : > { %13264 = vmatpush1.bf16.msra.mxu0 %v23276_v35  ;;  %v23342_v35 = vld [vmem:[#allocation16 + $0x190] ss:$48 sps:$4 sm:$0xff]  }
 0xc51   : > { %13387 = vmatpush1.bf16.msra.mxu1 %v23279_v9  ;;  %13265 = vmatprep.subr.bf16.mxu0 %v23284_v8  ;;  %v23345_v9 = vld [vmem:[#allocation16 + $0x198] ss:$48 sps:$4 sm:$0xff]   ;;  %v23350_v8 = vld [vmem:[#allocation16 + $0x1f4] ss:$48 sps:$4 sm:$0xff]  }
 0xc52   : > { %13388 = vmatprep.subr.bf16.mxu1 %v23287_v17  ;;  %v23353_v17 = vld [vmem:[#allocation16 + $0x1fc] ss:$48 sps:$4 sm:$0xff]  }
 0xc54   : > { %13266 = vmatpush1.bf16.msra.mxu0 %v23282_v49  ;;  %v23348_v49 = vld [vmem:[#allocation16 + $0x1f0] ss:$48 sps:$4 sm:$0xff]  }
 0xc55   : > { %13389 = vmatpush1.bf16.msra.mxu1 %v23285_v48  ;;  %13267 = vmatprep.subr.bf16.mxu0 %v23290_v39  ;;  %v23351_v48 = vld [vmem:[#allocation16 + $0x1f8] ss:$48 sps:$4 sm:$0xff]   ;;  %v23356_v39 = vld [vmem:[#allocation16 + $0x254] ss:$48 sps:$4 sm:$0xff]  }
 0xc56   : > { %13390 = vmatprep.subr.bf16.mxu1 %v23293_v40  ;;  %v23359_v40 = vld [vmem:[#allocation16 + $0x25c] ss:$48 sps:$4 sm:$0xff]  }
 0xc58   : > { %13268 = vmatpush1.bf16.msra.mxu0 %v23288_v10  ;;  %v23354_v10 = vld [vmem:[#allocation16 + $0x250] ss:$48 sps:$4 sm:$0xff]  }
 0xc59   : > { %13391 = vmatpush1.bf16.msra.mxu1 %v23291_v50  ;;  %13269 = vmatprep.subr.bf16.mxu0 %v23296_v55  ;;  %v23357_v50 = vld [vmem:[#allocation16 + $0x258] ss:$48 sps:$4 sm:$0xff]   ;;  %v23362_v55 = vld [vmem:[#allocation16 + $0x2b4] ss:$48 sps:$4 sm:$0xff]  }
 0xc5a   : > { %13392 = vmatprep.subr.bf16.mxu1 %v23299_v41  ;;  %v23365_v41 = vld [vmem:[#allocation16 + $0x2bc] ss:$48 sps:$4 sm:$0xff]  }
 0xc5c   : > { %13270 = vmatpush1.bf16.msra.mxu0 %v23294_v42  ;;  %v23360_v42 = vld [vmem:[#allocation16 + $0x2b0] ss:$48 sps:$4 sm:$0xff]  }
 0xc5d   : > { %13393 = vmatpush1.bf16.msra.mxu1 %v23297_v54  ;;  %13271 = vmatprep.subr.bf16.mxu0 %v23302_v38  ;;  %v23363_v54 = vld [vmem:[#allocation16 + $0x2b8] ss:$48 sps:$4 sm:$0xff]   ;;  %v23368_v38 = vld [vmem:[#allocation16 + $0x314] ss:$48 sps:$4 sm:$0xff]  }
 0xc5e   : > { %13394 = vmatprep.subr.bf16.mxu1 %v23305_v1  ;;  %v23371_v1 = vld [vmem:[#allocation16 + $0x31c] ss:$48 sps:$4 sm:$0xff]  }
 0xc60   : > { %13272 = vmatpush1.bf16.msra.mxu0 %v23300_v57  ;;  %v23366_v57 = vld [vmem:[#allocation16 + $0x310] ss:$48 sps:$4 sm:$0xff]  }
 0xc61   : > { %13395 = vmatpush1.bf16.msra.mxu1 %v23303_v5  ;;  %13273 = vmatprep.subr.bf16.mxu0 %v23308_v59  ;;  %v23369_v5 = vld [vmem:[#allocation16 + $0x318] ss:$48 sps:$4 sm:$0xff]   ;;  %v23374_v59 = vld [vmem:[#allocation16 + $0x374] ss:$48 sps:$4 sm:$0xff]  }
 0xc62   : > { %13396 = vmatprep.subr.bf16.mxu1 %v23311_v60  ;;  %v23377_v60 = vld [vmem:[#allocation16 + $0x37c] ss:$48 sps:$4 sm:$0xff]  }
 0xc64   : > { %13274 = vmatpush1.bf16.msra.mxu0 %v23306_v61  ;;  %v23372_v61 = vld [vmem:[#allocation16 + $0x370] ss:$48 sps:$4 sm:$0xff]  }
 0xc65   : > { %13397 = vmatpush1.bf16.msra.mxu1 %v23309_v62  ;;  %13275 = vmatprep.subr.bf16.mxu0 %v23314_v63  ;;  %v23375_v62 = vld [vmem:[#allocation16 + $0x378] ss:$48 sps:$4 sm:$0xff]   ;;  %v23380_v63 = vld [vmem:[#allocation16 + $0x3d4] ss:$48 sps:$4 sm:$0xff]  }
 0xc66   : > { %13398 = vmatprep.subr.bf16.mxu1 %v23317_v0  ;;  %v23383_v0 = vld [vmem:[#allocation16 + $0x3dc] ss:$48 sps:$4 sm:$0xff]  }
 0xc68   : > { %13276 = vmatpush1.bf16.msra.mxu0 %v23312_v23  ;;  %v23378_v23 = vld [vmem:[#allocation16 + $0x3d0] ss:$48 sps:$4 sm:$0xff]  }
 0xc69   : > { %13399 = vmatpush1.bf16.msra.mxu1 %v23315_v37  ;;  %13409 = vmatprep.subr.bf16.mxu0 %v23320_v45  ;;  %v23381_v37 = vld [vmem:[#allocation16 + $0x3d8] ss:$48 sps:$4 sm:$0xff]   ;;  %v23386_v45 = vld [vmem:[#allocation16 + $0x434] ss:$48 sps:$4 sm:$0xff]  }
 0xc6a   : > { %13532 = vmatprep.subr.bf16.mxu1 %v23323_v47  ;;  %v23389_v47 = vld [vmem:[#allocation16 + $0x43c] ss:$48 sps:$4 sm:$0xff]  }
 0xc6b   : > { %13278 = vmatmul.mubr.bf16.vlgmr.msra.gmra.mrb[36].mxu0 %v26205_v20 }
 0xc6c   : > { %13401 = vmatmul.mubr.bf16.vlgmr.msra.gmra.mrb[52].mxu1 %v26205_v20  ;;  %13410 = vmatpush1.bf16.msra.mxu0 %v23318_v15  ;;  %v23384_v15 = vld [vmem:[#allocation16 + $0x430] ss:$48 sps:$4 sm:$0xff]  }
 0xc6d   : > { %13441 = vmatprep.mubr.bf16.mxu0 %v26175_v33  ;;  %13533 = vmatpush1.bf16.msra.mxu1 %v23321_v12  ;;  %v23387_v12 = vld [vmem:[#allocation16 + $0x438] ss:$48 sps:$4 sm:$0xff]  }
 0xc6e   : > { %13564 = vmatprep.mubr.bf16.mxu1 %v26175_v33  ;;  %13411 = vmatprep.subr.bf16.mxu0 %v23326_v16  ;;  %v23392_v16 = vld [vmem:[#allocation16 + $0x494] ss:$48 sps:$4 sm:$0xff]  }
 0xc6f   : > { %13534 = vmatprep.subr.bf16.mxu1 %v23329_v18  ;;  %v23395_v18 = vld [vmem:[#allocation16 + $0x49c] ss:$48 sps:$4 sm:$0xff]  }
 0xc70   : > { %13412 = vmatpush1.bf16.msra.mxu0 %v23324_v58  ;;  %v23390_v58 = vld [vmem:[#allocation16 + $0x490] ss:$48 sps:$4 sm:$0xff]  }
 0xc71   : > { %13535 = vmatpush1.bf16.msra.mxu1 %v23327_v21  ;;  %13413 = vmatprep.subr.bf16.mxu0 %v23332_v26  ;;  %v23393_v21 = vld [vmem:[#allocation16 + $0x498] ss:$48 sps:$4 sm:$0xff]   ;;  %v23398_v26 = vld [vmem:[#allocation16 + $0x4f4] ss:$48 sps:$4 sm:$0xff]  }
 0xc72   : > { %13536 = vmatprep.subr.bf16.mxu1 %v23335_v2  ;;  %v23401_v2 = vld [vmem:[#allocation16 + $0x4fc] ss:$48 sps:$4 sm:$0xff]  }
 0xc74   : > { %13414 = vmatpush1.bf16.msra.mxu0 %v23330_v29  ;;  %v23396_v29 = vld [vmem:[#allocation16 + $0x4f0] ss:$48 sps:$4 sm:$0xff]  }
 0xc75   : > { %13537 = vmatpush1.bf16.msra.mxu1 %v23333_v4  ;;  %13415 = vmatprep.subr.bf16.mxu0 %v23338_v30  ;;  %v23399_v4 = vld [vmem:[#allocation16 + $0x4f8] ss:$48 sps:$4 sm:$0xff]   ;;  %v23404_v30 = vld [vmem:[#allocation16 + $0x554] ss:$48 sps:$4 sm:$0xff]  }
 0xc76   : > { %13538 = vmatprep.subr.bf16.mxu1 %v23341_v51  ;;  %v23407_v51 = vld [vmem:[#allocation16 + $0x55c] ss:$48 sps:$4 sm:$0xff]  }
 0xc78   : > { %13416 = vmatpush1.bf16.msra.mxu0 %v23336_v56  ;;  %v23402_v56 = vld [vmem:[#allocation16 + $0x550] ss:$48 sps:$4 sm:$0xff]  }
 0xc79   : > { %13539 = vmatpush1.bf16.msra.mxu1 %v23339_v27  ;;  %13417 = vmatprep.subr.bf16.mxu0 %v23344_v22  ;;  %v23405_v27 = vld [vmem:[#allocation16 + $0x558] ss:$48 sps:$4 sm:$0xff]   ;;  %v23410_v22 = vld [vmem:[#allocation16 + $0x5b4] ss:$48 sps:$4 sm:$0xff]  }
 0xc7a   : > { %13540 = vmatprep.subr.bf16.mxu1 %v23347_v43  ;;  %v23413_v43 = vld [vmem:[#allocation16 + $0x5bc] ss:$48 sps:$4 sm:$0xff]  }
 0xc7c   : > { %13418 = vmatpush1.bf16.msra.mxu0 %v23342_v35  ;;  %v23408_v35 = vld [vmem:[#allocation16 + $0x5b0] ss:$48 sps:$4 sm:$0xff]  }
 0xc7d   : > { %13541 = vmatpush1.bf16.msra.mxu1 %v23345_v9  ;;  %13419 = vmatprep.subr.bf16.mxu0 %v23350_v8  ;;  %v23411_v9 = vld [vmem:[#allocation16 + $0x5b8] ss:$48 sps:$4 sm:$0xff]   ;;  %v23416_v8 = vld [vmem:[#allocation16 + $0x614] ss:$48 sps:$4 sm:$0xff]  }
 0xc7e   : > { %13542 = vmatprep.subr.bf16.mxu1 %v23353_v17  ;;  %v23419_v17 = vld [vmem:[#allocation16 + $0x61c] ss:$48 sps:$4 sm:$0xff]  }
 0xc80   : > { %13420 = vmatpush1.bf16.msra.mxu0 %v23348_v49  ;;  %v23414_v49 = vld [vmem:[#allocation16 + $0x610] ss:$48 sps:$4 sm:$0xff]  }
 0xc81   : > { %13543 = vmatpush1.bf16.msra.mxu1 %v23351_v48  ;;  %13421 = vmatprep.subr.bf16.mxu0 %v23356_v39  ;;  %v23417_v48 = vld [vmem:[#allocation16 + $0x618] ss:$48 sps:$4 sm:$0xff]   ;;  %v23422_v39 = vld [vmem:[#allocation16 + $0x674] ss:$48 sps:$4 sm:$0xff]  }
 0xc82   : > { %13544 = vmatprep.subr.bf16.mxu1 %v23359_v40  ;;  %v23425_v40 = vld [vmem:[#allocation16 + $0x67c] ss:$48 sps:$4 sm:$0xff]  }
 0xc84   : > { %13422 = vmatpush1.bf16.msra.mxu0 %v23354_v10  ;;  %v23420_v10 = vld [vmem:[#allocation16 + $0x670] ss:$48 sps:$4 sm:$0xff]  }
 0xc85   : > { %13545 = vmatpush1.bf16.msra.mxu1 %v23357_v50  ;;  %13423 = vmatprep.subr.bf16.mxu0 %v23362_v55  ;;  %v23423_v50 = vld [vmem:[#allocation16 + $0x678] ss:$48 sps:$4 sm:$0xff]   ;;  %v23428_v55 = vld [vmem:[#allocation16 + $0x6d4] ss:$48 sps:$4 sm:$0xff]  }
 0xc86   : > { %13546 = vmatprep.subr.bf16.mxu1 %v23365_v41  ;;  %v23431_v41 = vld [vmem:[#allocation16 + $0x6dc] ss:$48 sps:$4 sm:$0xff]  }
 0xc88   : > { %13424 = vmatpush1.bf16.msra.mxu0 %v23360_v42  ;;  %v23426_v42 = vld [vmem:[#allocation16 + $0x6d0] ss:$48 sps:$4 sm:$0xff]  }
 0xc89   : > { %13547 = vmatpush1.bf16.msra.mxu1 %v23363_v54  ;;  %13425 = vmatprep.subr.bf16.mxu0 %v23368_v38  ;;  %v23429_v54 = vld [vmem:[#allocation16 + $0x6d8] ss:$48 sps:$4 sm:$0xff]   ;;  %v23434_v38 = vld [vmem:[#allocation16 + $0x734] ss:$48 sps:$4 sm:$0xff]  }
 0xc8a   : > { %13548 = vmatprep.subr.bf16.mxu1 %v23371_v1  ;;  %v23437_v1 = vld [vmem:[#allocation16 + $0x73c] ss:$48 sps:$4 sm:$0xff]  }
 0xc8c   : > { %13426 = vmatpush1.bf16.msra.mxu0 %v23366_v57  ;;  %v23432_v57 = vld [vmem:[#allocation16 + $0x730] ss:$48 sps:$4 sm:$0xff]  }
 0xc8d   : > { %13549 = vmatpush1.bf16.msra.mxu1 %v23369_v5  ;;  %13427 = vmatprep.subr.bf16.mxu0 %v23374_v59  ;;  %v23435_v5 = vld [vmem:[#allocation16 + $0x738] ss:$48 sps:$4 sm:$0xff]   ;;  %v23440_v59 = vld [vmem:[#allocation16 + $0x794] ss:$48 sps:$4 sm:$0xff]  }
 0xc8e   : > { %13550 = vmatprep.subr.bf16.mxu1 %v23377_v60  ;;  %v23443_v60 = vld [vmem:[#allocation16 + $0x79c] ss:$48 sps:$4 sm:$0xff]  }
 0xc90   : > { %13428 = vmatpush1.bf16.msra.mxu0 %v23372_v61  ;;  %v23438_v61 = vld [vmem:[#allocation16 + $0x790] ss:$48 sps:$4 sm:$0xff]  }
 0xc91   : > { %13551 = vmatpush1.bf16.msra.mxu1 %v23375_v62  ;;  %13429 = vmatprep.subr.bf16.mxu0 %v23380_v63  ;;  %v23441_v62 = vld [vmem:[#allocation16 + $0x798] ss:$48 sps:$4 sm:$0xff]   ;;  %v23446_v63 = vld [vmem:[#allocation16 + $0x7f4] ss:$48 sps:$4 sm:$0xff]  }
 0xc92   : > { %13552 = vmatprep.subr.bf16.mxu1 %v23383_v0  ;;  %v23449_v0 = vld [vmem:[#allocation16 + $0x7fc] ss:$48 sps:$4 sm:$0xff]  }
 0xc94   : > { %13430 = vmatpush1.bf16.msra.mxu0 %v23378_v23  ;;  %v23444_v23 = vld [vmem:[#allocation16 + $0x7f0] ss:$48 sps:$4 sm:$0xff]  }
 0xc95   : > { %13553 = vmatpush1.bf16.msra.mxu1 %v23381_v37  ;;  %13431 = vmatprep.subr.bf16.mxu0 %v23386_v45  ;;  %v23447_v37 = vld [vmem:[#allocation16 + $0x7f8] ss:$48 sps:$4 sm:$0xff]   ;;  %v23452_v45 = vld [vmem:[#allocation16 + $0x854] ss:$48 sps:$4 sm:$0xff]  }
 0xc96   : > { %13554 = vmatprep.subr.bf16.mxu1 %v23389_v47  ;;  %v23455_v47 = vld [vmem:[#allocation16 + $0x85c] ss:$48 sps:$4 sm:$0xff]  }
 0xc98   : > { %13432 = vmatpush1.bf16.msra.mxu0 %v23384_v15  ;;  %v23450_v15 = vld [vmem:[#allocation16 + $0x850] ss:$48 sps:$4 sm:$0xff]  }
 0xc99   : > { %13555 = vmatpush1.bf16.msra.mxu1 %v23387_v12  ;;  %13433 = vmatprep.subr.bf16.mxu0 %v23392_v16  ;;  %v23453_v12 = vld [vmem:[#allocation16 + $0x858] ss:$48 sps:$4 sm:$0xff]   ;;  %v23458_v16 = vld [vmem:[#allocation16 + $0x8b4] ss:$48 sps:$4 sm:$0xff]  }
 0xc9a   : > { %13556 = vmatprep.subr.bf16.mxu1 %v23395_v18  ;;  %v23461_v18 = vld [vmem:[#allocation16 + $0x8bc] ss:$48 sps:$4 sm:$0xff]  }
 0xc9c   : > { %13434 = vmatpush1.bf16.msra.mxu0 %v23390_v58  ;;  %v23456_v58 = vld [vmem:[#allocation16 + $0x8b0] ss:$48 sps:$4 sm:$0xff]  }
 0xc9d   : > { %13557 = vmatpush1.bf16.msra.mxu1 %v23393_v21  ;;  %13435 = vmatprep.subr.bf16.mxu0 %v23398_v26  ;;  %v23459_v21 = vld [vmem:[#allocation16 + $0x8b8] ss:$48 sps:$4 sm:$0xff]   ;;  %v23464_v26 = vld [vmem:[#allocation16 + $0x914] ss:$48 sps:$4 sm:$0xff]  }
 0xc9e   : > { %13558 = vmatprep.subr.bf16.mxu1 %v23401_v2  ;;  %v23467_v2 = vld [vmem:[#allocation16 + $0x91c] ss:$48 sps:$4 sm:$0xff]  }
 0xca0   : > { %13436 = vmatpush1.bf16.msra.mxu0 %v23396_v29  ;;  %v23462_v29 = vld [vmem:[#allocation16 + $0x910] ss:$48 sps:$4 sm:$0xff]  }
 0xca1   : > { %13559 = vmatpush1.bf16.msra.mxu1 %v23399_v4  ;;  %13437 = vmatprep.subr.bf16.mxu0 %v23404_v30  ;;  %v23465_v4 = vld [vmem:[#allocation16 + $0x918] ss:$48 sps:$4 sm:$0xff]   ;;  %v23470_v30 = vld [vmem:[#allocation16 + $0x974] ss:$48 sps:$4 sm:$0xff]  }
 0xca2   : > { %13560 = vmatprep.subr.bf16.mxu1 %v23407_v51  ;;  %v23473_v51 = vld [vmem:[#allocation16 + $0x97c] ss:$48 sps:$4 sm:$0xff]  }
 0xca4   : > { %13438 = vmatpush1.bf16.msra.mxu0 %v23402_v56  ;;  %v23468_v56 = vld [vmem:[#allocation16 + $0x970] ss:$48 sps:$4 sm:$0xff]  }
 0xca5   : > { %13561 = vmatpush1.bf16.msra.mxu1 %v23405_v27  ;;  %13439 = vmatprep.subr.bf16.mxu0 %v23410_v22  ;;  %v23471_v27 = vld [vmem:[#allocation16 + $0x978] ss:$48 sps:$4 sm:$0xff]   ;;  %v23476_v22 = vld [vmem:[#allocation16 + $0x9d4] ss:$48 sps:$4 sm:$0xff]  }
 0xca6   : > { %13562 = vmatprep.subr.bf16.mxu1 %v23413_v43  ;;  %v23479_v43 = vld [vmem:[#allocation16 + $0x9dc] ss:$48 sps:$4 sm:$0xff]  }
 0xca8   : > { %13440 = vmatpush1.bf16.msra.mxu0 %v23408_v35  ;;  %v23474_v35 = vld [vmem:[#allocation16 + $0x9d0] ss:$48 sps:$4 sm:$0xff]  }
 0xca9   : > { %13563 = vmatpush1.bf16.msra.mxu1 %v23411_v9  ;;  %13450 = vmatprep.subr.bf16.mxu0 %v23416_v8  ;;  %v23477_v9 = vld [vmem:[#allocation16 + $0x9d8] ss:$48 sps:$4 sm:$0xff]   ;;  %v23482_v8 = vld [vmem:[#allocation16 + $0xa34] ss:$48 sps:$4 sm:$0xff]  }
 0xcaa   : > { %13573 = vmatprep.subr.bf16.mxu1 %v23419_v17  ;;  %v23485_v17 = vld [vmem:[#allocation16 + $0xa3c] ss:$48 sps:$4 sm:$0xff]  }
 0xcab   : > { %13442 = vmatmul.mubr.bf16.vlgmr.msra.gmra.mrb[40].mxu0 %v26179_v32 }
 0xcac   : > { %13565 = vmatmul.mubr.bf16.vlgmr.msra.gmra.mrb[56].mxu1 %v26179_v32  ;;  %13451 = vmatpush1.bf16.msra.mxu0 %v23414_v49  ;;  %v23480_v49 = vld [vmem:[#allocation16 + $0xa30] ss:$48 sps:$4 sm:$0xff]  }
 0xcad   : > { %13482 = vmatprep.mubr.bf16.mxu0 %v26187_v31  ;;  %13574 = vmatpush1.bf16.msra.mxu1 %v23417_v48  ;;  %v23483_v48 = vld [vmem:[#allocation16 + $0xa38] ss:$48 sps:$4 sm:$0xff]  }
 0xcae   : > { %13605 = vmatprep.mubr.bf16.mxu1 %v26187_v31  ;;  %13452 = vmatprep.subr.bf16.mxu0 %v23422_v39  ;;  %v23488_v39 = vld [vmem:[#allocation16 + $0xa94] ss:$48 sps:$4 sm:$0xff]  }
 0xcaf   : > { %13575 = vmatprep.subr.bf16.mxu1 %v23425_v40  ;;  %v23491_v40 = vld [vmem:[#allocation16 + $0xa9c] ss:$48 sps:$4 sm:$0xff]  }
 0xcb0   : > { %13453 = vmatpush1.bf16.msra.mxu0 %v23420_v10  ;;  %v23486_v10 = vld [vmem:[#allocation16 + $0xa90] ss:$48 sps:$4 sm:$0xff]  }
 0xcb1   : > { %13576 = vmatpush1.bf16.msra.mxu1 %v23423_v50  ;;  %13454 = vmatprep.subr.bf16.mxu0 %v23428_v55  ;;  %v23489_v50 = vld [vmem:[#allocation16 + $0xa98] ss:$48 sps:$4 sm:$0xff]   ;;  %v23494_v55 = vld [vmem:[#allocation16 + $0xaf4] ss:$48 sps:$4 sm:$0xff]  }
 0xcb2   : > { %13577 = vmatprep.subr.bf16.mxu1 %v23431_v41  ;;  %v23497_v41 = vld [vmem:[#allocation16 + $0xafc] ss:$48 sps:$4 sm:$0xff]  }
 0xcb4   : > { %13455 = vmatpush1.bf16.msra.mxu0 %v23426_v42  ;;  %v23492_v42 = vld [vmem:[#allocation16 + $0xaf0] ss:$48 sps:$4 sm:$0xff]  }
 0xcb5   : > { %13578 = vmatpush1.bf16.msra.mxu1 %v23429_v54  ;;  %13456 = vmatprep.subr.bf16.mxu0 %v23434_v38  ;;  %v23495_v54 = vld [vmem:[#allocation16 + $0xaf8] ss:$48 sps:$4 sm:$0xff]   ;;  %v23500_v38 = vld [vmem:[#allocation16 + $0xb54] ss:$48 sps:$4 sm:$0xff]  }
 0xcb6   : > { %13579 = vmatprep.subr.bf16.mxu1 %v23437_v1  ;;  %v23503_v1 = vld [vmem:[#allocation16 + $0xb5c] ss:$48 sps:$4 sm:$0xff]  }
 0xcb8   : > { %13457 = vmatpush1.bf16.msra.mxu0 %v23432_v57  ;;  %v23498_v57 = vld [vmem:[#allocation16 + $0xb50] ss:$48 sps:$4 sm:$0xff]  }
 0xcb9   : > { %13580 = vmatpush1.bf16.msra.mxu1 %v23435_v5  ;;  %13458 = vmatprep.subr.bf16.mxu0 %v23440_v59  ;;  %v23501_v5 = vld [vmem:[#allocation16 + $0xb58] ss:$48 sps:$4 sm:$0xff]   ;;  %v23506_v59 = vld [vmem:[#allocation16 + $0xbb4] ss:$48 sps:$4 sm:$0xff]  }
 0xcba   : > { %13581 = vmatprep.subr.bf16.mxu1 %v23443_v60  ;;  %v23509_v60 = vld [vmem:[#allocation16 + $0xbbc] ss:$48 sps:$4 sm:$0xff]  }
 0xcbc   : > { %13459 = vmatpush1.bf16.msra.mxu0 %v23438_v61  ;;  %v23504_v61 = vld [vmem:[#allocation16 + $0xbb0] ss:$48 sps:$4 sm:$0xff]  }
 0xcbd   : > { %13582 = vmatpush1.bf16.msra.mxu1 %v23441_v62  ;;  %13460 = vmatprep.subr.bf16.mxu0 %v23446_v63  ;;  %v23507_v62 = vld [vmem:[#allocation16 + $0xbb8] ss:$48 sps:$4 sm:$0xff]   ;;  %v23512_v63 = vld [vmem:[#allocation16 + $0xc14] ss:$48 sps:$4 sm:$0xff]  }
 0xcbe   : > { %13583 = vmatprep.subr.bf16.mxu1 %v23449_v0  ;;  %v23515_v0 = vld [vmem:[#allocation16 + $0xc1c] ss:$48 sps:$4 sm:$0xff]  }
 0xcc0   : > { %13461 = vmatpush1.bf16.msra.mxu0 %v23444_v23  ;;  %v23510_v23 = vld [vmem:[#allocation16 + $0xc10] ss:$48 sps:$4 sm:$0xff]  }
 0xcc1   : > { %13584 = vmatpush1.bf16.msra.mxu1 %v23447_v37  ;;  %13462 = vmatprep.subr.bf16.mxu0 %v23452_v45  ;;  %v23513_v37 = vld [vmem:[#allocation16 + $0xc18] ss:$48 sps:$4 sm:$0xff]   ;;  %v23518_v45 = vld [vmem:[#allocation16 + $0xc74] ss:$48 sps:$4 sm:$0xff]  }
 0xcc2   : > { %13585 = vmatprep.subr.bf16.mxu1 %v23455_v47  ;;  %v23521_v47 = vld [vmem:[#allocation16 + $0xc7c] ss:$48 sps:$4 sm:$0xff]  }
 0xcc4   : > { %13463 = vmatpush1.bf16.msra.mxu0 %v23450_v15  ;;  %v23516_v15 = vld [vmem:[#allocation16 + $0xc70] ss:$48 sps:$4 sm:$0xff]  }
 0xcc5   : > { %13586 = vmatpush1.bf16.msra.mxu1 %v23453_v12  ;;  %13464 = vmatprep.subr.bf16.mxu0 %v23458_v16  ;;  %v23519_v12 = vld [vmem:[#allocation16 + $0xc78] ss:$48 sps:$4 sm:$0xff]   ;;  %v23524_v16 = vld [vmem:[#allocation16 + $0xcd4] ss:$48 sps:$4 sm:$0xff]  }
 0xcc6   : > { %13587 = vmatprep.subr.bf16.mxu1 %v23461_v18  ;;  %v23527_v18 = vld [vmem:[#allocation16 + $0xcdc] ss:$48 sps:$4 sm:$0xff]  }
 0xcc8   : > { %13465 = vmatpush1.bf16.msra.mxu0 %v23456_v58  ;;  %v23522_v58 = vld [vmem:[#allocation16 + $0xcd0] ss:$48 sps:$4 sm:$0xff]  }
 0xcc9   : > { %13588 = vmatpush1.bf16.msra.mxu1 %v23459_v21  ;;  %13466 = vmatprep.subr.bf16.mxu0 %v23464_v26  ;;  %v23525_v21 = vld [vmem:[#allocation16 + $0xcd8] ss:$48 sps:$4 sm:$0xff]   ;;  %v23530_v26 = vld [vmem:[#allocation16 + $0xd34] ss:$48 sps:$4 sm:$0xff]  }
 0xcca   : > { %13589 = vmatprep.subr.bf16.mxu1 %v23467_v2  ;;  %v23533_v2 = vld [vmem:[#allocation16 + $0xd3c] ss:$48 sps:$4 sm:$0xff]  }
 0xccc   : > { %13467 = vmatpush1.bf16.msra.mxu0 %v23462_v29  ;;  %v23528_v29 = vld [vmem:[#allocation16 + $0xd30] ss:$48 sps:$4 sm:$0xff]  }
 0xccd   : > { %13590 = vmatpush1.bf16.msra.mxu1 %v23465_v4  ;;  %13468 = vmatprep.subr.bf16.mxu0 %v23470_v30  ;;  %v23531_v4 = vld [vmem:[#allocation16 + $0xd38] ss:$48 sps:$4 sm:$0xff]   ;;  %v23536_v30 = vld [vmem:[#allocation16 + $0xd94] ss:$48 sps:$4 sm:$0xff]  }
 0xcce   : > { %13591 = vmatprep.subr.bf16.mxu1 %v23473_v51  ;;  %v23539_v51 = vld [vmem:[#allocation16 + $0xd9c] ss:$48 sps:$4 sm:$0xff]  }
 0xcd0   : > { %13469 = vmatpush1.bf16.msra.mxu0 %v23468_v56  ;;  %v23534_v56 = vld [vmem:[#allocation16 + $0xd90] ss:$48 sps:$4 sm:$0xff]  }
 0xcd1   : > { %13592 = vmatpush1.bf16.msra.mxu1 %v23471_v27  ;;  %13470 = vmatprep.subr.bf16.mxu0 %v23476_v22  ;;  %v23537_v27 = vld [vmem:[#allocation16 + $0xd98] ss:$48 sps:$4 sm:$0xff]   ;;  %v23542_v22 = vld [vmem:[#allocation16 + $0xdf4] ss:$48 sps:$4 sm:$0xff]  }
 0xcd2   : > { %13593 = vmatprep.subr.bf16.mxu1 %v23479_v43  ;;  %v23545_v43 = vld [vmem:[#allocation16 + $0xdfc] ss:$48 sps:$4 sm:$0xff]  }
 0xcd4   : > { %13471 = vmatpush1.bf16.msra.mxu0 %v23474_v35  ;;  %v23540_v35 = vld [vmem:[#allocation16 + $0xdf0] ss:$48 sps:$4 sm:$0xff]  }
 0xcd5   : > { %13594 = vmatpush1.bf16.msra.mxu1 %v23477_v9  ;;  %13472 = vmatprep.subr.bf16.mxu0 %v23482_v8  ;;  %v23543_v9 = vld [vmem:[#allocation16 + $0xdf8] ss:$48 sps:$4 sm:$0xff]   ;;  %v23548_v8 = vld [vmem:[#allocation16 + $0xe54] ss:$48 sps:$4 sm:$0xff]  }
 0xcd6   : > { %13595 = vmatprep.subr.bf16.mxu1 %v23485_v17  ;;  %v23551_v17 = vld [vmem:[#allocation16 + $0xe5c] ss:$48 sps:$4 sm:$0xff]  }
 0xcd8   : > { %13473 = vmatpush1.bf16.msra.mxu0 %v23480_v49  ;;  %v23546_v49 = vld [vmem:[#allocation16 + $0xe50] ss:$48 sps:$4 sm:$0xff]  }
 0xcd9   : > { %13596 = vmatpush1.bf16.msra.mxu1 %v23483_v48  ;;  %13474 = vmatprep.subr.bf16.mxu0 %v23488_v39  ;;  %v23549_v48 = vld [vmem:[#allocation16 + $0xe58] ss:$48 sps:$4 sm:$0xff]   ;;  %v23554_v39 = vld [vmem:[#allocation16 + $0xeb4] ss:$48 sps:$4 sm:$0xff]  }
 0xcda   : > { %13597 = vmatprep.subr.bf16.mxu1 %v23491_v40  ;;  %v23557_v40 = vld [vmem:[#allocation16 + $0xebc] ss:$48 sps:$4 sm:$0xff]  }
 0xcdc   : > { %13475 = vmatpush1.bf16.msra.mxu0 %v23486_v10  ;;  %v23552_v10 = vld [vmem:[#allocation16 + $0xeb0] ss:$48 sps:$4 sm:$0xff]  }
 0xcdd   : > { %13598 = vmatpush1.bf16.msra.mxu1 %v23489_v50  ;;  %13476 = vmatprep.subr.bf16.mxu0 %v23494_v55  ;;  %v23555_v50 = vld [vmem:[#allocation16 + $0xeb8] ss:$48 sps:$4 sm:$0xff]   ;;  %v23560_v55 = vld [vmem:[#allocation16 + $0xf14] ss:$48 sps:$4 sm:$0xff]  }
 0xcde   : > { %13599 = vmatprep.subr.bf16.mxu1 %v23497_v41  ;;  %v23563_v41 = vld [vmem:[#allocation16 + $0xf1c] ss:$48 sps:$4 sm:$0xff]  }
 0xce0   : > { %13477 = vmatpush1.bf16.msra.mxu0 %v23492_v42  ;;  %v23558_v42 = vld [vmem:[#allocation16 + $0xf10] ss:$48 sps:$4 sm:$0xff]  }
 0xce1   : > { %13600 = vmatpush1.bf16.msra.mxu1 %v23495_v54  ;;  %13478 = vmatprep.subr.bf16.mxu0 %v23500_v38  ;;  %v23561_v54 = vld [vmem:[#allocation16 + $0xf18] ss:$48 sps:$4 sm:$0xff]   ;;  %v23566_v38 = vld [vmem:[#allocation16 + $0xf74] ss:$48 sps:$4 sm:$0xff]  }
 0xce2   : > { %13601 = vmatprep.subr.bf16.mxu1 %v23503_v1  ;;  %v23569_v1 = vld [vmem:[#allocation16 + $0xf7c] ss:$48 sps:$4 sm:$0xff]  }
 0xce4   : > { %13479 = vmatpush1.bf16.msra.mxu0 %v23498_v57  ;;  %v23564_v57 = vld [vmem:[#allocation16 + $0xf70] ss:$48 sps:$4 sm:$0xff]  }
 0xce5   : > { %13602 = vmatpush1.bf16.msra.mxu1 %v23501_v5  ;;  %13480 = vmatprep.subr.bf16.mxu0 %v23506_v59  ;;  %v23567_v5 = vld [vmem:[#allocation16 + $0xf78] ss:$48 sps:$4 sm:$0xff]   ;;  %v23572_v59 = vld [vmem:[#allocation16 + $0xfd4] ss:$48 sps:$4 sm:$0xff]  }
 0xce6   : > { %13603 = vmatprep.subr.bf16.mxu1 %v23509_v60  ;;  %v23575_v60 = vld [vmem:[#allocation16 + $0xfdc] ss:$48 sps:$4 sm:$0xff]  }
 0xce8   : > { %13481 = vmatpush1.bf16.msra.mxu0 %v23504_v61  ;;  %v23570_v61 = vld [vmem:[#allocation16 + $0xfd0] ss:$48 sps:$4 sm:$0xff]  }
 0xce9   : > { %13604 = vmatpush1.bf16.msra.mxu1 %v23507_v62  ;;  %13491 = vmatprep.subr.bf16.mxu0 %v23512_v63  ;;  %v23573_v62 = vld [vmem:[#allocation16 + $0xfd8] ss:$48 sps:$4 sm:$0xff]   ;;  %v23578_v63 = vld [vmem:[#allocation16 + $0x1034] ss:$48 sps:$4 sm:$0xff]  }
 0xcea   : > { %13614 = vmatprep.subr.bf16.mxu1 %v23515_v0  ;;  %v23581_v0 = vld [vmem:[#allocation16 + $0x103c] ss:$48 sps:$4 sm:$0xff]  }
 0xceb   : > { %13483 = vmatmul.mubr.bf16.vlgmr.msra.gmra.mrb[40].mxu0 %v26193_v52 }
 0xcec   : > { %13606 = vmatmul.mubr.bf16.vlgmr.msra.gmra.mrb[56].mxu1 %v26193_v52  ;;  %13492 = vmatpush1.bf16.msra.mxu0 %v23510_v23  ;;  %v23576_v23 = vld [vmem:[#allocation16 + $0x1030] ss:$48 sps:$4 sm:$0xff]  }
 0xced   : > { %13523 = vmatprep.mubr.bf16.mxu0 %v26197_v24  ;;  %13615 = vmatpush1.bf16.msra.mxu1 %v23513_v37  ;;  %v23579_v37 = vld [vmem:[#allocation16 + $0x1038] ss:$48 sps:$4 sm:$0xff]  }
 0xcee   : > { %13646 = vmatprep.mubr.bf16.mxu1 %v26197_v24  ;;  %13493 = vmatprep.subr.bf16.mxu0 %v23518_v45  ;;  %v23584_v45 = vld [vmem:[#allocation16 + $0x1094] ss:$48 sps:$4 sm:$0xff]  }
 0xcef   : > { %13616 = vmatprep.subr.bf16.mxu1 %v23521_v47  ;;  %v23587_v47 = vld [vmem:[#allocation16 + $0x109c] ss:$48 sps:$4 sm:$0xff]  }
 0xcf0   : > { %13494 = vmatpush1.bf16.msra.mxu0 %v23516_v15  ;;  %v23582_v15 = vld [vmem:[#allocation16 + $0x1090] ss:$48 sps:$4 sm:$0xff]  }
 0xcf1   : > { %13617 = vmatpush1.bf16.msra.mxu1 %v23519_v12  ;;  %13495 = vmatprep.subr.bf16.mxu0 %v23524_v16  ;;  %v23585_v12 = vld [vmem:[#allocation16 + $0x1098] ss:$48 sps:$4 sm:$0xff]   ;;  %v23590_v16 = vld [vmem:[#allocation16 + $0x10f4] ss:$48 sps:$4 sm:$0xff]  }
 0xcf2   : > { %13618 = vmatprep.subr.bf16.mxu1 %v23527_v18  ;;  %v23593_v18 = vld [vmem:[#allocation16 + $0x10fc] ss:$48 sps:$4 sm:$0xff]  }
 0xcf4   : > { %13496 = vmatpush1.bf16.msra.mxu0 %v23522_v58  ;;  %v23588_v58 = vld [vmem:[#allocation16 + $0x10f0] ss:$48 sps:$4 sm:$0xff]  }
 0xcf5   : > { %13619 = vmatpush1.bf16.msra.mxu1 %v23525_v21  ;;  %13497 = vmatprep.subr.bf16.mxu0 %v23530_v26  ;;  %v23591_v21 = vld [vmem:[#allocation16 + $0x10f8] ss:$48 sps:$4 sm:$0xff]   ;;  %v23596_v26 = vld [vmem:[#allocation16 + $0x1154] ss:$48 sps:$4 sm:$0xff]  }
 0xcf6   : > { %13620 = vmatprep.subr.bf16.mxu1 %v23533_v2  ;;  %v23599_v2 = vld [vmem:[#allocation16 + $0x115c] ss:$48 sps:$4 sm:$0xff]  }
 0xcf8   : > { %13498 = vmatpush1.bf16.msra.mxu0 %v23528_v29  ;;  %v23594_v29 = vld [vmem:[#allocation16 + $0x1150] ss:$48 sps:$4 sm:$0xff]  }
 0xcf9   : > { %13621 = vmatpush1.bf16.msra.mxu1 %v23531_v4  ;;  %13499 = vmatprep.subr.bf16.mxu0 %v23536_v30  ;;  %v23597_v4 = vld [vmem:[#allocation16 + $0x1158] ss:$48 sps:$4 sm:$0xff]   ;;  %v23602_v30 = vld [vmem:[#allocation16 + $0x11b4] ss:$48 sps:$4 sm:$0xff]  }
 0xcfa   : > { %13622 = vmatprep.subr.bf16.mxu1 %v23539_v51  ;;  %v23605_v51 = vld [vmem:[#allocation16 + $0x11bc] ss:$48 sps:$4 sm:$0xff]  }
 0xcfc   : > { %13500 = vmatpush1.bf16.msra.mxu0 %v23534_v56  ;;  %v23600_v56 = vld [vmem:[#allocation16 + $0x11b0] ss:$48 sps:$4 sm:$0xff]  }
 0xcfd   : > { %13623 = vmatpush1.bf16.msra.mxu1 %v23537_v27  ;;  %13501 = vmatprep.subr.bf16.mxu0 %v23542_v22  ;;  %v23603_v27 = vld [vmem:[#allocation16 + $0x11b8] ss:$48 sps:$4 sm:$0xff]   ;;  %v23608_v22 = vld [vmem:[#allocation16 + $0x24] ss:$48 sps:$4 sm:$0xff]  }
 0xcfe   : > { %13624 = vmatprep.subr.bf16.mxu1 %v23545_v43  ;;  %v23611_v43 = vld [vmem:[#allocation16 + $0x2c] ss:$48 sps:$4 sm:$0xff]  }
 0xd00   : > { %13502 = vmatpush1.bf16.msra.mxu0 %v23540_v35  ;;  %v23606_v35 = vld [vmem:[#allocation16 + $0x20] ss:$48 sps:$4 sm:$0xff]  }
 0xd01   : > { %13625 = vmatpush1.bf16.msra.mxu1 %v23543_v9  ;;  %13503 = vmatprep.subr.bf16.mxu0 %v23548_v8  ;;  %v23609_v9 = vld [vmem:[#allocation16 + $0x28] ss:$48 sps:$4 sm:$0xff]   ;;  %v23614_v8 = vld [vmem:[#allocation16 + $0x84] ss:$48 sps:$4 sm:$0xff]  }
 0xd02   : > { %13626 = vmatprep.subr.bf16.mxu1 %v23551_v17  ;;  %v23617_v17 = vld [vmem:[#allocation16 + $0x8c] ss:$48 sps:$4 sm:$0xff]  }
 0xd04   : > { %13504 = vmatpush1.bf16.msra.mxu0 %v23546_v49  ;;  %v23612_v49 = vld [vmem:[#allocation16 + $0x80] ss:$48 sps:$4 sm:$0xff]  }
 0xd05   : > { %13627 = vmatpush1.bf16.msra.mxu1 %v23549_v48  ;;  %13505 = vmatprep.subr.bf16.mxu0 %v23554_v39  ;;  %v23615_v48 = vld [vmem:[#allocation16 + $0x88] ss:$48 sps:$4 sm:$0xff]   ;;  %v23620_v39 = vld [vmem:[#allocation16 + $0xe4] ss:$48 sps:$4 sm:$0xff]  }
 0xd06   : > { %13628 = vmatprep.subr.bf16.mxu1 %v23557_v40  ;;  %v23623_v40 = vld [vmem:[#allocation16 + $0xec] ss:$48 sps:$4 sm:$0xff]  }
 0xd08   : > { %13506 = vmatpush1.bf16.msra.mxu0 %v23552_v10  ;;  %v23618_v10 = vld [vmem:[#allocation16 + $0xe0] ss:$48 sps:$4 sm:$0xff]  }
 0xd09   : > { %13629 = vmatpush1.bf16.msra.mxu1 %v23555_v50  ;;  %13507 = vmatprep.subr.bf16.mxu0 %v23560_v55  ;;  %v23621_v50 = vld [vmem:[#allocation16 + $0xe8] ss:$48 sps:$4 sm:$0xff]   ;;  %v23626_v55 = vld [vmem:[#allocation16 + $0x144] ss:$48 sps:$4 sm:$0xff]  }
 0xd0a   : > { %13630 = vmatprep.subr.bf16.mxu1 %v23563_v41  ;;  %v23629_v41 = vld [vmem:[#allocation16 + $0x14c] ss:$48 sps:$4 sm:$0xff]  }
 0xd0c   : > { %13508 = vmatpush1.bf16.msra.mxu0 %v23558_v42  ;;  %v23624_v42 = vld [vmem:[#allocation16 + $0x140] ss:$48 sps:$4 sm:$0xff]  }
 0xd0d   : > { %13631 = vmatpush1.bf16.msra.mxu1 %v23561_v54  ;;  %13509 = vmatprep.subr.bf16.mxu0 %v23566_v38  ;;  %v23627_v54 = vld [vmem:[#allocation16 + $0x148] ss:$48 sps:$4 sm:$0xff]   ;;  %v23632_v38 = vld [vmem:[#allocation16 + $0x1a4] ss:$48 sps:$4 sm:$0xff]  }
 0xd0e   : > { %13632 = vmatprep.subr.bf16.mxu1 %v23569_v1  ;;  %v23635_v1 = vld [vmem:[#allocation16 + $0x1ac] ss:$48 sps:$4 sm:$0xff]  }
 0xd10   : > { %13510 = vmatpush1.bf16.msra.mxu0 %v23564_v57  ;;  %v23633_v57 = vld [vmem:[#allocation16 + $0x1a8] ss:$48 sps:$4 sm:$0xff]  }
 0xd11   : > { %13633 = vmatpush1.bf16.msra.mxu1 %v23567_v5  ;;  %13511 = vmatprep.subr.bf16.mxu0 %v23572_v59  ;;  %v23638_v5 = vld [vmem:[#allocation16 + $0x204] ss:$48 sps:$4 sm:$0xff]   ;;  %v23641_v59 = vld [vmem:[#allocation16 + $0x20c] ss:$48 sps:$4 sm:$0xff]  }
 0xd12   : > { %13634 = vmatprep.subr.bf16.mxu1 %v23575_v60  ;;  %v23636_v60 = vld [vmem:[#allocation16 + $0x200] ss:$48 sps:$4 sm:$0xff]  }
 0xd14   : > { %13512 = vmatpush1.bf16.msra.mxu0 %v23570_v61  ;;  %v23639_v61 = vld [vmem:[#allocation16 + $0x208] ss:$48 sps:$4 sm:$0xff]  }
 0xd15   : > { %13635 = vmatpush1.bf16.msra.mxu1 %v23573_v62  ;;  %13513 = vmatprep.subr.bf16.mxu0 %v23578_v63  ;;  %v23644_v62 = vld [vmem:[#allocation16 + $0x264] ss:$48 sps:$4 sm:$0xff]  }
 0xd16   : > { %13636 = vmatprep.subr.bf16.mxu1 %v23581_v0  ;;  %v23647_v0 = vld [vmem:[#allocation16 + $0x26c] ss:$48 sps:$4 sm:$0xff]  }
 0xd18   : > { %13514 = vmatpush1.bf16.msra.mxu0 %v23576_v23 }
 0xd19   : > { %13637 = vmatpush1.bf16.msra.mxu1 %v23579_v37  ;;  %13515 = vmatprep.subr.bf16.mxu0 %v23584_v45 }
 0xd1a   : > { %13638 = vmatprep.subr.bf16.mxu1 %v23587_v47 }
 0xd1c   : > { %13516 = vmatpush1.bf16.msra.mxu0 %v23582_v15  ;;  %v23642_v15 = vld [vmem:[#allocation16 + $0x260] ss:$48 sps:$4 sm:$0xff]  }
 0xd1d   : > { %13639 = vmatpush1.bf16.msra.mxu1 %v23585_v12  ;;  %13517 = vmatprep.subr.bf16.mxu0 %v23590_v16 }
 0xd1e   : > { %13640 = vmatprep.subr.bf16.mxu1 %v23593_v18  ;;  %v23645_v18 = vld [vmem:[#allocation16 + $0x268] ss:$48 sps:$4 sm:$0xff]  }
 0xd20   : > { %13518 = vmatpush1.bf16.msra.mxu0 %v23588_v58  ;;  %v23650_v58 = vld [vmem:[#allocation16 + $0x2c4] ss:$48 sps:$4 sm:$0xff]  }
 0xd21   : > { %13641 = vmatpush1.bf16.msra.mxu1 %v23591_v21  ;;  %13519 = vmatprep.subr.bf16.mxu0 %v23596_v26  ;;  %v23653_v26 = vld [vmem:[#allocation16 + $0x2cc] ss:$48 sps:$4 sm:$0xff]  }
 0xd22   : > { %13642 = vmatprep.subr.bf16.mxu1 %v23599_v2  ;;  %v23648_v2 = vld [vmem:[#allocation16 + $0x2c0] ss:$48 sps:$4 sm:$0xff]  }
 0xd24   : > { %13520 = vmatpush1.bf16.msra.mxu0 %v23594_v29  ;;  %v23651_v29 = vld [vmem:[#allocation16 + $0x2c8] ss:$48 sps:$4 sm:$0xff]  }
 0xd25   : > { %13643 = vmatpush1.bf16.msra.mxu1 %v23597_v4  ;;  %13521 = vmatprep.subr.bf16.mxu0 %v23602_v30  ;;  %v23656_v4 = vld [vmem:[#allocation16 + $0x324] ss:$48 sps:$4 sm:$0xff]   ;;  %v23659_v30 = vld [vmem:[#allocation16 + $0x32c] ss:$48 sps:$4 sm:$0xff]  }
 0xd26   : > { %13644 = vmatprep.subr.bf16.mxu1 %v23605_v51  ;;  %v23654_v51 = vld [vmem:[#allocation16 + $0x320] ss:$48 sps:$4 sm:$0xff]  }
 0xd28   : > { %13522 = vmatpush1.bf16.msra.mxu0 %v23600_v56  ;;  %v23657_v56 = vld [vmem:[#allocation16 + $0x328] ss:$48 sps:$4 sm:$0xff]  }
 0xd29   : > { %13645 = vmatpush1.bf16.msra.mxu1 %v23603_v27  ;;  %13655 = vmatprep.subr.bf16.mxu0 %v23608_v22  ;;  %v23662_v27 = vld [vmem:[#allocation16 + $0x384] ss:$48 sps:$4 sm:$0xff]   ;;  %v23665_v22 = vld [vmem:[#allocation16 + $0x38c] ss:$48 sps:$4 sm:$0xff]  }
 0xd2a   : > { %13778 = vmatprep.subr.bf16.mxu1 %v23611_v43  ;;  %v23660_v43 = vld [vmem:[#allocation16 + $0x380] ss:$48 sps:$4 sm:$0xff]  }
 0xd2b   : > { %13524 = vmatmul.mubr.bf16.vlgmr.msra.gmra.mrb[40].mxu0 %v26205_v20 }
 0xd2c   : > { %13647 = vmatmul.mubr.bf16.vlgmr.msra.gmra.mrb[56].mxu1 %v26205_v20  ;;  %13656 = vmatpush1.bf16.msra.mxu0 %v23606_v35  ;;  %v23663_v35 = vld [vmem:[#allocation16 + $0x388] ss:$48 sps:$4 sm:$0xff]  }
 0xd2d   : > { %13687 = vmatprep.mubr.bf16.mxu0 %v26175_v33  ;;  %13779 = vmatpush1.bf16.msra.mxu1 %v23609_v9  ;;  %v23668_v9 = vld [vmem:[#allocation16 + $0x3e4] ss:$48 sps:$4 sm:$0xff]  }
 0xd2e   : > { %13810 = vmatprep.mubr.bf16.mxu1 %v26175_v33  ;;  %13657 = vmatprep.subr.bf16.mxu0 %v23614_v8  ;;  %v23630_v33 = vld [vmem:[#allocation16 + $0x1a0] ss:$48 sps:$4 sm:$0xff]   ;;  %v23671_v8 = vld [vmem:[#allocation16 + $0x3ec] ss:$48 sps:$4 sm:$0xff]  }
 0xd2f   : > { %13780 = vmatprep.subr.bf16.mxu1 %v23617_v17  ;;  %v23666_v17 = vld [vmem:[#allocation16 + $0x3e0] ss:$48 sps:$4 sm:$0xff]  }
 0xd30   : > { %13658 = vmatpush1.bf16.msra.mxu0 %v23612_v49  ;;  %v23669_v49 = vld [vmem:[#allocation16 + $0x3e8] ss:$48 sps:$4 sm:$0xff]  }
 0xd31   : > { %13781 = vmatpush1.bf16.msra.mxu1 %v23615_v48  ;;  %13659 = vmatprep.subr.bf16.mxu0 %v23620_v39  ;;  %v23674_v48 = vld [vmem:[#allocation16 + $0x444] ss:$48 sps:$4 sm:$0xff]   ;;  %v23677_v39 = vld [vmem:[#allocation16 + $0x44c] ss:$48 sps:$4 sm:$0xff]  }
 0xd32   : > { %13782 = vmatprep.subr.bf16.mxu1 %v23623_v40  ;;  %v23672_v40 = vld [vmem:[#allocation16 + $0x440] ss:$48 sps:$4 sm:$0xff]  }
 0xd34   : > { %13660 = vmatpush1.bf16.msra.mxu0 %v23618_v10  ;;  %v23675_v10 = vld [vmem:[#allocation16 + $0x448] ss:$48 sps:$4 sm:$0xff]  }
 0xd35   : > { %13783 = vmatpush1.bf16.msra.mxu1 %v23621_v50  ;;  %13661 = vmatprep.subr.bf16.mxu0 %v23626_v55  ;;  %v23680_v50 = vld [vmem:[#allocation16 + $0x4a4] ss:$48 sps:$4 sm:$0xff]   ;;  %v23683_v55 = vld [vmem:[#allocation16 + $0x4ac] ss:$48 sps:$4 sm:$0xff]  }
 0xd36   : > { %13784 = vmatprep.subr.bf16.mxu1 %v23629_v41  ;;  %v23678_v41 = vld [vmem:[#allocation16 + $0x4a0] ss:$48 sps:$4 sm:$0xff]  }
 0xd38   : > { %13662 = vmatpush1.bf16.msra.mxu0 %v23624_v42  ;;  %v23681_v42 = vld [vmem:[#allocation16 + $0x4a8] ss:$48 sps:$4 sm:$0xff]  }
 0xd39   : > { %13785 = vmatpush1.bf16.msra.mxu1 %v23627_v54  ;;  %13663 = vmatprep.subr.bf16.mxu0 %v23632_v38  ;;  %v23686_v54 = vld [vmem:[#allocation16 + $0x504] ss:$48 sps:$4 sm:$0xff]   ;;  %v23689_v38 = vld [vmem:[#allocation16 + $0x50c] ss:$48 sps:$4 sm:$0xff]  }
 0xd3a   : > { %13786 = vmatprep.subr.bf16.mxu1 %v23635_v1  ;;  %v23684_v1 = vld [vmem:[#allocation16 + $0x500] ss:$48 sps:$4 sm:$0xff]  }
 0xd3c   : > { %13664 = vmatpush1.bf16.msra.mxu0 %v23630_v33  ;;  %v23687_v33 = vld [vmem:[#allocation16 + $0x508] ss:$48 sps:$4 sm:$0xff]  }
 0xd3d   : > { %13787 = vmatpush1.bf16.msra.mxu1 %v23633_v57  ;;  %13665 = vmatprep.subr.bf16.mxu0 %v23638_v5  ;;  %v23692_v57 = vld [vmem:[#allocation16 + $0x564] ss:$48 sps:$4 sm:$0xff]   ;;  %v23695_v5 = vld [vmem:[#allocation16 + $0x56c] ss:$48 sps:$4 sm:$0xff]  }
 0xd3e   : > { %v26223_v63 = vpop.f32.mrb[36].mxu0  ;;  %13788 = vmatprep.subr.bf16.mxu1 %v23641_v59  ;;  %v23690_v59 = vld [vmem:[#allocation16 + $0x560] ss:$48 sps:$4 sm:$0xff]  }
 0xd3f   : > { %v26225_v23 = vpop.f32.mrb[52].mxu1  ;;  %v26227_v37 = vpop.f32.mrb[37].mxu0 }
 0xd40   : > { %v26229_v45 = vpop.f32.mrb[53].mxu1  ;;  %v13283_v47 = vpop.f32.mrb[38].mxu0  ;;  %13666 = vmatpush1.bf16.msra.mxu0 %v23636_v60  ;;  %v23693_v60 = vld [vmem:[#allocation16 + $0x568] ss:$48 sps:$4 sm:$0xff]  }
 0xd41   : > { %v13406_v12 = vpop.f32.mrb[54].mxu1  ;;  %13789 = vmatpush1.bf16.msra.mxu1 %v23639_v61  ;;  %v13284_v16 = vpop.f32.mrb[39].mxu0  ;;  %13667 = vmatprep.subr.bf16.mxu0 %v23644_v62  ;;  %v23698_v61 = vld [vmem:[#allocation16 + $0x5c4] ss:$48 sps:$4 sm:$0xff]   ;;  %v23701_v62 = vld [vmem:[#allocation16 + $0x5cc] ss:$48 sps:$4 sm:$0xff]  }
 0xd42   : > { %v13407_v21 = vpop.f32.mrb[55].mxu1  ;;  %13790 = vmatprep.subr.bf16.mxu1 %v23647_v0  ;;  %v23696_v0 = vld [vmem:[#allocation16 + $0x5c0] ss:$48 sps:$4 sm:$0xff]   ;;  %v23699_v47 = vld [vmem:[#allocation16 + $0x5c8] ss:$48 sps:$4 sm:$0xff]  }
 0xd43   : > { %v23707_v12 = vld [vmem:[#allocation16 + $0x62c] ss:$48 sps:$4 sm:$0xff]   ;;  %v23702_v16 = vld [vmem:[#allocation16 + $0x620] ss:$48 sps:$4 sm:$0xff]  }
 0xd44   : > { %13668 = vmatpush1.bf16.msra.mxu0 %v23642_v15  ;;  %v23704_v15 = vld [vmem:[#allocation16 + $0x624] ss:$48 sps:$4 sm:$0xff]   ;;  %v23713_v21 = vld [vmem:[#allocation16 + $0x68c] ss:$48 sps:$4 sm:$0xff]  }
 0xd45   : > { %13791 = vmatpush1.bf16.msra.mxu1 %v23645_v18  ;;  %13669 = vmatprep.subr.bf16.mxu0 %v23650_v58  ;;  %v23705_v18 = vld [vmem:[#allocation16 + $0x628] ss:$48 sps:$4 sm:$0xff]   ;;  %v23710_v58 = vld [vmem:[#allocation16 + $0x684] ss:$48 sps:$4 sm:$0xff]  }
 0xd46   : > { %13792 = vmatprep.subr.bf16.mxu1 %v23653_v26  ;;  %v23708_v26 = vld [vmem:[#allocation16 + $0x680] ss:$48 sps:$4 sm:$0xff]  }
 0xd48   : > { %13670 = vmatpush1.bf16.msra.mxu0 %v23648_v2  ;;  %v23711_v2 = vld [vmem:[#allocation16 + $0x688] ss:$48 sps:$4 sm:$0xff]  }
 0xd49   : > { %13793 = vmatpush1.bf16.msra.mxu1 %v23651_v29  ;;  %13671 = vmatprep.subr.bf16.mxu0 %v23656_v4  ;;  %v23716_v29 = vld [vmem:[#allocation16 + $0x6e4] ss:$48 sps:$4 sm:$0xff]   ;;  %v23719_v4 = vld [vmem:[#allocation16 + $0x6ec] ss:$48 sps:$4 sm:$0xff]  }
 0xd4a   : > { %13794 = vmatprep.subr.bf16.mxu1 %v23659_v30  ;;  %v23714_v30 = vld [vmem:[#allocation16 + $0x6e0] ss:$48 sps:$4 sm:$0xff]  }
 0xd4c   : > { %13672 = vmatpush1.bf16.msra.mxu0 %v23654_v51  ;;  %v23717_v51 = vld [vmem:[#allocation16 + $0x6e8] ss:$48 sps:$4 sm:$0xff]  }
 0xd4d   : > { %13795 = vmatpush1.bf16.msra.mxu1 %v23657_v56  ;;  %13673 = vmatprep.subr.bf16.mxu0 %v23662_v27  ;;  %v23722_v56 = vld [vmem:[#allocation16 + $0x744] ss:$48 sps:$4 sm:$0xff]   ;;  %v23720_v27 = vld [vmem:[#allocation16 + $0x740] ss:$48 sps:$4 sm:$0xff]  }
 0xd4e   : > { %13796 = vmatprep.subr.bf16.mxu1 %v23665_v22  ;;  %v23723_v22 = vld [vmem:[#allocation16 + $0x748] ss:$48 sps:$4 sm:$0xff]  }
 0xd50   : > { %13674 = vmatpush1.bf16.msra.mxu0 %v23660_v43  ;;  %v23728_v43 = vld [vmem:[#allocation16 + $0x7a4] ss:$48 sps:$4 sm:$0xff]  }
 0xd51   : > { %13797 = vmatpush1.bf16.msra.mxu1 %v23663_v35  ;;  %13675 = vmatprep.subr.bf16.mxu0 %v23668_v9  ;;  %v23731_v35 = vld [vmem:[#allocation16 + $0x7ac] ss:$48 sps:$4 sm:$0xff]   ;;  %v23729_v9 = vld [vmem:[#allocation16 + $0x7a8] ss:$48 sps:$4 sm:$0xff]  }
 0xd52   : > { %13798 = vmatprep.subr.bf16.mxu1 %v23671_v8  ;;  %v23734_v8 = vld [vmem:[#allocation16 + $0x804] ss:$48 sps:$4 sm:$0xff]  }
 0xd54   : > { %13676 = vmatpush1.bf16.msra.mxu0 %v23666_v17  ;;  %v23737_v17 = vld [vmem:[#allocation16 + $0x80c] ss:$48 sps:$4 sm:$0xff]  }
 0xd55   : > { %13799 = vmatpush1.bf16.msra.mxu1 %v23669_v49  ;;  %13677 = vmatprep.subr.bf16.mxu0 %v23674_v48  ;;  %v23732_v49 = vld [vmem:[#allocation16 + $0x800] ss:$48 sps:$4 sm:$0xff]   ;;  %v23735_v48 = vld [vmem:[#allocation16 + $0x808] ss:$48 sps:$4 sm:$0xff]  }
 0xd56   : > { %13800 = vmatprep.subr.bf16.mxu1 %v23677_v39  ;;  %v23740_v39 = vld [vmem:[#allocation16 + $0x864] ss:$48 sps:$4 sm:$0xff]  }
 0xd58   : > { %13678 = vmatpush1.bf16.msra.mxu0 %v23672_v40  ;;  %v23743_v40 = vld [vmem:[#allocation16 + $0x86c] ss:$48 sps:$4 sm:$0xff]  }
 0xd59   : > { %13801 = vmatpush1.bf16.msra.mxu1 %v23675_v10  ;;  %13679 = vmatprep.subr.bf16.mxu0 %v23680_v50  ;;  %v23738_v10 = vld [vmem:[#allocation16 + $0x860] ss:$48 sps:$4 sm:$0xff]   ;;  %v23741_v50 = vld [vmem:[#allocation16 + $0x868] ss:$48 sps:$4 sm:$0xff]  }
 0xd5a   : > { %13802 = vmatprep.subr.bf16.mxu1 %v23683_v55  ;;  %v23746_v55 = vld [vmem:[#allocation16 + $0x8c4] ss:$48 sps:$4 sm:$0xff]  }
 0xd5c   : > { %13680 = vmatpush1.bf16.msra.mxu0 %v23678_v41  ;;  %v23749_v41 = vld [vmem:[#allocation16 + $0x8cc] ss:$48 sps:$4 sm:$0xff]  }
 0xd5d   : > { %13803 = vmatpush1.bf16.msra.mxu1 %v23681_v42  ;;  %13681 = vmatprep.subr.bf16.mxu0 %v23686_v54  ;;  %v23744_v42 = vld [vmem:[#allocation16 + $0x8c0] ss:$48 sps:$4 sm:$0xff]   ;;  %v23747_v54 = vld [vmem:[#allocation16 + $0x8c8] ss:$48 sps:$4 sm:$0xff]  }
 0xd5e   : > { %13804 = vmatprep.subr.bf16.mxu1 %v23689_v38  ;;  %v23752_v38 = vld [vmem:[#allocation16 + $0x924] ss:$48 sps:$4 sm:$0xff]  }
 0xd60   : > { %13682 = vmatpush1.bf16.msra.mxu0 %v23684_v1  ;;  %v23755_v1 = vld [vmem:[#allocation16 + $0x92c] ss:$48 sps:$4 sm:$0xff]  }
 0xd61   : > { %13805 = vmatpush1.bf16.msra.mxu1 %v23687_v33  ;;  %13683 = vmatprep.subr.bf16.mxu0 %v23692_v57  ;;  %v23750_v33 = vld [vmem:[#allocation16 + $0x920] ss:$48 sps:$4 sm:$0xff]   ;;  %v23753_v57 = vld [vmem:[#allocation16 + $0x928] ss:$48 sps:$4 sm:$0xff]  }
 0xd62   : > { %13806 = vmatprep.subr.bf16.mxu1 %v23695_v5  ;;  %v23758_v5 = vld [vmem:[#allocation16 + $0x984] ss:$48 sps:$4 sm:$0xff]  }
 0xd64   : > { %13684 = vmatpush1.bf16.msra.mxu0 %v23690_v59  ;;  %v23761_v59 = vld [vmem:[#allocation16 + $0x98c] ss:$48 sps:$4 sm:$0xff]  }
 0xd65   : > { %13807 = vmatpush1.bf16.msra.mxu1 %v23693_v60  ;;  %13685 = vmatprep.subr.bf16.mxu0 %v23698_v61  ;;  %v23756_v60 = vld [vmem:[#allocation16 + $0x980] ss:$48 sps:$4 sm:$0xff]   ;;  %v23759_v61 = vld [vmem:[#allocation16 + $0x988] ss:$48 sps:$4 sm:$0xff]  }
 0xd66   : > { %13808 = vmatprep.subr.bf16.mxu1 %v23701_v62  ;;  %v23764_v62 = vld [vmem:[#allocation16 + $0x9e4] ss:$48 sps:$4 sm:$0xff]  }
 0xd68   : > { %13686 = vmatpush1.bf16.msra.mxu0 %v23696_v0  ;;  %v23767_v0 = vld [vmem:[#allocation16 + $0x9ec] ss:$48 sps:$4 sm:$0xff]  }
 0xd69   : > { %13809 = vmatpush1.bf16.msra.mxu1 %v23699_v47  ;;  %13696 = vmatprep.subr.bf16.mxu0 %v23704_v15  ;;  %v23762_v47 = vld [vmem:[#allocation16 + $0x9e0] ss:$48 sps:$4 sm:$0xff]   ;;  %v23765_v15 = vld [vmem:[#allocation16 + $0x9e8] ss:$48 sps:$4 sm:$0xff]  }
 0xd6a   : > { %13819 = vmatprep.subr.bf16.mxu1 %v23707_v12  ;;  %v23770_v12 = vld [vmem:[#allocation16 + $0xa44] ss:$48 sps:$4 sm:$0xff]  }
 0xd6b   : > { %13688 = vmatmul.mubr.bf16.vlgmr.msra.gmra.mrb[44].mxu0 %v26179_v32 }
 0xd6c   : > { %13811 = vmatmul.mubr.bf16.vlgmr.msra.gmra.mrb[60].mxu1 %v26179_v32  ;;  %13697 = vmatpush1.bf16.msra.mxu0 %v23702_v16  ;;  %v23725_v32 = vld [vmem:[#allocation16 + $0x74c] ss:$48 sps:$4 sm:$0xff]  }
 0xd6d   : > { %13728 = vmatprep.mubr.bf16.mxu0 %v26187_v31  ;;  %13820 = vmatpush1.bf16.msra.mxu1 %v23705_v18  ;;  %v23773_v16 = vld [vmem:[#allocation16 + $0xa4c] ss:$48 sps:$4 sm:$0xff]   ;;  %v23768_v18 = vld [vmem:[#allocation16 + $0xa40] ss:$48 sps:$4 sm:$0xff]  }
 0xd6e   : > { %13851 = vmatprep.mubr.bf16.mxu1 %v26187_v31  ;;  %13698 = vmatprep.subr.bf16.mxu0 %v23710_v58  ;;  %v23726_v31 = vld [vmem:[#allocation16 + $0x7a0] ss:$48 sps:$4 sm:$0xff]   ;;  %v23771_v58 = vld [vmem:[#allocation16 + $0xa48] ss:$48 sps:$4 sm:$0xff]  }
 0xd6f   : > { %13821 = vmatprep.subr.bf16.mxu1 %v23713_v21  ;;  %v23776_v21 = vld [vmem:[#allocation16 + $0xaa4] ss:$48 sps:$4 sm:$0xff]  }
 0xd70   : > { %13699 = vmatpush1.bf16.msra.mxu0 %v23708_v26  ;;  %v23779_v26 = vld [vmem:[#allocation16 + $0xaac] ss:$48 sps:$4 sm:$0xff]  }
 0xd71   : > { %13822 = vmatpush1.bf16.msra.mxu1 %v23711_v2  ;;  %13700 = vmatprep.subr.bf16.mxu0 %v23716_v29  ;;  %v23774_v2 = vld [vmem:[#allocation16 + $0xaa0] ss:$48 sps:$4 sm:$0xff]   ;;  %v23777_v29 = vld [vmem:[#allocation16 + $0xaa8] ss:$48 sps:$4 sm:$0xff]  }
 0xd72   : > { %13823 = vmatprep.subr.bf16.mxu1 %v23719_v4  ;;  %v23782_v4 = vld [vmem:[#allocation16 + $0xb04] ss:$48 sps:$4 sm:$0xff]  }
 0xd74   : > { %13701 = vmatpush1.bf16.msra.mxu0 %v23714_v30  ;;  %v23785_v30 = vld [vmem:[#allocation16 + $0xb0c] ss:$48 sps:$4 sm:$0xff]  }
 0xd75   : > { %13824 = vmatpush1.bf16.msra.mxu1 %v23717_v51  ;;  %13702 = vmatprep.subr.bf16.mxu0 %v23722_v56  ;;  %v23780_v51 = vld [vmem:[#allocation16 + $0xb00] ss:$48 sps:$4 sm:$0xff]   ;;  %v23783_v56 = vld [vmem:[#allocation16 + $0xb08] ss:$48 sps:$4 sm:$0xff]  }
 0xd76   : > { %13825 = vmatprep.subr.bf16.mxu1 %v23725_v32  ;;  %v23788_v32 = vld [vmem:[#allocation16 + $0xb64] ss:$48 sps:$4 sm:$0xff]  }
 0xd78   : > { %13703 = vmatpush1.bf16.msra.mxu0 %v23720_v27  ;;  %v23791_v27 = vld [vmem:[#allocation16 + $0xb6c] ss:$48 sps:$4 sm:$0xff]  }
 0xd79   : > { %13826 = vmatpush1.bf16.msra.mxu1 %v23723_v22  ;;  %13704 = vmatprep.subr.bf16.mxu0 %v23728_v43  ;;  %v23786_v22 = vld [vmem:[#allocation16 + $0xb60] ss:$48 sps:$4 sm:$0xff]   ;;  %v23789_v43 = vld [vmem:[#allocation16 + $0xb68] ss:$48 sps:$4 sm:$0xff]  }
 0xd7a   : > { %13827 = vmatprep.subr.bf16.mxu1 %v23731_v35  ;;  %v23794_v35 = vld [vmem:[#allocation16 + $0xbc4] ss:$48 sps:$4 sm:$0xff]  }
 0xd7c   : > { %13705 = vmatpush1.bf16.msra.mxu0 %v23726_v31  ;;  %v23797_v31 = vld [vmem:[#allocation16 + $0xbcc] ss:$48 sps:$4 sm:$0xff]  }
 0xd7d   : > { %13828 = vmatpush1.bf16.msra.mxu1 %v23729_v9  ;;  %13706 = vmatprep.subr.bf16.mxu0 %v23734_v8  ;;  %v23792_v9 = vld [vmem:[#allocation16 + $0xbc0] ss:$48 sps:$4 sm:$0xff]   ;;  %v23795_v8 = vld [vmem:[#allocation16 + $0xbc8] ss:$48 sps:$4 sm:$0xff]  }
 0xd7e   : > { %13829 = vmatprep.subr.bf16.mxu1 %v23737_v17  ;;  %v23800_v17 = vld [vmem:[#allocation16 + $0xc24] ss:$48 sps:$4 sm:$0xff]  }
 0xd80   : > { %13707 = vmatpush1.bf16.msra.mxu0 %v23732_v49  ;;  %v23803_v49 = vld [vmem:[#allocation16 + $0xc2c] ss:$48 sps:$4 sm:$0xff]  }
 0xd81   : > { %13830 = vmatpush1.bf16.msra.mxu1 %v23735_v48  ;;  %13708 = vmatprep.subr.bf16.mxu0 %v23740_v39  ;;  %v23798_v48 = vld [vmem:[#allocation16 + $0xc20] ss:$48 sps:$4 sm:$0xff]   ;;  %v23801_v39 = vld [vmem:[#allocation16 + $0xc28] ss:$48 sps:$4 sm:$0xff]  }
 0xd82   : > { %13831 = vmatprep.subr.bf16.mxu1 %v23743_v40  ;;  %v23806_v40 = vld [vmem:[#allocation16 + $0xc84] ss:$48 sps:$4 sm:$0xff]  }
 0xd84   : > { %13709 = vmatpush1.bf16.msra.mxu0 %v23738_v10  ;;  %v23809_v10 = vld [vmem:[#allocation16 + $0xc8c] ss:$48 sps:$4 sm:$0xff]  }
 0xd85   : > { %13832 = vmatpush1.bf16.msra.mxu1 %v23741_v50  ;;  %13710 = vmatprep.subr.bf16.mxu0 %v23746_v55  ;;  %v23804_v50 = vld [vmem:[#allocation16 + $0xc80] ss:$48 sps:$4 sm:$0xff]   ;;  %v23807_v55 = vld [vmem:[#allocation16 + $0xc88] ss:$48 sps:$4 sm:$0xff]  }
 0xd86   : > { %13833 = vmatprep.subr.bf16.mxu1 %v23749_v41  ;;  %v23812_v41 = vld [vmem:[#allocation16 + $0xce4] ss:$48 sps:$4 sm:$0xff]  }
 0xd88   : > { %13711 = vmatpush1.bf16.msra.mxu0 %v23744_v42  ;;  %v23815_v42 = vld [vmem:[#allocation16 + $0xcec] ss:$48 sps:$4 sm:$0xff]  }
 0xd89   : > { %13834 = vmatpush1.bf16.msra.mxu1 %v23747_v54  ;;  %13712 = vmatprep.subr.bf16.mxu0 %v23752_v38  ;;  %v23810_v54 = vld [vmem:[#allocation16 + $0xce0] ss:$48 sps:$4 sm:$0xff]   ;;  %v23813_v38 = vld [vmem:[#allocation16 + $0xce8] ss:$48 sps:$4 sm:$0xff]  }
 0xd8a   : > { %13835 = vmatprep.subr.bf16.mxu1 %v23755_v1  ;;  %v23818_v1 = vld [vmem:[#allocation16 + $0xd44] ss:$48 sps:$4 sm:$0xff]  }
 0xd8c   : > { %13713 = vmatpush1.bf16.msra.mxu0 %v23750_v33  ;;  %v26239_v33 = vld [vmem:[#allocation17] sm:$0xff] }
 0xd8d   : > { %13836 = vmatpush1.bf16.msra.mxu1 %v23753_v57  ;;  %13714 = vmatprep.subr.bf16.mxu0 %v23758_v5  ;;  %v23816_v57 = vld [vmem:[#allocation16 + $0xd40] ss:$48 sps:$4 sm:$0xff]   ;;  %v23819_v5 = vld [vmem:[#allocation16 + $0xd48] ss:$48 sps:$4 sm:$0xff]  }
 0xd8e   : > { %13837 = vmatprep.subr.bf16.mxu1 %v23761_v59  ;;  %v23824_v59 = vld [vmem:[#allocation16 + $0xda4] ss:$48 sps:$4 sm:$0xff]  }
 0xd90   : > { %13715 = vmatpush1.bf16.msra.mxu0 %v23756_v60  ;;  %v23827_v60 = vld [vmem:[#allocation16 + $0xdac] ss:$48 sps:$4 sm:$0xff]  }
 0xd91   : > { %13838 = vmatpush1.bf16.msra.mxu1 %v23759_v61  ;;  %13716 = vmatprep.subr.bf16.mxu0 %v23764_v62  ;;  %v10238_v61 = vrot.slane %v26239_v33, %v25944_v36  ;;  %v23822_v62 = vld [vmem:[#allocation16 + $0xda0] ss:$48 sps:$4 sm:$0xff]  }
 0xd92   : > { %13839 = vmatprep.subr.bf16.mxu1 %v23767_v0  ;;  %v23825_v0 = vld [vmem:[#allocation16 + $0xda8] ss:$48 sps:$4 sm:$0xff]  }
 0xd94   : > { %13717 = vmatpush1.bf16.msra.mxu0 %v23762_v47  ;;  %v23830_v47 = vld [vmem:[#allocation16 + $0xe04] ss:$48 sps:$4 sm:$0xff]  }
 0xd95   : > { %13840 = vmatpush1.bf16.msra.mxu1 %v23765_v15  ;;  %13718 = vmatprep.subr.bf16.mxu0 %v23770_v12  ;;  %v23833_v12 = vld [vmem:[#allocation16 + $0xe0c] ss:$48 sps:$4 sm:$0xff]  }
 0xd96   : > { %13841 = vmatprep.subr.bf16.mxu1 %v23773_v16  ;;  %v26249_v16 = vadd.f32 %v26229_v45, %v10238_v61  ;;  %v23837_v45 = vld [vmem:[#allocation16 + $0xe68] ss:$48 sps:$4 sm:$0xff]  }
 0xd97   : > { %v23873_v61 = vld [vmem:[#allocation16 + $0x10a8] ss:$48 sps:$4 sm:$0xff]  }
 0xd98   : > { %13719 = vmatpush1.bf16.msra.mxu0 %v23768_v18  ;;  %v23828_v18 = vld [vmem:[#allocation16 + $0xe00] ss:$48 sps:$4 sm:$0xff]  }
 0xd99   : > { %13842 = vmatpush1.bf16.msra.mxu1 %v23771_v58  ;;  %13720 = vmatprep.subr.bf16.mxu0 %v23776_v21  ;;  %v23831_v58 = vld [vmem:[#allocation16 + $0xe08] ss:$48 sps:$4 sm:$0xff]   ;;  %v23836_v21 = vld [vmem:[#allocation16 + $0xe64] ss:$48 sps:$4 sm:$0xff]  }
 0xd9a   : > { %13843 = vmatprep.subr.bf16.mxu1 %v23779_v26 }
 0xd9c   : > { %13721 = vmatpush1.bf16.msra.mxu0 %v23774_v2  ;;  %v23839_v2 = vld [vmem:[#allocation16 + $0xe6c] ss:$48 sps:$4 sm:$0xff]  }
 0xd9d   : > { %13844 = vmatpush1.bf16.msra.mxu1 %v23777_v29  ;;  %13722 = vmatprep.subr.bf16.mxu0 %v23782_v4  ;;  %v23834_v29 = vld [vmem:[#allocation16 + $0xe60] ss:$48 sps:$4 sm:$0xff]   ;;  %v23842_v4 = vld [vmem:[#allocation16 + $0xec4] ss:$48 sps:$4 sm:$0xff]  }
 0xd9e   : > { %13845 = vmatprep.subr.bf16.mxu1 %v23785_v30 }
 0xda0   : > { %13723 = vmatpush1.bf16.msra.mxu0 %v23780_v51  ;;  %v23845_v51 = vld [vmem:[#allocation16 + $0xecc] ss:$48 sps:$4 sm:$0xff]  }
 0xda1   : > { %13846 = vmatpush1.bf16.msra.mxu1 %v23783_v56  ;;  %13724 = vmatprep.subr.bf16.mxu0 %v23788_v32  ;;  %v23840_v32 = vld [vmem:[#allocation16 + $0xec0] ss:$48 sps:$4 sm:$0xff]  }
 0xda2   : > { %13847 = vmatprep.subr.bf16.mxu1 %v23791_v27  ;;  %v23843_v27 = vld [vmem:[#allocation16 + $0xec8] ss:$48 sps:$4 sm:$0xff]  }
 0xda4   : > { %13725 = vmatpush1.bf16.msra.mxu0 %v23786_v22  ;;  %v23848_v22 = vld [vmem:[#allocation16 + $0xf24] ss:$48 sps:$4 sm:$0xff]  }
 0xda5   : > { %13848 = vmatpush1.bf16.msra.mxu1 %v23789_v43  ;;  %13726 = vmatprep.subr.bf16.mxu0 %v23794_v35  ;;  %v23851_v35 = vld [vmem:[#allocation16 + $0xf2c] ss:$48 sps:$4 sm:$0xff]  }
 0xda6   : > { %13849 = vmatprep.subr.bf16.mxu1 %v23797_v31 }
 0xda8   : > { %13727 = vmatpush1.bf16.msra.mxu0 %v23792_v9  ;;  %v23846_v9 = vld [vmem:[#allocation16 + $0xf20] ss:$48 sps:$4 sm:$0xff]  }
 0xda9   : > { %13850 = vmatpush1.bf16.msra.mxu1 %v23795_v8  ;;  %13737 = vmatprep.subr.bf16.mxu0 %v23800_v17  ;;  %v23849_v8 = vld [vmem:[#allocation16 + $0xf28] ss:$48 sps:$4 sm:$0xff]   ;;  %v23854_v17 = vld [vmem:[#allocation16 + $0xf84] ss:$48 sps:$4 sm:$0xff]  }
 0xdaa   : > { %13860 = vmatprep.subr.bf16.mxu1 %v23803_v49 }
 0xdab   : > { %13729 = vmatmul.mubr.bf16.vlgmr.msra.gmra.mrb[44].mxu0 %v26193_v52 }
 0xdac   : > { %13852 = vmatmul.mubr.bf16.vlgmr.msra.gmra.mrb[60].mxu1 %v26193_v52  ;;  %13738 = vmatpush1.bf16.msra.mxu0 %v23798_v48  ;;  %v23821_v52 = vld [vmem:[#allocation16 + $0xd4c] ss:$48 sps:$4 sm:$0xff]  }
 0xdad   : > { %13769 = vmatprep.mubr.bf16.mxu0 %v26197_v24  ;;  %13861 = vmatpush1.bf16.msra.mxu1 %v23801_v39  ;;  %v23857_v48 = vld [vmem:[#allocation16 + $0xf8c] ss:$48 sps:$4 sm:$0xff]  }
 0xdae   : > { %13892 = vmatprep.mubr.bf16.mxu1 %v26197_v24  ;;  %13739 = vmatprep.subr.bf16.mxu0 %v23806_v40  ;;  %v10230_v24 = vrot.slane %v26239_v33, %v25926_v14  ;;  %v23852_v40 = vld [vmem:[#allocation16 + $0xf80] ss:$48 sps:$4 sm:$0xff]  }
 0xdaf   : > { %13862 = vmatprep.subr.bf16.mxu1 %v23809_v10  ;;  %v23855_v10 = vld [vmem:[#allocation16 + $0xf88] ss:$48 sps:$4 sm:$0xff]  }
 0xdb0   : > { %13740 = vmatpush1.bf16.msra.mxu0 %v23804_v50  ;;  %v26246_v15 = vadd.f32 %v26227_v37, %v10230_v24  ;;  %v13904_v37 = vmul.f32 %v26249_v16, %v26249_v16  ;;  %v23860_v50 = vld [vmem:[#allocation16 + $0xfe4] ss:$48 sps:$4 sm:$0xff]   ;;  %v23875_v24 = vld [vmem:[#allocation16 + $0x10ac] ss:$48 sps:$4 sm:$0xff]  }
 0xdb1   : > { %13863 = vmatpush1.bf16.msra.mxu1 %v23807_v55  ;;  %13741 = vmatprep.subr.bf16.mxu0 %v23812_v41  ;;  %v23863_v41 = vld [vmem:[#allocation16 + $0xfec] ss:$48 sps:$4 sm:$0xff]  }
 0xdb2   : > { %13864 = vmatprep.subr.bf16.mxu1 %v23815_v42  ;;  %v13902_v26 = vmul.f32 %v26246_v15, %v26246_v15  ;;  %v13916_v56 = vmul.f32 %v26249_v16, %v13904_v37  ;;  %v23882_v37 = vld [vmem:[#allocation16 + $0x1160] ss:$48 sps:$4 sm:$0xff]  }
 0xdb4   : > { %13742 = vmatpush1.bf16.msra.mxu0 %v23810_v54  ;;  %v13914_v30 = vmul.f32 %v26246_v15, %v13902_v26  ;;  %v13928_v31 = vmul.f32 0.044715, %v13916_v56  ;;  %v23858_v54 = vld [vmem:[#allocation16 + $0xfe0] ss:$48 sps:$4 sm:$0xff]   ;;  %v23887_v26 = vld [vmem:[#allocation16 + $0x116c] ss:$48 sps:$4 sm:$0xff]  }
 0xdb5   : > { %13865 = vmatpush1.bf16.msra.mxu1 %v23813_v38  ;;  %13743 = vmatprep.subr.bf16.mxu0 %v23818_v1  ;;  %v23861_v38 = vld [vmem:[#allocation16 + $0xfe8] ss:$48 sps:$4 sm:$0xff]   ;;  %v23866_v1 = vld [vmem:[#allocation16 + $0x1044] ss:$48 sps:$4 sm:$0xff]   ;;  %v23888_v56 = vld [vmem:[#allocation16 + $0x11c0] ss:$48 sps:$4 sm:$0xff]  }
 0xdb6   : > { %13866 = vmatprep.subr.bf16.mxu1 %v23821_v52  ;;  %v13926_v43 = vmul.f32 0.044715, %v13914_v30  ;;  %v13940_v39 = vadd.f32 %v26249_v16, %v13928_v31  ;;  %v23869_v52 = vld [vmem:[#allocation16 + $0x104c] ss:$48 sps:$4 sm:$0xff]  }
 0xdb7   : > { %v23893_v30 = vld [vmem:[#allocation16 + $0x11cc] ss:$48 sps:$4 sm:$0xff]  }
 0xdb8   : > { %13744 = vmatpush1.bf16.msra.mxu0 %v23816_v57  ;;  %v13938_v49 = vadd.f32 %v26246_v15, %v13926_v43  ;;  %v13952_v42 = vmul.f32 0.7978846, %v13940_v39  ;;  %v23864_v57 = vld [vmem:[#allocation16 + $0x1040] ss:$48 sps:$4 sm:$0xff]   ;;  %v23894_v31 = vld [vmem:[#allocation19] ss:$24 sps:$4 sm:$0xff]  }
 0xdb9   : > { %13867 = vmatpush1.bf16.msra.mxu1 %v23819_v5  ;;  %13745 = vmatprep.subr.bf16.mxu0 %v23824_v59  ;;  %v23867_v5 = vld [vmem:[#allocation16 + $0x1048] ss:$48 sps:$4 sm:$0xff]   ;;  %v23872_v59 = vld [vmem:[#allocation16 + $0x10a4] ss:$48 sps:$4 sm:$0xff]  }
 0xdba   : > { %13868 = vmatprep.subr.bf16.mxu1 %v23827_v60  ;;  %v13950_v55 = vmul.f32 0.7978846, %v13938_v49  ;;  %v23870_v60 = vld [vmem:[#allocation16 + $0x10a0] ss:$48 sps:$4 sm:$0xff]  }
 0xdbb   : > { %v23899_v43 = vld [vmem:[#allocation19 + $0x304] ss:$24 sps:$4 sm:$0xff]  }
 0xdbc   : > { %13746 = vmatpush1.bf16.msra.mxu0 %v23822_v62  ;;  %24764 = vtanh.f32 %v13950_v55  ;;  %v23878_v62 = vld [vmem:[#allocation16 + $0x1104] ss:$48 sps:$4 sm:$0xff]  }
 0xdbd   : > { %13869 = vmatpush1.bf16.msra.mxu1 %v23825_v0  ;;  %13747 = vmatprep.subr.bf16.mxu0 %v23830_v47  ;;  %24766 = vtanh.f32 %v13952_v42  ;;  %v23881_v0 = vld [vmem:[#allocation16 + $0x110c] ss:$48 sps:$4 sm:$0xff]   ;;  %v10226_v42 = vrot.slane %v26239_v33, %v25942_v34 }
 0xdbe   : > { %13870 = vmatprep.subr.bf16.mxu1 %v23833_v12  ;;  %v23876_v12 = vld [vmem:[#allocation16 + $0x1100] ss:$48 sps:$4 sm:$0xff]   ;;  %v23909_v55 = vld [vmem:[#allocation19 + $0x360] ss:$24 sps:$4 sm:$0xff]  }
 0xdc0   : > { %13748 = vmatpush1.bf16.msra.mxu0 %v23828_v18 }
 0xdc1   : > { %13871 = vmatpush1.bf16.msra.mxu1 %v23831_v58  ;;  %13749 = vmatprep.subr.bf16.mxu0 %v23836_v21  ;;  %v23879_v58 = vld [vmem:[#allocation16 + $0x1108] ss:$48 sps:$4 sm:$0xff]   ;;  %v23884_v21 = vld [vmem:[#allocation16 + $0x1164] ss:$48 sps:$4 sm:$0xff]  }
 0xdc2   : > { %13872 = vmatprep.subr.bf16.mxu1 %v23839_v2 }
 0xdc4   : > { %13750 = vmatpush1.bf16.msra.mxu0 %v23834_v29 }
 0xdc5   : > { %13873 = vmatpush1.bf16.msra.mxu1 %v23837_v45  ;;  %13751 = vmatprep.subr.bf16.mxu0 %v23842_v4  ;;  %v23885_v45 = vld [vmem:[#allocation16 + $0x1168] ss:$48 sps:$4 sm:$0xff]   ;;  %v23890_v4 = vld [vmem:[#allocation16 + $0x11c4] ss:$48 sps:$4 sm:$0xff]  }
 0xdc6   : > { %13874 = vmatprep.subr.bf16.mxu1 %v23845_v51  ;;  %v24765_v47 = vpop.eup %24764 }
 0xdc7   : > { %v24767_v18 = vpop.eup %24766  ;;  %v13974_v2 = vadd.f32 1.0, %v24765_v47  ;;  %v10246_v47 = vrot.slane %v26239_v33, %v25963_v46 }
 0xdc8   : > { %13752 = vmatpush1.bf16.msra.mxu0 %v23840_v32  ;;  %v13976_v29 = vadd.f32 1.0, %v24767_v18  ;;  %v23927_v18 = vld [vmem:[#allocation19 + $0x3f0] ss:$24 sps:$4 sm:$0xff]  }
 0xdc9   : > { %13875 = vmatpush1.bf16.msra.mxu1 %v23843_v27  ;;  %13753 = vmatprep.subr.bf16.mxu0 %v23848_v22  ;;  %v13986_v51 = vmul.f32 0.5, %v13974_v2  ;;  %v23891_v27 = vld [vmem:[#allocation16 + $0x11c8] ss:$48 sps:$4 sm:$0xff]  }
 0xdca   : > { %13876 = vmatprep.subr.bf16.mxu1 %v23851_v35  ;;  %v13988_v32 = vmul.f32 0.5, %v13976_v29  ;;  %v23896_v22 = vld [vmem:[#allocation19 + $0x4] ss:$24 sps:$4 sm:$0xff]  }
 0xdcb   : > { %v13998_v35 = vmul.f32 %v26246_v15, %v13986_v51  ;;  %v23900_v15 = vld [vmem:[#allocation19 + $0x30] ss:$24 sps:$4 sm:$0xff]   ;;  %v23930_v51 = vld [vmem:[#allocation19 + $0x120] ss:$24 sps:$4 sm:$0xff]  }
 0xdcc   : > { %13754 = vmatpush1.bf16.msra.mxu0 %v23846_v9  ;;  %v14000_v9 = vmul.f32 %v26249_v16, %v13988_v32  ;;  %v23903_v16 = vld [vmem:[#allocation19 + $0x330] ss:$24 sps:$4 sm:$0xff]  }
 0xdcd   : > { %13877 = vmatpush1.bf16.msra.mxu1 %v23849_v8  ;;  %13755 = vmatprep.subr.bf16.mxu0 %v23854_v17  ;;  %v23897_v8 = vld [vmem:[#allocation19 + $0x300] ss:$24 sps:$4 sm:$0xff]   ;;  %v23902_v17 = vld [vmem:[#allocation19 + $0x34] ss:$24 sps:$4 sm:$0xff]   ;;  %v26262_v49 = vpack.c.bf16 %v13998_v35, %v13998_v35 }
 0xdce   : > { %13878 = vmatprep.subr.bf16.mxu1 %v23857_v48  ;;  %v23905_v48 = vld [vmem:[#allocation19 + $0x334] ss:$24 sps:$4 sm:$0xff]   ;;  %v26265_v39 = vpack.c.bf16 %v14000_v9, %v14000_v9 }
 0xdcf   : > { %v23941_v9 = vld [vmem:[#allocation19 + $0x454] ss:$24 sps:$4 sm:$0xff]  }
 0xdd0   : > { %13756 = vmatpush1.bf16.msra.mxu0 %v23852_v40  ;;  %v23908_v40 = vld [vmem:[#allocation19 + $0x64] ss:$24 sps:$4 sm:$0xff]  }
 0xdd1   : > { %13879 = vmatpush1.bf16.msra.mxu1 %v23855_v10  ;;  %13757 = vmatprep.subr.bf16.mxu0 %v23860_v50  ;;  %v23911_v10 = vld [vmem:[#allocation19 + $0x364] ss:$24 sps:$4 sm:$0xff]   ;;  %v23906_v50 = vld [vmem:[#allocation19 + $0x60] ss:$24 sps:$4 sm:$0xff]  }
 0xdd2   : > { %13880 = vmatprep.subr.bf16.mxu1 %v23863_v41  ;;  %v23917_v41 = vld [vmem:[#allocation19 + $0x394] ss:$24 sps:$4 sm:$0xff]  }
 0xdd4   : > { %13758 = vmatpush1.bf16.msra.mxu0 %v23858_v54  ;;  %v23912_v54 = vld [vmem:[#allocation19 + $0x90] ss:$24 sps:$4 sm:$0xff]  }
 0xdd5   : > { %13881 = vmatpush1.bf16.msra.mxu1 %v23861_v38  ;;  %13759 = vmatprep.subr.bf16.mxu0 %v23866_v1  ;;  %v10234_v38 = vrot.slane %v26239_v33, %v25961_v44  ;;  %v23915_v1 = vld [vmem:[#allocation19 + $0x390] ss:$24 sps:$4 sm:$0xff]  }
 0xdd6   : > { %13882 = vmatprep.subr.bf16.mxu1 %v23869_v52  ;;  %v23920_v52 = vld [vmem:[#allocation19 + $0xc4] ss:$24 sps:$4 sm:$0xff]  }
 0xdd8   : > { %13760 = vmatpush1.bf16.msra.mxu0 %v23864_v57  ;;  %v23923_v57 = vld [vmem:[#allocation19 + $0x3c4] ss:$24 sps:$4 sm:$0xff]  }
 0xdd9   : > { %13883 = vmatpush1.bf16.msra.mxu1 %v23867_v5  ;;  %13761 = vmatprep.subr.bf16.mxu0 %v23872_v59  ;;  %v26274_v5 = vadd.f32 %v26223_v63, %v10226_v42  ;;  %v23918_v59 = vld [vmem:[#allocation19 + $0xc0] ss:$24 sps:$4 sm:$0xff]   ;;  %v23924_v63 = vld [vmem:[#allocation19 + $0xf0] ss:$24 sps:$4 sm:$0xff]  }
 0xdda   : > { %13884 = vmatprep.subr.bf16.mxu1 %v23875_v24  ;;  %v26277_v24 = vadd.f32 %v26225_v23, %v10234_v38  ;;  %v10254_v23 = vrot.slane %v26239_v33, %v25922_v11 }
 0xddc   : > { %13762 = vmatpush1.bf16.msra.mxu0 %v23870_v60  ;;  %v23921_v60 = vld [vmem:[#allocation19 + $0x3c0] ss:$24 sps:$4 sm:$0xff]  }
 0xddd   : > { %13885 = vmatpush1.bf16.msra.mxu1 %v23873_v61  ;;  %13763 = vmatprep.subr.bf16.mxu0 %v23878_v62  ;;  %v23926_v61 = vld [vmem:[#allocation19 + $0xf4] ss:$24 sps:$4 sm:$0xff]  }
 0xdde   : > { %13886 = vmatprep.subr.bf16.mxu1 %v23881_v0  ;;  %v23929_v62 = vld [vmem:[#allocation19 + $0x3f4] ss:$24 sps:$4 sm:$0xff]   ;;  %v13901_v0 = vmul.f32 %v26274_v5, %v26274_v5 }
 0xde0   : > { %13764 = vmatpush1.bf16.msra.mxu0 %v23876_v12  ;;  %v13903_v12 = vmul.f32 %v26277_v24, %v26277_v24  ;;  %v13913_v29 = vmul.f32 %v26274_v5, %v13901_v0 }
 0xde1   : > { %13887 = vmatpush1.bf16.msra.mxu1 %v23879_v58  ;;  %13765 = vmatprep.subr.bf16.mxu0 %v23884_v21  ;;  %v23932_v58 = vld [vmem:[#allocation19 + $0x124] ss:$24 sps:$4 sm:$0xff]  }
 0xde2   : > { %13888 = vmatprep.subr.bf16.mxu1 %v23887_v26  ;;  %v23935_v26 = vld [vmem:[#allocation19 + $0x424] ss:$24 sps:$4 sm:$0xff]   ;;  %v13915_v11 = vmul.f32 %v26277_v24, %v13903_v12 }
 0xde4   : > { %13766 = vmatpush1.bf16.msra.mxu0 %v23882_v37 }
 0xde5   : > { %13889 = vmatpush1.bf16.msra.mxu1 %v23885_v45  ;;  %13767 = vmatprep.subr.bf16.mxu0 %v23890_v4 }
 0xde6   : > { %13890 = vmatprep.subr.bf16.mxu1 %v23893_v30 }
 0xde8   : > { %13768 = vmatpush1.bf16.msra.mxu0 %v23888_v56 }
 0xde9   : > { %13891 = vmatpush1.bf16.msra.mxu1 %v23891_v27  ;;  %17509 = vmatprep.subr.bf16.mxu0 %v23896_v22  ;;  %v23933_v22 = vld [vmem:[#allocation19 + $0x420] ss:$24 sps:$4 sm:$0xff]  }
 0xdea   : > { %17550 = vmatprep.subr.bf16.mxu1 %v23899_v43  ;;  %v23938_v43 = vld [vmem:[#allocation19 + $0x154] ss:$24 sps:$4 sm:$0xff]  }
 0xdeb   : > { %13770 = vmatmul.mubr.bf16.vlgmr.msra.gmra.mrb[44].mxu0 %v26205_v20 }
 0xdec   : > { %13893 = vmatmul.mubr.bf16.vlgmr.msra.gmra.mrb[60].mxu1 %v26205_v20  ;;  %17510 = vmatpush1.bf16.msra.mxu0 %v23894_v31  ;;  %v23914_v20 = vld [vmem:[#allocation19 + $0x94] ss:$24 sps:$4 sm:$0xff]  }
 0xded   : > { %17541 = vmatprep.mubr.bf16.mxu0 %v26262_v49  ;;  %17551 = vmatpush1.bf16.msra.mxu1 %v23897_v8 }
 0xdee   : > { %17582 = vmatprep.mubr.bf16.mxu1 %v26265_v39  ;;  %17511 = vmatprep.subr.bf16.mxu0 %v23902_v17  ;;  %v13925_v17 = vmul.f32 0.044715, %v13913_v29  ;;  %v23965_v29 = vld [vmem:[#allocation19 + $0x514] ss:$24 sps:$4 sm:$0xff]  }
 0xdef   : > { %17552 = vmatprep.subr.bf16.mxu1 %v23905_v48 }
 0xdf0   : > { %17512 = vmatpush1.bf16.msra.mxu0 %v23900_v15  ;;  %v23936_v15 = vld [vmem:[#allocation19 + $0x150] ss:$24 sps:$4 sm:$0xff]   ;;  %v13937_v42 = vadd.f32 %v26274_v5, %v13925_v17 }
 0xdf1   : > { %17553 = vmatpush1.bf16.msra.mxu1 %v23903_v16  ;;  %17513 = vmatprep.subr.bf16.mxu0 %v23908_v40  ;;  %v13927_v16 = vmul.f32 0.044715, %v13915_v11  ;;  %v23971_v11 = vld [vmem:[#allocation19 + $0x544] ss:$24 sps:$4 sm:$0xff]  }
 0xdf2   : > { %17554 = vmatprep.subr.bf16.mxu1 %v23911_v10  ;;  %v23939_v10 = vld [vmem:[#allocation19 + $0x450] ss:$24 sps:$4 sm:$0xff]  }
 0xdf3   : > { %v13939_v38 = vadd.f32 %v26277_v24, %v13927_v16 }
 0xdf4   : > { %17514 = vmatpush1.bf16.msra.mxu0 %v23906_v50  ;;  %v23944_v50 = vld [vmem:[#allocation19 + $0x184] ss:$24 sps:$4 sm:$0xff]  }
 0xdf5   : > { %17555 = vmatpush1.bf16.msra.mxu1 %v23909_v55  ;;  %17515 = vmatprep.subr.bf16.mxu0 %v23914_v20  ;;  %v23947_v20 = vld [vmem:[#allocation19 + $0x484] ss:$24 sps:$4 sm:$0xff]   ;;  %v13951_v0 = vmul.f32 0.7978846, %v13939_v38  ;;  %v23989_v38 = vld [vmem:[#allocation19 + $0x5d4] ss:$24 sps:$4 sm:$0xff]  }
 0xdf6   : > { %17556 = vmatprep.subr.bf16.mxu1 %v23917_v41 }
 0xdf8   : > { %17516 = vmatpush1.bf16.msra.mxu0 %v23912_v54  ;;  %v23942_v54 = vld [vmem:[#allocation19 + $0x180] ss:$24 sps:$4 sm:$0xff]  }
 0xdf9   : > { %17557 = vmatpush1.bf16.msra.mxu1 %v23915_v1  ;;  %17517 = vmatprep.subr.bf16.mxu0 %v23920_v52  ;;  %v23945_v1 = vld [vmem:[#allocation19 + $0x480] ss:$24 sps:$4 sm:$0xff]   ;;  %v23950_v52 = vld [vmem:[#allocation19 + $0x1b4] ss:$24 sps:$4 sm:$0xff]  }
 0xdfa   : > { %17558 = vmatprep.subr.bf16.mxu1 %v23923_v57 }
 0xdfc   : > { %17518 = vmatpush1.bf16.msra.mxu0 %v23918_v59  ;;  %v23953_v59 = vld [vmem:[#allocation19 + $0x4b4] ss:$24 sps:$4 sm:$0xff]  }
 0xdfd   : > { %17559 = vmatpush1.bf16.msra.mxu1 %v23921_v60  ;;  %17519 = vmatprep.subr.bf16.mxu0 %v23926_v61  ;;  %v13949_v61 = vmul.f32 0.7978846, %v13937_v42  ;;  %v23986_v42 = vld [vmem:[#allocation19 + $0x2d4] ss:$24 sps:$4 sm:$0xff]  }
 0xdfe   : > { %v26287_v21 = vpop.f32.mrb[40].mxu0  ;;  %17560 = vmatprep.subr.bf16.mxu1 %v23929_v62  ;;  %v23948_v62 = vld [vmem:[#allocation19 + $0x1b0] ss:$24 sps:$4 sm:$0xff]  }
 0xdff   : > { %v26289_v2 = vpop.f32.mrb[56].mxu1  ;;  %v13527_v37 = vpop.f32.mrb[41].mxu0  ;;  %24768 = vtanh.f32 %v13949_v61 }
 0xe00   : > { %v26292_v45 = vadd.f32 %v13527_v37, %v10246_v47  ;;  %v13650_v4 = vpop.f32.mrb[57].mxu1  ;;  %v13529_v30 = vpop.f32.mrb[42].mxu0  ;;  %17520 = vmatpush1.bf16.msra.mxu0 %v23924_v63  ;;  %v23951_v47 = vld [vmem:[#allocation19 + $0x4b0] ss:$24 sps:$4 sm:$0xff]   ;;  %v23956_v63 = vld [vmem:[#allocation19 + $0x1e4] ss:$24 sps:$4 sm:$0xff]   ;;  %24770 = vtanh.f32 %v13951_v0 }
 0xe01   : > { %v26295_v56 = vadd.f32 %v13650_v4, %v10254_v23  ;;  %v13652_v32 = vpop.f32.mrb[58].mxu1  ;;  %17561 = vmatpush1.bf16.msra.mxu1 %v23927_v18  ;;  %v13530_v27 = vpop.f32.mrb[43].mxu0  ;;  %17521 = vmatprep.subr.bf16.mxu0 %v23932_v58  ;;  %v23959_v23 = vld [vmem:[#allocation19 + $0x4e4] ss:$24 sps:$4 sm:$0xff]   ;;  %v23954_v58 = vld [vmem:[#allocation19 + $0x1e0] ss:$24 sps:$4 sm:$0xff]  }
 0xe02   : > { %v13906_v35 = vmul.f32 %v26292_v45, %v26292_v45  ;;  %v13653_v31 = vpop.f32.mrb[59].mxu1  ;;  %17562 = vmatprep.subr.bf16.mxu1 %v23935_v26  ;;  %v23957_v26 = vld [vmem:[#allocation19 + $0x4e0] ss:$24 sps:$4 sm:$0xff]   ;;  %v23962_v37 = vld [vmem:[#allocation19 + $0x214] ss:$24 sps:$4 sm:$0xff]  }
 0xe03   : > { %v13908_v8 = vmul.f32 %v26295_v56, %v26295_v56  ;;  %v23960_v4 = vld [vmem:[#allocation19 + $0x210] ss:$24 sps:$4 sm:$0xff]   ;;  %v23966_v32 = vld [vmem:[#allocation19 + $0x240] ss:$24 sps:$4 sm:$0xff]  }
 0xe04   : > { %v13918_v48 = vmul.f32 %v26292_v45, %v13906_v35  ;;  %17522 = vmatpush1.bf16.msra.mxu0 %v23930_v51  ;;  %v23963_v30 = vld [vmem:[#allocation19 + $0x510] ss:$24 sps:$4 sm:$0xff]   ;;  %v23968_v51 = vld [vmem:[#allocation19 + $0x244] ss:$24 sps:$4 sm:$0xff]   ;;  %v23969_v27 = vld [vmem:[#allocation19 + $0x540] ss:$24 sps:$4 sm:$0xff]  }
 0xe05   : > { %v13920_v40 = vmul.f32 %v26295_v56, %v13908_v8  ;;  %17563 = vmatpush1.bf16.msra.mxu1 %v23933_v22  ;;  %17523 = vmatprep.subr.bf16.mxu0 %v23938_v43  ;;  %v23974_v22 = vld [vmem:[#allocation19 + $0x274] ss:$24 sps:$4 sm:$0xff]   ;;  %v23972_v8 = vld [vmem:[#allocation19 + $0x270] ss:$24 sps:$4 sm:$0xff]  }
 0xe06   : > { %v13930_v55 = vmul.f32 0.044715, %v13918_v48  ;;  %17564 = vmatprep.subr.bf16.mxu1 %v23941_v9  ;;  %v23977_v35 = vld [vmem:[#allocation19 + $0x574] ss:$24 sps:$4 sm:$0xff]   ;;  %v23975_v48 = vld [vmem:[#allocation19 + $0x570] ss:$24 sps:$4 sm:$0xff]  }
 0xe07   : > { %v13932_v41 = vmul.f32 0.044715, %v13920_v40  ;;  %v23983_v40 = vld [vmem:[#allocation19 + $0x5a4] ss:$24 sps:$4 sm:$0xff]  }
 0xe08   : > { %17524 = vmatpush1.bf16.msra.mxu0 %v23936_v15  ;;  %v13942_v57 = vadd.f32 %v26292_v45, %v13930_v55  ;;  %v23980_v15 = vld [vmem:[#allocation19 + $0x2a4] ss:$24 sps:$4 sm:$0xff]   ;;  %v23978_v55 = vld [vmem:[#allocation19 + $0x2a0] ss:$24 sps:$4 sm:$0xff]  }
 0xe09   : > { %17565 = vmatpush1.bf16.msra.mxu1 %v23939_v10  ;;  %17525 = vmatprep.subr.bf16.mxu0 %v23944_v50  ;;  %v13944_v60 = vadd.f32 %v26295_v56, %v13932_v41  ;;  %v24769_v43 = vpop.eup %24768  ;;  %v23981_v41 = vld [vmem:[#allocation19 + $0x5a0] ss:$24 sps:$4 sm:$0xff]  }
 0xe0a   : > { %17566 = vmatprep.subr.bf16.mxu1 %v23947_v20  ;;  %v13954_v12 = vmul.f32 0.7978846, %v13942_v57  ;;  %v24771_v31 = vpop.eup %24770  ;;  %v13973_v16 = vadd.f32 1.0, %v24769_v43  ;;  %v23984_v57 = vld [vmem:[#allocation19 + $0x2d0] ss:$24 sps:$4 sm:$0xff]  }
 0xe0b   : > { %v13956_v18 = vmul.f32 0.7978846, %v13944_v60  ;;  %v13975_v10 = vadd.f32 1.0, %v24771_v31  ;;  %v23987_v60 = vld [vmem:[#allocation19 + $0x5d0] ss:$24 sps:$4 sm:$0xff]  }
 0xe0c   : > { %17526 = vmatpush1.bf16.msra.mxu0 %v23942_v54  ;;  %24772 = vtanh.f32 %v13954_v12  ;;  %v13985_v54 = vmul.f32 0.5, %v13973_v16  ;;  %v23990_v12 = vld [vmem:[#allocation19 + $0x600] ss:$24 sps:$4 sm:$0xff]   ;;  %v24008_v43 = vld [vmem:[#allocation19 + $0x690] ss:$24 sps:$4 sm:$0xff]  }
 0xe0d   : > { %17567 = vmatpush1.bf16.msra.mxu1 %v23945_v1  ;;  %17527 = vmatprep.subr.bf16.mxu0 %v23950_v52  ;;  %24774 = vtanh.f32 %v13956_v18  ;;  %v13987_v1 = vmul.f32 0.5, %v13975_v10  ;;  %v24011_v31 = vld [vmem:[#allocation19 + $0x990] ss:$24 sps:$4 sm:$0xff]   ;;  %v24017_v16 = vld [vmem:[#allocation19 + $0x9c0] ss:$24 sps:$4 sm:$0xff]  }
 0xe0e   : > { %17568 = vmatprep.subr.bf16.mxu1 %v23953_v59  ;;  %v13997_v61 = vmul.f32 %v26274_v5, %v13985_v54  ;;  %v23998_v5 = vld [vmem:[#allocation19 + $0x634] ss:$24 sps:$4 sm:$0xff]   ;;  %v24020_v10 = vld [vmem:[#allocation19 + $0x6f0] ss:$24 sps:$4 sm:$0xff]   ;;  %v24029_v54 = vld [vmem:[#allocation19 + $0xa20] ss:$24 sps:$4 sm:$0xff]  }
 0xe0f   : > { %v13999_v0 = vmul.f32 %v26277_v24, %v13987_v1  ;;  %v24001_v24 = vld [vmem:[#allocation19 + $0x934] ss:$24 sps:$4 sm:$0xff]  }
 0xe10   : > { %17528 = vmatpush1.bf16.msra.mxu0 %v23948_v62  ;;  %v23992_v62 = vld [vmem:[#allocation19 + $0x604] ss:$24 sps:$4 sm:$0xff]   ;;  %v26311_v18 = vpack.c.bf16 %v13997_v61, %v13997_v61  ;;  %v24037_v1 = vld [vmem:[#allocation19 + $0xa54] ss:$24 sps:$4 sm:$0xff]  }
 0xe11   : > { %17569 = vmatpush1.bf16.msra.mxu1 %v23951_v47  ;;  %17529 = vmatprep.subr.bf16.mxu0 %v23956_v63  ;;  %v23995_v47 = vld [vmem:[#allocation19 + $0x904] ss:$24 sps:$4 sm:$0xff]  }
 0xe12   : > { %17570 = vmatprep.subr.bf16.mxu1 %v23959_v23  ;;  %v24040_v61 = vld [vmem:[#allocation19 + $0x784] ss:$24 sps:$4 sm:$0xff]  }
 0xe14   : > { %17530 = vmatpush1.bf16.msra.mxu0 %v23954_v58  ;;  %v23993_v58 = vld [vmem:[#allocation19 + $0x900] ss:$24 sps:$4 sm:$0xff]  }
 0xe15   : > { %17571 = vmatpush1.bf16.msra.mxu1 %v23957_v26  ;;  %17531 = vmatprep.subr.bf16.mxu0 %v23962_v37  ;;  %v26313_v26 = vpack.c.bf16 %v13999_v0, %v13999_v0 }
 0xe16   : > { %17572 = vmatprep.subr.bf16.mxu1 %v23965_v29  ;;  %v24773_v9 = vpop.eup %24772  ;;  %v23999_v29 = vld [vmem:[#allocation19 + $0x930] ss:$24 sps:$4 sm:$0xff]  }
 0xe17   : > { %v24775_v17 = vpop.eup %24774  ;;  %v13978_v50 = vadd.f32 1.0, %v24773_v9  ;;  %v24016_v9 = vld [vmem:[#allocation19 + $0x6c4] ss:$24 sps:$4 sm:$0xff]  }
 0xe18   : > { %17532 = vmatpush1.bf16.msra.mxu0 %v23960_v4  ;;  %v13980_v20 = vadd.f32 1.0, %v24775_v17  ;;  %v24004_v4 = vld [vmem:[#allocation19 + $0x664] ss:$24 sps:$4 sm:$0xff]  }
 0xe19   : > { %17573 = vmatpush1.bf16.msra.mxu1 %v23963_v30  ;;  %17533 = vmatprep.subr.bf16.mxu0 %v23968_v51  ;;  %v13990_v52 = vmul.f32 0.5, %v13978_v50  ;;  %v24007_v30 = vld [vmem:[#allocation19 + $0x964] ss:$24 sps:$4 sm:$0xff]   ;;  %v24002_v51 = vld [vmem:[#allocation19 + $0x660] ss:$24 sps:$4 sm:$0xff]  }
 0xe1a   : > { %17574 = vmatprep.subr.bf16.mxu1 %v23971_v11  ;;  %v13992_v59 = vmul.f32 0.5, %v13980_v20  ;;  %v24005_v11 = vld [vmem:[#allocation19 + $0x960] ss:$24 sps:$4 sm:$0xff]   ;;  %v24023_v50 = vld [vmem:[#allocation19 + $0x9f0] ss:$24 sps:$4 sm:$0xff]  }
 0xe1b   : > { %v14002_v63 = vmul.f32 %v26292_v45, %v13990_v52 }
 0xe1c   : > { %17534 = vmatpush1.bf16.msra.mxu0 %v23966_v32  ;;  %v14004_v23 = vmul.f32 %v26295_v56, %v13992_v59  ;;  %v23996_v56 = vld [vmem:[#allocation19 + $0x630] ss:$24 sps:$4 sm:$0xff]   ;;  %v24010_v32 = vld [vmem:[#allocation19 + $0x694] ss:$24 sps:$4 sm:$0xff]  }
 0xe1d   : > { %17575 = vmatpush1.bf16.msra.mxu1 %v23969_v27  ;;  %17535 = vmatprep.subr.bf16.mxu0 %v23974_v22  ;;  %v26316_v37 = vpack.c.bf16 %v14002_v63, %v14002_v63  ;;  %v24013_v27 = vld [vmem:[#allocation19 + $0x994] ss:$24 sps:$4 sm:$0xff]   ;;  %v10242_v22 = vrot.slane %v26239_v33, %v25965_v53 }
 0xe1e   : > { %17576 = vmatprep.subr.bf16.mxu1 %v23977_v35  ;;  %v26319_v45 = vpack.c.bf16 %v14004_v23, %v14004_v23  ;;  %v10250_v35 = vrot.slane %v26239_v33, %v25932_v25  ;;  %v24025_v25 = vld [vmem:[#allocation19 + $0x9f4] ss:$24 sps:$4 sm:$0xff]  }
 0xe1f   : > { %v26328_v17 = vadd.f32 %v26287_v21, %v10242_v22  ;;  %v24046_v23 = vld [vmem:[#allocation19 + $0x7b4] ss:$24 sps:$4 sm:$0xff]   ;;  %v24056_v22 = vld [vmem:[#allocation19 + $0x810] ss:$24 sps:$4 sm:$0xff]  }
 0xe20   : > { %17536 = vmatpush1.bf16.msra.mxu0 %v23972_v8  ;;  %v24019_v8 = vld [vmem:[#allocation19 + $0x9c4] ss:$24 sps:$4 sm:$0xff]  }
 0xe21   : > { %17577 = vmatpush1.bf16.msra.mxu1 %v23975_v48  ;;  %17537 = vmatprep.subr.bf16.mxu0 %v23980_v15  ;;  %v24014_v48 = vld [vmem:[#allocation19 + $0x6c0] ss:$24 sps:$4 sm:$0xff]   ;;  %v26331_v15 = vadd.f32 %v26289_v2, %v10250_v35  ;;  %v13905_v33 = vmul.f32 %v26328_v17, %v26328_v17  ;;  %v24031_v2 = vld [vmem:[#allocation19 + $0xa24] ss:$24 sps:$4 sm:$0xff]  }
 0xe22   : > { %17578 = vmatprep.subr.bf16.mxu1 %v23983_v40  ;;  %v24022_v40 = vld [vmem:[#allocation19 + $0x6f4] ss:$24 sps:$4 sm:$0xff]   ;;  %v24064_v35 = vld [vmem:[#allocation19 + $0x844] ss:$24 sps:$4 sm:$0xff]  }
 0xe23   : > { %v13907_v21 = vmul.f32 %v26331_v15, %v26331_v15  ;;  %v13917_v20 = vmul.f32 %v26328_v17, %v13905_v33  ;;  %v24068_v33 = vld [vmem:[#allocation19 + $0x870] ss:$24 sps:$4 sm:$0xff]  }
 0xe24   : > { %17538 = vmatpush1.bf16.msra.mxu0 %v23978_v55  ;;  %v24028_v55 = vld [vmem:[#allocation19 + $0x724] ss:$24 sps:$4 sm:$0xff]  }
 0xe25   : > { %17579 = vmatpush1.bf16.msra.mxu1 %v23981_v41  ;;  %17539 = vmatprep.subr.bf16.mxu0 %v23986_v42  ;;  %v24026_v41 = vld [vmem:[#allocation19 + $0x720] ss:$24 sps:$4 sm:$0xff]   ;;  %v13919_v42 = vmul.f32 %v26331_v15, %v13907_v21  ;;  %v13929_v52 = vmul.f32 0.044715, %v13917_v20  ;;  %v24076_v21 = vld [vmem:[#allocation19 + $0x8a4] ss:$24 sps:$4 sm:$0xff]  }
 0xe26   : > { %17580 = vmatprep.subr.bf16.mxu1 %v23989_v38  ;;  %v24034_v38 = vld [vmem:[#allocation19 + $0x754] ss:$24 sps:$4 sm:$0xff]   ;;  %v24074_v20 = vld [vmem:[#allocation19 + $0x8a0] ss:$24 sps:$4 sm:$0xff]  }
 0xe27   : > { %v13931_v59 = vmul.f32 0.044715, %v13919_v42  ;;  %v13941_v0 = vadd.f32 %v26328_v17, %v13929_v52  ;;  %v24082_v42 = vld [vmem:[#allocation19 + $0x8d4] ss:$24 sps:$4 sm:$0xff]   ;;  %v24080_v52 = vld [vmem:[#allocation19 + $0x8d0] ss:$24 sps:$4 sm:$0xff]  }
 0xe28   : > { %17540 = vmatpush1.bf16.msra.mxu0 %v23984_v57  ;;  %v24032_v57 = vld [vmem:[#allocation19 + $0x750] ss:$24 sps:$4 sm:$0xff]  }
 0xe29   : > { %17581 = vmatpush1.bf16.msra.mxu1 %v23987_v60  ;;  %17591 = vmatprep.subr.bf16.mxu0 %v23992_v62  ;;  %v24035_v60 = vld [vmem:[#allocation19 + $0xa50] ss:$24 sps:$4 sm:$0xff]   ;;  %v24043_v62 = vld [vmem:[#allocation19 + $0xa84] ss:$24 sps:$4 sm:$0xff]   ;;  %v13943_v63 = vadd.f32 %v26331_v15, %v13931_v59 }
 0xe2a   : > { %17632 = vmatprep.subr.bf16.mxu1 %v23995_v47  ;;  %v24038_v47 = vld [vmem:[#allocation19 + $0x780] ss:$24 sps:$4 sm:$0xff]  }
 0xe2b   : > { %17542 = vmatmul.mubr.bf16.vlgmr.msra.gmra.mrb[48].mxu0 %v26311_v18 }
 0xe2c   : > { %17583 = vmatmul.mubr.bf16.vlgmr.msra.gmra.mrb[64].mxu1 %v26313_v26  ;;  %17592 = vmatpush1.bf16.msra.mxu0 %v23990_v12  ;;  %v24041_v12 = vld [vmem:[#allocation19 + $0xa80] ss:$24 sps:$4 sm:$0xff]  }
 0xe2d   : > { %17623 = vmatprep.mubr.bf16.mxu0 %v26316_v37  ;;  %17633 = vmatpush1.bf16.msra.mxu1 %v23993_v58  ;;  %v24049_v58 = vld [vmem:[#allocation19 + $0xab4] ss:$24 sps:$4 sm:$0xff]  }
 0xe2e   : > { %17664 = vmatprep.mubr.bf16.mxu1 %v26319_v45  ;;  %17593 = vmatprep.subr.bf16.mxu0 %v23998_v5  ;;  %v13953_v5 = vmul.f32 0.7978846, %v13941_v0  ;;  %v24086_v0 = vld [vmem:[#allocation19 + $0xc00] ss:$24 sps:$4 sm:$0xff]  }
 0xe2f   : > { %17634 = vmatprep.subr.bf16.mxu1 %v24001_v24  ;;  %v24044_v24 = vld [vmem:[#allocation19 + $0x7b0] ss:$24 sps:$4 sm:$0xff]  }
 0xe30   : > { %17594 = vmatpush1.bf16.msra.mxu0 %v23996_v56  ;;  %v13955_v56 = vmul.f32 0.7978846, %v13943_v63  ;;  %24776 = vtanh.f32 %v13953_v5  ;;  %v24089_v63 = vld [vmem:[#allocation19 + $0xf00] ss:$24 sps:$4 sm:$0xff]   ;;  %v24100_v5 = vld [vmem:[#allocation19 + $0xc64] ss:$24 sps:$4 sm:$0xff]  }
 0xe31   : > { %17635 = vmatpush1.bf16.msra.mxu1 %v23999_v29  ;;  %17595 = vmatprep.subr.bf16.mxu0 %v24004_v4  ;;  %v24047_v29 = vld [vmem:[#allocation19 + $0xab0] ss:$24 sps:$4 sm:$0xff]   ;;  %v24052_v4 = vld [vmem:[#allocation19 + $0x7e4] ss:$24 sps:$4 sm:$0xff]  }
 0xe32   : > { %17636 = vmatprep.subr.bf16.mxu1 %v24007_v30  ;;  %v24055_v30 = vld [vmem:[#allocation19 + $0xae4] ss:$24 sps:$4 sm:$0xff]   ;;  %24778 = vtanh.f32 %v13955_v56  ;;  %v24098_v56 = vld [vmem:[#allocation19 + $0xc60] ss:$24 sps:$4 sm:$0xff]  }
 0xe34   : > { %17596 = vmatpush1.bf16.msra.mxu0 %v24002_v51  ;;  %v24050_v51 = vld [vmem:[#allocation19 + $0x7e0] ss:$24 sps:$4 sm:$0xff]  }
 0xe35   : > { %17637 = vmatpush1.bf16.msra.mxu1 %v24005_v11  ;;  %17597 = vmatprep.subr.bf16.mxu0 %v24010_v32  ;;  %v24053_v11 = vld [vmem:[#allocation19 + $0xae0] ss:$24 sps:$4 sm:$0xff]   ;;  %v24058_v32 = vld [vmem:[#allocation19 + $0x814] ss:$24 sps:$4 sm:$0xff]  }
 0xe36   : > { %17638 = vmatprep.subr.bf16.mxu1 %v24013_v27  ;;  %v24061_v27 = vld [vmem:[#allocation19 + $0xb14] ss:$24 sps:$4 sm:$0xff]  }
 0xe38   : > { %17598 = vmatpush1.bf16.msra.mxu0 %v24008_v43  ;;  %v24059_v43 = vld [vmem:[#allocation19 + $0xb10] ss:$24 sps:$4 sm:$0xff]  }
 0xe39   : > { %17639 = vmatpush1.bf16.msra.mxu1 %v24011_v31  ;;  %17599 = vmatprep.subr.bf16.mxu0 %v24016_v9  ;;  %v24067_v31 = vld [vmem:[#allocation19 + $0xb44] ss:$24 sps:$4 sm:$0xff]   ;;  %v24062_v9 = vld [vmem:[#allocation19 + $0x840] ss:$24 sps:$4 sm:$0xff]  }
 0xe3a   : > { %17640 = vmatprep.subr.bf16.mxu1 %v24019_v8  ;;  %v24065_v8 = vld [vmem:[#allocation19 + $0xb40] ss:$24 sps:$4 sm:$0xff]  }
 0xe3c   : > { %17600 = vmatpush1.bf16.msra.mxu0 %v24014_v48  ;;  %v24070_v48 = vld [vmem:[#allocation19 + $0x874] ss:$24 sps:$4 sm:$0xff]  }
 0xe3d   : > { %17641 = vmatpush1.bf16.msra.mxu1 %v24017_v16  ;;  %17601 = vmatprep.subr.bf16.mxu0 %v24022_v40  ;;  %v24777_v16 = vpop.eup %24776  ;;  %v24073_v40 = vld [vmem:[#allocation19 + $0xb74] ss:$24 sps:$4 sm:$0xff]  }
 0xe3e   : > { %17642 = vmatprep.subr.bf16.mxu1 %v24025_v25  ;;  %v24779_v25 = vpop.eup %24778 }
 0xe40   : > { %17602 = vmatpush1.bf16.msra.mxu0 %v24020_v10  ;;  %v24071_v10 = vld [vmem:[#allocation19 + $0xb70] ss:$24 sps:$4 sm:$0xff]  }
 0xe41   : > { %17643 = vmatpush1.bf16.msra.mxu1 %v24023_v50  ;;  %17603 = vmatprep.subr.bf16.mxu0 %v24028_v55  ;;  %v13977_v50 = vadd.f32 1.0, %v24777_v16  ;;  %v24079_v55 = vld [vmem:[#allocation19 + $0xba4] ss:$24 sps:$4 sm:$0xff]  }
 0xe42   : > { %17644 = vmatprep.subr.bf16.mxu1 %v24031_v2  ;;  %v13979_v2 = vadd.f32 1.0, %v24779_v25  ;;  %v24127_v16 = vld [vmem:[#allocation19 + $0x1024] ss:$24 sps:$4 sm:$0xff]   ;;  %v24125_v25 = vld [vmem:[#allocation19 + $0x1020] ss:$24 sps:$4 sm:$0xff]  }
 0xe44   : > { %17604 = vmatpush1.bf16.msra.mxu0 %v24026_v41  ;;  %v24077_v41 = vld [vmem:[#allocation19 + $0xba0] ss:$24 sps:$4 sm:$0xff]  }
 0xe45   : > { %17645 = vmatpush1.bf16.msra.mxu1 %v24029_v54  ;;  %17605 = vmatprep.subr.bf16.mxu0 %v24034_v38  ;;  %v13989_v54 = vmul.f32 0.5, %v13977_v50  ;;  %v24085_v38 = vld [vmem:[#allocation19 + $0xbd4] ss:$24 sps:$4 sm:$0xff]   ;;  %v24131_v50 = vld [vmem:[#allocation19 + $0x1050] ss:$24 sps:$4 sm:$0xff]  }
 0xe46   : > { %17646 = vmatprep.subr.bf16.mxu1 %v24037_v1  ;;  %v13991_v1 = vmul.f32 0.5, %v13979_v2  ;;  %v24139_v2 = vld [vmem:[#allocation19 + $0x1084] ss:$24 sps:$4 sm:$0xff]  }
 0xe47   : > { %v14001_v59 = vmul.f32 %v26328_v17, %v13989_v54  ;;  %v24092_v17 = vld [vmem:[#allocation19 + $0xc30] ss:$24 sps:$4 sm:$0xff]   ;;  %v24145_v54 = vld [vmem:[#allocation19 + $0x10b4] ss:$24 sps:$4 sm:$0xff]  }
 0xe48   : > { %17606 = vmatpush1.bf16.msra.mxu0 %v24032_v57  ;;  %v24083_v57 = vld [vmem:[#allocation19 + $0xbd0] ss:$24 sps:$4 sm:$0xff]  }
 0xe49   : > { %17647 = vmatpush1.bf16.msra.mxu1 %v24035_v60  ;;  %17607 = vmatprep.subr.bf16.mxu0 %v24040_v61  ;;  %v24088_v60 = vld [vmem:[#allocation19 + $0xc04] ss:$24 sps:$4 sm:$0xff]   ;;  %v14003_v61 = vmul.f32 %v26331_v15, %v13991_v1  ;;  %v24095_v15 = vld [vmem:[#allocation19 + $0xf30] ss:$24 sps:$4 sm:$0xff]  }
 0xe4a   : > { %17648 = vmatprep.subr.bf16.mxu1 %v24043_v62  ;;  %v24091_v62 = vld [vmem:[#allocation19 + $0xf04] ss:$24 sps:$4 sm:$0xff]   ;;  %v24143_v1 = vld [vmem:[#allocation19 + $0x10b0] ss:$24 sps:$4 sm:$0xff]  }
 0xe4c   : > { %17608 = vmatpush1.bf16.msra.mxu0 %v24038_v47  ;;  %v26343_v47 = vpack.c.bf16 %v14001_v59, %v14001_v59  ;;  %v24146_v59 = vld [vmem:[#allocation19 + $0xde0] ss:$24 sps:$4 sm:$0xff]  }
 0xe4d   : > { %17649 = vmatpush1.bf16.msra.mxu1 %v24041_v12  ;;  %17609 = vmatprep.subr.bf16.mxu0 %v24046_v23  ;;  %v24094_v12 = vld [vmem:[#allocation19 + $0xc34] ss:$24 sps:$4 sm:$0xff]   ;;  %v26345_v23 = vpack.c.bf16 %v14003_v61, %v14003_v61 }
 0xe4e   : > { %17650 = vmatprep.subr.bf16.mxu1 %v24049_v58  ;;  %v24097_v58 = vld [vmem:[#allocation19 + $0xf34] ss:$24 sps:$4 sm:$0xff]  }
 0xe4f   : > { %v24154_v61 = vld [vmem:[#allocation19 + $0xe14] ss:$24 sps:$4 sm:$0xff]  }
 0xe50   : > { %17610 = vmatpush1.bf16.msra.mxu0 %v24044_v24  ;;  %v24103_v24 = vld [vmem:[#allocation19 + $0xf64] ss:$24 sps:$4 sm:$0xff]  }
 0xe51   : > { %17651 = vmatpush1.bf16.msra.mxu1 %v24047_v29  ;;  %17611 = vmatprep.subr.bf16.mxu0 %v24052_v4  ;;  %v24101_v29 = vld [vmem:[#allocation19 + $0xf60] ss:$24 sps:$4 sm:$0xff]   ;;  %v24106_v4 = vld [vmem:[#allocation19 + $0xc94] ss:$24 sps:$4 sm:$0xff]  }
 0xe52   : > { %17652 = vmatprep.subr.bf16.mxu1 %v24055_v30  ;;  %v24109_v30 = vld [vmem:[#allocation19 + $0xf94] ss:$24 sps:$4 sm:$0xff]  }
 0xe54   : > { %17612 = vmatpush1.bf16.msra.mxu0 %v24050_v51  ;;  %v24104_v51 = vld [vmem:[#allocation19 + $0xc90] ss:$24 sps:$4 sm:$0xff]  }
 0xe55   : > { %17653 = vmatpush1.bf16.msra.mxu1 %v24053_v11  ;;  %17613 = vmatprep.subr.bf16.mxu0 %v24058_v32  ;;  %v24107_v11 = vld [vmem:[#allocation19 + $0xf90] ss:$24 sps:$4 sm:$0xff]   ;;  %v24112_v32 = vld [vmem:[#allocation19 + $0xcc4] ss:$24 sps:$4 sm:$0xff]  }
 0xe56   : > { %17654 = vmatprep.subr.bf16.mxu1 %v24061_v27  ;;  %v24115_v27 = vld [vmem:[#allocation19 + $0xfc4] ss:$24 sps:$4 sm:$0xff]  }
 0xe58   : > { %17614 = vmatpush1.bf16.msra.mxu0 %v24056_v22  ;;  %v24110_v22 = vld [vmem:[#allocation19 + $0xcc0] ss:$24 sps:$4 sm:$0xff]  }
 0xe59   : > { %17655 = vmatpush1.bf16.msra.mxu1 %v24059_v43  ;;  %17615 = vmatprep.subr.bf16.mxu0 %v24064_v35  ;;  %v24113_v43 = vld [vmem:[#allocation19 + $0xfc0] ss:$24 sps:$4 sm:$0xff]   ;;  %v24118_v35 = vld [vmem:[#allocation19 + $0xcf4] ss:$24 sps:$4 sm:$0xff]  }
 0xe5a   : > { %17656 = vmatprep.subr.bf16.mxu1 %v24067_v31  ;;  %v24121_v31 = vld [vmem:[#allocation19 + $0xff4] ss:$24 sps:$4 sm:$0xff]  }
 0xe5c   : > { %17616 = vmatpush1.bf16.msra.mxu0 %v24062_v9  ;;  %v24116_v9 = vld [vmem:[#allocation19 + $0xcf0] ss:$24 sps:$4 sm:$0xff]  }
 0xe5d   : > { %17657 = vmatpush1.bf16.msra.mxu1 %v24065_v8  ;;  %17617 = vmatprep.subr.bf16.mxu0 %v24070_v48  ;;  %v24119_v8 = vld [vmem:[#allocation19 + $0xff0] ss:$24 sps:$4 sm:$0xff]   ;;  %v24124_v48 = vld [vmem:[#allocation19 + $0xd24] ss:$24 sps:$4 sm:$0xff]  }
 0xe5e   : > { %17658 = vmatprep.subr.bf16.mxu1 %v24073_v40  ;;  %v24122_v40 = vld [vmem:[#allocation19 + $0xd20] ss:$24 sps:$4 sm:$0xff]  }
 0xe60   : > { %17618 = vmatpush1.bf16.msra.mxu0 %v24068_v33  ;;  %v24130_v33 = vld [vmem:[#allocation19 + $0xd54] ss:$24 sps:$4 sm:$0xff]  }
 0xe61   : > { %17659 = vmatpush1.bf16.msra.mxu1 %v24071_v10  ;;  %17619 = vmatprep.subr.bf16.mxu0 %v24076_v21  ;;  %v24133_v10 = vld [vmem:[#allocation19 + $0x1054] ss:$24 sps:$4 sm:$0xff]   ;;  %v24128_v21 = vld [vmem:[#allocation19 + $0xd50] ss:$24 sps:$4 sm:$0xff]  }
 0xe62   : > { %17660 = vmatprep.subr.bf16.mxu1 %v24079_v55  ;;  %v24136_v55 = vld [vmem:[#allocation19 + $0xd84] ss:$24 sps:$4 sm:$0xff]  }
 0xe64   : > { %17620 = vmatpush1.bf16.msra.mxu0 %v24074_v20  ;;  %v24134_v20 = vld [vmem:[#allocation19 + $0xd80] ss:$24 sps:$4 sm:$0xff]  }
 0xe65   : > { %17661 = vmatpush1.bf16.msra.mxu1 %v24077_v41  ;;  %17621 = vmatprep.subr.bf16.mxu0 %v24082_v42  ;;  %v24137_v41 = vld [vmem:[#allocation19 + $0x1080] ss:$24 sps:$4 sm:$0xff]   ;;  %v24142_v42 = vld [vmem:[#allocation19 + $0xdb4] ss:$24 sps:$4 sm:$0xff]  }
 0xe66   : > { %17662 = vmatprep.subr.bf16.mxu1 %v24085_v38  ;;  %v24140_v38 = vld [vmem:[#allocation19 + $0xdb0] ss:$24 sps:$4 sm:$0xff]  }
 0xe68   : > { %17622 = vmatpush1.bf16.msra.mxu0 %v24080_v52  ;;  %v24148_v52 = vld [vmem:[#allocation19 + $0xde4] ss:$24 sps:$4 sm:$0xff]  }
 0xe69   : > { %17663 = vmatpush1.bf16.msra.mxu1 %v24083_v57  ;;  %17673 = vmatprep.subr.bf16.mxu0 %v24088_v60  ;;  %v24151_v57 = vld [vmem:[#allocation19 + $0x10e4] ss:$24 sps:$4 sm:$0xff]   ;;  %v24149_v60 = vld [vmem:[#allocation19 + $0x10e0] ss:$24 sps:$4 sm:$0xff]  }
 0xe6a   : > { %17714 = vmatprep.subr.bf16.mxu1 %v24091_v62  ;;  %v24157_v62 = vld [vmem:[#allocation19 + $0x1114] ss:$24 sps:$4 sm:$0xff]  }
 0xe6b   : > { %17624 = vmatmul.mubr.bf16.vlgmr.msra.gmra.mrb[52].mxu0 %v26343_v47 }
 0xe6c   : > { %17665 = vmatmul.mubr.bf16.vlgmr.msra.gmra.mrb[68].mxu1 %v26345_v23  ;;  %17674 = vmatpush1.bf16.msra.mxu0 %v24086_v0  ;;  %v24152_v0 = vld [vmem:[#allocation19 + $0xe10] ss:$24 sps:$4 sm:$0xff]  }
 0xe6d   : > { %17715 = vmatpush1.bf16.msra.mxu1 %v24089_v63  ;;  %17675 = vmatprep.subr.bf16.mxu0 %v24094_v12  ;;  %v24155_v63 = vld [vmem:[#allocation19 + $0x1110] ss:$24 sps:$4 sm:$0xff]   ;;  %v24160_v12 = vld [vmem:[#allocation19 + $0xe44] ss:$24 sps:$4 sm:$0xff]  }
 0xe6e   : > { %17716 = vmatprep.subr.bf16.mxu1 %v24097_v58  ;;  %v24163_v58 = vld [vmem:[#allocation19 + $0x1144] ss:$24 sps:$4 sm:$0xff]  }
 0xe70   : > { %17676 = vmatpush1.bf16.msra.mxu0 %v24092_v17  ;;  %v24158_v17 = vld [vmem:[#allocation19 + $0xe40] ss:$24 sps:$4 sm:$0xff]  }
 0xe71   : > { %17717 = vmatpush1.bf16.msra.mxu1 %v24095_v15  ;;  %17677 = vmatprep.subr.bf16.mxu0 %v24100_v5  ;;  %v24161_v15 = vld [vmem:[#allocation19 + $0x1140] ss:$24 sps:$4 sm:$0xff]   ;;  %v24166_v5 = vld [vmem:[#allocation19 + $0xe74] ss:$24 sps:$4 sm:$0xff]  }
 0xe72   : > { %17718 = vmatprep.subr.bf16.mxu1 %v24103_v24  ;;  %v24169_v24 = vld [vmem:[#allocation19 + $0x1174] ss:$24 sps:$4 sm:$0xff]  }
 0xe74   : > { %17678 = vmatpush1.bf16.msra.mxu0 %v24098_v56  ;;  %v24164_v56 = vld [vmem:[#allocation19 + $0xe70] ss:$24 sps:$4 sm:$0xff]  }
 0xe75   : > { %17719 = vmatpush1.bf16.msra.mxu1 %v24101_v29  ;;  %17679 = vmatprep.subr.bf16.mxu0 %v24106_v4  ;;  %v24167_v29 = vld [vmem:[#allocation19 + $0x1170] ss:$24 sps:$4 sm:$0xff]   ;;  %v24172_v4 = vld [vmem:[#allocation19 + $0xea4] ss:$24 sps:$4 sm:$0xff]  }
 0xe76   : > { %17720 = vmatprep.subr.bf16.mxu1 %v24109_v30  ;;  %v24175_v30 = vld [vmem:[#allocation19 + $0x11a4] ss:$24 sps:$4 sm:$0xff]  }
 0xe78   : > { %17680 = vmatpush1.bf16.msra.mxu0 %v24104_v51  ;;  %v24170_v51 = vld [vmem:[#allocation19 + $0xea0] ss:$24 sps:$4 sm:$0xff]  }
 0xe79   : > { %17721 = vmatpush1.bf16.msra.mxu1 %v24107_v11  ;;  %17681 = vmatprep.subr.bf16.mxu0 %v24112_v32  ;;  %v24173_v11 = vld [vmem:[#allocation19 + $0x11a0] ss:$24 sps:$4 sm:$0xff]   ;;  %v24178_v32 = vld [vmem:[#allocation19 + $0xed4] ss:$24 sps:$4 sm:$0xff]  }
 0xe7a   : > { %17722 = vmatprep.subr.bf16.mxu1 %v24115_v27  ;;  %v24181_v27 = vld [vmem:[#allocation19 + $0x11d4] ss:$24 sps:$4 sm:$0xff]  }
 0xe7c   : > { %17682 = vmatpush1.bf16.msra.mxu0 %v24110_v22  ;;  %v24176_v22 = vld [vmem:[#allocation19 + $0xed0] ss:$24 sps:$4 sm:$0xff]  }
 0xe7d   : > { %17723 = vmatpush1.bf16.msra.mxu1 %v24113_v43  ;;  %17683 = vmatprep.subr.bf16.mxu0 %v24118_v35  ;;  %v24179_v43 = vld [vmem:[#allocation19 + $0x11d0] ss:$24 sps:$4 sm:$0xff]   ;;  %v24184_v35 = vld [vmem:[#allocation19 + $0xc] ss:$24 sps:$4 sm:$0xff]  }
 0xe7e   : > { %17724 = vmatprep.subr.bf16.mxu1 %v24121_v31  ;;  %v24187_v31 = vld [vmem:[#allocation19 + $0x30c] ss:$24 sps:$4 sm:$0xff]  }
 0xe80   : > { %17684 = vmatpush1.bf16.msra.mxu0 %v24116_v9  ;;  %v10220_v9 = vld [vmem:[#allocation17 + $0x8] sm:$0xf] }
 0xe81   : > { %17725 = vmatpush1.bf16.msra.mxu1 %v24119_v8  ;;  %17685 = vmatprep.subr.bf16.mxu0 %v24124_v48  ;;  %v10258_v8 = vrot.slane %v10220_v9, %v25942_v34  ;;  %v10266_v48 = vrot.slane %v10220_v9, %v25961_v44 }
 0xe82   : > { %17726 = vmatprep.subr.bf16.mxu1 %v24127_v16  ;;  %v10262_v16 = vrot.slane %v10220_v9, %v25926_v14 }
 0xe84   : > { %17686 = vmatpush1.bf16.msra.mxu0 %v24122_v40  ;;  %v10270_v40 = vrot.slane %v10220_v9, %v25944_v36 }
 0xe85   : > { %17727 = vmatpush1.bf16.msra.mxu1 %v24125_v25  ;;  %17687 = vmatprep.subr.bf16.mxu0 %v24130_v33 }
 0xe86   : > { %17728 = vmatprep.subr.bf16.mxu1 %v24133_v10 }
 0xe88   : > { %17688 = vmatpush1.bf16.msra.mxu0 %v24128_v21 }
 0xe89   : > { %17729 = vmatpush1.bf16.msra.mxu1 %v24131_v50  ;;  %17689 = vmatprep.subr.bf16.mxu0 %v24136_v55 }
 0xe8a   : > { %17730 = vmatprep.subr.bf16.mxu1 %v24139_v2 }
 0xe8c   : > { %17690 = vmatpush1.bf16.msra.mxu0 %v24134_v20 }
 0xe8d   : > { %17731 = vmatpush1.bf16.msra.mxu1 %v24137_v41  ;;  %17691 = vmatprep.subr.bf16.mxu0 %v24142_v42 }
 0xe8e   : > { %17732 = vmatprep.subr.bf16.mxu1 %v24145_v54 }
 0xe90   : > { %17692 = vmatpush1.bf16.msra.mxu0 %v24140_v38 }
 0xe91   : > { %17733 = vmatpush1.bf16.msra.mxu1 %v24143_v1  ;;  %17693 = vmatprep.subr.bf16.mxu0 %v24148_v52 }
 0xe92   : > { %17734 = vmatprep.subr.bf16.mxu1 %v24151_v57 }
 0xe94   : > { %17694 = vmatpush1.bf16.msra.mxu0 %v24146_v59 }
 0xe95   : > { %17735 = vmatpush1.bf16.msra.mxu1 %v24149_v60  ;;  %17695 = vmatprep.subr.bf16.mxu0 %v24154_v61 }
 0xe96   : > { %17736 = vmatprep.subr.bf16.mxu1 %v24157_v62 }
 0xe98   : > { %17696 = vmatpush1.bf16.msra.mxu0 %v24152_v0 }
 0xe99   : > { %17737 = vmatpush1.bf16.msra.mxu1 %v24155_v63  ;;  %17697 = vmatprep.subr.bf16.mxu0 %v24160_v12 }
 0xe9a   : > { %17738 = vmatprep.subr.bf16.mxu1 %v24163_v58 }
 0xe9c   : > { %17698 = vmatpush1.bf16.msra.mxu0 %v24158_v17 }
 0xe9d   : > { %17739 = vmatpush1.bf16.msra.mxu1 %v24161_v15  ;;  %17699 = vmatprep.subr.bf16.mxu0 %v24166_v5 }
 0xe9e   : > { %17740 = vmatprep.subr.bf16.mxu1 %v24169_v24 }
 0xea0   : > { %17700 = vmatpush1.bf16.msra.mxu0 %v24164_v56 }
 0xea1   : > { %17741 = vmatpush1.bf16.msra.mxu1 %v24167_v29  ;;  %17701 = vmatprep.subr.bf16.mxu0 %v24172_v4 }
 0xea2   : > { %17742 = vmatprep.subr.bf16.mxu1 %v24175_v30 }
 0xea4   : > { %17702 = vmatpush1.bf16.msra.mxu0 %v24170_v51 }
 0xea5   : > { %17743 = vmatpush1.bf16.msra.mxu1 %v24173_v11  ;;  %17703 = vmatprep.subr.bf16.mxu0 %v24178_v32 }
 0xea6   : > { %17744 = vmatprep.subr.bf16.mxu1 %v24181_v27 }
 0xea8   : > { %17704 = vmatpush1.bf16.msra.mxu0 %v24176_v22 }
 0xea9   : > { %17745 = vmatpush1.bf16.msra.mxu1 %v24179_v43  ;;  %17755 = vmatprep.subr.bf16.mxu0 %v24184_v35 }
 0xeaa   : > { %17796 = vmatprep.subr.bf16.mxu1 %v24187_v31 }
 0xebe   : > { %v13771_v25 = vpop.f32.mrb[44].mxu0 }
 0xebf   : > { %v20986_v33 = vadd.f32 %v13771_v25, %v10258_v8  ;;  %v13894_v10 = vpop.f32.mrb[60].mxu1  ;;  %v13773_v21 = vpop.f32.mrb[45].mxu0 }
 0xec0   : > { %v20988_v50 = vadd.f32 %v13894_v10, %v10266_v48  ;;  %v20987_v55 = vadd.f32 %v13773_v21, %v10262_v16  ;;  %v13896_v2 = vpop.f32.mrb[61].mxu1  ;;  %v13775_v20 = vpop.f32.mrb[46].mxu0 }
 0xec1   : > { %v13909_v41 = vmul.f32 %v20986_v33, %v20986_v33  ;;  %v20989_v42 = vadd.f32 %v13896_v2, %v10270_v40  ;;  %v13898_v54 = vpop.f32.mrb[62].mxu1  ;;  %v13776_v38 = vpop.f32.mrb[47].mxu0 }
 0xec2   : > { %v13911_v1 = vmul.f32 %v20988_v50, %v20988_v50  ;;  %v13910_v52 = vmul.f32 %v20987_v55, %v20987_v55  ;;  %v13899_v57 = vpop.f32.mrb[63].mxu1  ;;  %v24185_v38 = vld [vmem:[#allocation19 + $0x308] ss:$24 sps:$4 sm:$0xff]  }
 0xec3   : > { %v13921_v59 = vmul.f32 %v20986_v33, %v13909_v41  ;;  %v13912_v60 = vmul.f32 %v20989_v42, %v20989_v42  ;;  %v24182_v41 = vld [vmem:[#allocation19 + $0x8] ss:$24 sps:$4 sm:$0xff]   ;;  %v24190_v57 = vld [vmem:[#allocation19 + $0x3c] ss:$24 sps:$4 sm:$0xff]  }
 0xec4   : > { %v13923_v61 = vmul.f32 %v20988_v50, %v13911_v1  ;;  %v13922_v62 = vmul.f32 %v20987_v55, %v13910_v52 }
 0xec5   : > { %v13933_v0 = vmul.f32 0.044715, %v13921_v59  ;;  %v13924_v63 = vmul.f32 %v20989_v42, %v13912_v60  ;;  %v24199_v59 = vld [vmem:[#allocation19 + $0x36c] ss:$24 sps:$4 sm:$0xff]   ;;  %v24194_v60 = vld [vmem:[#allocation19 + $0x68] ss:$24 sps:$4 sm:$0xff]  }
 0xec6   : > { %v13935_v12 = vmul.f32 0.044715, %v13923_v61  ;;  %v13934_v58 = vmul.f32 0.044715, %v13922_v62  ;;  %v24197_v61 = vld [vmem:[#allocation19 + $0x368] ss:$24 sps:$4 sm:$0xff]  }
 0xec7   : > { %v13945_v17 = vadd.f32 %v20986_v33, %v13933_v0  ;;  %v13936_v15 = vmul.f32 0.044715, %v13924_v63  ;;  %v24202_v62 = vld [vmem:[#allocation19 + $0x9c] ss:$24 sps:$4 sm:$0xff]   ;;  %v24200_v63 = vld [vmem:[#allocation19 + $0x98] ss:$24 sps:$4 sm:$0xff]  }
 0xec8   : > { %v13947_v5 = vadd.f32 %v20988_v50, %v13935_v12  ;;  %v13946_v24 = vadd.f32 %v20987_v55, %v13934_v58  ;;  %v24205_v0 = vld [vmem:[#allocation19 + $0x39c] ss:$24 sps:$4 sm:$0xff]   ;;  %v24203_v12 = vld [vmem:[#allocation19 + $0x398] ss:$24 sps:$4 sm:$0xff]   ;;  %v24208_v58 = vld [vmem:[#allocation19 + $0xcc] ss:$24 sps:$4 sm:$0xff]  }
 0xec9   : > { %v13957_v56 = vmul.f32 0.7978846, %v13945_v17  ;;  %v13948_v29 = vadd.f32 %v20989_v42, %v13936_v15  ;;  %v24211_v17 = vld [vmem:[#allocation19 + $0x3cc] ss:$24 sps:$4 sm:$0xff]   ;;  %v24206_v15 = vld [vmem:[#allocation19 + $0xc8] ss:$24 sps:$4 sm:$0xff]  }
 0xeca   : > { %v13959_v4 = vmul.f32 0.7978846, %v13947_v5  ;;  %v13958_v30 = vmul.f32 0.7978846, %v13946_v24  ;;  %v24209_v5 = vld [vmem:[#allocation19 + $0x3c8] ss:$24 sps:$4 sm:$0xff]  }
 0xecb   : > { %24780 = vtanh.f32 %v13957_v56  ;;  %v13960_v51 = vmul.f32 0.7978846, %v13948_v29  ;;  %v24214_v24 = vld [vmem:[#allocation19 + $0xfc] ss:$24 sps:$4 sm:$0xff]   ;;  %v24212_v29 = vld [vmem:[#allocation19 + $0xf8] ss:$24 sps:$4 sm:$0xff]  }
 0xecc   : > { %24782 = vtanh.f32 %v13959_v4  ;;  %v24217_v56 = vld [vmem:[#allocation19 + $0x3fc] ss:$24 sps:$4 sm:$0xff]   ;;  %v24215_v4 = vld [vmem:[#allocation19 + $0x3f8] ss:$24 sps:$4 sm:$0xff]  }
 0xecd   : > { %24784 = vtanh.f32 %v13958_v30  ;;  %v24220_v30 = vld [vmem:[#allocation19 + $0x12c] ss:$24 sps:$4 sm:$0xff]  }
 0xece   : > { %24786 = vtanh.f32 %v13960_v51  ;;  %v24223_v51 = vld [vmem:[#allocation19 + $0x42c] ss:$24 sps:$4 sm:$0xff]  }
 0xed5   : > { %v24781_v11 = vpop.eup %24780 }
 0xed6   : > { %v24783_v32 = vpop.eup %24782  ;;  %v13981_v27 = vadd.f32 1.0, %v24781_v11  ;;  %v24218_v11 = vld [vmem:[#allocation19 + $0x128] ss:$24 sps:$4 sm:$0xff]  }
 0xed7   : > { %v24785_v22 = vpop.eup %24784  ;;  %v13983_v43 = vadd.f32 1.0, %v24783_v32  ;;  %v24221_v32 = vld [vmem:[#allocation19 + $0x428] ss:$24 sps:$4 sm:$0xff]  }
 0xed8   : > { %v24787_v35 = vpop.eup %24786  ;;  %v13982_v31 = vadd.f32 1.0, %v24785_v22  ;;  %v13993_v9 = vmul.f32 0.5, %v13981_v27  ;;  %v24226_v27 = vld [vmem:[#allocation19 + $0x15c] ss:$24 sps:$4 sm:$0xff]  }
 0xed9   : > { %v13984_v8 = vadd.f32 1.0, %v24787_v35  ;;  %v13995_v48 = vmul.f32 0.5, %v13983_v43  ;;  %v24229_v22 = vld [vmem:[#allocation19 + $0x45c] ss:$24 sps:$4 sm:$0xff]   ;;  %v14597_v43 = vld [vmem:[#allocation20] sm:$0x3f] }
 0xeda   : > { %v13994_v16 = vmul.f32 0.5, %v13982_v31  ;;  %v14005_v25 = vmul.f32 %v20986_v33, %v13993_v9  ;;  %v24193_v33 = vld [vmem:[#allocation19 + $0x33c] ss:$24 sps:$4 sm:$0xff]   ;;  %v24224_v35 = vld [vmem:[#allocation19 + $0x158] ss:$24 sps:$4 sm:$0xff]   ;;  %v14602_v9 = vrot.slane %v14597_v43, %v25942_v34 }
 0xedb   : > { %v13996_v40 = vmul.f32 0.5, %v13984_v8  ;;  %v14007_v21 = vmul.f32 %v20988_v50, %v13995_v48  ;;  %v24188_v50 = vld [vmem:[#allocation19 + $0x38] ss:$24 sps:$4 sm:$0xff]   ;;  %v24232_v8 = vld [vmem:[#allocation19 + $0x18c] ss:$24 sps:$4 sm:$0xff]   ;;  %v14606_v48 = vrot.slane %v14597_v43, %v25926_v14 }
 0xedc   : > { %v14006_v10 = vmul.f32 %v20987_v55, %v13994_v16  ;;  %v26357_v1 = vpack.c.bf16 %v14005_v25, %v14005_v25  ;;  %v24191_v55 = vld [vmem:[#allocation19 + $0x338] ss:$24 sps:$4 sm:$0xff]   ;;  %v24235_v16 = vld [vmem:[#allocation19 + $0x48c] ss:$24 sps:$4 sm:$0xff]   ;;  %v24230_v25 = vld [vmem:[#allocation19 + $0x188] ss:$24 sps:$4 sm:$0xff]  }
 0xedd   : > { %v14008_v2 = vmul.f32 %v20989_v42, %v13996_v40  ;;  %v26360_v52 = vpack.c.bf16 %v14007_v21, %v14007_v21  ;;  %v24196_v42 = vld [vmem:[#allocation19 + $0x6c] ss:$24 sps:$4 sm:$0xff]   ;;  %v24227_v31 = vld [vmem:[#allocation19 + $0x458] ss:$24 sps:$4 sm:$0xff]  }
 0xede   : > { %v26353_v20 = vpack.c.bf16 %v14006_v10, %v14006_v10  ;;  %v24263_v43 = vld [vmem:[#allocation19 + $0x578] ss:$24 sps:$4 sm:$0xff]  }
 0xedf   : > { %v26355_v54 = vpack.c.bf16 %v14008_v2, %v14008_v2 }
 0xee0   : > { %17705 = vmatprep.mubr.bf16.mxu0 %v26353_v20 }
 0xee1   : > { %17746 = vmatprep.mubr.bf16.mxu1 %v26355_v54  ;;  %17706 = vmatmul.mubr.bf16.vlgmr.msra.gmra.mrb[56].mxu0 %v26357_v1 }
 0xee2   : > { %17747 = vmatmul.mubr.bf16.vlgmr.msra.gmra.mrb[72].mxu1 %v26360_v52  ;;  %17756 = vmatpush1.bf16.msra.mxu0 %v24182_v41  ;;  %v24233_v41 = vld [vmem:[#allocation19 + $0x488] ss:$24 sps:$4 sm:$0xff]  }
 0xee3   : > { %17797 = vmatpush1.bf16.msra.mxu1 %v24185_v38  ;;  %17787 = vmatprep.mubr.bf16.mxu0 %v26262_v49  ;;  %v24238_v38 = vld [vmem:[#allocation19 + $0x1bc] ss:$24 sps:$4 sm:$0xff]  }
 0xee4   : > { %17828 = vmatprep.mubr.bf16.mxu1 %v26265_v39  ;;  %17757 = vmatprep.subr.bf16.mxu0 %v24190_v57 }
 0xee5   : > { %17798 = vmatprep.subr.bf16.mxu1 %v24193_v33 }
 0xee6   : > { %17758 = vmatpush1.bf16.msra.mxu0 %v24188_v50 }
 0xee7   : > { %17799 = vmatpush1.bf16.msra.mxu1 %v24191_v55  ;;  %17759 = vmatprep.subr.bf16.mxu0 %v24196_v42  ;;  %v24241_v55 = vld [vmem:[#allocation19 + $0x4bc] ss:$24 sps:$4 sm:$0xff]  }
 0xee8   : > { %17800 = vmatprep.subr.bf16.mxu1 %v24199_v59 }
 0xeea   : > { %17760 = vmatpush1.bf16.msra.mxu0 %v24194_v60 }
 0xeeb   : > { %17801 = vmatpush1.bf16.msra.mxu1 %v24197_v61  ;;  %17761 = vmatprep.subr.bf16.mxu0 %v24202_v62 }
 0xeec   : > { %17802 = vmatprep.subr.bf16.mxu1 %v24205_v0  ;;  %v24236_v0 = vld [vmem:[#allocation19 + $0x1b8] ss:$24 sps:$4 sm:$0xff]  }
 0xeee   : > { %17762 = vmatpush1.bf16.msra.mxu0 %v24200_v63  ;;  %v24239_v63 = vld [vmem:[#allocation19 + $0x4b8] ss:$24 sps:$4 sm:$0xff]  }
 0xeef   : > { %17803 = vmatpush1.bf16.msra.mxu1 %v24203_v12  ;;  %17763 = vmatprep.subr.bf16.mxu0 %v24208_v58  ;;  %v24244_v12 = vld [vmem:[#allocation19 + $0x1ec] ss:$24 sps:$4 sm:$0xff]  }
 0xef0   : > { %17804 = vmatprep.subr.bf16.mxu1 %v24211_v17  ;;  %v24247_v58 = vld [vmem:[#allocation19 + $0x4ec] ss:$24 sps:$4 sm:$0xff]   ;;  %v24242_v17 = vld [vmem:[#allocation19 + $0x1e8] ss:$24 sps:$4 sm:$0xff]  }
 0xef2   : > { %17764 = vmatpush1.bf16.msra.mxu0 %v24206_v15  ;;  %v24245_v15 = vld [vmem:[#allocation19 + $0x4e8] ss:$24 sps:$4 sm:$0xff]  }
 0xef3   : > { %17805 = vmatpush1.bf16.msra.mxu1 %v24209_v5  ;;  %17765 = vmatprep.subr.bf16.mxu0 %v24214_v24  ;;  %v24250_v5 = vld [vmem:[#allocation19 + $0x21c] ss:$24 sps:$4 sm:$0xff]  }
 0xef4   : > { %17806 = vmatprep.subr.bf16.mxu1 %v24217_v56  ;;  %v24253_v24 = vld [vmem:[#allocation19 + $0x51c] ss:$24 sps:$4 sm:$0xff]   ;;  %v24248_v56 = vld [vmem:[#allocation19 + $0x218] ss:$24 sps:$4 sm:$0xff]  }
 0xef6   : > { %17766 = vmatpush1.bf16.msra.mxu0 %v24212_v29  ;;  %v24251_v29 = vld [vmem:[#allocation19 + $0x518] ss:$24 sps:$4 sm:$0xff]  }
 0xef7   : > { %17807 = vmatpush1.bf16.msra.mxu1 %v24215_v4  ;;  %17767 = vmatprep.subr.bf16.mxu0 %v24220_v30  ;;  %v24256_v4 = vld [vmem:[#allocation19 + $0x24c] ss:$24 sps:$4 sm:$0xff]  }
 0xef8   : > { %17808 = vmatprep.subr.bf16.mxu1 %v24223_v51  ;;  %v24259_v30 = vld [vmem:[#allocation19 + $0x54c] ss:$24 sps:$4 sm:$0xff]   ;;  %v24254_v51 = vld [vmem:[#allocation19 + $0x248] ss:$24 sps:$4 sm:$0xff]  }
 0xefa   : > { %17768 = vmatpush1.bf16.msra.mxu0 %v24218_v11  ;;  %v24257_v11 = vld [vmem:[#allocation19 + $0x548] ss:$24 sps:$4 sm:$0xff]  }
 0xefb   : > { %17809 = vmatpush1.bf16.msra.mxu1 %v24221_v32  ;;  %17769 = vmatprep.subr.bf16.mxu0 %v24226_v27  ;;  %v24262_v32 = vld [vmem:[#allocation19 + $0x27c] ss:$24 sps:$4 sm:$0xff]  }
 0xefc   : > { %17810 = vmatprep.subr.bf16.mxu1 %v24229_v22  ;;  %v24265_v27 = vld [vmem:[#allocation19 + $0x57c] ss:$24 sps:$4 sm:$0xff]   ;;  %v24260_v22 = vld [vmem:[#allocation19 + $0x278] ss:$24 sps:$4 sm:$0xff]  }
 0xefe   : > { %17770 = vmatpush1.bf16.msra.mxu0 %v24224_v35  ;;  %v17543_v40 = vpop.f32.mrb[48].mxu0  ;;  %v24268_v35 = vld [vmem:[#allocation19 + $0x2ac] ss:$24 sps:$4 sm:$0xff]  }
 0xeff   : > { %17811 = vmatpush1.bf16.msra.mxu1 %v24227_v31  ;;  %v17544_v10 = vadd.f32 %v17543_v40, %v14602_v9  ;;  %v17584_v21 = vpop.f32.mrb[64].mxu1  ;;  %v17545_v2 = vpop.f32.mrb[49].mxu0  ;;  %17771 = vmatprep.subr.bf16.mxu0 %v24232_v8  ;;  %v24271_v31 = vld [vmem:[#allocation19 + $0x5ac] ss:$24 sps:$4 sm:$0xff]   ;;  %v24266_v9 = vld [vmem:[#allocation19 + $0x2a8] ss:$24 sps:$4 sm:$0xff]  }
 0xf00   : > { %v17546_v57 = vadd.f32 %v17545_v2, %v14606_v48  ;;  %v17586_v33 = vpop.f32.mrb[65].mxu1  ;;  %17812 = vmatprep.subr.bf16.mxu1 %v24235_v16  ;;  %v17547_v50 = vpop.f32.mrb[50].mxu0  ;;  %v24269_v8 = vld [vmem:[#allocation19 + $0x5a8] ss:$24 sps:$4 sm:$0xff]   ;;  %v24274_v48 = vld [vmem:[#allocation19 + $0x2dc] ss:$24 sps:$4 sm:$0xff]  }
 0xf01   : > { %v26369_v42 = vadd.f32 %v17584_v21, %v17544_v10  ;;  %v17588_v59 = vpop.f32.mrb[66].mxu1  ;;  %v17548_v60 = vpop.f32.mrb[51].mxu0  ;;  %v24277_v16 = vld [vmem:[#allocation19 + $0x5dc] ss:$24 sps:$4 sm:$0xff]   ;;  %v24272_v40 = vld [vmem:[#allocation19 + $0x2d8] ss:$24 sps:$4 sm:$0xff]  }
 0xf02   : > { %v26371_v61 = vadd.f32 %v17586_v33, %v17546_v57  ;;  %17772 = vmatpush1.bf16.msra.mxu0 %v24230_v25  ;;  %v17589_v62 = vpop.f32.mrb[67].mxu1  ;;  %v24275_v25 = vld [vmem:[#allocation19 + $0x5d8] ss:$24 sps:$4 sm:$0xff]   ;;  %v24280_v10 = vld [vmem:[#allocation19 + $0x60c] ss:$24 sps:$4 sm:$0xff]  }
 0xf03   : > { %17813 = vmatpush1.bf16.msra.mxu1 %v24233_v41  ;;  %17773 = vmatprep.subr.bf16.mxu0 %v24238_v38  ;;  %v24283_v21 = vld [vmem:[#allocation19 + $0x90c] ss:$24 sps:$4 sm:$0xff]   ;;  %v24278_v2 = vld [vmem:[#allocation19 + $0x608] ss:$24 sps:$4 sm:$0xff]   ;;  %v24286_v38 = vld [vmem:[#allocation19 + $0x63c] ss:$24 sps:$4 sm:$0xff]  }
 0xf04   : > { %17814 = vmatprep.subr.bf16.mxu1 %v24241_v55  ;;  %v24281_v41 = vld [vmem:[#allocation19 + $0x908] ss:$24 sps:$4 sm:$0xff]   ;;  %v24289_v57 = vld [vmem:[#allocation19 + $0x93c] ss:$24 sps:$4 sm:$0xff]   ;;  %v24284_v33 = vld [vmem:[#allocation19 + $0x638] ss:$24 sps:$4 sm:$0xff]  }
 0xf05   : > { %v24287_v50 = vld [vmem:[#allocation19 + $0x938] ss:$24 sps:$4 sm:$0xff]   ;;  %v24292_v55 = vld [vmem:[#allocation19 + $0x66c] ss:$24 sps:$4 sm:$0xff]   ;;  %v24290_v60 = vld [vmem:[#allocation19 + $0x668] ss:$24 sps:$4 sm:$0xff]  }
 0xf06   : > { %17774 = vmatpush1.bf16.msra.mxu0 %v24236_v0  ;;  %v24295_v59 = vld [vmem:[#allocation19 + $0x96c] ss:$24 sps:$4 sm:$0xff]   ;;  %v24293_v62 = vld [vmem:[#allocation19 + $0x968] ss:$24 sps:$4 sm:$0xff]   ;;  %v24298_v0 = vld [vmem:[#allocation19 + $0x69c] ss:$24 sps:$4 sm:$0xff]  }
 0xf07   : > { %17815 = vmatpush1.bf16.msra.mxu1 %v24239_v63  ;;  %17775 = vmatprep.subr.bf16.mxu0 %v24244_v12  ;;  %v24301_v63 = vld [vmem:[#allocation19 + $0x99c] ss:$24 sps:$4 sm:$0xff]   ;;  %v24296_v12 = vld [vmem:[#allocation19 + $0x698] ss:$24 sps:$4 sm:$0xff]  }
 0xf08   : > { %17816 = vmatprep.subr.bf16.mxu1 %v24247_v58  ;;  %v24299_v58 = vld [vmem:[#allocation19 + $0x998] ss:$24 sps:$4 sm:$0xff]  }
 0xf0a   : > { %17776 = vmatpush1.bf16.msra.mxu0 %v24242_v17  ;;  %v24304_v17 = vld [vmem:[#allocation19 + $0x6cc] ss:$24 sps:$4 sm:$0xff]  }
 0xf0b   : > { %17817 = vmatpush1.bf16.msra.mxu1 %v24245_v15  ;;  %17777 = vmatprep.subr.bf16.mxu0 %v24250_v5  ;;  %v24307_v15 = vld [vmem:[#allocation19 + $0x9cc] ss:$24 sps:$4 sm:$0xff]   ;;  %v24302_v5 = vld [vmem:[#allocation19 + $0x6c8] ss:$24 sps:$4 sm:$0xff]  }
 0xf0c   : > { %17818 = vmatprep.subr.bf16.mxu1 %v24253_v24  ;;  %v24305_v24 = vld [vmem:[#allocation19 + $0x9c8] ss:$24 sps:$4 sm:$0xff]  }
 0xf0e   : > { %17778 = vmatpush1.bf16.msra.mxu0 %v24248_v56  ;;  %v24310_v56 = vld [vmem:[#allocation19 + $0x6fc] ss:$24 sps:$4 sm:$0xff]  }
 0xf0f   : > { %17819 = vmatpush1.bf16.msra.mxu1 %v24251_v29  ;;  %17779 = vmatprep.subr.bf16.mxu0 %v24256_v4  ;;  %v24313_v29 = vld [vmem:[#allocation19 + $0x9fc] ss:$24 sps:$4 sm:$0xff]   ;;  %v24308_v4 = vld [vmem:[#allocation19 + $0x6f8] ss:$24 sps:$4 sm:$0xff]  }
 0xf10   : > { %17820 = vmatprep.subr.bf16.mxu1 %v24259_v30  ;;  %v24311_v30 = vld [vmem:[#allocation19 + $0x9f8] ss:$24 sps:$4 sm:$0xff]  }
 0xf12   : > { %17780 = vmatpush1.bf16.msra.mxu0 %v24254_v51  ;;  %v24316_v51 = vld [vmem:[#allocation19 + $0x72c] ss:$24 sps:$4 sm:$0xff]  }
 0xf13   : > { %17821 = vmatpush1.bf16.msra.mxu1 %v24257_v11  ;;  %17781 = vmatprep.subr.bf16.mxu0 %v24262_v32  ;;  %v24319_v11 = vld [vmem:[#allocation19 + $0xa2c] ss:$24 sps:$4 sm:$0xff]   ;;  %v24314_v32 = vld [vmem:[#allocation19 + $0x728] ss:$24 sps:$4 sm:$0xff]  }
 0xf14   : > { %17822 = vmatprep.subr.bf16.mxu1 %v24265_v27  ;;  %v24317_v27 = vld [vmem:[#allocation19 + $0xa28] ss:$24 sps:$4 sm:$0xff]  }
 0xf16   : > { %17782 = vmatpush1.bf16.msra.mxu0 %v24260_v22  ;;  %v24322_v22 = vld [vmem:[#allocation19 + $0x75c] ss:$24 sps:$4 sm:$0xff]  }
 0xf17   : > { %17823 = vmatpush1.bf16.msra.mxu1 %v24263_v43  ;;  %17783 = vmatprep.subr.bf16.mxu0 %v24268_v35  ;;  %v24325_v43 = vld [vmem:[#allocation19 + $0xa5c] ss:$24 sps:$4 sm:$0xff]   ;;  %v24320_v35 = vld [vmem:[#allocation19 + $0x758] ss:$24 sps:$4 sm:$0xff]  }
 0xf18   : > { %17824 = vmatprep.subr.bf16.mxu1 %v24271_v31  ;;  %v24323_v31 = vld [vmem:[#allocation19 + $0xa58] ss:$24 sps:$4 sm:$0xff]  }
 0xf1a   : > { %17784 = vmatpush1.bf16.msra.mxu0 %v24266_v9  ;;  %v24328_v9 = vld [vmem:[#allocation19 + $0x78c] ss:$24 sps:$4 sm:$0xff]  }
 0xf1b   : > { %17825 = vmatpush1.bf16.msra.mxu1 %v24269_v8  ;;  %17785 = vmatprep.subr.bf16.mxu0 %v24274_v48  ;;  %v24331_v8 = vld [vmem:[#allocation19 + $0xa8c] ss:$24 sps:$4 sm:$0xff]  }
 0xf1c   : > { %17826 = vmatprep.subr.bf16.mxu1 %v24277_v16  ;;  %v24326_v16 = vld [vmem:[#allocation19 + $0x788] ss:$24 sps:$4 sm:$0xff]  }
 0xf1e   : > { %17786 = vmatpush1.bf16.msra.mxu0 %v24272_v40 }
 0xf1f   : > { %17827 = vmatpush1.bf16.msra.mxu1 %v24275_v25  ;;  %17837 = vmatprep.subr.bf16.mxu0 %v24280_v10 }
 0xf20   : > { %17878 = vmatprep.subr.bf16.mxu1 %v24283_v21  ;;  %v24329_v21 = vld [vmem:[#allocation19 + $0xa88] ss:$24 sps:$4 sm:$0xff]  }
 0xf21   : > { %17788 = vmatmul.mubr.bf16.vlgmr.msra.gmra.mrb[60].mxu0 %v26311_v18 }
 0xf22   : > { %17829 = vmatmul.mubr.bf16.vlgmr.msra.gmra.mrb[76].mxu1 %v26313_v26  ;;  %17838 = vmatpush1.bf16.msra.mxu0 %v24278_v2  ;;  %v24334_v2 = vld [vmem:[#allocation19 + $0x7bc] ss:$24 sps:$4 sm:$0xff]  }
 0xf23   : > { %17869 = vmatprep.mubr.bf16.mxu0 %v26316_v37  ;;  %17879 = vmatpush1.bf16.msra.mxu1 %v24281_v41 }
 0xf24   : > { %17910 = vmatprep.mubr.bf16.mxu1 %v26319_v45  ;;  %17839 = vmatprep.subr.bf16.mxu0 %v24286_v38 }
 0xf25   : > { %17880 = vmatprep.subr.bf16.mxu1 %v24289_v57 }
 0xf26   : > { %17840 = vmatpush1.bf16.msra.mxu0 %v24284_v33  ;;  %v24337_v33 = vld [vmem:[#allocation19 + $0xabc] ss:$24 sps:$4 sm:$0xff]  }
 0xf27   : > { %17881 = vmatpush1.bf16.msra.mxu1 %v24287_v50  ;;  %17841 = vmatprep.subr.bf16.mxu0 %v24292_v55 }
 0xf28   : > { %17882 = vmatprep.subr.bf16.mxu1 %v24295_v59 }
 0xf2a   : > { %17842 = vmatpush1.bf16.msra.mxu0 %v24290_v60 }
 0xf2b   : > { %17883 = vmatpush1.bf16.msra.mxu1 %v24293_v62  ;;  %17843 = vmatprep.subr.bf16.mxu0 %v24298_v0  ;;  %v24335_v0 = vld [vmem:[#allocation19 + $0xab8] ss:$24 sps:$4 sm:$0xff]  }
 0xf2c   : > { %17884 = vmatprep.subr.bf16.mxu1 %v24301_v63  ;;  %v24340_v63 = vld [vmem:[#allocation19 + $0x7ec] ss:$24 sps:$4 sm:$0xff]  }
 0xf2e   : > { %17844 = vmatpush1.bf16.msra.mxu0 %v24296_v12  ;;  %v24343_v12 = vld [vmem:[#allocation19 + $0xaec] ss:$24 sps:$4 sm:$0xff]  }
 0xf2f   : > { %17885 = vmatpush1.bf16.msra.mxu1 %v24299_v58  ;;  %17845 = vmatprep.subr.bf16.mxu0 %v24304_v17  ;;  %v24341_v58 = vld [vmem:[#allocation19 + $0xae8] ss:$24 sps:$4 sm:$0xff]   ;;  %v24346_v17 = vld [vmem:[#allocation19 + $0x81c] ss:$24 sps:$4 sm:$0xff]  }
 0xf30   : > { %17886 = vmatprep.subr.bf16.mxu1 %v24307_v15  ;;  %v24349_v15 = vld [vmem:[#allocation19 + $0xb1c] ss:$24 sps:$4 sm:$0xff]  }
 0xf32   : > { %17846 = vmatpush1.bf16.msra.mxu0 %v24302_v5  ;;  %v24344_v5 = vld [vmem:[#allocation19 + $0x818] ss:$24 sps:$4 sm:$0xff]  }
 0xf33   : > { %17887 = vmatpush1.bf16.msra.mxu1 %v24305_v24  ;;  %17847 = vmatprep.subr.bf16.mxu0 %v24310_v56  ;;  %v24347_v24 = vld [vmem:[#allocation19 + $0xb18] ss:$24 sps:$4 sm:$0xff]   ;;  %v24352_v56 = vld [vmem:[#allocation19 + $0x84c] ss:$24 sps:$4 sm:$0xff]  }
 0xf34   : > { %17888 = vmatprep.subr.bf16.mxu1 %v24313_v29  ;;  %v24355_v29 = vld [vmem:[#allocation19 + $0xb4c] ss:$24 sps:$4 sm:$0xff]  }
 0xf36   : > { %17848 = vmatpush1.bf16.msra.mxu0 %v24308_v4  ;;  %v24350_v4 = vld [vmem:[#allocation19 + $0x848] ss:$24 sps:$4 sm:$0xff]  }
 0xf37   : > { %17889 = vmatpush1.bf16.msra.mxu1 %v24311_v30  ;;  %17849 = vmatprep.subr.bf16.mxu0 %v24316_v51  ;;  %v24353_v30 = vld [vmem:[#allocation19 + $0xb48] ss:$24 sps:$4 sm:$0xff]   ;;  %v24358_v51 = vld [vmem:[#allocation19 + $0x87c] ss:$24 sps:$4 sm:$0xff]  }
 0xf38   : > { %17890 = vmatprep.subr.bf16.mxu1 %v24319_v11  ;;  %v24361_v11 = vld [vmem:[#allocation19 + $0xb7c] ss:$24 sps:$4 sm:$0xff]  }
 0xf3a   : > { %17850 = vmatpush1.bf16.msra.mxu0 %v24314_v32  ;;  %v24356_v32 = vld [vmem:[#allocation19 + $0x878] ss:$24 sps:$4 sm:$0xff]  }
 0xf3b   : > { %17891 = vmatpush1.bf16.msra.mxu1 %v24317_v27  ;;  %17851 = vmatprep.subr.bf16.mxu0 %v24322_v22  ;;  %v24359_v27 = vld [vmem:[#allocation19 + $0xb78] ss:$24 sps:$4 sm:$0xff]   ;;  %v24364_v22 = vld [vmem:[#allocation19 + $0x8ac] ss:$24 sps:$4 sm:$0xff]  }
 0xf3c   : > { %17892 = vmatprep.subr.bf16.mxu1 %v24325_v43  ;;  %v24367_v43 = vld [vmem:[#allocation19 + $0xbac] ss:$24 sps:$4 sm:$0xff]  }
 0xf3e   : > { %17852 = vmatpush1.bf16.msra.mxu0 %v24320_v35  ;;  %v17625_v48 = vpop.f32.mrb[52].mxu0  ;;  %v24362_v35 = vld [vmem:[#allocation19 + $0x8a8] ss:$24 sps:$4 sm:$0xff]  }
 0xf3f   : > { %17893 = vmatpush1.bf16.msra.mxu1 %v24323_v31  ;;  %v17626_v40 = vadd.f32 %v17625_v48, %v26369_v42  ;;  %v17666_v25 = vpop.f32.mrb[68].mxu1  ;;  %v17627_v10 = vpop.f32.mrb[53].mxu0  ;;  %17853 = vmatprep.subr.bf16.mxu0 %v24328_v9  ;;  %v24332_v42 = vld [vmem:[#allocation19 + $0x7b8] ss:$24 sps:$4 sm:$0xff]   ;;  %v24365_v31 = vld [vmem:[#allocation19 + $0xba8] ss:$24 sps:$4 sm:$0xff]  }
 0xf40   : > { %v17628_v41 = vadd.f32 %v17627_v10, %v26371_v61  ;;  %v17668_v38 = vpop.f32.mrb[69].mxu1  ;;  %17894 = vmatprep.subr.bf16.mxu1 %v24331_v8  ;;  %v17629_v57 = vpop.f32.mrb[54].mxu0  ;;  %v24338_v61 = vld [vmem:[#allocation19 + $0x7e8] ss:$24 sps:$4 sm:$0xff]   ;;  %v24370_v9 = vld [vmem:[#allocation19 + $0x8dc] ss:$24 sps:$4 sm:$0xff]  }
 0xf41   : > { %v26379_v50 = vadd.f32 %v17666_v25, %v17626_v40  ;;  %v17670_v55 = vpop.f32.mrb[70].mxu1  ;;  %v17630_v59 = vpop.f32.mrb[55].mxu0  ;;  %v24373_v8 = vld [vmem:[#allocation19 + $0xbdc] ss:$24 sps:$4 sm:$0xff]   ;;  %v24368_v48 = vld [vmem:[#allocation19 + $0x8d8] ss:$24 sps:$4 sm:$0xff]  }
 0xf42   : > { %v26381_v60 = vadd.f32 %v17668_v38, %v17628_v41  ;;  %17854 = vmatpush1.bf16.msra.mxu0 %v24326_v16  ;;  %v17671_v62 = vpop.f32.mrb[71].mxu1  ;;  %v24371_v16 = vld [vmem:[#allocation19 + $0xbd8] ss:$24 sps:$4 sm:$0xff]   ;;  %v24376_v40 = vld [vmem:[#allocation19 + $0xc0c] ss:$24 sps:$4 sm:$0xff]  }
 0xf43   : > { %17895 = vmatpush1.bf16.msra.mxu1 %v24329_v21  ;;  %17855 = vmatprep.subr.bf16.mxu0 %v24334_v2  ;;  %v24379_v25 = vld [vmem:[#allocation19 + $0xf0c] ss:$24 sps:$4 sm:$0xff]   ;;  %v24374_v10 = vld [vmem:[#allocation19 + $0xc08] ss:$24 sps:$4 sm:$0xff]   ;;  %v24382_v2 = vld [vmem:[#allocation19 + $0xc3c] ss:$24 sps:$4 sm:$0xff]  }
 0xf44   : > { %17896 = vmatprep.subr.bf16.mxu1 %v24337_v33  ;;  %v24377_v21 = vld [vmem:[#allocation19 + $0xf08] ss:$24 sps:$4 sm:$0xff]   ;;  %v24385_v41 = vld [vmem:[#allocation19 + $0xf3c] ss:$24 sps:$4 sm:$0xff]   ;;  %v24380_v38 = vld [vmem:[#allocation19 + $0xc38] ss:$24 sps:$4 sm:$0xff]  }
 0xf45   : > { %v24383_v57 = vld [vmem:[#allocation19 + $0xf38] ss:$24 sps:$4 sm:$0xff]   ;;  %v24388_v33 = vld [vmem:[#allocation19 + $0xc6c] ss:$24 sps:$4 sm:$0xff]   ;;  %v24386_v59 = vld [vmem:[#allocation19 + $0xc68] ss:$24 sps:$4 sm:$0xff]  }
 0xf46   : > { %17856 = vmatpush1.bf16.msra.mxu0 %v24332_v42  ;;  %v24391_v55 = vld [vmem:[#allocation19 + $0xf6c] ss:$24 sps:$4 sm:$0xff]   ;;  %v24389_v62 = vld [vmem:[#allocation19 + $0xf68] ss:$24 sps:$4 sm:$0xff]   ;;  %v24394_v42 = vld [vmem:[#allocation19 + $0xc9c] ss:$24 sps:$4 sm:$0xff]  }
 0xf47   : > { %17897 = vmatpush1.bf16.msra.mxu1 %v24335_v0  ;;  %17857 = vmatprep.subr.bf16.mxu0 %v24340_v63  ;;  %v24397_v0 = vld [vmem:[#allocation19 + $0xf9c] ss:$24 sps:$4 sm:$0xff]   ;;  %v24392_v63 = vld [vmem:[#allocation19 + $0xc98] ss:$24 sps:$4 sm:$0xff]  }
 0xf48   : > { %17898 = vmatprep.subr.bf16.mxu1 %v24343_v12  ;;  %v24395_v12 = vld [vmem:[#allocation19 + $0xf98] ss:$24 sps:$4 sm:$0xff]  }
 0xf4a   : > { %17858 = vmatpush1.bf16.msra.mxu0 %v24338_v61  ;;  %v24400_v61 = vld [vmem:[#allocation19 + $0xccc] ss:$24 sps:$4 sm:$0xff]  }
 0xf4b   : > { %17899 = vmatpush1.bf16.msra.mxu1 %v24341_v58  ;;  %17859 = vmatprep.subr.bf16.mxu0 %v24346_v17  ;;  %v24403_v58 = vld [vmem:[#allocation19 + $0xfcc] ss:$24 sps:$4 sm:$0xff]   ;;  %v24398_v17 = vld [vmem:[#allocation19 + $0xcc8] ss:$24 sps:$4 sm:$0xff]  }
 0xf4c   : > { %17900 = vmatprep.subr.bf16.mxu1 %v24349_v15  ;;  %v24401_v15 = vld [vmem:[#allocation19 + $0xfc8] ss:$24 sps:$4 sm:$0xff]  }
 0xf4e   : > { %17860 = vmatpush1.bf16.msra.mxu0 %v24344_v5  ;;  %v24406_v5 = vld [vmem:[#allocation19 + $0xcfc] ss:$24 sps:$4 sm:$0xff]  }
 0xf4f   : > { %17901 = vmatpush1.bf16.msra.mxu1 %v24347_v24  ;;  %17861 = vmatprep.subr.bf16.mxu0 %v24352_v56  ;;  %v24409_v24 = vld [vmem:[#allocation19 + $0xffc] ss:$24 sps:$4 sm:$0xff]   ;;  %v24404_v56 = vld [vmem:[#allocation19 + $0xcf8] ss:$24 sps:$4 sm:$0xff]  }
 0xf50   : > { %17902 = vmatprep.subr.bf16.mxu1 %v24355_v29  ;;  %v24407_v29 = vld [vmem:[#allocation19 + $0xff8] ss:$24 sps:$4 sm:$0xff]  }
 0xf52   : > { %17862 = vmatpush1.bf16.msra.mxu0 %v24350_v4  ;;  %v24412_v4 = vld [vmem:[#allocation19 + $0xd2c] ss:$24 sps:$4 sm:$0xff]  }
 0xf53   : > { %17903 = vmatpush1.bf16.msra.mxu1 %v24353_v30  ;;  %17863 = vmatprep.subr.bf16.mxu0 %v24358_v51  ;;  %v24415_v30 = vld [vmem:[#allocation19 + $0x102c] ss:$24 sps:$4 sm:$0xff]   ;;  %v24410_v51 = vld [vmem:[#allocation19 + $0xd28] ss:$24 sps:$4 sm:$0xff]  }
 0xf54   : > { %17904 = vmatprep.subr.bf16.mxu1 %v24361_v11  ;;  %v24413_v11 = vld [vmem:[#allocation19 + $0x1028] ss:$24 sps:$4 sm:$0xff]  }
 0xf56   : > { %17864 = vmatpush1.bf16.msra.mxu0 %v24356_v32  ;;  %v24418_v32 = vld [vmem:[#allocation19 + $0xd5c] ss:$24 sps:$4 sm:$0xff]  }
 0xf57   : > { %17905 = vmatpush1.bf16.msra.mxu1 %v24359_v27  ;;  %17865 = vmatprep.subr.bf16.mxu0 %v24364_v22  ;;  %v24421_v27 = vld [vmem:[#allocation19 + $0x105c] ss:$24 sps:$4 sm:$0xff]   ;;  %v24416_v22 = vld [vmem:[#allocation19 + $0xd58] ss:$24 sps:$4 sm:$0xff]  }
 0xf58   : > { %17906 = vmatprep.subr.bf16.mxu1 %v24367_v43  ;;  %v24419_v43 = vld [vmem:[#allocation19 + $0x1058] ss:$24 sps:$4 sm:$0xff]  }
 0xf5a   : > { %17866 = vmatpush1.bf16.msra.mxu0 %v24362_v35  ;;  %v24424_v35 = vld [vmem:[#allocation19 + $0xd8c] ss:$24 sps:$4 sm:$0xff]  }
 0xf5b   : > { %17907 = vmatpush1.bf16.msra.mxu1 %v24365_v31  ;;  %17867 = vmatprep.subr.bf16.mxu0 %v24370_v9  ;;  %v24427_v31 = vld [vmem:[#allocation19 + $0x108c] ss:$24 sps:$4 sm:$0xff]   ;;  %v24422_v9 = vld [vmem:[#allocation19 + $0xd88] ss:$24 sps:$4 sm:$0xff]  }
 0xf5c   : > { %17908 = vmatprep.subr.bf16.mxu1 %v24373_v8  ;;  %v24425_v8 = vld [vmem:[#allocation19 + $0x1088] ss:$24 sps:$4 sm:$0xff]  }
 0xf5e   : > { %17868 = vmatpush1.bf16.msra.mxu0 %v24368_v48  ;;  %v24430_v48 = vld [vmem:[#allocation19 + $0xdbc] ss:$24 sps:$4 sm:$0xff]  }
 0xf5f   : > { %17909 = vmatpush1.bf16.msra.mxu1 %v24371_v16  ;;  %17919 = vmatprep.subr.bf16.mxu0 %v24376_v40  ;;  %v24433_v16 = vld [vmem:[#allocation19 + $0x10bc] ss:$24 sps:$4 sm:$0xff]   ;;  %v24428_v40 = vld [vmem:[#allocation19 + $0xdb8] ss:$24 sps:$4 sm:$0xff]  }
 0xf60   : > { %17960 = vmatprep.subr.bf16.mxu1 %v24379_v25  ;;  %v24431_v25 = vld [vmem:[#allocation19 + $0x10b8] ss:$24 sps:$4 sm:$0xff]  }
 0xf61   : > { %17870 = vmatmul.mubr.bf16.vlgmr.msra.gmra.mrb[64].mxu0 %v26343_v47 }
 0xf62   : > { %17911 = vmatmul.mubr.bf16.vlgmr.msra.gmra.mrb[80].mxu1 %v26345_v23  ;;  %17920 = vmatpush1.bf16.msra.mxu0 %v24374_v10  ;;  %v24436_v10 = vld [vmem:[#allocation19 + $0xdec] ss:$24 sps:$4 sm:$0xff]  }
 0xf63   : > { %17951 = vmatprep.mubr.bf16.mxu0 %v26353_v20  ;;  %17961 = vmatpush1.bf16.msra.mxu1 %v24377_v21  ;;  %v24439_v21 = vld [vmem:[#allocation19 + $0x10ec] ss:$24 sps:$4 sm:$0xff]  }
 0xf64   : > { %17992 = vmatprep.mubr.bf16.mxu1 %v26355_v54  ;;  %17921 = vmatprep.subr.bf16.mxu0 %v24382_v2  ;;  %v24434_v2 = vld [vmem:[#allocation19 + $0xde8] ss:$24 sps:$4 sm:$0xff]  }
 0xf65   : > { %17962 = vmatprep.subr.bf16.mxu1 %v24385_v41  ;;  %v24437_v41 = vld [vmem:[#allocation19 + $0x10e8] ss:$24 sps:$4 sm:$0xff]  }
 0xf66   : > { %17922 = vmatpush1.bf16.msra.mxu0 %v24380_v38  ;;  %v24442_v38 = vld [vmem:[#allocation19 + $0xe1c] ss:$24 sps:$4 sm:$0xff]  }
 0xf67   : > { %17963 = vmatpush1.bf16.msra.mxu1 %v24383_v57  ;;  %17923 = vmatprep.subr.bf16.mxu0 %v24388_v33  ;;  %v24445_v57 = vld [vmem:[#allocation19 + $0x111c] ss:$24 sps:$4 sm:$0xff]   ;;  %v24440_v33 = vld [vmem:[#allocation19 + $0xe18] ss:$24 sps:$4 sm:$0xff]  }
 0xf68   : > { %17964 = vmatprep.subr.bf16.mxu1 %v24391_v55  ;;  %v24443_v55 = vld [vmem:[#allocation19 + $0x1118] ss:$24 sps:$4 sm:$0xff]  }
 0xf6a   : > { %17924 = vmatpush1.bf16.msra.mxu0 %v24386_v59  ;;  %v24448_v59 = vld [vmem:[#allocation19 + $0xe4c] ss:$24 sps:$4 sm:$0xff]  }
 0xf6b   : > { %17965 = vmatpush1.bf16.msra.mxu1 %v24389_v62  ;;  %17925 = vmatprep.subr.bf16.mxu0 %v24394_v42  ;;  %v24451_v62 = vld [vmem:[#allocation19 + $0x114c] ss:$24 sps:$4 sm:$0xff]   ;;  %v24446_v42 = vld [vmem:[#allocation19 + $0xe48] ss:$24 sps:$4 sm:$0xff]  }
 0xf6c   : > { %17966 = vmatprep.subr.bf16.mxu1 %v24397_v0  ;;  %v24449_v0 = vld [vmem:[#allocation19 + $0x1148] ss:$24 sps:$4 sm:$0xff]  }
 0xf6e   : > { %17926 = vmatpush1.bf16.msra.mxu0 %v24392_v63  ;;  %v24454_v63 = vld [vmem:[#allocation19 + $0xe7c] ss:$24 sps:$4 sm:$0xff]  }
 0xf6f   : > { %17967 = vmatpush1.bf16.msra.mxu1 %v24395_v12  ;;  %17927 = vmatprep.subr.bf16.mxu0 %v24400_v61  ;;  %v24457_v12 = vld [vmem:[#allocation19 + $0x117c] ss:$24 sps:$4 sm:$0xff]   ;;  %v24452_v61 = vld [vmem:[#allocation19 + $0xe78] ss:$24 sps:$4 sm:$0xff]  }
 0xf70   : > { %17968 = vmatprep.subr.bf16.mxu1 %v24403_v58  ;;  %v24455_v58 = vld [vmem:[#allocation19 + $0x1178] ss:$24 sps:$4 sm:$0xff]  }
 0xf72   : > { %17928 = vmatpush1.bf16.msra.mxu0 %v24398_v17  ;;  %v24460_v17 = vld [vmem:[#allocation19 + $0xeac] ss:$24 sps:$4 sm:$0xff]  }
 0xf73   : > { %17969 = vmatpush1.bf16.msra.mxu1 %v24401_v15  ;;  %17929 = vmatprep.subr.bf16.mxu0 %v24406_v5  ;;  %v24463_v15 = vld [vmem:[#allocation19 + $0x11ac] ss:$24 sps:$4 sm:$0xff]   ;;  %v24458_v5 = vld [vmem:[#allocation19 + $0xea8] ss:$24 sps:$4 sm:$0xff]  }
 0xf74   : > { %17970 = vmatprep.subr.bf16.mxu1 %v24409_v24  ;;  %v24461_v24 = vld [vmem:[#allocation19 + $0x11a8] ss:$24 sps:$4 sm:$0xff]  }
 0xf76   : > { %17930 = vmatpush1.bf16.msra.mxu0 %v24404_v56  ;;  %v24466_v56 = vld [vmem:[#allocation19 + $0xedc] ss:$24 sps:$4 sm:$0xff]  }
 0xf77   : > { %17971 = vmatpush1.bf16.msra.mxu1 %v24407_v29  ;;  %17931 = vmatprep.subr.bf16.mxu0 %v24412_v4  ;;  %v24469_v29 = vld [vmem:[#allocation19 + $0x11dc] ss:$24 sps:$4 sm:$0xff]   ;;  %v24464_v4 = vld [vmem:[#allocation19 + $0xed8] ss:$24 sps:$4 sm:$0xff]  }
 0xf78   : > { %17972 = vmatprep.subr.bf16.mxu1 %v24415_v30  ;;  %v24467_v30 = vld [vmem:[#allocation19 + $0x11d8] ss:$24 sps:$4 sm:$0xff]  }
 0xf7a   : > { %17932 = vmatpush1.bf16.msra.mxu0 %v24410_v51  ;;  %v24472_v51 = vld [vmem:[#allocation19 + $0x14] ss:$24 sps:$4 sm:$0xff]  }
 0xf7b   : > { %17973 = vmatpush1.bf16.msra.mxu1 %v24413_v11  ;;  %17933 = vmatprep.subr.bf16.mxu0 %v24418_v32  ;;  %v24475_v11 = vld [vmem:[#allocation19 + $0x314] ss:$24 sps:$4 sm:$0xff]   ;;  %v24470_v32 = vld [vmem:[#allocation19 + $0x10] ss:$24 sps:$4 sm:$0xff]  }
 0xf7c   : > { %17974 = vmatprep.subr.bf16.mxu1 %v24421_v27  ;;  %v24473_v27 = vld [vmem:[#allocation19 + $0x310] ss:$24 sps:$4 sm:$0xff]  }
 0xf7e   : > { %17934 = vmatpush1.bf16.msra.mxu0 %v24416_v22  ;;  %v24478_v22 = vld [vmem:[#allocation19 + $0x44] ss:$24 sps:$4 sm:$0xff]  }
 0xf7f   : > { %17975 = vmatpush1.bf16.msra.mxu1 %v24419_v43  ;;  %17935 = vmatprep.subr.bf16.mxu0 %v24424_v35  ;;  %v24481_v43 = vld [vmem:[#allocation19 + $0x344] ss:$24 sps:$4 sm:$0xff]   ;;  %v24476_v35 = vld [vmem:[#allocation19 + $0x40] ss:$24 sps:$4 sm:$0xff]  }
 0xf80   : > { %17976 = vmatprep.subr.bf16.mxu1 %v24427_v31  ;;  %v24479_v31 = vld [vmem:[#allocation19 + $0x340] ss:$24 sps:$4 sm:$0xff]  }
 0xf82   : > { %17936 = vmatpush1.bf16.msra.mxu0 %v24422_v9  ;;  %v24484_v9 = vld [vmem:[#allocation19 + $0x74] ss:$24 sps:$4 sm:$0xff]  }
 0xf83   : > { %17977 = vmatpush1.bf16.msra.mxu1 %v24425_v8  ;;  %17937 = vmatprep.subr.bf16.mxu0 %v24430_v48  ;;  %v24487_v8 = vld [vmem:[#allocation19 + $0x374] ss:$24 sps:$4 sm:$0xff]   ;;  %v24482_v48 = vld [vmem:[#allocation19 + $0x70] ss:$24 sps:$4 sm:$0xff]  }
 0xf84   : > { %17978 = vmatprep.subr.bf16.mxu1 %v24433_v16  ;;  %v24485_v16 = vld [vmem:[#allocation19 + $0x370] ss:$24 sps:$4 sm:$0xff]  }
 0xf86   : > { %17938 = vmatpush1.bf16.msra.mxu0 %v24428_v40  ;;  %v24490_v40 = vld [vmem:[#allocation19 + $0xa4] ss:$24 sps:$4 sm:$0xff]  }
 0xf87   : > { %17979 = vmatpush1.bf16.msra.mxu1 %v24431_v25  ;;  %17939 = vmatprep.subr.bf16.mxu0 %v24436_v10  ;;  %v24493_v25 = vld [vmem:[#allocation19 + $0x3a4] ss:$24 sps:$4 sm:$0xff]   ;;  %v24488_v10 = vld [vmem:[#allocation19 + $0xa0] ss:$24 sps:$4 sm:$0xff]  }
 0xf88   : > { %17980 = vmatprep.subr.bf16.mxu1 %v24439_v21  ;;  %v24496_v21 = vld [vmem:[#allocation19 + $0xd4] ss:$24 sps:$4 sm:$0xff]  }
 0xf8a   : > { %17940 = vmatpush1.bf16.msra.mxu0 %v24434_v2  ;;  %v24499_v2 = vld [vmem:[#allocation19 + $0x3d4] ss:$24 sps:$4 sm:$0xff]  }
 0xf8b   : > { %17981 = vmatpush1.bf16.msra.mxu1 %v24437_v41  ;;  %17941 = vmatprep.subr.bf16.mxu0 %v24442_v38  ;;  %v24497_v41 = vld [vmem:[#allocation19 + $0x3d0] ss:$24 sps:$4 sm:$0xff]   ;;  %v24502_v38 = vld [vmem:[#allocation19 + $0x104] ss:$24 sps:$4 sm:$0xff]  }
 0xf8c   : > { %17982 = vmatprep.subr.bf16.mxu1 %v24445_v57  ;;  %v24505_v57 = vld [vmem:[#allocation19 + $0x404] ss:$24 sps:$4 sm:$0xff]  }
 0xf8e   : > { %17942 = vmatpush1.bf16.msra.mxu0 %v24440_v33  ;;  %v24500_v33 = vld [vmem:[#allocation19 + $0x100] ss:$24 sps:$4 sm:$0xff]  }
 0xf8f   : > { %17983 = vmatpush1.bf16.msra.mxu1 %v24443_v55  ;;  %17943 = vmatprep.subr.bf16.mxu0 %v24448_v59  ;;  %v24503_v55 = vld [vmem:[#allocation19 + $0x400] ss:$24 sps:$4 sm:$0xff]   ;;  %v24508_v59 = vld [vmem:[#allocation19 + $0x134] ss:$24 sps:$4 sm:$0xff]  }
 0xf90   : > { %17984 = vmatprep.subr.bf16.mxu1 %v24451_v62 }
 0xf92   : > { %17944 = vmatpush1.bf16.msra.mxu0 %v24446_v42  ;;  %v24511_v42 = vld [vmem:[#allocation19 + $0x434] ss:$24 sps:$4 sm:$0xff]  }
 0xf93   : > { %17985 = vmatpush1.bf16.msra.mxu1 %v24449_v0  ;;  %17945 = vmatprep.subr.bf16.mxu0 %v24454_v63 }
 0xf94   : > { %17986 = vmatprep.subr.bf16.mxu1 %v24457_v12 }
 0xf96   : > { %17946 = vmatpush1.bf16.msra.mxu0 %v24452_v61 }
 0xf97   : > { %17987 = vmatpush1.bf16.msra.mxu1 %v24455_v58  ;;  %17947 = vmatprep.subr.bf16.mxu0 %v24460_v17 }
 0xf98   : > { %17988 = vmatprep.subr.bf16.mxu1 %v24463_v15  ;;  %v24506_v15 = vld [vmem:[#allocation19 + $0x130] ss:$24 sps:$4 sm:$0xff]  }
 0xf9a   : > { %17948 = vmatpush1.bf16.msra.mxu0 %v24458_v5 }
 0xf9b   : > { %17989 = vmatpush1.bf16.msra.mxu1 %v24461_v24  ;;  %17949 = vmatprep.subr.bf16.mxu0 %v24466_v56 }
 0xf9c   : > { %17990 = vmatprep.subr.bf16.mxu1 %v24469_v29  ;;  %v24509_v29 = vld [vmem:[#allocation19 + $0x430] ss:$24 sps:$4 sm:$0xff]  }
 0xf9e   : > { %17950 = vmatpush1.bf16.msra.mxu0 %v24464_v4  ;;  %v24514_v4 = vld [vmem:[#allocation19 + $0x164] ss:$24 sps:$4 sm:$0xff]  }
 0xf9f   : > { %17991 = vmatpush1.bf16.msra.mxu1 %v24467_v30  ;;  %18001 = vmatprep.subr.bf16.mxu0 %v24472_v51 }
 0xfa0   : > { %18042 = vmatprep.subr.bf16.mxu1 %v24475_v11  ;;  %v24512_v11 = vld [vmem:[#allocation19 + $0x160] ss:$24 sps:$4 sm:$0xff]  }
 0xfa1   : > { %17952 = vmatmul.mubr.bf16.vlgmr.msra.gmra.mrb[68].mxu0 %v26357_v1 }
 0xfa2   : > { %17993 = vmatmul.mubr.bf16.vlgmr.msra.gmra.mrb[84].mxu1 %v26360_v52  ;;  %18002 = vmatpush1.bf16.msra.mxu0 %v24470_v32  ;;  %v24520_v32 = vld [vmem:[#allocation19 + $0x194] ss:$24 sps:$4 sm:$0xff]  }
 0xfa3   : > { %18033 = vmatprep.mubr.bf16.mxu0 %v26262_v49  ;;  %18043 = vmatpush1.bf16.msra.mxu1 %v24473_v27  ;;  %v24491_v49 = vld [vmem:[#allocation19 + $0x3a0] ss:$24 sps:$4 sm:$0xff]   ;;  %v24523_v27 = vld [vmem:[#allocation19 + $0x494] ss:$24 sps:$4 sm:$0xff]  }
 0xfa4   : > { %18074 = vmatprep.mubr.bf16.mxu1 %v26265_v39  ;;  %18003 = vmatprep.subr.bf16.mxu0 %v24478_v22  ;;  %v24494_v39 = vld [vmem:[#allocation19 + $0xd0] ss:$24 sps:$4 sm:$0xff]  }
 0xfa5   : > { %18044 = vmatprep.subr.bf16.mxu1 %v24481_v43  ;;  %v24518_v22 = vld [vmem:[#allocation19 + $0x190] ss:$24 sps:$4 sm:$0xff]  }
 0xfa6   : > { %18004 = vmatpush1.bf16.msra.mxu0 %v24476_v35  ;;  %v24521_v43 = vld [vmem:[#allocation19 + $0x490] ss:$24 sps:$4 sm:$0xff]   ;;  %v24526_v35 = vld [vmem:[#allocation19 + $0x1c4] ss:$24 sps:$4 sm:$0xff]  }
 0xfa7   : > { %18045 = vmatpush1.bf16.msra.mxu1 %v24479_v31  ;;  %18005 = vmatprep.subr.bf16.mxu0 %v24484_v9  ;;  %v24529_v31 = vld [vmem:[#allocation19 + $0x4c4] ss:$24 sps:$4 sm:$0xff]   ;;  %v24524_v9 = vld [vmem:[#allocation19 + $0x1c0] ss:$24 sps:$4 sm:$0xff]  }
 0xfa8   : > { %18046 = vmatprep.subr.bf16.mxu1 %v24487_v8  ;;  %v24527_v8 = vld [vmem:[#allocation19 + $0x4c0] ss:$24 sps:$4 sm:$0xff]  }
 0xfaa   : > { %18006 = vmatpush1.bf16.msra.mxu0 %v24482_v48  ;;  %v24532_v48 = vld [vmem:[#allocation19 + $0x1f4] ss:$24 sps:$4 sm:$0xff]  }
 0xfab   : > { %18047 = vmatpush1.bf16.msra.mxu1 %v24485_v16  ;;  %18007 = vmatprep.subr.bf16.mxu0 %v24490_v40  ;;  %v24535_v16 = vld [vmem:[#allocation19 + $0x4f4] ss:$24 sps:$4 sm:$0xff]   ;;  %v24530_v40 = vld [vmem:[#allocation19 + $0x1f0] ss:$24 sps:$4 sm:$0xff]  }
 0xfac   : > { %18048 = vmatprep.subr.bf16.mxu1 %v24493_v25  ;;  %v24533_v25 = vld [vmem:[#allocation19 + $0x4f0] ss:$24 sps:$4 sm:$0xff]  }
 0xfae   : > { %18008 = vmatpush1.bf16.msra.mxu0 %v24488_v10  ;;  %v24538_v10 = vld [vmem:[#allocation19 + $0x224] ss:$24 sps:$4 sm:$0xff]  }
 0xfaf   : > { %18049 = vmatpush1.bf16.msra.mxu1 %v24491_v49  ;;  %18009 = vmatprep.subr.bf16.mxu0 %v24496_v21  ;;  %v24541_v49 = vld [vmem:[#allocation19 + $0x524] ss:$24 sps:$4 sm:$0xff]   ;;  %v24536_v21 = vld [vmem:[#allocation19 + $0x220] ss:$24 sps:$4 sm:$0xff]  }
 0xfb0   : > { %18050 = vmatprep.subr.bf16.mxu1 %v24499_v2  ;;  %v24539_v2 = vld [vmem:[#allocation19 + $0x520] ss:$24 sps:$4 sm:$0xff]  }
 0xfb2   : > { %18010 = vmatpush1.bf16.msra.mxu0 %v24494_v39  ;;  %v24544_v39 = vld [vmem:[#allocation19 + $0x254] ss:$24 sps:$4 sm:$0xff]  }
 0xfb3   : > { %18051 = vmatpush1.bf16.msra.mxu1 %v24497_v41  ;;  %18011 = vmatprep.subr.bf16.mxu0 %v24502_v38  ;;  %v24547_v41 = vld [vmem:[#allocation19 + $0x554] ss:$24 sps:$4 sm:$0xff]   ;;  %v24542_v38 = vld [vmem:[#allocation19 + $0x250] ss:$24 sps:$4 sm:$0xff]  }
 0xfb4   : > { %v17707_v62 = vpop.f32.mrb[56].mxu0  ;;  %18052 = vmatprep.subr.bf16.mxu1 %v24505_v57  ;;  %v24545_v57 = vld [vmem:[#allocation19 + $0x550] ss:$24 sps:$4 sm:$0xff]  }
 0xfb5   : > { %v17708_v0 = vadd.f32 %v17707_v62, %v26379_v50  ;;  %v17748_v63 = vpop.f32.mrb[72].mxu1  ;;  %v17709_v12 = vpop.f32.mrb[57].mxu0  ;;  %v24517_v50 = vld [vmem:[#allocation19 + $0x464] ss:$24 sps:$4 sm:$0xff]   ;;  %v24551_v62 = vld [vmem:[#allocation19 + $0x580] ss:$24 sps:$4 sm:$0xff]  }
 0xfb6   : > { %v17710_v61 = vadd.f32 %v17709_v12, %v26381_v60  ;;  %v17750_v58 = vpop.f32.mrb[73].mxu1  ;;  %18012 = vmatpush1.bf16.msra.mxu0 %v24500_v33  ;;  %v17711_v17 = vpop.f32.mrb[58].mxu0  ;;  %v24515_v60 = vld [vmem:[#allocation19 + $0x460] ss:$24 sps:$4 sm:$0xff]   ;;  %v24550_v33 = vld [vmem:[#allocation19 + $0x284] ss:$24 sps:$4 sm:$0xff]  }
 0xfb7   : > { %v26393_v5 = vadd.f32 %v17748_v63, %v17708_v0  ;;  %18053 = vmatpush1.bf16.msra.mxu1 %v24503_v55  ;;  %v17752_v24 = vpop.f32.mrb[74].mxu1  ;;  %v17712_v56 = vpop.f32.mrb[59].mxu0  ;;  %18013 = vmatprep.subr.bf16.mxu0 %v24508_v59  ;;  %v24553_v55 = vld [vmem:[#allocation19 + $0x584] ss:$24 sps:$4 sm:$0xff]   ;;  %v24548_v59 = vld [vmem:[#allocation19 + $0x280] ss:$24 sps:$4 sm:$0xff]  }
 0xfb8   : > { %v26395_v30 = vadd.f32 %v17750_v58, %v17710_v61  ;;  %v17753_v51 = vpop.f32.mrb[75].mxu1  ;;  %18054 = vmatprep.subr.bf16.mxu1 %v24511_v42  ;;  %v24556_v42 = vld [vmem:[#allocation19 + $0x2b4] ss:$24 sps:$4 sm:$0xff]   ;;  %v24554_v63 = vld [vmem:[#allocation19 + $0x2b0] ss:$24 sps:$4 sm:$0xff]  }
 0xfb9   : > { %v24559_v0 = vld [vmem:[#allocation19 + $0x5b4] ss:$24 sps:$4 sm:$0xff]   ;;  %v24557_v12 = vld [vmem:[#allocation19 + $0x5b0] ss:$24 sps:$4 sm:$0xff]   ;;  %v24562_v61 = vld [vmem:[#allocation19 + $0x2e4] ss:$24 sps:$4 sm:$0xff]  }
 0xfba   : > { %18014 = vmatpush1.bf16.msra.mxu0 %v24506_v15  ;;  %v24565_v58 = vld [vmem:[#allocation19 + $0x5e4] ss:$24 sps:$4 sm:$0xff]   ;;  %v24560_v17 = vld [vmem:[#allocation19 + $0x2e0] ss:$24 sps:$4 sm:$0xff]   ;;  %v24568_v24 = vld [vmem:[#allocation19 + $0x614] ss:$24 sps:$4 sm:$0xff]  }
 0xfbb   : > { %18055 = vmatpush1.bf16.msra.mxu1 %v24509_v29  ;;  %18015 = vmatprep.subr.bf16.mxu0 %v24514_v4  ;;  %v24563_v15 = vld [vmem:[#allocation19 + $0x5e0] ss:$24 sps:$4 sm:$0xff]   ;;  %v24571_v56 = vld [vmem:[#allocation19 + $0x914] ss:$24 sps:$4 sm:$0xff]   ;;  %v24566_v29 = vld [vmem:[#allocation19 + $0x610] ss:$24 sps:$4 sm:$0xff]  }
 0xfbc   : > { %18056 = vmatprep.subr.bf16.mxu1 %v24517_v50  ;;  %v24569_v4 = vld [vmem:[#allocation19 + $0x910] ss:$24 sps:$4 sm:$0xff]   ;;  %v24574_v51 = vld [vmem:[#allocation19 + $0x644] ss:$24 sps:$4 sm:$0xff]  }
 0xfbd   : > { %v24577_v50 = vld [vmem:[#allocation19 + $0x944] ss:$24 sps:$4 sm:$0xff]  }
 0xfbe   : > { %18016 = vmatpush1.bf16.msra.mxu0 %v24512_v11  ;;  %v24572_v11 = vld [vmem:[#allocation19 + $0x640] ss:$24 sps:$4 sm:$0xff]  }
 0xfbf   : > { %18057 = vmatpush1.bf16.msra.mxu1 %v24515_v60  ;;  %18017 = vmatprep.subr.bf16.mxu0 %v24520_v32  ;;  %v24575_v60 = vld [vmem:[#allocation19 + $0x940] ss:$24 sps:$4 sm:$0xff]   ;;  %v24580_v32 = vld [vmem:[#allocation19 + $0x674] ss:$24 sps:$4 sm:$0xff]  }
 0xfc0   : > { %18058 = vmatprep.subr.bf16.mxu1 %v24523_v27  ;;  %v24583_v27 = vld [vmem:[#allocation19 + $0x974] ss:$24 sps:$4 sm:$0xff]  }
 0xfc2   : > { %18018 = vmatpush1.bf16.msra.mxu0 %v24518_v22  ;;  %v24578_v22 = vld [vmem:[#allocation19 + $0x670] ss:$24 sps:$4 sm:$0xff]  }
 0xfc3   : > { %18059 = vmatpush1.bf16.msra.mxu1 %v24521_v43  ;;  %18019 = vmatprep.subr.bf16.mxu0 %v24526_v35  ;;  %v24586_v43 = vld [vmem:[#allocation19 + $0x6a4] ss:$24 sps:$4 sm:$0xff]   ;;  %v24584_v35 = vld [vmem:[#allocation19 + $0x6a0] ss:$24 sps:$4 sm:$0xff]  }
 0xfc4   : > { %18060 = vmatprep.subr.bf16.mxu1 %v24529_v31  ;;  %v24592_v31 = vld [vmem:[#allocation19 + $0x6d4] ss:$24 sps:$4 sm:$0xff]  }
 0xfc6   : > { %18020 = vmatpush1.bf16.msra.mxu0 %v24524_v9  ;;  %v24595_v9 = vld [vmem:[#allocation19 + $0x9d4] ss:$24 sps:$4 sm:$0xff]  }
 0xfc7   : > { %18061 = vmatpush1.bf16.msra.mxu1 %v24527_v8  ;;  %18021 = vmatprep.subr.bf16.mxu0 %v24532_v48  ;;  %v24593_v8 = vld [vmem:[#allocation19 + $0x9d0] ss:$24 sps:$4 sm:$0xff]   ;;  %v24598_v48 = vld [vmem:[#allocation19 + $0x704] ss:$24 sps:$4 sm:$0xff]  }
 0xfc8   : > { %18062 = vmatprep.subr.bf16.mxu1 %v24535_v16  ;;  %v24601_v16 = vld [vmem:[#allocation19 + $0xa04] ss:$24 sps:$4 sm:$0xff]  }
 0xfca   : > { %18022 = vmatpush1.bf16.msra.mxu0 %v24530_v40  ;;  %v26401_v40 = vld [vmem:[#allocation20] sm:$0x3f] }
 0xfcb   : > { %18063 = vmatpush1.bf16.msra.mxu1 %v24533_v25  ;;  %18023 = vmatprep.subr.bf16.mxu0 %v24538_v10  ;;  %v14610_v25 = vrot.slane %v26401_v40, %v25961_v44  ;;  %v14614_v10 = vrot.slane %v26401_v40, %v25944_v36 }
 0xfcc   : > { %18064 = vmatprep.subr.bf16.mxu1 %v24541_v49  ;;  %v24596_v49 = vld [vmem:[#allocation19 + $0x700] ss:$24 sps:$4 sm:$0xff]  }
 0xfce   : > { %18024 = vmatpush1.bf16.msra.mxu0 %v24536_v21  ;;  %v24599_v21 = vld [vmem:[#allocation19 + $0xa00] ss:$24 sps:$4 sm:$0xff]  }
 0xfcf   : > { %18065 = vmatpush1.bf16.msra.mxu1 %v24539_v2  ;;  %18025 = vmatprep.subr.bf16.mxu0 %v24544_v39  ;;  %v24604_v2 = vld [vmem:[#allocation19 + $0x734] ss:$24 sps:$4 sm:$0xff]  }
 0xfd0   : > { %18066 = vmatprep.subr.bf16.mxu1 %v24547_v41  ;;  %v24607_v41 = vld [vmem:[#allocation19 + $0xa34] ss:$24 sps:$4 sm:$0xff]  }
 0xfd2   : > { %18026 = vmatpush1.bf16.msra.mxu0 %v24542_v38 }
 0xfd3   : > { %18067 = vmatpush1.bf16.msra.mxu1 %v24545_v57  ;;  %18027 = vmatprep.subr.bf16.mxu0 %v24550_v33 }
 0xfd4   : > { %18068 = vmatprep.subr.bf16.mxu1 %v24553_v55 }
 0xfd6   : > { %18028 = vmatpush1.bf16.msra.mxu0 %v24548_v59 }
 0xfd7   : > { %18069 = vmatpush1.bf16.msra.mxu1 %v24551_v62  ;;  %18029 = vmatprep.subr.bf16.mxu0 %v24556_v42  ;;  %v24602_v42 = vld [vmem:[#allocation19 + $0x730] ss:$24 sps:$4 sm:$0xff]  }
 0xfd8   : > { %18070 = vmatprep.subr.bf16.mxu1 %v24559_v0 }
 0xfda   : > { %18030 = vmatpush1.bf16.msra.mxu0 %v24554_v63 }
 0xfdb   : > { %18071 = vmatpush1.bf16.msra.mxu1 %v24557_v12  ;;  %18031 = vmatprep.subr.bf16.mxu0 %v24562_v61  ;;  %v24605_v61 = vld [vmem:[#allocation19 + $0xa30] ss:$24 sps:$4 sm:$0xff]  }
 0xfdc   : > { %18072 = vmatprep.subr.bf16.mxu1 %v24565_v58  ;;  %v24610_v58 = vld [vmem:[#allocation19 + $0x764] ss:$24 sps:$4 sm:$0xff]  }
 0xfde   : > { %18032 = vmatpush1.bf16.msra.mxu0 %v24560_v17 }
 0xfdf   : > { %18073 = vmatpush1.bf16.msra.mxu1 %v24563_v15  ;;  %18083 = vmatprep.subr.bf16.mxu0 %v24568_v24  ;;  %v24613_v24 = vld [vmem:[#allocation19 + $0xa64] ss:$24 sps:$4 sm:$0xff]  }
 0xfe0   : > { %18124 = vmatprep.subr.bf16.mxu1 %v24571_v56  ;;  %v24608_v56 = vld [vmem:[#allocation19 + $0x760] ss:$24 sps:$4 sm:$0xff]  }
 0xfe1   : > { %18034 = vmatmul.mubr.bf16.vlgmr.msra.gmra.mrb[72].mxu0 %v26311_v18  ;;  %v24581_v18 = vld [vmem:[#allocation19 + $0x970] ss:$24 sps:$4 sm:$0xff]  }
 0xfe2   : > { %18075 = vmatmul.mubr.bf16.vlgmr.msra.gmra.mrb[88].mxu1 %v26313_v26  ;;  %18084 = vmatpush1.bf16.msra.mxu0 %v24566_v29  ;;  %v24589_v26 = vld [vmem:[#allocation19 + $0x9a4] ss:$24 sps:$4 sm:$0xff]   ;;  %v24611_v29 = vld [vmem:[#allocation19 + $0xa60] ss:$24 sps:$4 sm:$0xff]  }
 0xfe3   : > { %18115 = vmatprep.mubr.bf16.mxu0 %v26316_v37  ;;  %18125 = vmatpush1.bf16.msra.mxu1 %v24569_v4  ;;  %v24587_v37 = vld [vmem:[#allocation19 + $0x9a0] ss:$24 sps:$4 sm:$0xff]   ;;  %v24616_v4 = vld [vmem:[#allocation19 + $0x794] ss:$24 sps:$4 sm:$0xff]  }
 0xfe4   : > { %18156 = vmatprep.mubr.bf16.mxu1 %v26319_v45  ;;  %18085 = vmatprep.subr.bf16.mxu0 %v24574_v51  ;;  %v24590_v45 = vld [vmem:[#allocation19 + $0x6d0] ss:$24 sps:$4 sm:$0xff]   ;;  %v24619_v51 = vld [vmem:[#allocation19 + $0xa94] ss:$24 sps:$4 sm:$0xff]  }
 0xfe5   : > { %18126 = vmatprep.subr.bf16.mxu1 %v24577_v50  ;;  %v24614_v50 = vld [vmem:[#allocation19 + $0x790] ss:$24 sps:$4 sm:$0xff]  }
 0xfe6   : > { %18086 = vmatpush1.bf16.msra.mxu0 %v24572_v11  ;;  %v24617_v11 = vld [vmem:[#allocation19 + $0xa90] ss:$24 sps:$4 sm:$0xff]  }
 0xfe7   : > { %18127 = vmatpush1.bf16.msra.mxu1 %v24575_v60  ;;  %18087 = vmatprep.subr.bf16.mxu0 %v24580_v32  ;;  %v24622_v60 = vld [vmem:[#allocation19 + $0x7c4] ss:$24 sps:$4 sm:$0xff]  }
 0xfe8   : > { %18128 = vmatprep.subr.bf16.mxu1 %v24583_v27  ;;  %v24625_v32 = vld [vmem:[#allocation19 + $0xac4] ss:$24 sps:$4 sm:$0xff]   ;;  %v24620_v27 = vld [vmem:[#allocation19 + $0x7c0] ss:$24 sps:$4 sm:$0xff]  }
 0xfea   : > { %18088 = vmatpush1.bf16.msra.mxu0 %v24578_v22  ;;  %v24623_v22 = vld [vmem:[#allocation19 + $0xac0] ss:$24 sps:$4 sm:$0xff]  }
 0xfeb   : > { %18129 = vmatpush1.bf16.msra.mxu1 %v24581_v18  ;;  %18089 = vmatprep.subr.bf16.mxu0 %v24586_v43  ;;  %v24628_v18 = vld [vmem:[#allocation19 + $0x7f4] ss:$24 sps:$4 sm:$0xff]  }
 0xfec   : > { %18130 = vmatprep.subr.bf16.mxu1 %v24589_v26  ;;  %v24631_v43 = vld [vmem:[#allocation19 + $0xaf4] ss:$24 sps:$4 sm:$0xff]   ;;  %v24626_v26 = vld [vmem:[#allocation19 + $0x7f0] ss:$24 sps:$4 sm:$0xff]  }
 0xfee   : > { %18090 = vmatpush1.bf16.msra.mxu0 %v24584_v35  ;;  %v24629_v35 = vld [vmem:[#allocation19 + $0xaf0] ss:$24 sps:$4 sm:$0xff]  }
 0xfef   : > { %18131 = vmatpush1.bf16.msra.mxu1 %v24587_v37  ;;  %18091 = vmatprep.subr.bf16.mxu0 %v24592_v31  ;;  %v24634_v37 = vld [vmem:[#allocation19 + $0x824] ss:$24 sps:$4 sm:$0xff]  }
 0xff0   : > { %18132 = vmatprep.subr.bf16.mxu1 %v24595_v9  ;;  %v24637_v31 = vld [vmem:[#allocation19 + $0xb24] ss:$24 sps:$4 sm:$0xff]   ;;  %v24632_v9 = vld [vmem:[#allocation19 + $0x820] ss:$24 sps:$4 sm:$0xff]  }
 0xff2   : > { %18092 = vmatpush1.bf16.msra.mxu0 %v24590_v45  ;;  %v24635_v45 = vld [vmem:[#allocation19 + $0xb20] ss:$24 sps:$4 sm:$0xff]  }
 0xff3   : > { %18133 = vmatpush1.bf16.msra.mxu1 %v24593_v8  ;;  %18093 = vmatprep.subr.bf16.mxu0 %v24598_v48  ;;  %v24640_v8 = vld [vmem:[#allocation19 + $0x854] ss:$24 sps:$4 sm:$0xff]  }
 0xff4   : > { %v17789_v39 = vpop.f32.mrb[60].mxu0  ;;  %18134 = vmatprep.subr.bf16.mxu1 %v24601_v16  ;;  %v24643_v48 = vld [vmem:[#allocation19 + $0xb54] ss:$24 sps:$4 sm:$0xff]   ;;  %v24638_v16 = vld [vmem:[#allocation19 + $0x850] ss:$24 sps:$4 sm:$0xff]  }
 0xff5   : > { %v17790_v38 = vadd.f32 %v17789_v39, %v14610_v25  ;;  %v17830_v57 = vpop.f32.mrb[76].mxu1  ;;  %v17791_v33 = vpop.f32.mrb[61].mxu0  ;;  %v24641_v25 = vld [vmem:[#allocation19 + $0xb50] ss:$24 sps:$4 sm:$0xff]   ;;  %v24652_v39 = vld [vmem:[#allocation19 + $0x8b4] ss:$24 sps:$4 sm:$0xff]  }
 0xff6   : > { %v17792_v55 = vadd.f32 %v17791_v33, %v14614_v10  ;;  %v17832_v59 = vpop.f32.mrb[77].mxu1  ;;  %v17793_v62 = vpop.f32.mrb[62].mxu0  ;;  %18094 = vmatpush1.bf16.msra.mxu0 %v24596_v49  ;;  %v24646_v10 = vld [vmem:[#allocation19 + $0x884] ss:$24 sps:$4 sm:$0xff]  }
 0xff7   : > { %v26407_v0 = vadd.f32 %v17830_v57, %v17790_v38  ;;  %v17834_v63 = vpop.f32.mrb[78].mxu1  ;;  %18135 = vmatpush1.bf16.msra.mxu1 %v24599_v21  ;;  %v17794_v12 = vpop.f32.mrb[63].mxu0  ;;  %18095 = vmatprep.subr.bf16.mxu0 %v24604_v2  ;;  %v24649_v49 = vld [vmem:[#allocation19 + $0xb84] ss:$24 sps:$4 sm:$0xff]   ;;  %v24644_v21 = vld [vmem:[#allocation19 + $0x880] ss:$24 sps:$4 sm:$0xff]  }
 0xff8   : > { %v26409_v17 = vadd.f32 %v17832_v59, %v17792_v55  ;;  %v17835_v15 = vpop.f32.mrb[79].mxu1  ;;  %18136 = vmatprep.subr.bf16.mxu1 %v24607_v41  ;;  %v24647_v2 = vld [vmem:[#allocation19 + $0xb80] ss:$24 sps:$4 sm:$0xff]   ;;  %v24655_v41 = vld [vmem:[#allocation19 + $0xbb4] ss:$24 sps:$4 sm:$0xff]  }
 0xff9   : > { %v24650_v38 = vld [vmem:[#allocation19 + $0x8b0] ss:$24 sps:$4 sm:$0xff]   ;;  %v24658_v33 = vld [vmem:[#allocation19 + $0x8e4] ss:$24 sps:$4 sm:$0xff]   ;;  %v24656_v59 = vld [vmem:[#allocation19 + $0x8e0] ss:$24 sps:$4 sm:$0xff]  }
 0xffa   : > { %18096 = vmatpush1.bf16.msra.mxu0 %v24602_v42  ;;  %v24653_v57 = vld [vmem:[#allocation19 + $0xbb0] ss:$24 sps:$4 sm:$0xff]   ;;  %v24661_v55 = vld [vmem:[#allocation19 + $0xbe4] ss:$24 sps:$4 sm:$0xff]   ;;  %v24659_v62 = vld [vmem:[#allocation19 + $0xbe0] ss:$24 sps:$4 sm:$0xff]  }
 0xffb   : > { %18137 = vmatpush1.bf16.msra.mxu1 %v24605_v61  ;;  %18097 = vmatprep.subr.bf16.mxu0 %v24610_v58  ;;  %v24664_v42 = vld [vmem:[#allocation19 + $0xc14] ss:$24 sps:$4 sm:$0xff]   ;;  %v24662_v12 = vld [vmem:[#allocation19 + $0xc10] ss:$24 sps:$4 sm:$0xff]   ;;  %v24670_v58 = vld [vmem:[#allocation19 + $0xc44] ss:$24 sps:$4 sm:$0xff]  }
 0xffc   : > { %18138 = vmatprep.subr.bf16.mxu1 %v24613_v24  ;;  %v24667_v63 = vld [vmem:[#allocation19 + $0xf14] ss:$24 sps:$4 sm:$0xff]   ;;  %v24665_v61 = vld [vmem:[#allocation19 + $0xf10] ss:$24 sps:$4 sm:$0xff]   ;;  %v24673_v15 = vld [vmem:[#allocation19 + $0xf44] ss:$24 sps:$4 sm:$0xff]  }
 0xffd   : > { %v24668_v24 = vld [vmem:[#allocation19 + $0xc40] ss:$24 sps:$4 sm:$0xff]  }
 0xffe   : > { %18098 = vmatpush1.bf16.msra.mxu0 %v24608_v56  ;;  %v24671_v56 = vld [vmem:[#allocation19 + $0xf40] ss:$24 sps:$4 sm:$0xff]  }
 0xfff   : > { %18139 = vmatpush1.bf16.msra.mxu1 %v24611_v29  ;;  %18099 = vmatprep.subr.bf16.mxu0 %v24616_v4  ;;  %v24676_v29 = vld [vmem:[#allocation19 + $0xc74] ss:$24 sps:$4 sm:$0xff]  }
0x1000   : > { %18140 = vmatprep.subr.bf16.mxu1 %v24619_v51  ;;  %v24679_v4 = vld [vmem:[#allocation19 + $0xf74] ss:$24 sps:$4 sm:$0xff]   ;;  %v24674_v51 = vld [vmem:[#allocation19 + $0xc70] ss:$24 sps:$4 sm:$0xff]  }
0x1002   : > { %18100 = vmatpush1.bf16.msra.mxu0 %v24614_v50  ;;  %v24682_v50 = vld [vmem:[#allocation19 + $0xca4] ss:$24 sps:$4 sm:$0xff]  }
0x1003   : > { %18141 = vmatpush1.bf16.msra.mxu1 %v24617_v11  ;;  %18101 = vmatprep.subr.bf16.mxu0 %v24622_v60  ;;  %v24680_v11 = vld [vmem:[#allocation19 + $0xca0] ss:$24 sps:$4 sm:$0xff]   ;;  %v24688_v60 = vld [vmem:[#allocation19 + $0xcd4] ss:$24 sps:$4 sm:$0xff]  }
0x1004   : > { %18142 = vmatprep.subr.bf16.mxu1 %v24625_v32  ;;  %v24691_v32 = vld [vmem:[#allocation19 + $0xfd4] ss:$24 sps:$4 sm:$0xff]  }
0x1006   : > { %18102 = vmatpush1.bf16.msra.mxu0 %v24620_v27  ;;  %v24689_v27 = vld [vmem:[#allocation19 + $0xfd0] ss:$24 sps:$4 sm:$0xff]  }
0x1007   : > { %18143 = vmatpush1.bf16.msra.mxu1 %v24623_v22  ;;  %18103 = vmatprep.subr.bf16.mxu0 %v24628_v18  ;;  %v24694_v22 = vld [vmem:[#allocation19 + $0xd04] ss:$24 sps:$4 sm:$0xff]  }
0x1008   : > { %18144 = vmatprep.subr.bf16.mxu1 %v24631_v43  ;;  %v24697_v18 = vld [vmem:[#allocation19 + $0x1004] ss:$24 sps:$4 sm:$0xff]   ;;  %v24692_v43 = vld [vmem:[#allocation19 + $0xd00] ss:$24 sps:$4 sm:$0xff]  }
0x100a   : > { %18104 = vmatpush1.bf16.msra.mxu0 %v24626_v26  ;;  %v24695_v26 = vld [vmem:[#allocation19 + $0x1000] ss:$24 sps:$4 sm:$0xff]  }
0x100b   : > { %18145 = vmatpush1.bf16.msra.mxu1 %v24629_v35  ;;  %18105 = vmatprep.subr.bf16.mxu0 %v24634_v37  ;;  %v24700_v35 = vld [vmem:[#allocation19 + $0xd34] ss:$24 sps:$4 sm:$0xff]  }
0x100c   : > { %18146 = vmatprep.subr.bf16.mxu1 %v24637_v31  ;;  %v24703_v31 = vld [vmem:[#allocation19 + $0x1034] ss:$24 sps:$4 sm:$0xff]  }
0x100e   : > { %18106 = vmatpush1.bf16.msra.mxu0 %v24632_v9 }
0x100f   : > { %18147 = vmatpush1.bf16.msra.mxu1 %v24635_v45  ;;  %18107 = vmatprep.subr.bf16.mxu0 %v24640_v8 }
0x1010   : > { %18148 = vmatprep.subr.bf16.mxu1 %v24643_v48 }
0x1012   : > { %18108 = vmatpush1.bf16.msra.mxu0 %v24638_v16 }
0x1013   : > { %18149 = vmatpush1.bf16.msra.mxu1 %v24641_v25  ;;  %18109 = vmatprep.subr.bf16.mxu0 %v24646_v10  ;;  %v24698_v10 = vld [vmem:[#allocation19 + $0xd30] ss:$24 sps:$4 sm:$0xff]  }
0x1014   : > { %18150 = vmatprep.subr.bf16.mxu1 %v24649_v49 }
0x1016   : > { %18110 = vmatpush1.bf16.msra.mxu0 %v24644_v21 }
0x1017   : > { %18151 = vmatpush1.bf16.msra.mxu1 %v24647_v2  ;;  %18111 = vmatprep.subr.bf16.mxu0 %v24652_v39  ;;  %v24701_v39 = vld [vmem:[#allocation19 + $0x1030] ss:$24 sps:$4 sm:$0xff]  }
0x1018   : > { %18152 = vmatprep.subr.bf16.mxu1 %v24655_v41  ;;  %v24706_v41 = vld [vmem:[#allocation19 + $0xd64] ss:$24 sps:$4 sm:$0xff]  }
0x101a   : > { %18112 = vmatpush1.bf16.msra.mxu0 %v24650_v38 }
0x101b   : > { %18153 = vmatpush1.bf16.msra.mxu1 %v24653_v57  ;;  %18113 = vmatprep.subr.bf16.mxu0 %v24658_v33  ;;  %v24704_v33 = vld [vmem:[#allocation19 + $0xd60] ss:$24 sps:$4 sm:$0xff]  }
0x101c   : > { %18154 = vmatprep.subr.bf16.mxu1 %v24661_v55  ;;  %v24712_v55 = vld [vmem:[#allocation19 + $0xd94] ss:$24 sps:$4 sm:$0xff]  }
0x101e   : > { %18114 = vmatpush1.bf16.msra.mxu0 %v24656_v59  ;;  %v24715_v59 = vld [vmem:[#allocation19 + $0x1094] ss:$24 sps:$4 sm:$0xff]  }
0x101f   : > { %18155 = vmatpush1.bf16.msra.mxu1 %v24659_v62  ;;  %18165 = vmatprep.subr.bf16.mxu0 %v24664_v42  ;;  %v24710_v62 = vld [vmem:[#allocation19 + $0xd90] ss:$24 sps:$4 sm:$0xff]  }
0x1020   : > { %18206 = vmatprep.subr.bf16.mxu1 %v24667_v63  ;;  %v24713_v42 = vld [vmem:[#allocation19 + $0x1090] ss:$24 sps:$4 sm:$0xff]   ;;  %v24718_v63 = vld [vmem:[#allocation19 + $0xdc4] ss:$24 sps:$4 sm:$0xff]  }
0x1021   : > { %18116 = vmatmul.mubr.bf16.vlgmr.msra.gmra.mrb[76].mxu0 %v26343_v47  ;;  %v24677_v47 = vld [vmem:[#allocation19 + $0xf70] ss:$24 sps:$4 sm:$0xff]  }
0x1022   : > { %18157 = vmatmul.mubr.bf16.vlgmr.msra.gmra.mrb[92].mxu1 %v26345_v23  ;;  %18166 = vmatpush1.bf16.msra.mxu0 %v24662_v12  ;;  %v24685_v23 = vld [vmem:[#allocation19 + $0xfa4] ss:$24 sps:$4 sm:$0xff]  }
0x1023   : > { %18197 = vmatprep.mubr.bf16.mxu0 %v26353_v20  ;;  %18207 = vmatpush1.bf16.msra.mxu1 %v24665_v61  ;;  %v24683_v20 = vld [vmem:[#allocation19 + $0xfa0] ss:$24 sps:$4 sm:$0xff]   ;;  %v24721_v12 = vld [vmem:[#allocation19 + $0x10c4] ss:$24 sps:$4 sm:$0xff]  }
0x1024   : > { %18238 = vmatprep.mubr.bf16.mxu1 %v26355_v54  ;;  %18167 = vmatprep.subr.bf16.mxu0 %v24670_v58  ;;  %v24686_v54 = vld [vmem:[#allocation19 + $0xcd0] ss:$24 sps:$4 sm:$0xff]   ;;  %v24716_v61 = vld [vmem:[#allocation19 + $0xdc0] ss:$24 sps:$4 sm:$0xff]  }
0x1025   : > { %18208 = vmatprep.subr.bf16.mxu1 %v24673_v15  ;;  %v24719_v58 = vld [vmem:[#allocation19 + $0x10c0] ss:$24 sps:$4 sm:$0xff]   ;;  %v24724_v15 = vld [vmem:[#allocation19 + $0xdf4] ss:$24 sps:$4 sm:$0xff]  }
0x1026   : > { %18168 = vmatpush1.bf16.msra.mxu0 %v24668_v24  ;;  %v24727_v24 = vld [vmem:[#allocation19 + $0x10f4] ss:$24 sps:$4 sm:$0xff]  }
0x1027   : > { %18209 = vmatpush1.bf16.msra.mxu1 %v24671_v56  ;;  %18169 = vmatprep.subr.bf16.mxu0 %v24676_v29  ;;  %v24722_v56 = vld [vmem:[#allocation19 + $0xdf0] ss:$24 sps:$4 sm:$0xff]  }
0x1028   : > { %18210 = vmatprep.subr.bf16.mxu1 %v24679_v4  ;;  %v24725_v29 = vld [vmem:[#allocation19 + $0x10f0] ss:$24 sps:$4 sm:$0xff]   ;;  %v24730_v4 = vld [vmem:[#allocation19 + $0xe24] ss:$24 sps:$4 sm:$0xff]  }
0x102a   : > { %18170 = vmatpush1.bf16.msra.mxu0 %v24674_v51  ;;  %v24733_v51 = vld [vmem:[#allocation19 + $0x1124] ss:$24 sps:$4 sm:$0xff]  }
0x102b   : > { %18211 = vmatpush1.bf16.msra.mxu1 %v24677_v47  ;;  %18171 = vmatprep.subr.bf16.mxu0 %v24682_v50  ;;  %v24728_v47 = vld [vmem:[#allocation19 + $0xe20] ss:$24 sps:$4 sm:$0xff]  }
0x102c   : > { %18212 = vmatprep.subr.bf16.mxu1 %v24685_v23  ;;  %v24731_v50 = vld [vmem:[#allocation19 + $0x1120] ss:$24 sps:$4 sm:$0xff]   ;;  %v24736_v23 = vld [vmem:[#allocation19 + $0xe54] ss:$24 sps:$4 sm:$0xff]  }
0x102e   : > { %18172 = vmatpush1.bf16.msra.mxu0 %v24680_v11  ;;  %v24739_v11 = vld [vmem:[#allocation19 + $0x1154] ss:$24 sps:$4 sm:$0xff]  }
0x102f   : > { %18213 = vmatpush1.bf16.msra.mxu1 %v24683_v20  ;;  %18173 = vmatprep.subr.bf16.mxu0 %v24688_v60  ;;  %v24734_v20 = vld [vmem:[#allocation19 + $0xe50] ss:$24 sps:$4 sm:$0xff]  }
0x1030   : > { %18214 = vmatprep.subr.bf16.mxu1 %v24691_v32  ;;  %v24737_v60 = vld [vmem:[#allocation19 + $0x1150] ss:$24 sps:$4 sm:$0xff]   ;;  %v24742_v32 = vld [vmem:[#allocation19 + $0xe84] ss:$24 sps:$4 sm:$0xff]  }
0x1032   : > { %18174 = vmatpush1.bf16.msra.mxu0 %v24686_v54  ;;  %v24745_v54 = vld [vmem:[#allocation19 + $0x1184] ss:$24 sps:$4 sm:$0xff]  }
0x1033   : > { %18215 = vmatpush1.bf16.msra.mxu1 %v24689_v27  ;;  %18175 = vmatprep.subr.bf16.mxu0 %v24694_v22  ;;  %v24740_v27 = vld [vmem:[#allocation19 + $0xe80] ss:$24 sps:$4 sm:$0xff]  }
0x1034   : > { %v17871_v37 = vpop.f32.mrb[64].mxu0  ;;  %18216 = vmatprep.subr.bf16.mxu1 %v24697_v18  ;;  %v24743_v22 = vld [vmem:[#allocation19 + $0x1180] ss:$24 sps:$4 sm:$0xff]   ;;  %v24748_v18 = vld [vmem:[#allocation19 + $0xeb4] ss:$24 sps:$4 sm:$0xff]  }
0x1035   : > { %v17872_v9 = vadd.f32 %v17871_v37, %v26407_v0  ;;  %v17912_v45 = vpop.f32.mrb[80].mxu1  ;;  %v17873_v8 = vpop.f32.mrb[65].mxu0  ;;  %v24709_v0 = vld [vmem:[#allocation19 + $0x1064] ss:$24 sps:$4 sm:$0xff]  }
0x1036   : > { %v17874_v48 = vadd.f32 %v17873_v8, %v26409_v17  ;;  %v17914_v16 = vpop.f32.mrb[81].mxu1  ;;  %v17875_v25 = vpop.f32.mrb[66].mxu0  ;;  %18176 = vmatpush1.bf16.msra.mxu0 %v24692_v43  ;;  %v24707_v17 = vld [vmem:[#allocation19 + $0x1060] ss:$24 sps:$4 sm:$0xff]   ;;  %v24751_v43 = vld [vmem:[#allocation19 + $0x11b4] ss:$24 sps:$4 sm:$0xff]  }
0x1037   : > { %v26417_v49 = vadd.f32 %v17912_v45, %v17872_v9  ;;  %v17916_v21 = vpop.f32.mrb[82].mxu1  ;;  %18217 = vmatpush1.bf16.msra.mxu1 %v24695_v26  ;;  %v17876_v2 = vpop.f32.mrb[67].mxu0  ;;  %18177 = vmatprep.subr.bf16.mxu0 %v24700_v35  ;;  %v24746_v26 = vld [vmem:[#allocation19 + $0xeb0] ss:$24 sps:$4 sm:$0xff]   ;;  %v24754_v37 = vld [vmem:[#allocation19 + $0xee4] ss:$24 sps:$4 sm:$0xff]  }
0x1038   : > { %v26419_v38 = vadd.f32 %v17914_v16, %v17874_v48  ;;  %v17917_v57 = vpop.f32.mrb[83].mxu1  ;;  %18218 = vmatprep.subr.bf16.mxu1 %v24703_v31  ;;  %v24749_v35 = vld [vmem:[#allocation19 + $0x11b0] ss:$24 sps:$4 sm:$0xff]   ;;  %v24757_v31 = vld [vmem:[#allocation19 + $0x11e4] ss:$24 sps:$4 sm:$0xff]  }
0x1039   : > { %v24752_v9 = vld [vmem:[#allocation19 + $0xee0] ss:$24 sps:$4 sm:$0xff]  }
0x103a   : > { %18178 = vmatpush1.bf16.msra.mxu0 %v24698_v10  ;;  %v24755_v45 = vld [vmem:[#allocation19 + $0x11e0] ss:$24 sps:$4 sm:$0xff]  }
0x103b   : > { %18219 = vmatpush1.bf16.msra.mxu1 %v24701_v39  ;;  %18179 = vmatprep.subr.bf16.mxu0 %v24706_v41 }
0x103c   : > { %18220 = vmatprep.subr.bf16.mxu1 %v24709_v0 }
0x103e   : > { %18180 = vmatpush1.bf16.msra.mxu0 %v24704_v33 }
0x103f   : > { %18221 = vmatpush1.bf16.msra.mxu1 %v24707_v17  ;;  %18181 = vmatprep.subr.bf16.mxu0 %v24712_v55  ;;  %v14618_v17 = vrot.slane %v26401_v40, %v25965_v53 }
0x1040   : > { %18222 = vmatprep.subr.bf16.mxu1 %v24715_v59 }
0x1042   : > { %18182 = vmatpush1.bf16.msra.mxu0 %v24710_v62 }
0x1043   : > { %18223 = vmatpush1.bf16.msra.mxu1 %v24713_v42  ;;  %18183 = vmatprep.subr.bf16.mxu0 %v24718_v63 }
0x1044   : > { %18224 = vmatprep.subr.bf16.mxu1 %v24721_v12 }
0x1046   : > { %18184 = vmatpush1.bf16.msra.mxu0 %v24716_v61 }
0x1047   : > { %18225 = vmatpush1.bf16.msra.mxu1 %v24719_v58  ;;  %18185 = vmatprep.subr.bf16.mxu0 %v24724_v15 }
0x1048   : > { %18226 = vmatprep.subr.bf16.mxu1 %v24727_v24 }
0x104a   : > { %18186 = vmatpush1.bf16.msra.mxu0 %v24722_v56 }
0x104b   : > { %18227 = vmatpush1.bf16.msra.mxu1 %v24725_v29  ;;  %18187 = vmatprep.subr.bf16.mxu0 %v24730_v4 }
0x104c   : > { %18228 = vmatprep.subr.bf16.mxu1 %v24733_v51 }
0x104e   : > { %18188 = vmatpush1.bf16.msra.mxu0 %v24728_v47 }
0x104f   : > { %18229 = vmatpush1.bf16.msra.mxu1 %v24731_v50  ;;  %18189 = vmatprep.subr.bf16.mxu0 %v24736_v23 }
0x1050   : > { %18230 = vmatprep.subr.bf16.mxu1 %v24739_v11 }
0x1052   : > { %18190 = vmatpush1.bf16.msra.mxu0 %v24734_v20 }
0x1053   : > { %18231 = vmatpush1.bf16.msra.mxu1 %v24737_v60  ;;  %18191 = vmatprep.subr.bf16.mxu0 %v24742_v32  ;;  %v18247_v32 = vadd.f32 %v26393_v5, %v26163_v3 }
0x1054   : > { %18232 = vmatprep.subr.bf16.mxu1 %v24745_v54  ;;  %v18248_v54 = vadd.f32 %v26395_v30, %v26161_v28 }
0x1056   : > { %18192 = vmatpush1.bf16.msra.mxu0 %v24740_v27 }
0x1057   : > { %18233 = vmatpush1.bf16.msra.mxu1 %v24743_v22  ;;  %18193 = vmatprep.subr.bf16.mxu0 %v24748_v18  ;;  %v18253_v22 = vadd.f32 %v18248_v54, %v18247_v32 }
0x1058   : > { %18234 = vmatprep.subr.bf16.mxu1 %v24751_v43 }
0x105a   : > { %18194 = vmatpush1.bf16.msra.mxu0 %v24746_v26 }
0x105b   : > { %18235 = vmatpush1.bf16.msra.mxu1 %v24749_v35  ;;  %18195 = vmatprep.subr.bf16.mxu0 %v24754_v37 }
0x105c   : > { %18236 = vmatprep.subr.bf16.mxu1 %v24757_v31 }
0x105e   : > { %18196 = vmatpush1.bf16.msra.mxu0 %v24752_v9 }
0x105f   : > { %18237 = vmatpush1.bf16.msra.mxu1 %v24755_v45 }
0x1061   : > { %18198 = vmatmul.mubr.bf16.vlgmr.msra.gmra.mrb[80].mxu0 %v26357_v1  ;;  %v14622_v1 = vrot.slane %v26401_v40, %v25963_v46 }
0x1062   : > { %18239 = vmatmul.mubr.bf16.vlgmr.msra.gmra.mrb[96].mxu1 %v26360_v52 }
0x1074   : > { %v17953_v8 = vpop.f32.mrb[68].mxu0 }
0x1075   : > { %v17954_v48 = vadd.f32 %v17953_v8, %v26417_v49  ;;  %v17994_v16 = vpop.f32.mrb[84].mxu1  ;;  %v17955_v25 = vpop.f32.mrb[69].mxu0 }
0x1076   : > { %v17956_v10 = vadd.f32 %v17955_v25, %v26419_v38  ;;  %v17996_v21 = vpop.f32.mrb[85].mxu1  ;;  %v17957_v2 = vpop.f32.mrb[70].mxu0 }
0x1077   : > { %v17995_v39 = vadd.f32 %v17994_v16, %v17954_v48  ;;  %v17998_v41 = vpop.f32.mrb[86].mxu1  ;;  %v17958_v57 = vpop.f32.mrb[71].mxu0 }
0x1078   : > { %v17997_v0 = vadd.f32 %v17996_v21, %v17956_v10  ;;  %v17999_v33 = vpop.f32.mrb[87].mxu1 }
0x1079   : > { %v18249_v27 = vadd.f32 %v17995_v39, %v26165_v7 }
0x107a   : > { %v18250_v26 = vadd.f32 %v17997_v0, %v26167_v6 }
0x107b   : > { %v18254_v43 = vadd.f32 %v18253_v22, %v18249_v27 }
0x107d   : > { %v18255_v10 = vadd.f32 %v18254_v43, %v18250_v26 }
0x10b4   : > { %v18035_v52 = vpop.f32.mrb[72].mxu0 }
0x10b5   : > { %v18036_v55 = vadd.f32 %v18035_v52, %v14618_v17  ;;  %v18076_v49 = vpop.f32.mrb[88].mxu1  ;;  %v18037_v59 = vpop.f32.mrb[73].mxu0 }
0x10b6   : > { %v18038_v62 = vadd.f32 %v18037_v59, %v14622_v1  ;;  %v18078_v42 = vpop.f32.mrb[89].mxu1  ;;  %v18039_v38 = vpop.f32.mrb[74].mxu0 }
0x10b7   : > { %v18077_v63 = vadd.f32 %v18076_v49, %v18036_v55  ;;  %v18080_v12 = vpop.f32.mrb[90].mxu1  ;;  %v18040_v61 = vpop.f32.mrb[75].mxu0 }
0x10b8   : > { %v18079_v58 = vadd.f32 %v18078_v42, %v18038_v62  ;;  %v18081_v15 = vpop.f32.mrb[91].mxu1 }
0x10b9   : > { %v18289_v15 = vld [vmem:[#allocation22] sm:$0x3f] }
0x10f4   : > { %v18117_v24 = vpop.f32.mrb[76].mxu0 }
0x10f5   : > { %v18118_v56 = vadd.f32 %v18117_v24, %v18077_v63  ;;  %v18158_v29 = vpop.f32.mrb[92].mxu1  ;;  %v18119_v4 = vpop.f32.mrb[77].mxu0  ;;  %v18327_v24 = vld [vmem:[#allocation23] sm:$0x3f] }
0x10f6   : > { %v18120_v51 = vadd.f32 %v18119_v4, %v18079_v58  ;;  %v18160_v47 = vpop.f32.mrb[93].mxu1  ;;  %v18121_v50 = vpop.f32.mrb[78].mxu0  ;;  %v18302_v4 = vrot.slane %v18289_v15, %v25961_v44 }
0x10f7   : > { %v18159_v40 = vadd.f32 %v18158_v29, %v18118_v56  ;;  %v18162_v23 = vpop.f32.mrb[94].mxu1  ;;  %v18122_v11 = vpop.f32.mrb[79].mxu0  ;;  %v18294_v56 = vrot.slane %v18289_v15, %v25942_v34  ;;  %v18298_v29 = vrot.slane %v18289_v15, %v25926_v14  ;;  %v18314_v50 = vrot.slane %v18289_v15, %v25963_v46 }
0x10f8   : > { %v18161_v20 = vadd.f32 %v18160_v47, %v18120_v51  ;;  %v18163_v60 = vpop.f32.mrb[95].mxu1  ;;  %v18306_v51 = vrot.slane %v18289_v15, %v25944_v36  ;;  %v18310_v47 = vrot.slane %v18289_v15, %v25965_v53  ;;  %v18332_v23 = vrot.slane %v18327_v24, %v25942_v34 }
0x10f9   : > { %v18336_v11 = vrot.slane %v18327_v24, %v25926_v14  ;;  %v18344_v60 = vrot.slane %v18327_v24, %v25944_v36 }
0x1134   : > { %v18199_v18 = vpop.f32.mrb[80].mxu0 }
0x1135   : > { %v18200_v35 = vadd.f32 %v18199_v18, %v18159_v40  ;;  %v18240_v37 = vpop.f32.mrb[96].mxu1  ;;  %v18201_v31 = vpop.f32.mrb[81].mxu0 }
0x1136   : > { %v18202_v9 = vadd.f32 %v18201_v31, %v18161_v20  ;;  %v18242_v45 = vpop.f32.mrb[97].mxu1  ;;  %v18203_v8 = vpop.f32.mrb[82].mxu0  ;;  %v18340_v20 = vrot.slane %v18327_v24, %v25961_v44 }
0x1137   : > { %v18241_v48 = vadd.f32 %v18240_v37, %v18200_v35  ;;  %v18244_v16 = vpop.f32.mrb[98].mxu1  ;;  %v18204_v25 = vpop.f32.mrb[83].mxu0  ;;  %v18352_v35 = vrot.slane %v18327_v24, %v25963_v46 }
0x1138   : > { %v18243_v3 = vadd.f32 %v18242_v45, %v18202_v9  ;;  %v18245_v5 = vpop.f32.mrb[99].mxu1 }
0x1139   : > { %v18251_v28 = vadd.f32 %v18241_v48, %v26171_v13 }
0x113a   : > { %v18252_v7 = vadd.f32 %v18243_v3, %v26169_v19 }
0x113b   : > { %v18256_v30 = vadd.f32 %v18255_v10, %v18251_v28 }
0x113d   : > { %v18257_v21 = vadd.f32 %v18256_v30, %v18252_v7 }
0x113f   : > { %18258 = vadd.xlane.f32.xlu0 %v18257_v21 }
0x11cc   : > { %v18259_v6 = vpop.xlane.xlu0 %18258 }
0x11cd   : > { %v18260_v2 = vmul.f32 0.0013020834, %v18259_v6 }
0x11cf   : > { %v18261_v39 = vsub.f32 %v18247_v32, %v18260_v2  ;;  %v18262_v41 = vsub.f32 %v18248_v54, %v18260_v2  ;;  %v18263_v57 = vsub.f32 %v18249_v27, %v18260_v2  ;;  %v18264_v0 = vsub.f32 %v18250_v26, %v18260_v2 }
0x11d0   : > { %v18265_v1 = vsub.f32 %v18251_v28, %v18260_v2  ;;  %v18266_v49 = vsub.f32 %v18252_v7, %v18260_v2  ;;  %v18348_v26 = vrot.slane %v18327_v24, %v25965_v53 }
0x11d1   : > { %v18267_v33 = vmul.f32 %v18261_v39, %v18261_v39  ;;  %v18268_v17 = vmul.f32 %v18262_v41, %v18262_v41  ;;  %v18269_v52 = vmul.f32 %v18263_v57, %v18263_v57  ;;  %v18270_v59 = vmul.f32 %v18264_v0, %v18264_v0 }
0x11d2   : > { %v18271_v62 = vmul.f32 %v18265_v1, %v18265_v1  ;;  %v18272_v42 = vmul.f32 %v18266_v49, %v18266_v49 }
0x11d3   : > { %v18273_v55 = vadd.f32 %v18268_v17, %v18267_v33 }
0x11d5   : > { %v18274_v13 = vadd.f32 %v18273_v55, %v18269_v52 }
0x11d7   : > { %v18275_v19 = vadd.f32 %v18274_v13, %v18270_v59 }
0x11d9   : > { %v18276_v38 = vadd.f32 %v18275_v19, %v18271_v62 }
0x11db   : > { %v18277_v63 = vadd.f32 %v18276_v38, %v18272_v42 }
0x11dd   : > { %18278 = vadd.xlane.f32.xlu1 %v18277_v63 }
0x126a   : > { %v18279_v12 = vpop.xlane.xlu1 %18278 }
0x126b   : > { %v18280_v61 = vmul.f32 0.0013020834, %v18279_v12 }
0x126d   : > { %v18281_v58 = vadd.f32 1e-12, %v18280_v61 }
0x126f   : > { %24788 = vrsqrt.f32 %v18281_v58 }
0x1279   : > { %v24789_v40 = vpop.eup %24788 }
0x127a   : > { %v18283_v32 = vmul.f32 %v24789_v40, %v18261_v39  ;;  %v18284_v54 = vmul.f32 %v24789_v40, %v18262_v41  ;;  %v18285_v27 = vmul.f32 %v24789_v40, %v18263_v57  ;;  %v18286_v22 = vmul.f32 %v24789_v40, %v18264_v0 }
0x127b   : > { %v18287_v18 = vmul.f32 %v24789_v40, %v18265_v1  ;;  %v18288_v43 = vmul.f32 %v24789_v40, %v18266_v49 }
0x127c   : > { %v18321_v37 = vmul.f32 %v18294_v56, %v18283_v32  ;;  %v18322_v34 = vmul.f32 %v18298_v29, %v18284_v54  ;;  %v18323_v31 = vmul.f32 %v18302_v4, %v18285_v27  ;;  %v18324_v14 = vmul.f32 %v18306_v51, %v18286_v22 }
0x127d   : > { %v18325_v9 = vmul.f32 %v18310_v47, %v18287_v18  ;;  %v18326_v44 = vmul.f32 %v18314_v50, %v18288_v43 }
0x127e   : > { %v18359_v45 = vadd.f32 %v18332_v23, %v18321_v37  ;;  %v18360_v36 = vadd.f32 %v18336_v11, %v18322_v34  ;;  %v18361_v8 = vadd.f32 %v18340_v20, %v18323_v31  ;;  %v18362_v48 = vadd.f32 %v18344_v60, %v18324_v14 }
0x127f   : > { %v18363_v16 = vadd.f32 %v18348_v26, %v18325_v9  ;;  %v18364_v53 = vadd.f32 %v18352_v35, %v18326_v44 }
0x1280   : > { %v20957_v25 = vpack.c.bf16 %v18360_v36, %v18359_v45  ;;  %v20958_v46 = vpack.c.bf16 %v18362_v48, %v18361_v8 }
0x1281   : > { %v20959_v3 = vpack.c.bf16 %v18364_v53, %v18363_v16 }
0x1282   : > { %18389 = vst [vmem:[%s675_s27] sm:$0xff] %v20957_v25  ;;  %18390 = vst [vmem:[%s675_s27 + $0x8] sm:$0xff] %v20958_v46 }
0x1283   : > { %18391 = vst [vmem:[%s675_s27 + $0x10] sm:$0xff] %v20959_v3 }
0x1284   : > { %25206 = shalt.err (!%p25203_p2)
}
0x1285   : > { %s25207_s25 = scalar_lea.hbm %s26456_s21, 384  ;;  %s25211_s3 = scalar_lea.hbm %s26577_s6, 768 }
0x1286   : > { %p25208_p4 = scmp.ne.s32.totalorder %s26456_s21, %s25207_s25  ;;  %p25212_p7 = scmp.lt.u32.totalorder %s26456_s21, %s26577_s6 }
0x1287   : > { %p25213_p0 = scmp.lt.u32.totalorder %s25211_s3, %s25207_s25  ;;  %p25215_p11 = scmp.lt.u32.totalorder %s25207_s25, %s26456_s21 }
0x1288   : > { %p25209_p10 = pnand %p25208_p4, %p26578_p8 }
0x1289   : > { %p25214_p5 = por %p25213_p0, %p25212_p7 }
0x128a   : > { %p25210_p6 = pneg %p25209_p10 }
0x128b   : > { %p25216_p9 = por %p25215_p11, %p25214_p5 }
0x128d   : > { %p25217_p12 = pnand %p25216_p9, %p25210_p6 }
0x128f   : > { %25220 = shalt.err (!%p25217_p12)
}
0x1290   : > { %21175 = dma.vmem_to_hbm [thread:$0]  (%p26578_p8), %s26458_s14, 384, %s26456_s21, %s18393_s20  }
0x1291 PF: > { %s26579_s18 = sld [smem:[#allocation36_spill]]  ;;  %p26580_p13 = scmp.ne.s32.totalorder %s26554_s17, 0 }
0x1292   : > { %p26581_p1 = scmp.ge.s32.totalorder %s25291_s16, 2 }
0x1294   : > { %p21222_p3 = pnand %p26581_p1, %p26580_p13 }
0x1297   : > { %s18419_s2 = sand.u32 1, %s26579_s18  }
0x1298   : > { %s18420_s0 = scalar_lea.sflag [#allocation4], %s18419_s2 }
0x1299   : > { %25274 = dma.done.wait (!%p21222_p3), %s18420_s0, 384  }
0x129a   : > { %25276 = vsyncadd (!%p21222_p3), %s18420_s0, 4294966912  ;;  %p36_p2 = scmp.ge.s32.totalorder %s25680_s23, 4   ;;  %s26582_s29 = smov %s25283_s30 }
0x129b   : > { %s26583_s30 = smov %s25287_s15  ;;  %s26584_s15 = smov %s25691_s1 }
0x129c   : > { %s26585_s16 = smov %s25680_s23  ;;  %38 = sbr.rel (!%p36_p2) target bundleno = 22 (0x16), region = 182 }
0x12a3   :  { %18425 = vsyncpa [#allocation3], 1 }
0x12a4   :  { %18427 = vsyncpa [#allocation3 + $0x1], 1 }
0x12a5   :  { %18428 = vsyncpa [#allocation6], 1 }
0x12a6   :  { %18430 = vsyncpa [#allocation6 + $0x1], 1 }
0x12a7   :  { %18431 = vsyncpa [#allocation9], 1 }
0x12a8   :  { %18432 = vsyncpa [#allocation12], 1 }
0x12a9   :  { %18433 = vsyncpa [#allocation15], 1 }
0x12aa   :  { %18434 = vsyncpa [#allocation18], 1 }
0x12ab   :  { %18435 = vsyncpa [#allocation21], 1 }
0x12ac   :  { %18436 = vsyncpa [#allocation24], 1 }
0x12ad   :  { %18437 = vsyncpa [#allocation4], 1 }
0x12ae   :  { %18439 = vsyncpa [#allocation4 + $0x1], 1 }

</bundles_post_ra>
